<compile_context>
chip_gen: v5e
topology: v5e:2x2
jax: 0.10.0
libtpu: 0.0.40
codegen_flags: <defaults>
</compile_context>

<pallas_src>
import functools

import jax
import jax.numpy as jnp
import numpy as np
from jax import lax
from jax.experimental import pallas as pl
from jax.experimental.pallas import tpu as pltpu

_MIN_SPLIT_ROWS = 256  # don't shard tiny batches across grid steps / TensorCores
_BWD_DNUMS = (((1,), (1,)), ((), ()))  # contract g axis 1 with W axis 1 (g @ W^T)


def _round_up(x, m):
    return ((x + m - 1) // m) * m


def _dot(a, b):
    return jnp.dot(a, b, preferred_element_type=jnp.float32)


def _dot_t(g, w):
    # g @ w^T without materializing a transposed copy of w (f32 accumulation).
    return lax.dot_general(g.astype(jnp.bfloat16), w, _BWD_DNUMS,
                           preferred_element_type=jnp.float32)


# ----------------------------------------------------------------------------
# Generation-aware configuration
# ----------------------------------------------------------------------------
@functools.lru_cache(maxsize=None)
def _tpu_config():
    """Returns (max_batch_tile, vmem_limit_bytes, min_grid_steps)."""
    try:
        info = pltpu.get_tpu_info()
        vmem_cap = int(getattr(info, "vmem_capacity_bytes", 0))
    except Exception:
        vmem_cap = 0
    if vmem_cap >= 100 * 1024 * 1024:
        # v5e / v6e: 128 MiB VMEM, 1 TensorCore per chip.
        return 2048, min(96 * 1024 * 1024, (3 * vmem_cap) // 4), 1
    if vmem_cap >= 48 * 1024 * 1024:
        # v7x-like: 64 MiB VMEM per TC, 2 TCs -> want >= 2 grid steps.
        return 1024, min(48 * 1024 * 1024, (3 * vmem_cap) // 4), 2
    # Unknown / tiny VMEM: previously validated conservative config.
    return 512, 32 * 1024 * 1024, 1


@functools.lru_cache(maxsize=None)
def _use_bf16_grad():
    # v6e/v7x have a native bf16 VPU -> run the backward selects on bf16 vregs.
    # v5e and older emulate bf16 elementwise, so keep the f32 path there.
    try:
        kind = jax.devices()[0].device_kind.lower()
    except Exception:
        return True
    return not any(tag in kind for tag in ("v2", "v3", "v4", "v5"))


def _pick_tile_b(batch, tile_max, min_steps):
    steps = pl.cdiv(batch, tile_max)
    if min_steps > 1 and batch >= min_steps * _MIN_SPLIT_ROWS:
        steps = max(steps, min_steps)   # spread across both TensorCores (v7x)
    tile = pl.cdiv(batch, steps)
    if steps > 1:
        tile = _round_up(tile, 8)       # sublane-aligned sub-tile
    return tile


# ----------------------------------------------------------------------------
# Kernels
# ----------------------------------------------------------------------------
def mlp_forward_kernel(
    x_ref,
    w1_ref, b1_ref, w2_ref, b2_ref, w3_ref, b3_ref,
    w4_ref, b4_ref, w5_ref, b5_ref, w6_ref,
    out_ref,
):
    """force=True path: out = MLP(x), shape (TILE_B, pad_out)."""
    bf16 = jnp.bfloat16
    h = x_ref[...].astype(bf16)
    h = jnp.maximum(_dot(h, w1_ref[...]) + b1_ref[...], 0.0).astype(bf16)
    h = jnp.maximum(_dot(h, w2_ref[...]) + b2_ref[...], 0.0).astype(bf16)
    h = jnp.maximum(_dot(h, w3_ref[...]) + b3_ref[...], 0.0).astype(bf16)
    h = jnp.maximum(_dot(h, w4_ref[...]) + b4_ref[...], 0.0).astype(bf16)
    h = jnp.maximum(_dot(h, w5_ref[...]) + b5_ref[...], 0.0).astype(bf16)
    out_ref[...] = _dot(h, w6_ref[...])  # final layer has no bias


def mlp_force_kernel(
    x_ref,
    w1_ref, b1_ref, w2_ref, b2_ref, w3_ref, b3_ref,
    w4_ref, b4_ref, w5_ref, b5_ref, w6row_ref,
    f_ref,
    *,
    bf16_grad,
):
    """force=False path: f = -d(sum MLP(x)) / dx via explicit in-kernel backprop.

    w6row_ref is the last-layer weight pre-reshaped to (1, 256) by the wrapper:
    since the head is (256, 1) with no bias, d(sum out)/d a5 is just that row
    broadcast over the batch.
    """
    bf16 = jnp.bfloat16
    gdt = bf16 if bf16_grad else jnp.float32

    x = x_ref[...].astype(bf16)
    # Forward; keep only the (bf16) post-ReLU activations for the masks.
    a1 = jnp.maximum(_dot(x, w1_ref[...]) + b1_ref[...], 0.0).astype(bf16)
    a2 = jnp.maximum(_dot(a1, w2_ref[...]) + b2_ref[...], 0.0).astype(bf16)
    a3 = jnp.maximum(_dot(a2, w3_ref[...]) + b3_ref[...], 0.0).astype(bf16)
    a4 = jnp.maximum(_dot(a3, w4_ref[...]) + b4_ref[...], 0.0).astype(bf16)
    a5 = jnp.maximum(_dot(a4, w5_ref[...]) + b5_ref[...], 0.0).astype(bf16)

    # Backward of out.sum() w.r.t. x (mask == (z > 0) == (relu(z) > 0)).
    # Python 0.0 is weakly typed -> the selects stay in gdt (bf16 on v6e/v7x).
    g = jnp.where(a5 > 0, w6row_ref[...].astype(gdt), 0.0)            # (B, 256)
    g = jnp.where(a4 > 0, _dot_t(g, w5_ref[...]).astype(gdt), 0.0)    # (B, 512)
    g = jnp.where(a3 > 0, _dot_t(g, w4_ref[...]).astype(gdt), 0.0)    # (B, 1024)
    g = jnp.where(a2 > 0, _dot_t(g, w3_ref[...]).astype(gdt), 0.0)    # (B, 512)
    g = jnp.where(a1 > 0, _dot_t(g, w2_ref[...]).astype(gdt), 0.0)    # (B, 256)
    g = _dot_t(g, w1_ref[...])                                        # (B, pad_in)
    f_ref[...] = -g


# ----------------------------------------------------------------------------
# Wrapper
# ----------------------------------------------------------------------------
@functools.partial(jax.jit, static_argnames=("force", "buffered"))
def _poly_forward_impl(pos, params, *, force, buffered):
    input_dim = pos.shape[-2] * pos.shape[-1]
    x = pos.reshape(-1, input_dim).astype(jnp.float32)
    batch = x.shape[0]

    params = list(params)
    w1, w6 = params[0], params[-1]
    out_dim = w6.shape[1] if force else input_dim
    if force and out_dim != input_dim:
        raise ValueError("force=True requires output_dim == num_particles * 3")

    # Lane-pad the narrow feature dims to a multiple of 128 (zeros -> exact).
    pad_in = _round_up(input_dim, 128)
    pad_out = _round_up(out_dim, 128)
    if pad_in != input_dim:
        x = jnp.pad(x, ((0, 0), (0, pad_in - input_dim)))
        w1 = jnp.pad(w1, ((0, pad_in - input_dim), (0, 0)))

    if force:
        if pad_out != out_dim:
            w6 = jnp.pad(w6, ((0, 0), (0, pad_out - out_dim)))
        kernel = mlp_forward_kernel
        args = (x, w1) + tuple(params[1:-1]) + (w6,)
    else:
        kernel = functools.partial(mlp_force_kernel, bf16_grad=_use_bf16_grad())
        # Last-layer weight (256, 1) is only needed as its transposed row.
        args = (x, w1) + tuple(params[1:-1]) + (w6.reshape(1, -1),)

    tile_max, vmem_limit, min_steps = _tpu_config()
    tile_b = _pick_tile_b(batch, tile_max, min_steps)
    grid = (pl.cdiv(batch, tile_b),)

    in_specs = [pl.BlockSpec((tile_b, pad_in), lambda i: (i, 0))]
    # Weights/biases: full block, constant index_map -> DMA'd once, held
    # resident; request a single buffer (no prefetch copy needed).
    wkwargs = {"pipeline_mode": pl.Buffered(1)} if buffered else {}
    in_specs += [pl.BlockSpec(p.shape, lambda i: (0, 0), **wkwargs)
                 for p in args[1:]]
    out_spec = pl.BlockSpec((tile_b, pad_out), lambda i: (i, 0))

    out = pl.pallas_call(
        kernel,
        out_shape=jax.ShapeDtypeStruct((batch, pad_out), jnp.float32),
        grid=grid,
        in_specs=in_specs,
        out_specs=out_spec,
        compiler_params=pltpu.CompilerParams(
            dimension_semantics=("parallel",),   # shards across TCs on v7x
            vmem_limit_bytes=vmem_limit,
        ),
    )(*args)

    return out[:, :out_dim].reshape(pos.shape)


def poly_forward(pos, params, *, force):
    """Mirrors Poly.forward. pos: (B, num_particles, 3) float32."""
    params = tuple(params)
    try:
        return jax.block_until_ready(
            _poly_forward_impl(pos, params, force=force, buffered=True))
    except Exception:
        # pipeline_mode=pl.Buffered(1) unsupported on this jax/libtpu combo:
        # retry with default double-buffered weight blocks.
        return jax.block_until_ready(
            _poly_forward_impl(pos, params, force=force, buffered=False))


# ----------------------------------------------------------------------------
# Deterministic parameter init (mimics nn.Linear default U(-1/sqrt(fan_in), .))
# Weights -> bf16 (MXU-native), biases -> f32 (added post f32 accumulation).
# ----------------------------------------------------------------------------
def init_params(key, input_dim, output_dim):
    dims = [input_dim, 256, 512, 1024, 512, 256, output_dim]
    params = []
    for layer in range(6):
        fan_in, fan_out = dims[layer], dims[layer + 1]
        k = 1.0 / np.sqrt(fan_in)
        key, wk, bk = jax.random.split(key, 3)
        w = jax.random.uniform(wk, (fan_in, fan_out), jnp.float32, -k, k)
        params.append(w.astype(jnp.bfloat16))
        if layer < 5:  # last Linear has bias=False
            b = jax.random.uniform(bk, (1, fan_out), jnp.float32, -k, k)
            params.append(b)
    return params
    # TODO(synk): self.log_z is a standalone nn.Parameter unused in forward; omitted.


# ----------------------------------------------------------------------------
# Pure-JAX references mirroring the kernel numerics (bf16 weights, f32 accum)
# ----------------------------------------------------------------------------
def mlp_ref(x, params):
    w1, b1, w2, b2, w3, b3, w4, b4, w5, b5, w6 = params
    bf16 = jnp.bfloat16
    h = x.astype(bf16)
    for w, b in ((w1, b1), (w2, b2), (w3, b3), (w4, b4), (w5, b5)):
        h = jnp.maximum(_dot(h, w) + b, 0.0).astype(bf16)
    return _dot(h, w6)


def force_ref(x, params):
    w1, b1, w2, b2, w3, b3, w4, b4, w5, b5, w6 = params
    bf16 = jnp.bfloat16
    h = x.astype(bf16)
    acts = []
    for w, b in ((w1, b1), (w2, b2), (w3, b3), (w4, b4), (w5, b5)):
        h = jnp.maximum(_dot(h, w) + b, 0.0).astype(bf16)
        acts.append(h)
    a1, a2, a3, a4, a5 = acts
    g = jnp.where(a5 > 0, w6.reshape(1, -1).astype(jnp.float32), 0.0)
    for a, w in ((a4, w5), (a3, w4), (a2, w3), (a1, w2)):
        g = lax.dot_general(g.astype(bf16), w, _BWD_DNUMS,
                            preferred_element_type=jnp.float32)
        g = jnp.where(a > 0, g, 0.0)
    g = lax.dot_general(g.astype(bf16), w1, _BWD_DNUMS,
                        preferred_element_type=jnp.float32)
    return -g


if __name__ == "__main__":
    num_particles = 4
    batch = 2
    input_dim = num_particles * 3

    key = jax.random.PRNGKey(0)
    key, pos_key = jax.random.split(key)
    pos = jax.random.normal(pos_key, (batch, num_particles, 3), jnp.float32)

    # --- force=True (output_dim = num_particles * 3) ---
    params_force = init_params(jax.random.PRNGKey(1), input_dim, input_dim)
    out_force = poly_forward(pos, params_force, force=True)
    ref_force = mlp_ref(pos.reshape(-1, input_dim), params_force).reshape(pos.shape)
    np.testing.assert_allclose(np.asarray(out_force), np.asarray(ref_force),
                               rtol=1e-2, atol=1e-2)

    # --- force=False (energy head; force = -grad of out.sum() w.r.t. pos) ---
    params_energy = init_params(jax.random.PRNGKey(2), input_dim, 1)
    out_energy = poly_forward(pos, params_energy, force=False)
    ref_energy_force = force_ref(pos.reshape(-1, input_dim),
                                 params_energy).reshape(pos.shape)
    np.testing.assert_allclose(np.asarray(out_energy), np.asarray(ref_energy_force),
                               rtol=1e-2, atol=1e-2)

    print("KERNEL_OK")
</pallas_src>

<mosaic_0001>
module attributes {stable_mosaic.version = 11 : i64} {
  func.func @mlp_forward_kernel(%arg0: i32, %arg1: memref<2x128xf32, #tpu.memory_space<vmem>>, %arg2: memref<128x256xbf16, #tpu.memory_space<vmem>>, %arg3: memref<1x256xf32, #tpu.memory_space<vmem>>, %arg4: memref<256x512xbf16, #tpu.memory_space<vmem>>, %arg5: memref<1x512xf32, #tpu.memory_space<vmem>>, %arg6: memref<512x1024xbf16, #tpu.memory_space<vmem>>, %arg7: memref<1x1024xf32, #tpu.memory_space<vmem>>, %arg8: memref<1024x512xbf16, #tpu.memory_space<vmem>>, %arg9: memref<1x512xf32, #tpu.memory_space<vmem>>, %arg10: memref<512x256xbf16, #tpu.memory_space<vmem>>, %arg11: memref<1x256xf32, #tpu.memory_space<vmem>>, %arg12: memref<256x128xbf16, #tpu.memory_space<vmem>>, %arg13: memref<2x128xf32, #tpu.memory_space<vmem>>) attributes {dimension_semantics = [#tpu.dimension_semantics<parallel>], iteration_bounds = array<i64: 1>, scalar_prefetch = 0 : i64, scratch_operands = 0 : i64, tpu.core_type = #tpu.core_type<tc>, window_params = [{transform_indices = @transform_0, window_bounds = array<i64: 2, 128>}, {pipeline_mode = #tpu.pipeline_mode<synchronous>, transform_indices = @transform_1, window_bounds = array<i64: 128, 256>}, {pipeline_mode = #tpu.pipeline_mode<synchronous>, transform_indices = @transform_2, window_bounds = array<i64: 1, 256>}, {pipeline_mode = #tpu.pipeline_mode<synchronous>, transform_indices = @transform_3, window_bounds = array<i64: 256, 512>}, {pipeline_mode = #tpu.pipeline_mode<synchronous>, transform_indices = @transform_4, window_bounds = array<i64: 1, 512>}, {pipeline_mode = #tpu.pipeline_mode<synchronous>, transform_indices = @transform_5, window_bounds = array<i64: 512, 1024>}, {pipeline_mode = #tpu.pipeline_mode<synchronous>, transform_indices = @transform_6, window_bounds = array<i64: 1, 1024>}, {pipeline_mode = #tpu.pipeline_mode<synchronous>, transform_indices = @transform_7, window_bounds = array<i64: 1024, 512>}, {pipeline_mode = #tpu.pipeline_mode<synchronous>, transform_indices = @transform_8, window_bounds = array<i64: 1, 512>}, {pipeline_mode = #tpu.pipeline_mode<synchronous>, transform_indices = @transform_9, window_bounds = array<i64: 512, 256>}, {pipeline_mode = #tpu.pipeline_mode<synchronous>, transform_indices = @transform_10, window_bounds = array<i64: 1, 256>}, {pipeline_mode = #tpu.pipeline_mode<synchronous>, transform_indices = @transform_11, window_bounds = array<i64: 256, 128>}, {transform_indices = @transform_12, window_bounds = array<i64: 2, 128>}]} {
    %c0 = arith.constant 0 : index
    %c0_0 = arith.constant 0 : index
    %0 = vector.load %arg1[%c0, %c0_0] : memref<2x128xf32, #tpu.memory_space<vmem>>, vector<2x128xf32>
    %1 = arith.truncf %0 : vector<2x128xf32> to vector<2x128xbf16>
    %c0_1 = arith.constant 0 : index
    %c0_2 = arith.constant 0 : index
    %2 = vector.load %arg2[%c0_1, %c0_2] : memref<128x256xbf16, #tpu.memory_space<vmem>>, vector<128x256xbf16>
    %cst = arith.constant dense<0.000000e+00> : vector<2x256xf32>
    %3 = tpu.matmul %1, %2, %cst {dimension_numbers = #tpu.dot_dimension_numbers<[1], [0], [0], [1], [0, 0, 1, 1], [], []>} : vector<2x128xbf16>, vector<128x256xbf16>, vector<2x256xf32> -> vector<2x256xf32>
    %c0_3 = arith.constant 0 : index
    %c0_4 = arith.constant 0 : index
    %4 = vector.load %arg3[%c0_3, %c0_4] : memref<1x256xf32, #tpu.memory_space<vmem>>, vector<1x256xf32>
    %5 = vector.broadcast %4 : vector<1x256xf32> to vector<2x256xf32>
    %6 = arith.addf %3, %5 : vector<2x256xf32>
    %cst_5 = arith.constant 0.000000e+00 : f32
    %7 = vector.broadcast %cst_5 : f32 to vector<2x256xf32>
    %8 = arith.maximumf %6, %7 : vector<2x256xf32>
    %9 = arith.truncf %8 : vector<2x256xf32> to vector<2x256xbf16>
    %c0_6 = arith.constant 0 : index
    %c0_7 = arith.constant 0 : index
    %10 = vector.load %arg4[%c0_6, %c0_7] : memref<256x512xbf16, #tpu.memory_space<vmem>>, vector<256x512xbf16>
    %cst_8 = arith.constant dense<0.000000e+00> : vector<2x512xf32>
    %11 = tpu.matmul %9, %10, %cst_8 {dimension_numbers = #tpu.dot_dimension_numbers<[1], [0], [0], [1], [0, 0, 1, 1], [], []>} : vector<2x256xbf16>, vector<256x512xbf16>, vector<2x512xf32> -> vector<2x512xf32>
    %c0_9 = arith.constant 0 : index
    %c0_10 = arith.constant 0 : index
    %12 = vector.load %arg5[%c0_9, %c0_10] : memref<1x512xf32, #tpu.memory_space<vmem>>, vector<1x512xf32>
    %13 = vector.broadcast %12 : vector<1x512xf32> to vector<2x512xf32>
    %14 = arith.addf %11, %13 : vector<2x512xf32>
    %cst_11 = arith.constant 0.000000e+00 : f32
    %15 = vector.broadcast %cst_11 : f32 to vector<2x512xf32>
    %16 = arith.maximumf %14, %15 : vector<2x512xf32>
    %17 = arith.truncf %16 : vector<2x512xf32> to vector<2x512xbf16>
    %c0_12 = arith.constant 0 : index
    %c0_13 = arith.constant 0 : index
    %18 = vector.load %arg6[%c0_12, %c0_13] : memref<512x1024xbf16, #tpu.memory_space<vmem>>, vector<512x1024xbf16>
    %cst_14 = arith.constant dense<0.000000e+00> : vector<2x1024xf32>
    %19 = tpu.matmul %17, %18, %cst_14 {dimension_numbers = #tpu.dot_dimension_numbers<[1], [0], [0], [1], [0, 0, 1, 1], [], []>} : vector<2x512xbf16>, vector<512x1024xbf16>, vector<2x1024xf32> -> vector<2x1024xf32>
    %c0_15 = arith.constant 0 : index
    %c0_16 = arith.constant 0 : index
    %20 = vector.load %arg7[%c0_15, %c0_16] : memref<1x1024xf32, #tpu.memory_space<vmem>>, vector<1x1024xf32>
    %21 = vector.broadcast %20 : vector<1x1024xf32> to vector<2x1024xf32>
    %22 = arith.addf %19, %21 : vector<2x1024xf32>
    %cst_17 = arith.constant 0.000000e+00 : f32
    %23 = vector.broadcast %cst_17 : f32 to vector<2x1024xf32>
    %24 = arith.maximumf %22, %23 : vector<2x1024xf32>
    %25 = arith.truncf %24 : vector<2x1024xf32> to vector<2x1024xbf16>
    %c0_18 = arith.constant 0 : index
    %c0_19 = arith.constant 0 : index
    %26 = vector.load %arg8[%c0_18, %c0_19] : memref<1024x512xbf16, #tpu.memory_space<vmem>>, vector<1024x512xbf16>
    %cst_20 = arith.constant dense<0.000000e+00> : vector<2x512xf32>
    %27 = tpu.matmul %25, %26, %cst_20 {dimension_numbers = #tpu.dot_dimension_numbers<[1], [0], [0], [1], [0, 0, 1, 1], [], []>} : vector<2x1024xbf16>, vector<1024x512xbf16>, vector<2x512xf32> -> vector<2x512xf32>
    %c0_21 = arith.constant 0 : index
    %c0_22 = arith.constant 0 : index
    %28 = vector.load %arg9[%c0_21, %c0_22] : memref<1x512xf32, #tpu.memory_space<vmem>>, vector<1x512xf32>
    %29 = vector.broadcast %28 : vector<1x512xf32> to vector<2x512xf32>
    %30 = arith.addf %27, %29 : vector<2x512xf32>
    %cst_23 = arith.constant 0.000000e+00 : f32
    %31 = vector.broadcast %cst_23 : f32 to vector<2x512xf32>
    %32 = arith.maximumf %30, %31 : vector<2x512xf32>
    %33 = arith.truncf %32 : vector<2x512xf32> to vector<2x512xbf16>
    %c0_24 = arith.constant 0 : index
    %c0_25 = arith.constant 0 : index
    %34 = vector.load %arg10[%c0_24, %c0_25] : memref<512x256xbf16, #tpu.memory_space<vmem>>, vector<512x256xbf16>
    %cst_26 = arith.constant dense<0.000000e+00> : vector<2x256xf32>
    %35 = tpu.matmul %33, %34, %cst_26 {dimension_numbers = #tpu.dot_dimension_numbers<[1], [0], [0], [1], [0, 0, 1, 1], [], []>} : vector<2x512xbf16>, vector<512x256xbf16>, vector<2x256xf32> -> vector<2x256xf32>
    %c0_27 = arith.constant 0 : index
    %c0_28 = arith.constant 0 : index
    %36 = vector.load %arg11[%c0_27, %c0_28] : memref<1x256xf32, #tpu.memory_space<vmem>>, vector<1x256xf32>
    %37 = vector.broadcast %36 : vector<1x256xf32> to vector<2x256xf32>
    %38 = arith.addf %35, %37 : vector<2x256xf32>
    %cst_29 = arith.constant 0.000000e+00 : f32
    %39 = vector.broadcast %cst_29 : f32 to vector<2x256xf32>
    %40 = arith.maximumf %38, %39 : vector<2x256xf32>
    %41 = arith.truncf %40 : vector<2x256xf32> to vector<2x256xbf16>
    %c0_30 = arith.constant 0 : index
    %c0_31 = arith.constant 0 : index
    %42 = vector.load %arg12[%c0_30, %c0_31] : memref<256x128xbf16, #tpu.memory_space<vmem>>, vector<256x128xbf16>
    %cst_32 = arith.constant dense<0.000000e+00> : vector<2x128xf32>
    %43 = tpu.matmul %41, %42, %cst_32 {dimension_numbers = #tpu.dot_dimension_numbers<[1], [0], [0], [1], [0, 0, 1, 1], [], []>} : vector<2x256xbf16>, vector<256x128xbf16>, vector<2x128xf32> -> vector<2x128xf32>
    %c0_33 = arith.constant 0 : index
    %c0_34 = arith.constant 0 : index
    %44 = vector.load %arg13[%c0_33, %c0_34] : memref<2x128xf32, #tpu.memory_space<vmem>>, vector<2x128xf32>
    tpu.vector_store %arg13[%c0_33, %c0_34], %43 {strides = array<i32>} : memref<2x128xf32, #tpu.memory_space<vmem>>, vector<2x128xf32>,
    return
  }
  func.func @transform_0(%arg0: i32) -> (i32, i32) {
    %c0_i32 = arith.constant 0 : i32
    %c0_i32_0 = arith.constant 0 : i32
    return %arg0, %c0_i32 : i32, i32
  }
  func.func @transform_1(%arg0: i32) -> (i32, i32) {
    %c0_i32 = arith.constant 0 : i32
    %c0_i32_0 = arith.constant 0 : i32
    %c0_i32_1 = arith.constant 0 : i32
    return %c0_i32, %c0_i32_0 : i32, i32
  }
  func.func @transform_2(%arg0: i32) -> (i32, i32) {
    %c0_i32 = arith.constant 0 : i32
    %c0_i32_0 = arith.constant 0 : i32
    %c0_i32_1 = arith.constant 0 : i32
    return %c0_i32, %c0_i32_0 : i32, i32
  }
  func.func @transform_3(%arg0: i32) -> (i32, i32) {
    %c0_i32 = arith.constant 0 : i32
    %c0_i32_0 = arith.constant 0 : i32
    %c0_i32_1 = arith.constant 0 : i32
    return %c0_i32, %c0_i32_0 : i32, i32
  }
  func.func @transform_4(%arg0: i32) -> (i32, i32) {
    %c0_i32 = arith.constant 0 : i32
    %c0_i32_0 = arith.constant 0 : i32
    %c0_i32_1 = arith.constant 0 : i32
    return %c0_i32, %c0_i32_0 : i32, i32
  }
  func.func @transform_5(%arg0: i32) -> (i32, i32) {
    %c0_i32 = arith.constant 0 : i32
    %c0_i32_0 = arith.constant 0 : i32
    %c0_i32_1 = arith.constant 0 : i32
    return %c0_i32, %c0_i32_0 : i32, i32
  }
  func.func @transform_6(%arg0: i32) -> (i32, i32) {
    %c0_i32 = arith.constant 0 : i32
    %c0_i32_0 = arith.constant 0 : i32
    %c0_i32_1 = arith.constant 0 : i32
    return %c0_i32, %c0_i32_0 : i32, i32
  }
  func.func @transform_7(%arg0: i32) -> (i32, i32) {
    %c0_i32 = arith.constant 0 : i32
    %c0_i32_0 = arith.constant 0 : i32
    %c0_i32_1 = arith.constant 0 : i32
    return %c0_i32, %c0_i32_0 : i32, i32
  }
  func.func @transform_8(%arg0: i32) -> (i32, i32) {
    %c0_i32 = arith.constant 0 : i32
    %c0_i32_0 = arith.constant 0 : i32
    %c0_i32_1 = arith.constant 0 : i32
    return %c0_i32, %c0_i32_0 : i32, i32
  }
  func.func @transform_9(%arg0: i32) -> (i32, i32) {
    %c0_i32 = arith.constant 0 : i32
    %c0_i32_0 = arith.constant 0 : i32
    %c0_i32_1 = arith.constant 0 : i32
    return %c0_i32, %c0_i32_0 : i32, i32
  }
  func.func @transform_10(%arg0: i32) -> (i32, i32) {
    %c0_i32 = arith.constant 0 : i32
    %c0_i32_0 = arith.constant 0 : i32
    %c0_i32_1 = arith.constant 0 : i32
    return %c0_i32, %c0_i32_0 : i32, i32
  }
  func.func @transform_11(%arg0: i32) -> (i32, i32) {
    %c0_i32 = arith.constant 0 : i32
    %c0_i32_0 = arith.constant 0 : i32
    %c0_i32_1 = arith.constant 0 : i32
    return %c0_i32, %c0_i32_0 : i32, i32
  }
  func.func @transform_12(%arg0: i32) -> (i32, i32) {
    %c0_i32 = arith.constant 0 : i32
    %c0_i32_0 = arith.constant 0 : i32
    return %arg0, %c0_i32 : i32, i32
  }
}

module attributes {stable_mosaic.version = 11 : i64} {
  func.func @mlp_forward_kernel(%arg0: i32, %arg1: memref<2x128xf32, #tpu.memory_space<vmem>>, %arg2: memref<128x256xbf16, #tpu.memory_space<vmem>>, %arg3: memref<1x256xf32, #tpu.memory_space<vmem>>, %arg4: memref<256x512xbf16, #tpu.memory_space<vmem>>, %arg5: memref<1x512xf32, #tpu.memory_space<vmem>>, %arg6: memref<512x1024xbf16, #tpu.memory_space<vmem>>, %arg7: memref<1x1024xf32, #tpu.memory_space<vmem>>, %arg8: memref<1024x512xbf16, #tpu.memory_space<vmem>>, %arg9: memref<1x512xf32, #tpu.memory_space<vmem>>, %arg10: memref<512x256xbf16, #tpu.memory_space<vmem>>, %arg11: memref<1x256xf32, #tpu.memory_space<vmem>>, %arg12: memref<256x128xbf16, #tpu.memory_space<vmem>>, %arg13: memref<2x128xf32, #tpu.memory_space<vmem>>) attributes {dimension_semantics = [#tpu.dimension_semantics<parallel>], iteration_bounds = array<i64: 1>, scalar_prefetch = 0 : i64, scratch_operands = 0 : i64, tpu.core_type = #tpu.core_type<tc>, window_params = [{transform_indices = @transform_0, window_bounds = array<i64: 2, 128>}, {pipeline_mode = #tpu.pipeline_mode<synchronous>, transform_indices = @transform_1, window_bounds = array<i64: 128, 256>}, {pipeline_mode = #tpu.pipeline_mode<synchronous>, transform_indices = @transform_2, window_bounds = array<i64: 1, 256>}, {pipeline_mode = #tpu.pipeline_mode<synchronous>, transform_indices = @transform_3, window_bounds = array<i64: 256, 512>}, {pipeline_mode = #tpu.pipeline_mode<synchronous>, transform_indices = @transform_4, window_bounds = array<i64: 1, 512>}, {pipeline_mode = #tpu.pipeline_mode<synchronous>, transform_indices = @transform_5, window_bounds = array<i64: 512, 1024>}, {pipeline_mode = #tpu.pipeline_mode<synchronous>, transform_indices = @transform_6, window_bounds = array<i64: 1, 1024>}, {pipeline_mode = #tpu.pipeline_mode<synchronous>, transform_indices = @transform_7, window_bounds = array<i64: 1024, 512>}, {pipeline_mode = #tpu.pipeline_mode<synchronous>, transform_indices = @transform_8, window_bounds = array<i64: 1, 512>}, {pipeline_mode = #tpu.pipeline_mode<synchronous>, transform_indices = @transform_9, window_bounds = array<i64: 512, 256>}, {pipeline_mode = #tpu.pipeline_mode<synchronous>, transform_indices = @transform_10, window_bounds = array<i64: 1, 256>}, {pipeline_mode = #tpu.pipeline_mode<synchronous>, transform_indices = @transform_11, window_bounds = array<i64: 256, 128>}, {transform_indices = @transform_12, window_bounds = array<i64: 2, 128>}]} {
    %c0 = arith.constant 0 : index
    %c0_0 = arith.constant 0 : index
    %0 = vector.load %arg1[%c0, %c0_0] : memref<2x128xf32, #tpu.memory_space<vmem>>, vector<2x128xf32>
    %1 = arith.truncf %0 : vector<2x128xf32> to vector<2x128xbf16>
    %c0_1 = arith.constant 0 : index
    %c0_2 = arith.constant 0 : index
    %2 = vector.load %arg2[%c0_1, %c0_2] : memref<128x256xbf16, #tpu.memory_space<vmem>>, vector<128x256xbf16>
    %cst = arith.constant dense<0.000000e+00> : vector<2x256xf32>
    %3 = tpu.matmul %1, %2, %cst {dimension_numbers = #tpu.dot_dimension_numbers<[1], [0], [0], [1], [0, 0, 1, 1], [], []>} : vector<2x128xbf16>, vector<128x256xbf16>, vector<2x256xf32> -> vector<2x256xf32>
    %c0_3 = arith.constant 0 : index
    %c0_4 = arith.constant 0 : index
    %4 = vector.load %arg3[%c0_3, %c0_4] : memref<1x256xf32, #tpu.memory_space<vmem>>, vector<1x256xf32>
    %5 = vector.broadcast %4 : vector<1x256xf32> to vector<2x256xf32>
    %6 = arith.addf %3, %5 : vector<2x256xf32>
    %cst_5 = arith.constant 0.000000e+00 : f32
    %7 = vector.broadcast %cst_5 : f32 to vector<2x256xf32>
    %8 = arith.maximumf %6, %7 : vector<2x256xf32>
    %9 = arith.truncf %8 : vector<2x256xf32> to vector<2x256xbf16>
    %c0_6 = arith.constant 0 : index
    %c0_7 = arith.constant 0 : index
    %10 = vector.load %arg4[%c0_6, %c0_7] : memref<256x512xbf16, #tpu.memory_space<vmem>>, vector<256x512xbf16>
    %cst_8 = arith.constant dense<0.000000e+00> : vector<2x512xf32>
    %11 = tpu.matmul %9, %10, %cst_8 {dimension_numbers = #tpu.dot_dimension_numbers<[1], [0], [0], [1], [0, 0, 1, 1], [], []>} : vector<2x256xbf16>, vector<256x512xbf16>, vector<2x512xf32> -> vector<2x512xf32>
    %c0_9 = arith.constant 0 : index
    %c0_10 = arith.constant 0 : index
    %12 = vector.load %arg5[%c0_9, %c0_10] : memref<1x512xf32, #tpu.memory_space<vmem>>, vector<1x512xf32>
    %13 = vector.broadcast %12 : vector<1x512xf32> to vector<2x512xf32>
    %14 = arith.addf %11, %13 : vector<2x512xf32>
    %cst_11 = arith.constant 0.000000e+00 : f32
    %15 = vector.broadcast %cst_11 : f32 to vector<2x512xf32>
    %16 = arith.maximumf %14, %15 : vector<2x512xf32>
    %17 = arith.truncf %16 : vector<2x512xf32> to vector<2x512xbf16>
    %c0_12 = arith.constant 0 : index
    %c0_13 = arith.constant 0 : index
    %18 = vector.load %arg6[%c0_12, %c0_13] : memref<512x1024xbf16, #tpu.memory_space<vmem>>, vector<512x1024xbf16>
    %cst_14 = arith.constant dense<0.000000e+00> : vector<2x1024xf32>
    %19 = tpu.matmul %17, %18, %cst_14 {dimension_numbers = #tpu.dot_dimension_numbers<[1], [0], [0], [1], [0, 0, 1, 1], [], []>} : vector<2x512xbf16>, vector<512x1024xbf16>, vector<2x1024xf32> -> vector<2x1024xf32>
    %c0_15 = arith.constant 0 : index
    %c0_16 = arith.constant 0 : index
    %20 = vector.load %arg7[%c0_15, %c0_16] : memref<1x1024xf32, #tpu.memory_space<vmem>>, vector<1x1024xf32>
    %21 = vector.broadcast %20 : vector<1x1024xf32> to vector<2x1024xf32>
    %22 = arith.addf %19, %21 : vector<2x1024xf32>
    %cst_17 = arith.constant 0.000000e+00 : f32
    %23 = vector.broadcast %cst_17 : f32 to vector<2x1024xf32>
    %24 = arith.maximumf %22, %23 : vector<2x1024xf32>
    %25 = arith.truncf %24 : vector<2x1024xf32> to vector<2x1024xbf16>
    %c0_18 = arith.constant 0 : index
    %c0_19 = arith.constant 0 : index
    %26 = vector.load %arg8[%c0_18, %c0_19] : memref<1024x512xbf16, #tpu.memory_space<vmem>>, vector<1024x512xbf16>
    %cst_20 = arith.constant dense<0.000000e+00> : vector<2x512xf32>
    %27 = tpu.matmul %25, %26, %cst_20 {dimension_numbers = #tpu.dot_dimension_numbers<[1], [0], [0], [1], [0, 0, 1, 1], [], []>} : vector<2x1024xbf16>, vector<1024x512xbf16>, vector<2x512xf32> -> vector<2x512xf32>
    %c0_21 = arith.constant 0 : index
    %c0_22 = arith.constant 0 : index
    %28 = vector.load %arg9[%c0_21, %c0_22] : memref<1x512xf32, #tpu.memory_space<vmem>>, vector<1x512xf32>
    %29 = vector.broadcast %28 : vector<1x512xf32> to vector<2x512xf32>
    %30 = arith.addf %27, %29 : vector<2x512xf32>
    %cst_23 = arith.constant 0.000000e+00 : f32
    %31 = vector.broadcast %cst_23 : f32 to vector<2x512xf32>
    %32 = arith.maximumf %30, %31 : vector<2x512xf32>
    %33 = arith.truncf %32 : vector<2x512xf32> to vector<2x512xbf16>
    %c0_24 = arith.constant 0 : index
    %c0_25 = arith.constant 0 : index
    %34 = vector.load %arg10[%c0_24, %c0_25] : memref<512x256xbf16, #tpu.memory_space<vmem>>, vector<512x256xbf16>
    %cst_26 = arith.constant dense<0.000000e+00> : vector<2x256xf32>
    %35 = tpu.matmul %33, %34, %cst_26 {dimension_numbers = #tpu.dot_dimension_numbers<[1], [0], [0], [1], [0, 0, 1, 1], [], []>} : vector<2x512xbf16>, vector<512x256xbf16>, vector<2x256xf32> -> vector<2x256xf32>
    %c0_27 = arith.constant 0 : index
    %c0_28 = arith.constant 0 : index
    %36 = vector.load %arg11[%c0_27, %c0_28] : memref<1x256xf32, #tpu.memory_space<vmem>>, vector<1x256xf32>
    %37 = vector.broadcast %36 : vector<1x256xf32> to vector<2x256xf32>
    %38 = arith.addf %35, %37 : vector<2x256xf32>
    %cst_29 = arith.constant 0.000000e+00 : f32
    %39 = vector.broadcast %cst_29 : f32 to vector<2x256xf32>
    %40 = arith.maximumf %38, %39 : vector<2x256xf32>
    %41 = arith.truncf %40 : vector<2x256xf32> to vector<2x256xbf16>
    %c0_30 = arith.constant 0 : index
    %c0_31 = arith.constant 0 : index
    %42 = vector.load %arg12[%c0_30, %c0_31] : memref<256x128xbf16, #tpu.memory_space<vmem>>, vector<256x128xbf16>
    %cst_32 = arith.constant dense<0.000000e+00> : vector<2x128xf32>
    %43 = tpu.matmul %41, %42, %cst_32 {dimension_numbers = #tpu.dot_dimension_numbers<[1], [0], [0], [1], [0, 0, 1, 1], [], []>} : vector<2x256xbf16>, vector<256x128xbf16>, vector<2x128xf32> -> vector<2x128xf32>
    %c0_33 = arith.constant 0 : index
    %c0_34 = arith.constant 0 : index
    %44 = vector.load %arg13[%c0_33, %c0_34] : memref<2x128xf32, #tpu.memory_space<vmem>>, vector<2x128xf32>
    tpu.vector_store %arg13[%c0_33, %c0_34], %43 {strides = array<i32>} : memref<2x128xf32, #tpu.memory_space<vmem>>, vector<2x128xf32>,
    return
  }
  func.func @transform_0(%arg0: i32) -> (i32, i32) {
    %c0_i32 = arith.constant 0 : i32
    %c0_i32_0 = arith.constant 0 : i32
    return %arg0, %c0_i32 : i32, i32
  }
  func.func @transform_1(%arg0: i32) -> (i32, i32) {
    %c0_i32 = arith.constant 0 : i32
    %c0_i32_0 = arith.constant 0 : i32
    %c0_i32_1 = arith.constant 0 : i32
    return %c0_i32, %c0_i32_0 : i32, i32
  }
  func.func @transform_2(%arg0: i32) -> (i32, i32) {
    %c0_i32 = arith.constant 0 : i32
    %c0_i32_0 = arith.constant 0 : i32
    %c0_i32_1 = arith.constant 0 : i32
    return %c0_i32, %c0_i32_0 : i32, i32
  }
  func.func @transform_3(%arg0: i32) -> (i32, i32) {
    %c0_i32 = arith.constant 0 : i32
    %c0_i32_0 = arith.constant 0 : i32
    %c0_i32_1 = arith.constant 0 : i32
    return %c0_i32, %c0_i32_0 : i32, i32
  }
  func.func @transform_4(%arg0: i32) -> (i32, i32) {
    %c0_i32 = arith.constant 0 : i32
    %c0_i32_0 = arith.constant 0 : i32
    %c0_i32_1 = arith.constant 0 : i32
    return %c0_i32, %c0_i32_0 : i32, i32
  }
  func.func @transform_5(%arg0: i32) -> (i32, i32) {
    %c0_i32 = arith.constant 0 : i32
    %c0_i32_0 = arith.constant 0 : i32
    %c0_i32_1 = arith.constant 0 : i32
    return %c0_i32, %c0_i32_0 : i32, i32
  }
  func.func @transform_6(%arg0: i32) -> (i32, i32) {
    %c0_i32 = arith.constant 0 : i32
    %c0_i32_0 = arith.constant 0 : i32
    %c0_i32_1 = arith.constant 0 : i32
    return %c0_i32, %c0_i32_0 : i32, i32
  }
  func.func @transform_7(%arg0: i32) -> (i32, i32) {
    %c0_i32 = arith.constant 0 : i32
    %c0_i32_0 = arith.constant 0 : i32
    %c0_i32_1 = arith.constant 0 : i32
    return %c0_i32, %c0_i32_0 : i32, i32
  }
  func.func @transform_8(%arg0: i32) -> (i32, i32) {
    %c0_i32 = arith.constant 0 : i32
    %c0_i32_0 = arith.constant 0 : i32
    %c0_i32_1 = arith.constant 0 : i32
    return %c0_i32, %c0_i32_0 : i32, i32
  }
  func.func @transform_9(%arg0: i32) -> (i32, i32) {
    %c0_i32 = arith.constant 0 : i32
    %c0_i32_0 = arith.constant 0 : i32
    %c0_i32_1 = arith.constant 0 : i32
    return %c0_i32, %c0_i32_0 : i32, i32
  }
  func.func @transform_10(%arg0: i32) -> (i32, i32) {
    %c0_i32 = arith.constant 0 : i32
    %c0_i32_0 = arith.constant 0 : i32
    %c0_i32_1 = arith.constant 0 : i32
    return %c0_i32, %c0_i32_0 : i32, i32
  }
  func.func @transform_11(%arg0: i32) -> (i32, i32) {
    %c0_i32 = arith.constant 0 : i32
    %c0_i32_0 = arith.constant 0 : i32
    %c0_i32_1 = arith.constant 0 : i32
    return %c0_i32, %c0_i32_0 : i32, i32
  }
  func.func @transform_12(%arg0: i32) -> (i32, i32) {
    %c0_i32 = arith.constant 0 : i32
    %c0_i32_0 = arith.constant 0 : i32
    return %arg0, %c0_i32 : i32, i32
  }
}

</mosaic_0001>

<bundles_post_ra>
// kernel: _poly_forward_impl.1
= control target key start
LH: loop header
LB: loop body
LE: loop exit
PB: predicated region body
PF: predicated region fallthrough
CT: control target
= control target key end

     0   :  { %17 = vsyncpa [#allocation3], 0  ;;  %s9305_s0 = inlined_call_operand.vmem [shape: f32[2,128], index: 0, kind: input, shape index: {}]   ;;  %s9306_s1 = inlined_call_operand.vmem [shape: bf16[128,256], index: 1, kind: input, shape index: {}]   ;;  %s9307_s2 = inlined_call_operand.vmem [shape: f32[1,256], index: 2, kind: input, shape index: {}]   ;;  %s9308_s3 = inlined_call_operand.hbm [shape: bf16[256,512], index: 3, kind: input, shape index: {}]   ;;  %s9309_s4 = inlined_call_operand.vmem [shape: f32[1,512], index: 4, kind: input, shape index: {}]   ;;  %s9310_s5 = inlined_call_operand.hbm [shape: bf16[512,1024], index: 5, kind: input, shape index: {}]   ;;  %s9311_s6 = inlined_call_operand.vmem [shape: f32[1,1024], index: 6, kind: input, shape index: {}]   ;;  %s9312_s7 = inlined_call_operand.hbm [shape: bf16[1024,512], index: 7, kind: input, shape index: {}]   ;;  %s9313_s8 = inlined_call_operand.vmem [shape: f32[1,512], index: 8, kind: input, shape index: {}]   ;;  %s9314_s9 = inlined_call_operand.hbm [shape: bf16[512,256], index: 9, kind: input, shape index: {}]   ;;  %s9315_s10 = inlined_call_operand.vmem [shape: f32[1,256], index: 10, kind: input, shape index: {}]   ;;  %s9316_s11 = inlined_call_operand.vmem [shape: bf16[256,128], index: 11, kind: input, shape index: {}]   ;;  %s9317_s12 = inlined_call_operand.vmem [shape: f32[2,128], index: 12, kind: output, shape index: {}]  }
   0x1   :  { %18 = vsyncpa [#allocation5], 0  ;;  %s45_s23 = sshll.u32 %s9310_s5, 4  ;;  %s46_s23 = int_to_ptr.hbm [resolvable:$true] %s45_s23 }
   0x2   :  { %19 = vsyncpa [#allocation8], 0  ;;  %s8834_s24 = smov [#allocation4]   ;;  %s30_s28 = sshll.u32 %s9308_s3, 4  ;;  %s31_s28 = int_to_ptr.hbm [resolvable:$true] %s30_s28 }
   0x3   :  { %s47_s25 = sshll.u32 %s8834_s24, 4  ;;  %s8835_s29 = smov 512   ;;  %s48_s25 = int_to_ptr.vmem [resolvable:$true] %s47_s25 }
   0x4   :  { %s8836_s30 = smov 32   ;;  %s8837_s13 = smov [#allocation2]  }
   0x5   :  { %53 = dma.hbm_to_vmem [thread:$0]  %s46_s23, 32768, %s48_s25, [#allocation5], %s8835_s29, %s8835_s29, %s8836_s30  }
   0x6   :  { %s32_s14 = sshll.u32 %s8837_s13, 4  ;;  %s8838_s15 = smov 256   ;;  %s33_s14 = int_to_ptr.vmem [resolvable:$true] %s32_s14 }
   0x7   :  { %s8839_s16 = smov 16   ;;  %s60_s18 = sshll.u32 %s9312_s7, 4  ;;  %s61_s18 = int_to_ptr.hbm [resolvable:$true] %s60_s18 }
   0x8   :  { %38 = dma.hbm_to_vmem [thread:$0]  %s31_s28, 8192, %s33_s14, [#allocation3], %s8838_s15, %s8838_s15, %s8839_s16  }
   0x9   :  { %s8840_s19 = smov [#allocation6]   ;;  %s75_s22 = sshll.u32 %s9314_s9, 4  ;;  %s76_s22 = int_to_ptr.hbm [resolvable:$true] %s75_s22 }
   0xa   :  { %s62_s20 = sshll.u32 %s8840_s19, 4  ;;  %s8841_s23 = smov [#allocation7]   ;;  %s63_s20 = int_to_ptr.vmem [resolvable:$true] %s62_s20 }
   0xb   :  { %68 = dma.hbm_to_vmem [thread:$0]  %s61_s18, 32768, %s63_s20, [#allocation5], %s8838_s15, %s8838_s15, %s8839_s16  }
   0xc   :  { %s77_s24 = sshll.u32 %s8841_s23, 4  ;;  %s8842_s25 = smov 128   ;;  %s78_s24 = int_to_ptr.vmem [resolvable:$true] %s77_s24 }
   0xd   :  { %s8843_s26 = smov 8  }
   0xe   :  { %83 = dma.hbm_to_vmem [thread:$0]  %s76_s22, 8192, %s78_s24, [#allocation8], %s8842_s25, %s8842_s25, %s8843_s26  }
   0xf   :  { %8828 = dma.done.wait [#allocation3], 8192  }
  0x10   :  { %8829 = vsyncadd [#allocation3], 4294959104 }
  0x11   :  { %8830 = dma.done.wait [#allocation5], 65536  }
  0x12   :  { %8831 = vsyncadd [#allocation5], 4294901760 }
  0x13   :  { %8832 = dma.done.wait [#allocation8], 8192  }
  0x14   :  { %8833 = vsyncadd [#allocation8], 4294959104  ;;  %v5418_v0 = vld [vmem:[%s9306_s1 + $0x70] sm:$0xf]  ;;  %v8063_v1 = vld [vmem:[%s9306_s1 + $0x74] sm:$0xf0] }
  0x15   :  { %v8062_v2 = vld [vmem:[%s9306_s1 + $0x74] sm:$0xf]  ;;  %v5419_v3 = vor.u32 %v8063_v1, %v5418_v0  ;;  %v5420_v4 = vld [vmem:[%s9306_s1 + $0x78] sm:$0xf0]  ;;  %v5410_v5 = vld [vmem:[%s9306_s1 + $0x60] sm:$0xf] }
  0x16   :  { %v8061_v6 = vld [vmem:[%s9306_s1 + $0x64] sm:$0xf0]  ;;  %v5423_v7 = vor.u32 %v8062_v2, %v5420_v4  ;;  %v8060_v8 = vld [vmem:[%s9306_s1 + $0x64] sm:$0xf]  ;;  %v5412_v9 = vld [vmem:[%s9306_s1 + $0x68] sm:$0xf0] }
  0x17   :  { %208 = vmatpush.bf16.msra.mxu0 %v5419_v3  ;;  %v5411_v10 = vor.u32 %v8061_v6, %v5410_v5  ;;  %v5415_v11 = vor.u32 %v8060_v8, %v5412_v9  ;;  %v5402_v12 = vld [vmem:[%s9306_s1 + $0x50] sm:$0xf]  ;;  %v8059_v13 = vld [vmem:[%s9306_s1 + $0x54] sm:$0xf0]  ;;  %v8058_v14 = vld [vmem:[%s9306_s1 + $0x54] sm:$0xf] }
  0x18   :  { %221 = vmatpush.bf16.msra.mxu1 %v5423_v7  ;;  %v5404_v15 = vld [vmem:[%s9306_s1 + $0x58] sm:$0xf0]  ;;  %v5403_v16 = vor.u32 %v8059_v13, %v5402_v12  ;;  %v5394_v18 = vld [vmem:[%s9306_s1 + $0x40] sm:$0xf]  ;;  %v8057_v19 = vld [vmem:[%s9306_s1 + $0x44] sm:$0xf0] }
  0x19   :  { %v5407_v17 = vor.u32 %v8058_v14, %v5404_v15  ;;  %v8056_v20 = vld [vmem:[%s9306_s1 + $0x44] sm:$0xf]  ;;  %v5396_v21 = vld [vmem:[%s9306_s1 + $0x48] sm:$0xf0]  ;;  %v5395_v22 = vor.u32 %v8057_v19, %v5394_v18  ;;  %v5538_v23 = vld [vmem:[#allocation2 + $0xe0] sm:$0xf] }
  0x1a   :  { %v8094_v24 = vld [vmem:[#allocation2 + $0xec] sm:$0xf0]  ;;  %v5666_v25 = vld [vmem:[#allocation2 + $0x1e0] sm:$0xf]  ;;  %v5399_v26 = vor.u32 %v8056_v20, %v5396_v21  ;;  %v8055_v28 = vld [vmem:[%s9306_s1 + $0x34] sm:$0xf0] }
  0x1b   :  { %209 = vmatpush.bf16.msra.mxu0 %v5411_v10  ;;  %v5386_v27 = vld [vmem:[%s9306_s1 + $0x30] sm:$0xf]  ;;  %v5539_v29 = vor.u32 %v8094_v24, %v5538_v23  ;;  %v8054_v31 = vld [vmem:[%s9306_s1 + $0x34] sm:$0xf]  ;;  %v5388_v32 = vld [vmem:[%s9306_s1 + $0x38] sm:$0xf0] }
  0x1c   :  { %222 = vmatpush.bf16.msra.mxu1 %v5415_v11  ;;  %v8126_v30 = vld [vmem:[#allocation2 + $0x1ec] sm:$0xf0]  ;;  %v5522_v34 = vld [vmem:[#allocation2 + $0xc0] sm:$0xf]  ;;  %v5387_v38 = vor.u32 %v8055_v28, %v5386_v27  ;;  %v8053_v40 = vld [vmem:[%s9306_s1 + $0x24] sm:$0xf0]  ;;  %v5391_v43 = vor.u32 %v8054_v31, %v5388_v32 }
  0x1d   :  { %v5667_v33 = vor.u32 %v8126_v30, %v5666_v25  ;;  %632 = vmatpush.bf16.msra.mxu2 %v5539_v29  ;;  %v8090_v35 = vld [vmem:[#allocation2 + $0xcc] sm:$0xf0]  ;;  %v5650_v36 = vld [vmem:[#allocation2 + $0x1c0] sm:$0xf]  ;;  %v8052_v44 = vld [vmem:[%s9306_s1 + $0x24] sm:$0xf] }
  0x1e   :  { %v8122_v37 = vld [vmem:[#allocation2 + $0x1cc] sm:$0xf0]  ;;  %v5378_v39 = vld [vmem:[%s9306_s1 + $0x20] sm:$0xf]  ;;  %v5523_v41 = vor.u32 %v8090_v35, %v5522_v34  ;;  %v5380_v47 = vld [vmem:[%s9306_s1 + $0x28] sm:$0xf0] }
  0x1f   :  { %210 = vmatpush.bf16.msra.mxu0 %v5403_v16  ;;  %645 = vmatpush.bf16.msra.mxu3 %v5667_v33  ;;  %v5651_v42 = vor.u32 %v8122_v37, %v5650_v36  ;;  %v5506_v45 = vld [vmem:[#allocation2 + $0xa0] sm:$0xf]  ;;  %v8086_v46 = vld [vmem:[#allocation2 + $0xac] sm:$0xf0]  ;;  %v5379_v51 = vor.u32 %v8053_v40, %v5378_v39  ;;  %v5383_v56 = vor.u32 %v8052_v44, %v5380_v47  ;;  %v8051_v57 = vld [vmem:[%s9306_s1 + $0x14] sm:$0xf0] }
  0x20   :  { %223 = vmatpush.bf16.msra.mxu1 %v5407_v17  ;;  %v5634_v48 = vld [vmem:[#allocation2 + $0x1a0] sm:$0xf]  ;;  %v8118_v49 = vld [vmem:[#allocation2 + $0x1ac] sm:$0xf0]  ;;  %v5507_v50 = vor.u32 %v8086_v46, %v5506_v45  ;;  %v8050_v60 = vld [vmem:[%s9306_s1 + $0x14] sm:$0xf] }
  0x21   :  { %633 = vmatpush.bf16.msra.mxu2 %v5523_v41  ;;  %v5370_v52 = vld [vmem:[%s9306_s1 + $0x10] sm:$0xf]  ;;  %v5635_v53 = vor.u32 %v8118_v49, %v5634_v48  ;;  %v5490_v54 = vld [vmem:[#allocation2 + $0x80] sm:$0xf]  ;;  %v5372_v61 = vld [vmem:[%s9306_s1 + $0x18] sm:$0xf0] }
  0x22   :  { %v8082_v55 = vld [vmem:[#allocation2 + $0x8c] sm:$0xf0]  ;;  %v5618_v58 = vld [vmem:[#allocation2 + $0x180] sm:$0xf]  ;;  %v5371_v0 = vor.u32 %v8051_v57, %v5370_v52  ;;  %v8049_v1 = vld [vmem:[%s9306_s1 + $0x4] sm:$0xf0]  ;;  %v5375_v5 = vor.u32 %v8050_v60, %v5372_v61 }
  0x23   :  { %211 = vmatpush.bf16.msra.mxu0 %v5395_v22  ;;  %646 = vmatpush.bf16.msra.mxu3 %v5651_v42  ;;  %v8114_v59 = vld [vmem:[#allocation2 + $0x18c] sm:$0xf0]  ;;  %v5362_v62 = vld [vmem:[%s9306_s1] sm:$0xf]  ;;  %v5491_v63 = vor.u32 %v8082_v55, %v5490_v54  ;;  %v8048_v6 = vld [vmem:[%s9306_s1 + $0x4] sm:$0xf] }
  0x24   :  { %224 = vmatpush.bf16.msra.mxu1 %v5399_v26  ;;  %v5619_v2 = vor.u32 %v8114_v59, %v5618_v58  ;;  %v5474_v3 = vld [vmem:[#allocation2 + $0x60] sm:$0xf]  ;;  %v8078_v4 = vld [vmem:[#allocation2 + $0x6c] sm:$0xf0]  ;;  %v5364_v9 = vld [vmem:[%s9306_s1 + $0x8] sm:$0xf0]  ;;  %v5363_v15 = vor.u32 %v8049_v1, %v5362_v62 }
  0x25   :  { %634 = vmatpush.bf16.msra.mxu2 %v5507_v50  ;;  %v5602_v7 = vld [vmem:[#allocation2 + $0x160] sm:$0xf]  ;;  %v8110_v8 = vld [vmem:[#allocation2 + $0x16c] sm:$0xf0]  ;;  %v8092_v10 = vld [vmem:[#allocation2 + $0xe4] sm:$0xf]  ;;  %v5475_v14 = vor.u32 %v8078_v4, %v5474_v3  ;;  %v5367_v20 = vor.u32 %v8048_v6, %v5364_v9 }
  0x26   :  { %v5540_v11 = vld [vmem:[#allocation2 + $0xf0] sm:$0xf0]  ;;  %v8124_v12 = vld [vmem:[#allocation2 + $0x1e4] sm:$0xf]  ;;  %v104_v16 = vld [vmem:[%s9305_s0] sm:$0x3]  ;;  %v5603_v17 = vor.u32 %v8110_v8, %v5602_v7 }
  0x27   :  { %212 = vmatpush.bf16.msra.mxu0 %v5387_v38  ;;  %647 = vmatpush.bf16.msra.mxu3 %v5635_v53  ;;  %v5668_v13 = vld [vmem:[#allocation2 + $0x1f0] sm:$0xf0]  ;;  %v5458_v18 = vld [vmem:[#allocation2 + $0x40] sm:$0xf]  ;;  %v8074_v19 = vld [vmem:[#allocation2 + $0x4c] sm:$0xf0]  ;;  %v5543_v21 = vor.u32 %v8092_v10, %v5540_v11  ;;  %v105_v27 = vpack.c.bf16 %v104_v16, %v104_v16 }
  0x28   :  { %225 = vmatpush.bf16.msra.mxu1 %v5391_v43  ;;  %v5586_v22 = vld [vmem:[#allocation2 + $0x140] sm:$0xf]  ;;  %v8106_v23 = vld [vmem:[#allocation2 + $0x14c] sm:$0xf0]  ;;  %v5671_v24 = vor.u32 %v8124_v12, %v5668_v13  ;;  %v8088_v25 = vld [vmem:[#allocation2 + $0xc4] sm:$0xf]  ;;  %v5459_v30 = vor.u32 %v8074_v19, %v5458_v18 }
  0x29   :  { %635 = vmatpush.bf16.msra.mxu2 %v5491_v63  ;;  %v5524_v26 = vld [vmem:[#allocation2 + $0xd0] sm:$0xf0]  ;;  %v8120_v28 = vld [vmem:[#allocation2 + $0x1c4] sm:$0xf]  ;;  %v5587_v31 = vor.u32 %v8106_v23, %v5586_v22  ;;  %v5442_v32 = vld [vmem:[#allocation2 + $0x20] sm:$0xf] }
  0x2a   :  { %v5652_v29 = vld [vmem:[#allocation2 + $0x1d0] sm:$0xf0]  ;;  %v8070_v33 = vld [vmem:[#allocation2 + $0x2c] sm:$0xf0]  ;;  %v5527_v34 = vor.u32 %v8088_v25, %v5524_v26  ;;  %v5570_v35 = vld [vmem:[#allocation2 + $0x120] sm:$0xf] }
  0x2b   :  { %213 = vmatpush.bf16.msra.mxu0 %v5379_v51  ;;  %648 = vmatpush.bf16.msra.mxu3 %v5619_v2  ;;  %v8102_v36 = vld [vmem:[#allocation2 + $0x12c] sm:$0xf0]  ;;  %v5655_v37 = vor.u32 %v8120_v28, %v5652_v29  ;;  %v8084_v38 = vld [vmem:[#allocation2 + $0xa4] sm:$0xf]  ;;  %v5508_v39 = vld [vmem:[#allocation2 + $0xb0] sm:$0xf0]  ;;  %v5443_v42 = vor.u32 %v8070_v33, %v5442_v32 }
  0x2c   :  { %226 = vmatpush.bf16.msra.mxu1 %v5383_v56  ;;  %v8116_v40 = vld [vmem:[#allocation2 + $0x1a4] sm:$0xf]  ;;  %v5636_v41 = vld [vmem:[#allocation2 + $0x1b0] sm:$0xf0]  ;;  %v5571_v44 = vor.u32 %v8102_v36, %v5570_v35  ;;  %v5426_v45 = vld [vmem:[#allocation2] sm:$0xf]  ;;  %v5511_v48 = vor.u32 %v8084_v38, %v5508_v39 }
  0x2d   :  { %636 = vmatpush.bf16.msra.mxu2 %v5475_v14  ;;  %v8080_v43 = vld [vmem:[#allocation2 + $0x84] sm:$0xf]  ;;  %v8066_v46 = vld [vmem:[#allocation2 + $0xc] sm:$0xf0]  ;;  %v5554_v47 = vld [vmem:[#allocation2 + $0x100] sm:$0xf]  ;;  %v5639_v52 = vor.u32 %v8116_v40, %v5636_v41 }
  0x2e   :  { %v8098_v49 = vld [vmem:[#allocation2 + $0x10c] sm:$0xf0]  ;;  %v5546_v50 = vld [vmem:[#allocation2 + $0xe8] sm:$0xf]  ;;  %v8095_v51 = vld [vmem:[#allocation2 + $0xf4] sm:$0xf0]  ;;  %v5427_v58 = vor.u32 %v8066_v46, %v5426_v45 }
  0x2f   :  { %214 = vmatpush.bf16.msra.mxu0 %v5371_v0  ;;  %649 = vmatpush.bf16.msra.mxu3 %v5603_v17  ;;  %v5492_v53 = vld [vmem:[#allocation2 + $0x90] sm:$0xf0]  ;;  %v5674_v54 = vld [vmem:[#allocation2 + $0x1e8] sm:$0xf]  ;;  %v8127_v55 = vld [vmem:[#allocation2 + $0x1f4] sm:$0xf0]  ;;  %v5555_v59 = vor.u32 %v8098_v49, %v5554_v47  ;;  %v5547_v60 = vor.u32 %v8095_v51, %v5546_v50 }
  0x30   :  { %227 = vmatpush.bf16.msra.mxu1 %v5375_v5  ;;  %v8112_v56 = vld [vmem:[#allocation2 + $0x184] sm:$0xf]  ;;  %v5620_v57 = vld [vmem:[#allocation2 + $0x190] sm:$0xf0]  ;;  %v5495_v61 = vor.u32 %v8080_v43, %v5492_v53  ;;  %v5675_v63 = vor.u32 %v8127_v55, %v5674_v54  ;;  %v5530_v0 = vld [vmem:[#allocation2 + $0xc8] sm:$0xf] }
  0x31   :  { %637 = vmatpush.bf16.msra.mxu2 %v5459_v30  ;;  %v8076_v62 = vld [vmem:[#allocation2 + $0x64] sm:$0xf]  ;;  %v8091_v1 = vld [vmem:[#allocation2 + $0xd4] sm:$0xf0]  ;;  %v5623_v2 = vor.u32 %v8112_v56, %v5620_v57  ;;  %v5476_v3 = vld [vmem:[#allocation2 + $0x70] sm:$0xf0] }
  0x32   :  { %v5658_v4 = vld [vmem:[#allocation2 + $0x1c8] sm:$0xf]  ;;  %v8123_v5 = vld [vmem:[#allocation2 + $0x1d4] sm:$0xf0]  ;;  %v8108_v6 = vld [vmem:[#allocation2 + $0x164] sm:$0xf]  ;;  %v5531_v8 = vor.u32 %v8091_v1, %v5530_v0  ;;  %v5479_v9 = vor.u32 %v8076_v62, %v5476_v3 }
  0x33   :  { %215 = vmatpush.bf16.msra.mxu0 %v5363_v15  ;;  %650 = vmatpush.bf16.msra.mxu3 %v5587_v31  ;;  %v5604_v7 = vld [vmem:[#allocation2 + $0x170] sm:$0xf0]  ;;  %v5659_v10 = vor.u32 %v8123_v5, %v5658_v4  ;;  %v8072_v12 = vld [vmem:[#allocation2 + $0x44] sm:$0xf]  ;;  %v8093_v28 = vld [vmem:[#allocation2 + $0xec] sm:$0xf] }
  0x34   :  { %228 = vmatpush.bf16.msra.mxu1 %v5367_v20  ;;  %v5607_v11 = vor.u32 %v8108_v6, %v5604_v7  ;;  %v5460_v13 = vld [vmem:[#allocation2 + $0x50] sm:$0xf0]  ;;  %v8104_v14 = vld [vmem:[#allocation2 + $0x144] sm:$0xf]  ;;  %v5548_v29 = vld [vmem:[#allocation2 + $0xf8] sm:$0xf0] }
  0x35   :  { %638 = vmatpush.bf16.msra.mxu2 %v5443_v42  ;;  %v5588_v15 = vld [vmem:[#allocation2 + $0x150] sm:$0xf0]  ;;  %v5463_v16 = vor.u32 %v8072_v12, %v5460_v13  ;;  %v8068_v18 = vld [vmem:[#allocation2 + $0x24] sm:$0xf]  ;;  %v8125_v30 = vld [vmem:[#allocation2 + $0x1ec] sm:$0xf] }
  0x36   :  { %216 = vmatmul.bf16.vlgmr.msra.gmra.mxu0 %v105_v27  ;;  %v5591_v17 = vor.u32 %v8104_v14, %v5588_v15  ;;  %v5444_v19 = vld [vmem:[#allocation2 + $0x30] sm:$0xf0]  ;;  %v8100_v20 = vld [vmem:[#allocation2 + $0x124] sm:$0xf]  ;;  %v5676_v31 = vld [vmem:[#allocation2 + $0x1f8] sm:$0xf0] }
  0x37   :  { %658 = vmatpush.bf16.msrb.mxu0 %v5543_v21  ;;  %229 = vmatmul.bf16.vlgmr.msra.gmra.mxu1 %v105_v27  ;;  %v5572_v21 = vld [vmem:[#allocation2 + $0x130] sm:$0xf0]  ;;  %v5447_v22 = vor.u32 %v8068_v18, %v5444_v19  ;;  %v8096_v26 = vld [vmem:[#allocation2 + $0x104] sm:$0xf]  ;;  %v5679_v35 = vor.u32 %v8125_v30, %v5676_v31  ;;  %v8089_v36 = vld [vmem:[#allocation2 + $0xcc] sm:$0xf] }
  0x38   :  { %671 = vmatpush.bf16.msrb.mxu1 %v5671_v24  ;;  %651 = vmatpush.bf16.msra.mxu3 %v5571_v44  ;;  %v5575_v23 = vor.u32 %v8100_v20, %v5572_v21  ;;  %v8064_v24 = vld [vmem:[#allocation2 + $0x4] sm:$0xf]  ;;  %v5428_v25 = vld [vmem:[#allocation2 + $0x10] sm:$0xf0]  ;;  %v8121_v38 = vld [vmem:[#allocation2 + $0x1cc] sm:$0xf] }
  0x39   :  { %639 = vmatpush.bf16.msra.mxu2 %v5427_v58  ;;  %v5556_v27 = vld [vmem:[#allocation2 + $0x110] sm:$0xf0]  ;;  %v5431_v32 = vor.u32 %v8064_v24, %v5428_v25  ;;  %v5660_v39 = vld [vmem:[#allocation2 + $0x1d8] sm:$0xf0]  ;;  %v5514_v42 = vld [vmem:[#allocation2 + $0xa8] sm:$0xf] }
  0x3a   :  { %v5559_v33 = vor.u32 %v8096_v26, %v5556_v27  ;;  %v5663_v41 = vor.u32 %v8121_v38, %v5660_v39  ;;  %v8087_v43 = vld [vmem:[#allocation2 + $0xb4] sm:$0xf0]  ;;  %v5642_v44 = vld [vmem:[#allocation2 + $0x1a8] sm:$0xf]  ;;  %v8085_v47 = vld [vmem:[#allocation2 + $0xac] sm:$0xf] }
  0x3b   :  { %659 = vmatpush.bf16.msrb.mxu0 %v5527_v34  ;;  %v5551_v34 = vor.u32 %v8093_v28, %v5548_v29  ;;  %v5515_v45 = vor.u32 %v8087_v43, %v5514_v42  ;;  %v8119_v46 = vld [vmem:[#allocation2 + $0x1b4] sm:$0xf0]  ;;  %v8117_v51 = vld [vmem:[#allocation2 + $0x1ac] sm:$0xf]  ;;  %v5498_v54 = vld [vmem:[#allocation2 + $0x88] sm:$0xf] }
  0x3c   :  { %672 = vmatpush.bf16.msrb.mxu1 %v5655_v37  ;;  %652 = vmatpush.bf16.msra.mxu3 %v5555_v59  ;;  %v5532_v37 = vld [vmem:[#allocation2 + $0xd8] sm:$0xf0]  ;;  %v5643_v49 = vor.u32 %v8119_v46, %v5642_v44  ;;  %v8083_v55 = vld [vmem:[#allocation2 + $0x94] sm:$0xf0]  ;;  %v5626_v56 = vld [vmem:[#allocation2 + $0x188] sm:$0xf] }
  0x3d   :  { %684 = vmatpush.bf16.msrb.mxu2 %v5547_v60  ;;  %v5535_v40 = vor.u32 %v8089_v36, %v5532_v37  ;;  %v5499_v57 = vor.u32 %v8083_v55, %v5498_v54  ;;  %v8115_v58 = vld [vmem:[#allocation2 + $0x194] sm:$0xf0]  ;;  %v8081_v59 = vld [vmem:[#allocation2 + $0x8c] sm:$0xf]  ;;  %v5500_v60 = vld [vmem:[#allocation2 + $0x98] sm:$0xf0] }
  0x3e   :  { %v5503_v62 = vor.u32 %v8081_v59, %v5500_v60  ;;  %v5628_v0 = vld [vmem:[#allocation2 + $0x198] sm:$0xf0]  ;;  %v8079_v3 = vld [vmem:[#allocation2 + $0x74] sm:$0xf0]  ;;  %v5610_v4 = vld [vmem:[#allocation2 + $0x168] sm:$0xf] }
  0x3f   :  { %660 = vmatpush.bf16.msrb.mxu0 %v5511_v48  ;;  %v5516_v48 = vld [vmem:[#allocation2 + $0xb8] sm:$0xf0]  ;;  %v8111_v6 = vld [vmem:[#allocation2 + $0x174] sm:$0xf0]  ;;  %v8077_v7 = vld [vmem:[#allocation2 + $0x6c] sm:$0xf] }
  0x40   :  { %673 = vmatpush.bf16.msrb.mxu1 %v5639_v52  ;;  %697 = vmatpush.bf16.msrb.mxu3 %v5675_v63  ;;  %v5519_v50 = vor.u32 %v8085_v47, %v5516_v48  ;;  %v5644_v52 = vld [vmem:[#allocation2 + $0x1b8] sm:$0xf0]  ;;  %v8113_v63 = vld [vmem:[#allocation2 + $0x18c] sm:$0xf]  ;;  %v5466_v14 = vld [vmem:[#allocation2 + $0x48] sm:$0xf] }
  0x41   :  { %685 = vmatpush.bf16.msrb.mxu2 %v5531_v8  ;;  %v5647_v53 = vor.u32 %v8117_v51, %v5644_v52  ;;  %v5631_v1 = vor.u32 %v8113_v63, %v5628_v0  ;;  %v5484_v8 = vld [vmem:[#allocation2 + $0x78] sm:$0xf0]  ;;  %v8075_v15 = vld [vmem:[#allocation2 + $0x54] sm:$0xf0]  ;;  %v8073_v19 = vld [vmem:[#allocation2 + $0x4c] sm:$0xf] }
  0x42   :  { %v5612_v12 = vld [vmem:[#allocation2 + $0x178] sm:$0xf0]  ;;  %v8107_v18 = vld [vmem:[#allocation2 + $0x154] sm:$0xf0]  ;;  %v5450_v25 = vld [vmem:[#allocation2 + $0x28] sm:$0xf] }
  0x43   :  { %661 = vmatpush.bf16.msrb.mxu0 %v5495_v61  ;;  %v5627_v61 = vor.u32 %v8115_v58, %v5626_v56  ;;  %v5468_v20 = vld [vmem:[#allocation2 + $0x58] sm:$0xf0]  ;;  %v8071_v27 = vld [vmem:[#allocation2 + $0x34] sm:$0xf0]  ;;  %v5578_v28 = vld [vmem:[#allocation2 + $0x128] sm:$0xf] }
  0x44   :  { %674 = vmatpush.bf16.msrb.mxu1 %v5623_v2  ;;  %698 = vmatpush.bf16.msrb.mxu3 %v5659_v10  ;;  %v5482_v2 = vld [vmem:[#allocation2 + $0x68] sm:$0xf]  ;;  %v5487_v10 = vor.u32 %v8077_v7, %v5484_v8  ;;  %v5596_v24 = vld [vmem:[#allocation2 + $0x158] sm:$0xf0]  ;;  %v8103_v29 = vld [vmem:[#allocation2 + $0x134] sm:$0xf0]  ;;  %v5451_v30 = vor.u32 %v8071_v27, %v5450_v25 }
  0x45   :  { %686 = vmatpush.bf16.msrb.mxu2 %v5515_v45  ;;  %v5483_v5 = vor.u32 %v8079_v3, %v5482_v2  ;;  %v8069_v31 = vld [vmem:[#allocation2 + $0x2c] sm:$0xf]  ;;  %v5580_v36 = vld [vmem:[#allocation2 + $0x138] sm:$0xf0]  ;;  %v5434_v37 = vld [vmem:[#allocation2 + $0x8] sm:$0xf] }
  0x46   :  { %v8067_v38 = vld [vmem:[#allocation2 + $0x14] sm:$0xf0]  ;;  %v8065_v42 = vld [vmem:[#allocation2 + $0xc] sm:$0xf]  ;;  %v5436_v43 = vld [vmem:[#allocation2 + $0x18] sm:$0xf0] }
  0x47   :  { %662 = vmatpush.bf16.msrb.mxu0 %v5479_v9  ;;  %v5611_v9 = vor.u32 %v8111_v6, %v5610_v4  ;;  %v8097_v44 = vld [vmem:[#allocation2 + $0x10c] sm:$0xf]  ;;  %v5564_v45 = vld [vmem:[#allocation2 + $0x118] sm:$0xf0]  ;;  %v5435_v46 = vor.u32 %v8067_v38, %v5434_v37  ;;  %v5439_v48 = vor.u32 %v8065_v42, %v5436_v43  ;;  %v6162_v56 = vld [vmem:[#allocation4 + $0x3c0] sm:$0xf] }
  0x48   :  { %675 = vmatpush.bf16.msrb.mxu1 %v5607_v11  ;;  %699 = vmatpush.bf16.msrb.mxu3 %v5643_v49  ;;  %v8109_v11 = vld [vmem:[#allocation2 + $0x16c] sm:$0xf]  ;;  %v5567_v49 = vor.u32 %v8097_v44, %v5564_v45  ;;  %v5906_v58 = vld [vmem:[#allocation4 + $0x1c0] sm:$0xf] }
  0x49   :  { %687 = vmatpush.bf16.msrb.mxu2 %v5499_v57  ;;  %v5615_v13 = vor.u32 %v8109_v11, %v5612_v12  ;;  %v8252_v57 = vld [vmem:[#allocation4 + $0x3dc] sm:$0xf0] }
  0x4a   :  { %v8188_v60 = vld [vmem:[#allocation4 + $0x1dc] sm:$0xf0]  ;;  %v6163_v4 = vor.u32 %v8252_v57, %v6162_v56 }
  0x4b   :  { %663 = vmatpush.bf16.msrb.mxu0 %v5463_v16  ;;  %v5594_v16 = vld [vmem:[#allocation2 + $0x148] sm:$0xf]  ;;  %v6418_v0 = vld [vmem:[#allocation4 + $0x5c0] sm:$0xf]  ;;  %v5907_v7 = vor.u32 %v8188_v60, %v5906_v58 }
  0x4c   :  { %676 = vmatpush.bf16.msrb.mxu1 %v5591_v17  ;;  %700 = vmatpush.bf16.msrb.mxu3 %v5627_v61  ;;  %v5467_v17 = vor.u32 %v8075_v15, %v5466_v14  ;;  %v5595_v21 = vor.u32 %v8107_v18, %v5594_v16  ;;  %v6674_v61 = vld [vmem:[#allocation4 + $0x7c0] sm:$0xf] }
  0x4d   :  { %688 = vmatpush.bf16.msrb.mxu2 %v5483_v5  ;;  %v6130_v5 = vld [vmem:[#allocation4 + $0x380] sm:$0xf] }
  0x4e   :  { %v8244_v6 = vld [vmem:[#allocation4 + $0x39c] sm:$0xf0] }
  0x4f   :  { %664 = vmatpush.bf16.msrb.mxu0 %v5447_v22  ;;  %v5471_v22 = vor.u32 %v8073_v19, %v5468_v20  ;;  %v6642_v12 = vld [vmem:[#allocation4 + $0x780] sm:$0xf]  ;;  %v6131_v19 = vor.u32 %v8244_v6, %v6130_v5 }
  0x50   :  { %677 = vmatpush.bf16.msrb.mxu1 %v5575_v23  ;;  %701 = vmatpush.bf16.msrb.mxu3 %v5611_v9  ;;  %v8105_v23 = vld [vmem:[#allocation2 + $0x14c] sm:$0xf]  ;;  %v5874_v9 = vld [vmem:[#allocation4 + $0x180] sm:$0xf] }
  0x51   :  { %v5599_v26 = vor.u32 %v8105_v23, %v5596_v24  ;;  %689 = vmatpush.bf16.msrb.mxu2 %v5467_v17  ;;  %v8372_v14 = vld [vmem:[#allocation4 + $0x79c] sm:$0xf0] }
  0x52   :  { %v6386_v15 = vld [vmem:[#allocation4 + $0x580] sm:$0xf]  ;;  %v6643_v25 = vor.u32 %v8372_v14, %v6642_v12 }
  0x53   :  { %665 = vmatpush.bf16.msrb.mxu0 %v5431_v32  ;;  %v5452_v32 = vld [vmem:[#allocation2 + $0x38] sm:$0xf0]  ;;  %v8308_v16 = vld [vmem:[#allocation4 + $0x59c] sm:$0xf0] }
  0x54   :  { %678 = vmatpush.bf16.msrb.mxu1 %v5559_v33  ;;  %v8101_v33 = vld [vmem:[#allocation2 + $0x12c] sm:$0xf]  ;;  %702 = vmatpush.bf16.msrb.mxu3 %v5595_v21  ;;  %v6098_v20 = vld [vmem:[#allocation4 + $0x340] sm:$0xf]  ;;  %v6387_v27 = vor.u32 %v8308_v16, %v6386_v15 }
  0x55   :  { %v5583_v39 = vor.u32 %v8101_v33, %v5580_v36  ;;  %690 = vmatpush.bf16.msrb.mxu2 %v5451_v30  ;;  %v8236_v21 = vld [vmem:[#allocation4 + $0x35c] sm:$0xf0] }
  0x56   :  { %v5842_v23 = vld [vmem:[#allocation4 + $0x140] sm:$0xf] }
  0x57   :  { %710 = vmatpush.bf16.msra.mxu0 %v5551_v34  ;;  %v5579_v34 = vor.u32 %v8103_v29, %v5578_v28  ;;  %v8172_v24 = vld [vmem:[#allocation4 + $0x15c] sm:$0xf0] }
  0x58   :  { %723 = vmatpush.bf16.msra.mxu1 %v5679_v35  ;;  %v5455_v35 = vor.u32 %v8069_v31, %v5452_v32  ;;  %v8364_v28 = vld [vmem:[#allocation4 + $0x75c] sm:$0xf0]  ;;  %v6099_v31 = vor.u32 %v8236_v21, %v6098_v20 }
  0x59   :  { %703 = vmatpush.bf16.msrb.mxu3 %v5579_v34  ;;  %691 = vmatpush.bf16.msrb.mxu2 %v5435_v46  ;;  %v6354_v29 = vld [vmem:[#allocation4 + $0x540] sm:$0xf]  ;;  %v5843_v34 = vor.u32 %v8172_v24, %v5842_v23  ;;  %v6164_v24 = vld [vmem:[#allocation4 + $0x3e0] sm:$0xf0] }
  0x5a   :  { %v8300_v30 = vld [vmem:[#allocation4 + $0x55c] sm:$0xf0] }
  0x5b   :  { %711 = vmatpush.bf16.msra.mxu0 %v5535_v40  ;;  %v5562_v40 = vld [vmem:[#allocation2 + $0x108] sm:$0xf]  ;;  %v6066_v32 = vld [vmem:[#allocation4 + $0x300] sm:$0xf] }
  0x5c   :  { %724 = vmatpush.bf16.msra.mxu1 %v5663_v41  ;;  %v8099_v41 = vld [vmem:[#allocation2 + $0x114] sm:$0xf0]  ;;  %v8228_v33 = vld [vmem:[#allocation4 + $0x31c] sm:$0xf0] }
  0x5d   :  { %v5563_v47 = vor.u32 %v8099_v41, %v5562_v40  ;;  %v8164_v36 = vld [vmem:[#allocation4 + $0x11c] sm:$0xf0]  ;;  %v6067_v43 = vor.u32 %v8228_v33, %v6066_v32  ;;  %v6676_v32 = vld [vmem:[#allocation4 + $0x7e0] sm:$0xf0] }
  0x5e   :  { %v6578_v38 = vld [vmem:[#allocation4 + $0x700] sm:$0xf] }
  0x5f   :  { %712 = vmatpush.bf16.msra.mxu0 %v5519_v50  ;;  %704 = vmatpush.bf16.msrb.mxu3 %v5563_v47  ;;  %v122_v50 = vld [vmem:[%s9307_s2] sm:$0x3] }
  0x60   :  { %725 = vmatpush.bf16.msra.mxu1 %v5647_v53  ;;  %v124_v51 = vperm.slane %v122_v50, 0  ;;  %v125_v52 = vperm.slane %v122_v50, 1  ;;  %v8356_v40 = vld [vmem:[#allocation4 + $0x71c] sm:$0xf0] }
  0x61   :  { %v6322_v41 = vld [vmem:[#allocation4 + $0x500] sm:$0xf] }
  0x62   :  { %v8292_v42 = vld [vmem:[#allocation4 + $0x51c] sm:$0xf0] }
  0x63   :  { %713 = vmatpush.bf16.msra.mxu0 %v5503_v62  ;;  %v8380_v62 = vld [vmem:[#allocation4 + $0x7dc] sm:$0xf0] }
  0x64   :  { %726 = vmatpush.bf16.msra.mxu1 %v5631_v1  ;;  %v8316_v1 = vld [vmem:[#allocation4 + $0x5dc] sm:$0xf0]  ;;  %v6675_v11 = vor.u32 %v8380_v62, %v6674_v61 }
  0x65   :  { %v6034_v44 = vld [vmem:[#allocation4 + $0x2c0] sm:$0xf] }
  0x66   :  { %v8220_v45 = vld [vmem:[#allocation4 + $0x2dc] sm:$0xf0] }
  0x67   :  { %714 = vmatpush.bf16.msra.mxu0 %v5487_v10  ;;  %v8180_v10 = vld [vmem:[#allocation4 + $0x19c] sm:$0xf0] }
  0x68   :  { %727 = vmatpush.bf16.msra.mxu1 %v5615_v13  ;;  %v6419_v13 = vor.u32 %v8316_v1, %v6418_v0  ;;  %v5778_v47 = vld [vmem:[#allocation4 + $0xc0] sm:$0xf] }
  0x69   :  { %v6546_v50 = vld [vmem:[#allocation4 + $0x6c0] sm:$0xf] }
  0x6a   :  { %v6002_v56 = vld [vmem:[#allocation4 + $0x280] sm:$0xf] }
  0x6b   :  { %715 = vmatpush.bf16.msra.mxu0 %v5471_v22  ;;  %v5875_v22 = vor.u32 %v8180_v10, %v5874_v9  ;;  %v8212_v57 = vld [vmem:[#allocation4 + $0x29c] sm:$0xf0] }
  0x6c   :  { %728 = vmatpush.bf16.msra.mxu1 %v5599_v26  ;;  %v6610_v26 = vld [vmem:[#allocation4 + $0x740] sm:$0xf] }
  0x6d   :  { %v6611_v37 = vor.u32 %v8364_v28, %v6610_v26  ;;  %v8148_v60 = vld [vmem:[#allocation4 + $0x9c] sm:$0xf0]  ;;  %v5908_v26 = vld [vmem:[#allocation4 + $0x1e0] sm:$0xf0] }
  0x6e   :  { %v6514_v62 = vld [vmem:[#allocation4 + $0x680] sm:$0xf] }
  0x6f   :  { %716 = vmatpush.bf16.msra.mxu0 %v5455_v35  ;;  %v5810_v35 = vld [vmem:[#allocation4 + $0x100] sm:$0xf] }
  0x70   :  { %729 = vmatpush.bf16.msra.mxu1 %v5583_v39  ;;  %v6355_v39 = vor.u32 %v8300_v30, %v6354_v29  ;;  %v5811_v46 = vor.u32 %v8164_v36, %v5810_v35  ;;  %v8340_v0 = vld [vmem:[#allocation4 + $0x69c] sm:$0xf0]  ;;  %v6132_v36 = vld [vmem:[#allocation4 + $0x3a0] sm:$0xf0] }
  0x71   :  { %v6258_v1 = vld [vmem:[#allocation4 + $0x480] sm:$0xf] }
  0x72   :  { %v5970_v5 = vld [vmem:[#allocation4 + $0x240] sm:$0xf] }
  0x73   :  { %717 = vmatpush.bf16.msra.mxu0 %v5439_v48  ;;  %v8156_v48 = vld [vmem:[#allocation4 + $0xdc] sm:$0xf0] }
  0x74   :  { %730 = vmatpush.bf16.msra.mxu1 %v5567_v49  ;;  %v6579_v49 = vor.u32 %v8356_v40, %v6578_v38  ;;  %v5779_v58 = vor.u32 %v8156_v48, %v5778_v47  ;;  %v8204_v6 = vld [vmem:[#allocation4 + $0x25c] sm:$0xf0]  ;;  %v5876_v38 = vld [vmem:[#allocation4 + $0x1a0] sm:$0xf0] }
  0x75   :  { %v5714_v9 = vld [vmem:[#allocation4 + $0x40] sm:$0xf]  ;;  %v5971_v16 = vor.u32 %v8204_v6, %v5970_v5  ;;  %v8224_v48 = vld [vmem:[#allocation4 + $0x304] sm:$0xf] }
  0x76   :  { %v8140_v10 = vld [vmem:[#allocation4 + $0x5c] sm:$0xf0]  ;;  %v5780_v5 = vld [vmem:[#allocation4 + $0xe0] sm:$0xf0] }
  0x77   :  { %v6482_v12 = vld [vmem:[#allocation4 + $0x640] sm:$0xf]  ;;  %v8312_v6 = vld [vmem:[#allocation4 + $0x5c4] sm:$0xf] }
  0x78   :  { %v6226_v14 = vld [vmem:[#allocation4 + $0x440] sm:$0xf] }
  0x79   :  { %v8268_v15 = vld [vmem:[#allocation4 + $0x45c] sm:$0xf0] }
  0x7a   :  { %v5682_v20 = vld [vmem:[#allocation4] sm:$0xf]  ;;  %v6227_v23 = vor.u32 %v8268_v15, %v6226_v14  ;;  %v6612_v14 = vld [vmem:[#allocation4 + $0x760] sm:$0xf0] }
  0x7b   :  { %v8132_v21 = vld [vmem:[#allocation4 + $0x1c] sm:$0xf0] }
  0x7c   :  { %v8324_v28 = vld [vmem:[#allocation4 + $0x61c] sm:$0xf0]  ;;  %v5683_v30 = vor.u32 %v8132_v21, %v5682_v20  ;;  %v8192_v21 = vld [vmem:[#allocation4 + $0x204] sm:$0xf] }
  0xb3   :  { %v217_v53 = vpop.f32.mrf.mxu0 }
  0xb4   :  { %v218_v54 = vadd.f32 %v217_v53, %v124_v51  ;;  %v230_v55 = vpop.f32.mrf.mxu1  ;;  %v6323_v51 = vor.u32 %v8292_v42, %v6322_v41  ;;  %v6290_v53 = vld [vmem:[#allocation4 + $0x4c0] sm:$0xf]  ;;  %v8232_v42 = vld [vmem:[#allocation4 + $0x344] sm:$0xf] }
  0xb5   :  { %v231_v59 = vadd.f32 %v230_v55, %v125_v52  ;;  %v8348_v52 = vld [vmem:[#allocation4 + $0x6dc] sm:$0xf0]  ;;  %v6035_v55 = vor.u32 %v8220_v45, %v6034_v44  ;;  %v6100_v44 = vld [vmem:[#allocation4 + $0x360] sm:$0xf0] }
  0xb6   :  { %v234_v63 = vmax.f32 %v218_v54, 0.0  ;;  %v8284_v54 = vld [vmem:[#allocation4 + $0x4dc] sm:$0xf0]  ;;  %v6547_v61 = vor.u32 %v8348_v52, %v6546_v50  ;;  %v8168_v45 = vld [vmem:[#allocation4 + $0x144] sm:$0xf]  ;;  %v6103_v47 = vor.u32 %v8232_v42, %v6100_v44 }
  0xb7   :  { %v235_v2 = vmax.f32 %v231_v59, 0.0  ;;  %v5746_v59 = vld [vmem:[#allocation4 + $0x80] sm:$0xf]  ;;  %v6068_v50 = vld [vmem:[#allocation4 + $0x320] sm:$0xf0] }
  0xb8   :  { %v9023_v3 = vpack.c.bf16 %v234_v63, %v234_v63  ;;  %v6291_v63 = vor.u32 %v8284_v54, %v6290_v53  ;;  %v5812_v52 = vld [vmem:[#allocation4 + $0x120] sm:$0xf0]  ;;  %v6071_v53 = vor.u32 %v8224_v48, %v6068_v50 }
  0xb9   :  { %v9025_v8 = vpack.c.bf16 %v235_v2, %v235_v2  ;;  %v8276_v2 = vld [vmem:[#allocation4 + $0x49c] sm:$0xf0]  ;;  %v8336_v42 = vld [vmem:[#allocation4 + $0x684] sm:$0xf] }
  0xba   :  { %640 = vmatmul.bf16.vlgmr.msra.gmra.mxu2 %v9023_v3  ;;  %666 = vmatmul.bf16.vlgmr.msrb.gmra.mxu0 %v9023_v3  ;;  %v8328_v48 = vld [vmem:[#allocation4 + $0x644] sm:$0xf] }
  0xbb   :  { %653 = vmatmul.bf16.vlgmr.msra.gmra.mxu3 %v9025_v8  ;;  %679 = vmatmul.bf16.vlgmr.msrb.gmra.mxu1 %v9025_v8  ;;  %v219_v17 = vpop.f32.mrf.mxu0 }
  0xbc   :  { %v232_v18 = vpop.f32.mrf.mxu1  ;;  %2311 = vmatpush.bf16.msra.mxu3 %v6163_v4  ;;  %2298 = vmatpush.bf16.msra.mxu2 %v5907_v7  ;;  %v6003_v4 = vor.u32 %v8212_v57, %v6002_v56  ;;  %v5747_v7 = vor.u32 %v8148_v60, %v5746_v59  ;;  %v8196_v17 = vld [vmem:[#allocation4 + $0x21c] sm:$0xf0]  ;;  %v6036_v56 = vld [vmem:[#allocation4 + $0x2e0] sm:$0xf0] }
  0xbd   :  { %2337 = vmatpush.bf16.msrb.mxu1 %v6675_v11  ;;  %2324 = vmatpush.bf16.msrb.mxu0 %v6419_v13  ;;  %v6515_v11 = vor.u32 %v8340_v0, %v6514_v62  ;;  %v8332_v13 = vld [vmem:[#allocation4 + $0x65c] sm:$0xf0]  ;;  %v5715_v18 = vor.u32 %v8140_v10, %v5714_v9  ;;  %v6004_v59 = vld [vmem:[#allocation4 + $0x2a0] sm:$0xf0] }
  0xbe   :  { %v8368_v60 = vld [vmem:[#allocation4 + $0x784] sm:$0xf]  ;;  %v8260_v0 = vld [vmem:[#allocation4 + $0x41c] sm:$0xf0] }
  0xbf   :  { %v6644_v62 = vld [vmem:[#allocation4 + $0x7a0] sm:$0xf0] }
  0xc0   :  { %2312 = vmatpush.bf16.msra.mxu3 %v6131_v19  ;;  %2299 = vmatpush.bf16.msra.mxu2 %v5875_v22  ;;  %v8248_v19 = vld [vmem:[#allocation4 + $0x3c4] sm:$0xf]  ;;  %v6483_v22 = vor.u32 %v8332_v13, %v6482_v12 }
  0xc1   :  { %2338 = vmatpush.bf16.msrb.mxu1 %v6643_v25  ;;  %2325 = vmatpush.bf16.msrb.mxu0 %v6387_v27  ;;  %v8184_v25 = vld [vmem:[#allocation4 + $0x1c4] sm:$0xf]  ;;  %v6450_v27 = vld [vmem:[#allocation4 + $0x600] sm:$0xf]  ;;  %v6167_v33 = vor.u32 %v8248_v19, %v6164_v24 }
  0xc2   :  { %v5911_v35 = vor.u32 %v8184_v25, %v5908_v26  ;;  %v6420_v9 = vld [vmem:[#allocation4 + $0x5e0] sm:$0xf0] }
  0xc3   :  { %v6423_v10 = vor.u32 %v8312_v6, %v6420_v9  ;;  %v5972_v12 = vld [vmem:[#allocation4 + $0x260] sm:$0xf0]  ;;  %v8253_v9 = vld [vmem:[#allocation4 + $0x3e4] sm:$0xf0] }
  0xc4   :  { %2313 = vmatpush.bf16.msra.mxu3 %v6099_v31  ;;  %2300 = vmatpush.bf16.msra.mxu2 %v5843_v34  ;;  %v8376_v31 = vld [vmem:[#allocation4 + $0x7c4] sm:$0xf] }
  0xc5   :  { %2339 = vmatpush.bf16.msrb.mxu1 %v6611_v37  ;;  %2326 = vmatpush.bf16.msrb.mxu0 %v6355_v39  ;;  %v8240_v34 = vld [vmem:[#allocation4 + $0x384] sm:$0xf]  ;;  %v6451_v39 = vor.u32 %v8324_v28, %v6450_v27  ;;  %v6679_v40 = vor.u32 %v8376_v31, %v6676_v32 }
  0xc6   :  { %v8176_v37 = vld [vmem:[#allocation4 + $0x184] sm:$0xf]  ;;  %v6135_v41 = vor.u32 %v8240_v34, %v6132_v36 }
  0xc7   :  { %v6388_v19 = vld [vmem:[#allocation4 + $0x5a0] sm:$0xf0] }
  0xc8   :  { %2314 = vmatpush.bf16.msra.mxu3 %v6067_v43  ;;  %2301 = vmatpush.bf16.msra.mxu2 %v5811_v46  ;;  %v5879_v43 = vor.u32 %v8176_v37, %v5876_v38  ;;  %v5844_v46 = vld [vmem:[#allocation4 + $0x160] sm:$0xf0] }
  0xc9   :  { %2340 = vmatpush.bf16.msrb.mxu1 %v6579_v49  ;;  %2327 = vmatpush.bf16.msrb.mxu0 %v6323_v51  ;;  %v5847_v49 = vor.u32 %v8168_v45, %v5844_v46  ;;  %v8160_v51 = vld [vmem:[#allocation4 + $0x104] sm:$0xf] }
  0xca   :  { %692 = vmatmul.bf16.vlgmr.msrb.gmra.mxu2 %v9023_v3  ;;  %718 = vmatmul.bf16.vlgmr.msra.gmra.mxu0 %v9023_v3  ;;  %v6259_v3 = vor.u32 %v8276_v2, %v6258_v1  ;;  %v5815_v54 = vor.u32 %v8160_v51, %v5812_v52  ;;  %v6647_v1 = vor.u32 %v8368_v60, %v6644_v62  ;;  %v8352_v24 = vld [vmem:[#allocation4 + $0x704] sm:$0xf]  ;;  %v9038_v60 = vld [vmem:[%s9309_s4] sm:$0xf] }
  0xcb   :  { %705 = vmatmul.bf16.vlgmr.msrb.gmra.mxu3 %v9025_v8  ;;  %731 = vmatmul.bf16.vlgmr.msra.gmra.mxu1 %v9025_v8  ;;  %v5938_v8 = vld [vmem:[#allocation4 + $0x200] sm:$0xf]  ;;  %v6580_v25 = vld [vmem:[#allocation4 + $0x720] sm:$0xf0]  ;;  %v304_v6 = vperm.slane %v9038_v60, 0 }
  0xcc   :  { %2315 = vmatpush.bf16.msra.mxu3 %v6035_v55  ;;  %2302 = vmatpush.bf16.msra.mxu2 %v5779_v58  ;;  %v5939_v29 = vor.u32 %v8196_v17, %v5938_v8  ;;  %v8216_v55 = vld [vmem:[#allocation4 + $0x2c4] sm:$0xf]  ;;  %v6583_v26 = vor.u32 %v8352_v24, %v6580_v25  ;;  %v8237_v24 = vld [vmem:[#allocation4 + $0x364] sm:$0xf0] }
  0xcd   :  { %2341 = vmatpush.bf16.msrb.mxu1 %v6547_v61  ;;  %2328 = vmatpush.bf16.msrb.mxu0 %v6291_v63  ;;  %v6039_v57 = vor.u32 %v8216_v55, %v6036_v56  ;;  %v8208_v58 = vld [vmem:[#allocation4 + $0x284] sm:$0xf]  ;;  %v6194_v63 = vld [vmem:[#allocation4 + $0x400] sm:$0xf] }
  0xce   :  { %v6007_v61 = vor.u32 %v8208_v58, %v6004_v59  ;;  %v6195_v2 = vor.u32 %v8260_v0, %v6194_v63  ;;  %v5748_v8 = vld [vmem:[#allocation4 + $0xa0] sm:$0xf0]  ;;  %v305_v63 = vperm.slane %v9038_v60, 1 }
  0xcf   :  { %v8304_v17 = vld [vmem:[#allocation4 + $0x584] sm:$0xf] }
  0xd0   :  { %2316 = vmatpush.bf16.msra.mxu3 %v6003_v4  ;;  %2303 = vmatpush.bf16.msra.mxu2 %v5747_v7  ;;  %v8152_v4 = vld [vmem:[#allocation4 + $0xc4] sm:$0xf]  ;;  %v6391_v20 = vor.u32 %v8304_v17, %v6388_v19  ;;  %v5914_v19 = vld [vmem:[#allocation4 + $0x1c8] sm:$0xf] }
  0xd1   :  { %2342 = vmatpush.bf16.msrb.mxu1 %v6515_v11  ;;  %2329 = vmatpush.bf16.msrb.mxu0 %v6259_v3  ;;  %v5783_v7 = vor.u32 %v8152_v4, %v5780_v5  ;;  %v8200_v11 = vld [vmem:[#allocation4 + $0x244] sm:$0xf] }
  0xd2   :  { %v8360_v3 = vld [vmem:[#allocation4 + $0x744] sm:$0xf]  ;;  %v5975_v13 = vor.u32 %v8200_v11, %v5972_v12 }
  0xd3   :  { %v6615_v15 = vor.u32 %v8360_v3, %v6612_v14  ;;  %v8136_v27 = vld [vmem:[#allocation4 + $0x44] sm:$0xf] }
  0xd4   :  { %2317 = vmatpush.bf16.msra.mxu3 %v5971_v16  ;;  %2304 = vmatpush.bf16.msra.mxu2 %v5715_v18  ;;  %v8144_v16 = vld [vmem:[#allocation4 + $0x84] sm:$0xf] }
  0xd5   :  { %2343 = vmatpush.bf16.msrb.mxu1 %v6483_v22  ;;  %2330 = vmatpush.bf16.msrb.mxu0 %v6227_v23  ;;  %v5751_v18 = vor.u32 %v8144_v16, %v5748_v8  ;;  %v5940_v22 = vld [vmem:[#allocation4 + $0x220] sm:$0xf0]  ;;  %v8245_v16 = vld [vmem:[#allocation4 + $0x3a4] sm:$0xf0] }
  0xd6   :  { %v5943_v23 = vor.u32 %v8192_v21, %v5940_v22  ;;  %v5716_v28 = vld [vmem:[#allocation4 + $0x60] sm:$0xf0] }
  0xd7   :  { %v6356_v31 = vld [vmem:[#allocation4 + $0x560] sm:$0xf0] }
  0xd8   :  { %2318 = vmatpush.bf16.msra.mxu3 %v5939_v29  ;;  %2305 = vmatpush.bf16.msra.mxu2 %v5683_v30  ;;  %v5719_v29 = vor.u32 %v8136_v27, %v5716_v28  ;;  %v8296_v30 = vld [vmem:[#allocation4 + $0x544] sm:$0xf]  ;;  %v307_v27 = vperm.slane %v9038_v60, 3  ;;  %v5882_v28 = vld [vmem:[#allocation4 + $0x188] sm:$0xf] }
  0xd9   :  { %2344 = vmatpush.bf16.msrb.mxu1 %v6451_v39  ;;  %2331 = vmatpush.bf16.msrb.mxu0 %v6195_v2  ;;  %v6359_v32 = vor.u32 %v8296_v30, %v6356_v31  ;;  %v6548_v34 = vld [vmem:[#allocation4 + $0x6e0] sm:$0xf0] }
  0xda   :  { %v8128_v36 = vld [vmem:[#allocation4 + $0x4] sm:$0xf] }
  0xdb   :  { %v5684_v37 = vld [vmem:[#allocation4 + $0x20] sm:$0xf0] }
  0xdc   :  { %2363 = vmatpush.bf16.msrb.mxu3 %v6167_v33  ;;  %2350 = vmatpush.bf16.msrb.mxu2 %v5911_v35  ;;  %v8344_v33 = vld [vmem:[#allocation4 + $0x6c4] sm:$0xf]  ;;  %v5687_v39 = vor.u32 %v8128_v36, %v5684_v37 }
  0xdd   :  { %2389 = vmatpush.bf16.msra.mxu1 %v6679_v40  ;;  %2376 = vmatpush.bf16.msra.mxu0 %v6423_v10  ;;  %v6551_v35 = vor.u32 %v8344_v33, %v6548_v34  ;;  %v8288_v38 = vld [vmem:[#allocation4 + $0x504] sm:$0xf]  ;;  %v6074_v33 = vld [vmem:[#allocation4 + $0x308] sm:$0xf] }
  0xde   :  { %v6324_v40 = vld [vmem:[#allocation4 + $0x520] sm:$0xf0]  ;;  %v8229_v34 = vld [vmem:[#allocation4 + $0x324] sm:$0xf0] }
  0xdf   :  { %v8280_v45 = vld [vmem:[#allocation4 + $0x4c4] sm:$0xf] }
  0xe0   :  { %2364 = vmatpush.bf16.msrb.mxu3 %v6135_v41  ;;  %2351 = vmatpush.bf16.msrb.mxu2 %v5879_v43  ;;  %v6327_v41 = vor.u32 %v8288_v38, %v6324_v40  ;;  %v6516_v43 = vld [vmem:[#allocation4 + $0x6a0] sm:$0xf0]  ;;  %v8173_v40 = vld [vmem:[#allocation4 + $0x164] sm:$0xf0] }
  0xe1   :  { %2390 = vmatpush.bf16.msra.mxu1 %v6647_v1  ;;  %2377 = vmatpush.bf16.msra.mxu0 %v6391_v20  ;;  %v6519_v44 = vor.u32 %v8336_v42, %v6516_v43  ;;  %v6292_v46 = vld [vmem:[#allocation4 + $0x4e0] sm:$0xf0]  ;;  %v8189_v20 = vld [vmem:[#allocation4 + $0x1e4] sm:$0xf0]  ;;  %v306_v42 = vperm.slane %v9038_v60, 2 }
  0xe2   :  { %v8272_v51 = vld [vmem:[#allocation4 + $0x484] sm:$0xf]  ;;  %v5915_v25 = vor.u32 %v8189_v20, %v5914_v19  ;;  %v6042_v43 = vld [vmem:[#allocation4 + $0x2c8] sm:$0xf] }
  0xe3   :  { %v6260_v52 = vld [vmem:[#allocation4 + $0x4a0] sm:$0xf0]  ;;  %v6650_v60 = vld [vmem:[#allocation4 + $0x788] sm:$0xf] }
  0xe4   :  { %2365 = vmatpush.bf16.msrb.mxu3 %v6103_v47  ;;  %2352 = vmatpush.bf16.msrb.mxu2 %v5847_v49  ;;  %v6295_v47 = vor.u32 %v8280_v45, %v6292_v46  ;;  %v6484_v49 = vld [vmem:[#allocation4 + $0x660] sm:$0xf0]  ;;  %v8221_v45 = vld [vmem:[#allocation4 + $0x2e4] sm:$0xf0] }
  0xe5   :  { %2391 = vmatpush.bf16.msra.mxu1 %v6615_v15  ;;  %2378 = vmatpush.bf16.msra.mxu0 %v6359_v32  ;;  %v6487_v50 = vor.u32 %v8328_v48, %v6484_v49  ;;  %v6452_v55 = vld [vmem:[#allocation4 + $0x620] sm:$0xf0]  ;;  %v6138_v15 = vld [vmem:[#allocation4 + $0x388] sm:$0xf] }
  0xe6   :  { %v6228_v58 = vld [vmem:[#allocation4 + $0x460] sm:$0xf0]  ;;  %v6139_v21 = vor.u32 %v8245_v16, %v6138_v15  ;;  %v6682_v46 = vld [vmem:[#allocation4 + $0x7c8] sm:$0xf] }
  0xe7   :  { %v6196_v62 = vld [vmem:[#allocation4 + $0x420] sm:$0xf0]  ;;  %v6394_v19 = vld [vmem:[#allocation4 + $0x588] sm:$0xf] }
  0xe8   :  { %2366 = vmatpush.bf16.msrb.mxu3 %v6071_v53  ;;  %2353 = vmatpush.bf16.msrb.mxu2 %v5815_v54  ;;  %v6263_v53 = vor.u32 %v8272_v51, %v6260_v52  ;;  %v8320_v54 = vld [vmem:[#allocation4 + $0x604] sm:$0xf]  ;;  %v8165_v51 = vld [vmem:[#allocation4 + $0x124] sm:$0xf0] }
  0xe9   :  { %2392 = vmatpush.bf16.msra.mxu1 %v6583_v26  ;;  %2379 = vmatpush.bf16.msra.mxu0 %v6327_v41  ;;  %v6455_v56 = vor.u32 %v8320_v54, %v6452_v55  ;;  %v6075_v41 = vor.u32 %v8229_v34, %v6074_v33  ;;  %v6010_v55 = vld [vmem:[#allocation4 + $0x288] sm:$0xf]  ;;  %v6172_v33 = vld [vmem:[#allocation4 + $0x3e8] sm:$0xf0] }
  0xea   :  { %v8309_v20 = vld [vmem:[#allocation4 + $0x5a4] sm:$0xf0] }
  0xeb   :  { %v5722_v34 = vld [vmem:[#allocation4 + $0x48] sm:$0xf] }
  0xec   :  { %2367 = vmatpush.bf16.msrb.mxu3 %v6039_v57  ;;  %2354 = vmatpush.bf16.msrb.mxu2 %v5783_v7  ;;  %v8264_v57 = vld [vmem:[#allocation4 + $0x444] sm:$0xf]  ;;  %v6170_v7 = vld [vmem:[#allocation4 + $0x3c8] sm:$0xf] }
  0xed   :  { %2393 = vmatpush.bf16.msra.mxu1 %v6551_v35  ;;  %2380 = vmatpush.bf16.msra.mxu0 %v6295_v47  ;;  %v6231_v59 = vor.u32 %v8264_v57, %v6228_v58  ;;  %v6171_v12 = vor.u32 %v8253_v9, %v6170_v7  ;;  %v8381_v47 = vld [vmem:[#allocation4 + $0x7e4] sm:$0xf0] }
  0xee   :  { %v6683_v54 = vor.u32 %v8381_v47, %v6682_v46  ;;  %v6140_v46 = vld [vmem:[#allocation4 + $0x3a8] sm:$0xf0]  ;;  %v5690_v47 = vld [vmem:[#allocation4 + $0x8] sm:$0xf] }
  0xf0   :  { %2368 = vmatpush.bf16.msrb.mxu3 %v6007_v61  ;;  %2355 = vmatpush.bf16.msrb.mxu2 %v5751_v18  ;;  %v8256_v61 = vld [vmem:[#allocation4 + $0x404] sm:$0xf] }
  0xf1   :  { %2394 = vmatpush.bf16.msra.mxu1 %v6519_v44  ;;  %2381 = vmatpush.bf16.msra.mxu0 %v6263_v53  ;;  %v6199_v0 = vor.u32 %v8256_v61, %v6196_v62  ;;  %v6043_v53 = vor.u32 %v8221_v45, %v6042_v43  ;;  %v8373_v61 = vld [vmem:[#allocation4 + $0x7a4] sm:$0xf0]  ;;  %v8241_v45 = vld [vmem:[#allocation4 + $0x38c] sm:$0xf] }
  0xf2   :  { %v6651_v9 = vor.u32 %v8373_v61, %v6650_v60  ;;  %v8233_v60 = vld [vmem:[#allocation4 + $0x34c] sm:$0xf] }
  0xf3   :  { %v6108_v61 = vld [vmem:[#allocation4 + $0x368] sm:$0xf0] }
  0xf4   :  { %2369 = vmatpush.bf16.msrb.mxu3 %v5975_v13  ;;  %2356 = vmatpush.bf16.msrb.mxu2 %v5719_v29  ;;  %v8181_v29 = vld [vmem:[#allocation4 + $0x1a4] sm:$0xf0] }
  0xf5   :  { %2395 = vmatpush.bf16.msra.mxu1 %v6487_v50  ;;  %2382 = vmatpush.bf16.msra.mxu0 %v6231_v59  ;;  %v5883_v36 = vor.u32 %v8181_v29, %v5882_v28  ;;  %v5818_v50 = vld [vmem:[#allocation4 + $0x108] sm:$0xf] }
  0xf6   :  { %v8213_v59 = vld [vmem:[#allocation4 + $0x2a4] sm:$0xf0] }
  0xf7   :  { %v6011_v7 = vor.u32 %v8213_v59, %v6010_v55  ;;  %v6586_v28 = vld [vmem:[#allocation4 + $0x708] sm:$0xf] }
  0xf8   :  { %2370 = vmatpush.bf16.msrb.mxu3 %v5943_v23  ;;  %2357 = vmatpush.bf16.msrb.mxu2 %v5687_v39  ;;  %v6106_v23 = vld [vmem:[#allocation4 + $0x348] sm:$0xf] }
  0xf9   :  { %2396 = vmatpush.bf16.msra.mxu1 %v6455_v56  ;;  %2383 = vmatpush.bf16.msra.mxu0 %v6199_v0  ;;  %v6107_v31 = vor.u32 %v8237_v24, %v6106_v23  ;;  %v5850_v39 = vld [vmem:[#allocation4 + $0x148] sm:$0xf] }
  0xfa   :  { %v5851_v48 = vor.u32 %v8173_v40, %v5850_v39  ;;  %v5786_v0 = vld [vmem:[#allocation4 + $0xc8] sm:$0xf] }
  0xfb   :  { %v5946_v24 = vld [vmem:[#allocation4 + $0x208] sm:$0xf] }
  0xfc   :  { %v8357_v29 = vld [vmem:[#allocation4 + $0x724] sm:$0xf0] }
  0xfd   :  { %v6587_v39 = vor.u32 %v8357_v29, %v6586_v28  ;;  %v6522_v55 = vld [vmem:[#allocation4 + $0x688] sm:$0xf] }
  0xfe   :  { %v6234_v28 = vld [vmem:[#allocation4 + $0x448] sm:$0xf] }
  0xff   :  { %v8269_v29 = vld [vmem:[#allocation4 + $0x464] sm:$0xf0] }
 0x137   :  { %v667_v1 = vpop.f32.mrf.mxu0 }
 0x138   :  { %v668_v2 = vadd.f32 %v667_v1, %v305_v63  ;;  %v680_v4 = vpop.f32.mrf.mxu1  ;;  %v5819_v63 = vor.u32 %v8165_v51, %v5818_v50  ;;  %v8293_v50 = vld [vmem:[#allocation4 + $0x524] sm:$0xf0] }
 0x13a   :  { %v681_v5 = vadd.f32 %v680_v4, %v668_v2  ;;  %v8157_v4 = vld [vmem:[#allocation4 + $0xe4] sm:$0xf0] }
 0x13b   :  { %v5787_v15 = vor.u32 %v8157_v4, %v5786_v0  ;;  %v8285_v0 = vld [vmem:[#allocation4 + $0x4e4] sm:$0xf0]  ;;  %v5884_v4 = vld [vmem:[#allocation4 + $0x1a8] sm:$0xf0] }
 0x13c   :  { %v737_v10 = vmax.f32 %v681_v5, 0.0  ;;  %v6426_v5 = vld [vmem:[#allocation4 + $0x5c8] sm:$0xf] }
 0x13d   :  { %v641_v11 = vpop.f32.mrf.mxu2 }
 0x13e   :  { %v9042_v3 = vpack.c.bf16 %v737_v10, %v737_v10  ;;  %v642_v13 = vadd.f32 %v641_v11, %v304_v6  ;;  %v654_v14 = vpop.f32.mrf.mxu3  ;;  %v8317_v6 = vld [vmem:[#allocation4 + $0x5e4] sm:$0xf0] }
 0x13f   :  { %v669_v8 = vpop.f32.mrf.mxu0  ;;  %v5978_v10 = vld [vmem:[#allocation4 + $0x248] sm:$0xf]  ;;  %v6427_v16 = vor.u32 %v8317_v6, %v6426_v5  ;;  %v6111_v5 = vor.u32 %v8233_v60, %v6108_v61  ;;  %v6396_v60 = vld [vmem:[#allocation4 + $0x5a8] sm:$0xf0] }
 0x140   :  { %v655_v17 = vadd.f32 %v654_v14, %v642_v13  ;;  %v682_v18 = vpop.f32.mrf.mxu1  ;;  %2319 = vmatmul.bf16.vlgmr.msra.gmra.mxu3 %v9042_v3  ;;  %v8205_v11 = vld [vmem:[#allocation4 + $0x264] sm:$0xf0] }
 0x141   :  { %2415 = vmatpush.bf16.msra.mxu3 %v6171_v12  ;;  %v6618_v13 = vld [vmem:[#allocation4 + $0x748] sm:$0xf] }
 0x142   :  { %v736_v22 = vmax.f32 %v655_v17, 0.0  ;;  %v8365_v14 = vld [vmem:[#allocation4 + $0x764] sm:$0xf0] }
 0x143   :  { %v5754_v8 = vld [vmem:[#allocation4 + $0x88] sm:$0xf]  ;;  %v6619_v23 = vor.u32 %v8365_v14, %v6618_v13 }
 0x144   :  { %v9045_v26 = vpack.c.bf16 %v736_v22, %v736_v22  ;;  %v8149_v18 = vld [vmem:[#allocation4 + $0xa4] sm:$0xf0]  ;;  %v5979_v22 = vor.u32 %v8205_v11, %v5978_v10  ;;  %v8225_v10 = vld [vmem:[#allocation4 + $0x30c] sm:$0xf] }
 0x145   :  { %2416 = vmatpush.bf16.msra.mxu3 %v6139_v21  ;;  %v643_v30 = vpop.f32.mrf.mxu2  ;;  %v6490_v6 = vld [vmem:[#allocation4 + $0x648] sm:$0xf]  ;;  %v6076_v11 = vld [vmem:[#allocation4 + $0x328] sm:$0xf0] }
 0x146   :  { %v656_v32 = vpop.f32.mrf.mxu3  ;;  %2306 = vmatmul.bf16.vlgmr.msra.gmra.mxu2 %v9045_v26  ;;  %v5755_v30 = vor.u32 %v8149_v18, %v5754_v8  ;;  %v6266_v13 = vld [vmem:[#allocation4 + $0x488] sm:$0xf]  ;;  %v5852_v8 = vld [vmem:[#allocation4 + $0x168] sm:$0xf0]  ;;  %v6079_v18 = vor.u32 %v8225_v10, %v6076_v11 }
 0x147   :  { %2402 = vmatpush.bf16.msra.mxu2 %v5915_v25  ;;  %v719_v35 = vpop.f32.mrf.mxu0  ;;  %v8249_v32 = vld [vmem:[#allocation4 + $0x3cc] sm:$0xf]  ;;  %v8277_v14 = vld [vmem:[#allocation4 + $0x4a4] sm:$0xf0] }
 0x148   :  { %v720_v37 = vadd.f32 %v719_v35, %v307_v27  ;;  %v732_v38 = vpop.f32.mrf.mxu1  ;;  %v8197_v27 = vld [vmem:[#allocation4 + $0x224] sm:$0xf0]  ;;  %v6175_v40 = vor.u32 %v8249_v32, %v6172_v33  ;;  %v5820_v32 = vld [vmem:[#allocation4 + $0x128] sm:$0xf0] }
 0x149   :  { %2417 = vmatpush.bf16.msra.mxu3 %v6107_v31  ;;  %v6395_v31 = vor.u32 %v8309_v20, %v6394_v19  ;;  %v8141_v35 = vld [vmem:[#allocation4 + $0x64] sm:$0xf0]  ;;  %v5724_v10 = vld [vmem:[#allocation4 + $0x68] sm:$0xf0] }
 0x14a   :  { %v733_v44 = vadd.f32 %v732_v38, %v720_v37  ;;  %v8301_v37 = vld [vmem:[#allocation4 + $0x564] sm:$0xf0]  ;;  %v5947_v38 = vor.u32 %v8197_v27, %v5946_v24  ;;  %v5723_v43 = vor.u32 %v8141_v35, %v5722_v34  ;;  %v8377_v24 = vld [vmem:[#allocation4 + $0x7cc] sm:$0xf] }
 0x14b   :  { %2403 = vmatpush.bf16.msra.mxu2 %v5883_v36  ;;  %v6362_v36 = vld [vmem:[#allocation4 + $0x548] sm:$0xf]  ;;  %v8209_v35 = vld [vmem:[#allocation4 + $0x28c] sm:$0xf] }
 0x14c   :  { %v739_v49 = vmax.f32 %v733_v44, 0.0  ;;  %v6363_v44 = vor.u32 %v8301_v37, %v6362_v36  ;;  %v6458_v19 = vld [vmem:[#allocation4 + $0x608] sm:$0xf]  ;;  %v6235_v36 = vor.u32 %v8269_v29, %v6234_v28  ;;  %v6012_v37 = vld [vmem:[#allocation4 + $0x2a8] sm:$0xf0] }
 0x14d   :  { %2418 = vmatpush.bf16.msra.mxu3 %v6075_v41  ;;  %v693_v52 = vpop.f32.mrf.mxu2  ;;  %v6554_v41 = vld [vmem:[#allocation4 + $0x6c8] sm:$0xf]  ;;  %v8297_v11 = vld [vmem:[#allocation4 + $0x54c] sm:$0xf]  ;;  %v5922_v28 = vld [vmem:[#allocation4 + $0x1d0] sm:$0xf] }
 0x14e   :  { %v9050_v56 = vpack.c.bf16 %v739_v49, %v739_v49  ;;  %v694_v57 = vadd.f32 %v693_v52, %v306_v42  ;;  %v706_v58 = vpop.f32.mrf.mxu3  ;;  %v8349_v42 = vld [vmem:[#allocation4 + $0x6e4] sm:$0xf0]  ;;  %v8185_v52 = vld [vmem:[#allocation4 + $0x1cc] sm:$0xf]  ;;  %v8190_v29 = vld [vmem:[#allocation4 + $0x1ec] sm:$0xf0] }
 0x14f   :  { %2404 = vmatpush.bf16.msra.mxu2 %v5851_v48  ;;  %v721_v62 = vpop.f32.mrf.mxu0  ;;  %v8133_v48 = vld [vmem:[#allocation4 + $0x24] sm:$0xf0]  ;;  %v6555_v51 = vor.u32 %v8349_v42, %v6554_v41 }
 0x150   :  { %v707_v1 = vadd.f32 %v706_v58, %v694_v57  ;;  %v734_v2 = vpop.f32.mrf.mxu1  ;;  %2345 = vmatmul.bf16.vlgmr.msrb.gmra.mxu1 %v9050_v56  ;;  %2371 = vmatmul.bf16.vlgmr.msrb.gmra.mxu3 %v9042_v3  ;;  %v6330_v49 = vld [vmem:[#allocation4 + $0x508] sm:$0xf]  ;;  %v5691_v58 = vor.u32 %v8133_v48, %v5690_v47  ;;  %v6015_v47 = vor.u32 %v8209_v35, %v6012_v37  ;;  %v6114_v35 = vld [vmem:[#allocation4 + $0x350] sm:$0xf] }
 0x151   :  { %2419 = vmatpush.bf16.msra.mxu3 %v6043_v53  ;;  %2441 = vmatpush.bf16.msrb.mxu1 %v6683_v54  ;;  %v5916_v53 = vld [vmem:[#allocation4 + $0x1e8] sm:$0xf0]  ;;  %v6143_v54 = vor.u32 %v8241_v45, %v6140_v46  ;;  %v8341_v57 = vld [vmem:[#allocation4 + $0x6a4] sm:$0xf0]  ;;  %v6331_v59 = vor.u32 %v8293_v50, %v6330_v49  ;;  %v5923_v37 = vor.u32 %v8190_v29, %v5922_v28 }
 0x152   :  { %v738_v12 = vmax.f32 %v707_v1, 0.0  ;;  %v5919_v62 = vor.u32 %v8185_v52, %v5916_v53  ;;  %v6523_v1 = vor.u32 %v8341_v57, %v6522_v55  ;;  %v8177_v2 = vld [vmem:[#allocation4 + $0x18c] sm:$0xf]  ;;  %v8325_v20 = vld [vmem:[#allocation4 + $0x624] sm:$0xf0] }
 0x153   :  { %2405 = vmatpush.bf16.msra.mxu2 %v5819_v63  ;;  %v6298_v63 = vld [vmem:[#allocation4 + $0x4c8] sm:$0xf]  ;;  %v8313_v45 = vld [vmem:[#allocation4 + $0x5cc] sm:$0xf] }
 0x154   :  { %v9054_v17 = vpack.c.bf16 %v738_v12, %v738_v12  ;;  %v5887_v12 = vor.u32 %v8177_v2, %v5884_v4  ;;  %v6202_v41 = vld [vmem:[#allocation4 + $0x408] sm:$0xf]  ;;  %v6428_v46 = vld [vmem:[#allocation4 + $0x5e8] sm:$0xf0] }
 0x155   :  { %2420 = vmatpush.bf16.msra.mxu3 %v6011_v7  ;;  %2442 = vmatpush.bf16.msrb.mxu1 %v6651_v9  ;;  %v695_v21 = vpop.f32.mrf.mxu2  ;;  %v8333_v7 = vld [vmem:[#allocation4 + $0x664] sm:$0xf0]  ;;  %v6299_v9 = vor.u32 %v8285_v0, %v6298_v63  ;;  %v8201_v49 = vld [vmem:[#allocation4 + $0x24c] sm:$0xf]  ;;  %v6431_v55 = vor.u32 %v8313_v45, %v6428_v46 }
 0x156   :  { %v708_v25 = vpop.f32.mrf.mxu3  ;;  %2332 = vmatmul.bf16.vlgmr.msrb.gmra.mxu0 %v9054_v17  ;;  %2358 = vmatmul.bf16.vlgmr.msrb.gmra.mxu2 %v9045_v26  ;;  %v8217_v21 = vld [vmem:[#allocation4 + $0x2cc] sm:$0xf]  ;;  %v8261_v42 = vld [vmem:[#allocation4 + $0x424] sm:$0xf0] }
 0x157   :  { %2406 = vmatpush.bf16.msra.mxu2 %v5787_v15  ;;  %2428 = vmatpush.bf16.msrb.mxu0 %v6427_v16  ;;  %v6491_v15 = vor.u32 %v8333_v7, %v6490_v6  ;;  %v8169_v16 = vld [vmem:[#allocation4 + $0x14c] sm:$0xf]  ;;  %v6203_v50 = vor.u32 %v8261_v42, %v6202_v41  ;;  %v6178_v6 = vld [vmem:[#allocation4 + $0x3d0] sm:$0xf] }
 0x158   :  { %v6684_v25 = vld [vmem:[#allocation4 + $0x7e8] sm:$0xf0]  ;;  %v5855_v27 = vor.u32 %v8169_v16, %v5852_v8  ;;  %v8254_v7 = vld [vmem:[#allocation4 + $0x3ec] sm:$0xf0] }
 0x159   :  { %2421 = vmatpush.bf16.msra.mxu3 %v5979_v22  ;;  %2443 = vmatpush.bf16.msrb.mxu1 %v6619_v23  ;;  %v6267_v22 = vor.u32 %v8277_v14, %v6266_v13  ;;  %v6044_v23 = vld [vmem:[#allocation4 + $0x2e8] sm:$0xf0]  ;;  %v6687_v34 = vor.u32 %v8377_v24, %v6684_v25  ;;  %v5890_v41 = vld [vmem:[#allocation4 + $0x190] sm:$0xf] }
 0x15a   :  { %v6047_v33 = vor.u32 %v8217_v21, %v6044_v23  ;;  %v8361_v52 = vld [vmem:[#allocation4 + $0x74c] sm:$0xf]  ;;  %v8246_v21 = vld [vmem:[#allocation4 + $0x3ac] sm:$0xf0] }
 0x15b   :  { %2407 = vmatpush.bf16.msra.mxu2 %v5755_v30  ;;  %2429 = vmatpush.bf16.msrb.mxu0 %v6395_v31  ;;  %v6459_v30 = vor.u32 %v8325_v20, %v6458_v19  ;;  %v8161_v31 = vld [vmem:[#allocation4 + $0x10c] sm:$0xf]  ;;  %v6146_v20 = vld [vmem:[#allocation4 + $0x390] sm:$0xf] }
 0x15c   :  { %v6620_v53 = vld [vmem:[#allocation4 + $0x768] sm:$0xf0]  ;;  %v8182_v42 = vld [vmem:[#allocation4 + $0x1ac] sm:$0xf0] }
 0x15d   :  { %2422 = vmatpush.bf16.msra.mxu3 %v5947_v38  ;;  %2444 = vmatpush.bf16.msrb.mxu1 %v6587_v39  ;;  %v8369_v38 = vld [vmem:[#allocation4 + $0x78c] sm:$0xf] }
 0x15e   :  { %v6652_v39 = vld [vmem:[#allocation4 + $0x7a8] sm:$0xf0] }
 0x15f   :  { %2408 = vmatpush.bf16.msra.mxu2 %v5723_v43  ;;  %2430 = vmatpush.bf16.msrb.mxu0 %v6363_v44  ;;  %v8153_v43 = vld [vmem:[#allocation4 + $0xcc] sm:$0xf]  ;;  %v6655_v48 = vor.u32 %v8369_v38, %v6652_v39 }
 0x160   :  { %2397 = vmatmul.bf16.vlgmr.msra.gmra.mxu1 %v9050_v56  ;;  %2423 = vmatmul.bf16.vlgmr.msra.gmra.mxu3 %v9042_v3  ;;  %v5788_v44 = vld [vmem:[#allocation4 + $0xe8] sm:$0xf0] }
 0x161   :  { %2467 = vmatpush.bf16.msrb.mxu3 %v6175_v40  ;;  %2445 = vmatpush.bf16.msrb.mxu1 %v6555_v51  ;;  %v5823_v40 = vor.u32 %v8161_v31, %v5820_v32  ;;  %v5980_v51 = vld [vmem:[#allocation4 + $0x268] sm:$0xf0] }
 0x162   :  { %v8145_v57 = vld [vmem:[#allocation4 + $0x8c] sm:$0xf]  ;;  %v5983_v61 = vor.u32 %v8201_v49, %v5980_v51  ;;  %v5891_v49 = vor.u32 %v8182_v42, %v5890_v41  ;;  %v8358_v41 = vld [vmem:[#allocation4 + $0x72c] sm:$0xf0] }
 0x163   :  { %2409 = vmatpush.bf16.msra.mxu2 %v5691_v58  ;;  %2431 = vmatpush.bf16.msrb.mxu0 %v6331_v59  ;;  %v5756_v58 = vld [vmem:[#allocation4 + $0xa8] sm:$0xf0] }
 0x164   :  { %v8305_v59 = vld [vmem:[#allocation4 + $0x58c] sm:$0xf]  ;;  %v5759_v4 = vor.u32 %v8145_v57, %v5756_v58 }
 0x165   :  { %2468 = vmatpush.bf16.msrb.mxu3 %v6143_v54  ;;  %2446 = vmatpush.bf16.msrb.mxu1 %v6523_v1  ;;  %v5791_v54 = vor.u32 %v8153_v43, %v5788_v44  ;;  %v8193_v63 = vld [vmem:[#allocation4 + $0x20c] sm:$0xf] }
 0x166   :  { %2384 = vmatmul.bf16.vlgmr.msra.gmra.mxu0 %v9054_v17  ;;  %2410 = vmatmul.bf16.vlgmr.msra.gmra.mxu2 %v9045_v26  ;;  %v5948_v0 = vld [vmem:[#allocation4 + $0x228] sm:$0xf0] }
 0x167   :  { %2454 = vmatpush.bf16.msrb.mxu2 %v5919_v62  ;;  %2432 = vmatpush.bf16.msrb.mxu0 %v6299_v9  ;;  %v6623_v62 = vor.u32 %v8361_v52, %v6620_v53  ;;  %v8353_v1 = vld [vmem:[#allocation4 + $0x70c] sm:$0xf]  ;;  %v5951_v13 = vor.u32 %v8193_v63, %v5948_v0  ;;  %v5858_v53 = vld [vmem:[#allocation4 + $0x150] sm:$0xf] }
 0x168   :  { %v6588_v2 = vld [vmem:[#allocation4 + $0x728] sm:$0xf0]  ;;  %v8382_v63 = vld [vmem:[#allocation4 + $0x7ec] sm:$0xf0] }
 0x169   :  { %2469 = vmatpush.bf16.msrb.mxu3 %v6111_v5  ;;  %2447 = vmatpush.bf16.msrb.mxu1 %v6491_v15  ;;  %v6399_v5 = vor.u32 %v8305_v59, %v6396_v60  ;;  %v8137_v9 = vld [vmem:[#allocation4 + $0x4c] sm:$0xf]  ;;  %v6591_v14 = vor.u32 %v8353_v1, %v6588_v2  ;;  %v6179_v15 = vor.u32 %v8254_v7, %v6178_v6  ;;  %v6050_v59 = vld [vmem:[#allocation4 + $0x2d0] sm:$0xf] }
 0x16a   :  { %v8345_v16 = vld [vmem:[#allocation4 + $0x6cc] sm:$0xf]  ;;  %v8166_v6 = vld [vmem:[#allocation4 + $0x12c] sm:$0xf0] }
 0x16b   :  { %2455 = vmatpush.bf16.msrb.mxu2 %v5887_v12  ;;  %2433 = vmatpush.bf16.msrb.mxu0 %v6267_v22  ;;  %v6364_v12 = vld [vmem:[#allocation4 + $0x568] sm:$0xf0] }
 0x16c   :  { %v6556_v8 = vld [vmem:[#allocation4 + $0x6e8] sm:$0xf0]  ;;  %v6367_v19 = vor.u32 %v8297_v11, %v6364_v12  ;;  %v8214_v12 = vld [vmem:[#allocation4 + $0x2ac] sm:$0xf0] }
 0x16d   :  { %2470 = vmatpush.bf16.msrb.mxu3 %v6079_v18  ;;  %2448 = vmatpush.bf16.msrb.mxu1 %v6459_v30  ;;  %v5727_v18 = vor.u32 %v8137_v9, %v5724_v10  ;;  %v8129_v22 = vld [vmem:[#allocation4 + $0xc] sm:$0xf]  ;;  %v6147_v30 = vor.u32 %v8246_v21, %v6146_v20  ;;  %v6018_v10 = vld [vmem:[#allocation4 + $0x290] sm:$0xf] }
 0x16e   :  { %v5692_v23 = vld [vmem:[#allocation4 + $0x28] sm:$0xf0]  ;;  %v6434_v20 = vld [vmem:[#allocation4 + $0x5d0] sm:$0xf] }
 0x16f   :  { %2456 = vmatpush.bf16.msrb.mxu2 %v5855_v27  ;;  %2434 = vmatpush.bf16.msrb.mxu0 %v6235_v36  ;;  %v8289_v24 = vld [vmem:[#allocation4 + $0x50c] sm:$0xf]  ;;  %v6559_v27 = vor.u32 %v8345_v16, %v6556_v8  ;;  %v8238_v36 = vld [vmem:[#allocation4 + $0x36c] sm:$0xf0] }
 0x170   :  { %2449 = vmatmul.bf16.vlgmr.msrb.gmra.mxu1 %v9050_v56  ;;  %v6332_v25 = vld [vmem:[#allocation4 + $0x528] sm:$0xf0]  ;;  %v6115_v43 = vor.u32 %v8238_v36, %v6114_v35  ;;  %v8318_v21 = vld [vmem:[#allocation4 + $0x5ec] sm:$0xf0] }
 0x171   :  { %2471 = vmatpush.bf16.msrb.mxu3 %v6047_v33  ;;  %2493 = vmatpush.bf16.msra.mxu1 %v6687_v34  ;;  %v8337_v31 = vld [vmem:[#allocation4 + $0x68c] sm:$0xf]  ;;  %v5695_v33 = vor.u32 %v8129_v22, %v5692_v23  ;;  %v6335_v34 = vor.u32 %v8289_v24, %v6332_v25  ;;  %v6019_v22 = vor.u32 %v8214_v12, %v6018_v10  ;;  %v5986_v25 = vld [vmem:[#allocation4 + $0x250] sm:$0xf]  ;;  %v8234_v10 = vld [vmem:[#allocation4 + $0x354] sm:$0xf] }
 0x172   :  { %v6524_v32 = vld [vmem:[#allocation4 + $0x6a8] sm:$0xf0]  ;;  %v6435_v29 = vor.u32 %v8318_v21, %v6434_v20  ;;  %v8310_v35 = vld [vmem:[#allocation4 + $0x5ac] sm:$0xf0]  ;;  %v6116_v12 = vld [vmem:[#allocation4 + $0x370] sm:$0xf0] }
 0x173   :  { %2457 = vmatpush.bf16.msrb.mxu2 %v5823_v40  ;;  %2435 = vmatpush.bf16.msrb.mxu0 %v6203_v50  ;;  %v8281_v38 = vld [vmem:[#allocation4 + $0x4cc] sm:$0xf]  ;;  %v6527_v40 = vor.u32 %v8337_v31, %v6524_v32  ;;  %v8366_v31 = vld [vmem:[#allocation4 + $0x76c] sm:$0xf0] }
 0x174   :  { %v6300_v39 = vld [vmem:[#allocation4 + $0x4e8] sm:$0xf0]  ;;  %v5762_v32 = vld [vmem:[#allocation4 + $0x90] sm:$0xf] }
 0x175   :  { %2472 = vmatpush.bf16.msrb.mxu3 %v6015_v47  ;;  %2494 = vmatpush.bf16.msra.mxu1 %v6655_v48  ;;  %v8329_v44 = vld [vmem:[#allocation4 + $0x64c] sm:$0xf]  ;;  %v6303_v46 = vor.u32 %v8281_v38, %v6300_v39  ;;  %v6082_v47 = vld [vmem:[#allocation4 + $0x310] sm:$0xf] }
 0x176   :  { %2436 = vmatmul.bf16.vlgmr.msrb.gmra.mxu0 %v9054_v17  ;;  %v6492_v45 = vld [vmem:[#allocation4 + $0x668] sm:$0xf0]  ;;  %v8230_v48 = vld [vmem:[#allocation4 + $0x32c] sm:$0xf0] }
 0x177   :  { %2458 = vmatpush.bf16.msrb.mxu2 %v5791_v54  ;;  %2480 = vmatpush.bf16.msra.mxu0 %v6431_v55  ;;  %v8273_v50 = vld [vmem:[#allocation4 + $0x48c] sm:$0xf]  ;;  %v6495_v52 = vor.u32 %v8329_v44, %v6492_v45  ;;  %v8174_v54 = vld [vmem:[#allocation4 + $0x16c] sm:$0xf0]  ;;  %v6083_v55 = vor.u32 %v8230_v48, %v6082_v47  ;;  %v8250_v44 = vld [vmem:[#allocation4 + $0x3d4] sm:$0xf] }
 0x178   :  { %v6268_v51 = vld [vmem:[#allocation4 + $0x4a8] sm:$0xf0]  ;;  %v5859_v0 = vor.u32 %v8174_v54, %v5858_v53  ;;  %v8198_v39 = vld [vmem:[#allocation4 + $0x22c] sm:$0xf0]  ;;  %v6180_v45 = vld [vmem:[#allocation4 + $0x3f0] sm:$0xf0] }
 0x179   :  { %2473 = vmatpush.bf16.msrb.mxu3 %v5983_v61  ;;  %2495 = vmatpush.bf16.msra.mxu1 %v6623_v62  ;;  %v8321_v57 = vld [vmem:[#allocation4 + $0x60c] sm:$0xf]  ;;  %v6271_v60 = vor.u32 %v8273_v50, %v6268_v51  ;;  %v8222_v61 = vld [vmem:[#allocation4 + $0x2ec] sm:$0xf0] }
 0x17a   :  { %v6460_v58 = vld [vmem:[#allocation4 + $0x628] sm:$0xf0]  ;;  %v6690_v62 = vld [vmem:[#allocation4 + $0x7d0] sm:$0xf]  ;;  %v6051_v7 = vor.u32 %v8222_v61, %v6050_v59  ;;  %v6148_v59 = vld [vmem:[#allocation4 + $0x3b0] sm:$0xf0] }
 0x17b   :  { %2459 = vmatpush.bf16.msrb.mxu2 %v5759_v4  ;;  %2481 = vmatpush.bf16.msra.mxu0 %v6399_v5  ;;  %v8265_v1 = vld [vmem:[#allocation4 + $0x44c] sm:$0xf]  ;;  %v6463_v4 = vor.u32 %v8321_v57, %v6460_v58  ;;  %v5826_v5 = vld [vmem:[#allocation4 + $0x110] sm:$0xf]  ;;  %v6691_v9 = vor.u32 %v8382_v63, %v6690_v62  ;;  %v8242_v58 = vld [vmem:[#allocation4 + $0x394] sm:$0xf] }
 0x17c   :  { %v6236_v2 = vld [vmem:[#allocation4 + $0x468] sm:$0xf0]  ;;  %v8142_v47 = vld [vmem:[#allocation4 + $0x6c] sm:$0xf0] }
 0x17d   :  { %2474 = vmatpush.bf16.msrb.mxu3 %v5951_v13  ;;  %2496 = vmatpush.bf16.msra.mxu1 %v6591_v14  ;;  %v6239_v11 = vor.u32 %v8265_v1, %v6236_v2  ;;  %v6658_v13 = vld [vmem:[#allocation4 + $0x790] sm:$0xf]  ;;  %v8257_v16 = vld [vmem:[#allocation4 + $0x40c] sm:$0xf]  ;;  %v5924_v1 = vld [vmem:[#allocation4 + $0x1f0] sm:$0xf0] }
 0x17e   :  { %v8374_v14 = vld [vmem:[#allocation4 + $0x7ac] sm:$0xf0]  ;;  %v6204_v8 = vld [vmem:[#allocation4 + $0x428] sm:$0xf0] }
 0x17f   :  { %2460 = vmatpush.bf16.msrb.mxu2 %v5727_v18  ;;  %2482 = vmatpush.bf16.msra.mxu0 %v6367_v19  ;;  %v5794_v18 = vld [vmem:[#allocation4 + $0xd0] sm:$0xf]  ;;  %v6659_v23 = vor.u32 %v8374_v14, %v6658_v13  ;;  %v6207_v24 = vor.u32 %v8257_v16, %v6204_v8  ;;  %v5892_v16 = vld [vmem:[#allocation4 + $0x1b0] sm:$0xf0] }
 0x180   :  { %2475 = vmatmul.bf16.vlgmr.msrb.gmra.mxu3 %v9042_v3  ;;  %v8158_v19 = vld [vmem:[#allocation4 + $0xec] sm:$0xf0] }
 0x181   :  { %2519 = vmatpush.bf16.msra.mxu3 %v6179_v15  ;;  %2497 = vmatpush.bf16.msra.mxu1 %v6559_v27  ;;  %v5827_v15 = vor.u32 %v8166_v6, %v5826_v5  ;;  %v8206_v27 = vld [vmem:[#allocation4 + $0x26c] sm:$0xf0]  ;;  %v5795_v28 = vor.u32 %v8158_v19, %v5794_v18  ;;  %v6119_v18 = vor.u32 %v8234_v10, %v6116_v12  ;;  %v6404_v10 = vld [vmem:[#allocation4 + $0x5b0] sm:$0xf0] }
 0x182   :  { %v5987_v36 = vor.u32 %v8206_v27, %v5986_v25  ;;  %v6370_v48 = vld [vmem:[#allocation4 + $0x550] sm:$0xf]  ;;  %v8194_v12 = vld [vmem:[#allocation4 + $0x214] sm:$0xf] }
 0x183   :  { %2461 = vmatpush.bf16.msrb.mxu2 %v5695_v33  ;;  %2483 = vmatpush.bf16.msra.mxu0 %v6335_v34  ;;  %v8150_v33 = vld [vmem:[#allocation4 + $0xac] sm:$0xf0] }
 0x184   :  { %v6402_v34 = vld [vmem:[#allocation4 + $0x590] sm:$0xf]  ;;  %v5763_v42 = vor.u32 %v8150_v33, %v5762_v32 }
 0x185   :  { %2520 = vmatpush.bf16.msra.mxu3 %v6147_v30  ;;  %2498 = vmatpush.bf16.msra.mxu1 %v6527_v40  ;;  %v6626_v30 = vld [vmem:[#allocation4 + $0x750] sm:$0xf] }
 0x186   :  { %2462 = vmatmul.bf16.vlgmr.msrb.gmra.mxu2 %v9045_v26  ;;  %v6627_v38 = vor.u32 %v8366_v31, %v6626_v30  ;;  %v6594_v40 = vld [vmem:[#allocation4 + $0x710] sm:$0xf] }
 0x187   :  { %2506 = vmatpush.bf16.msra.mxu2 %v5923_v37  ;;  %2484 = vmatpush.bf16.msra.mxu0 %v6303_v46  ;;  %v5954_v37 = vld [vmem:[#allocation4 + $0x210] sm:$0xf]  ;;  %v6595_v51 = vor.u32 %v8358_v41, %v6594_v40 }
 0x188   :  { %v5730_v46 = vld [vmem:[#allocation4 + $0x50] sm:$0xf]  ;;  %v5955_v50 = vor.u32 %v8198_v39, %v5954_v37  ;;  %v6692_v39 = vld [vmem:[#allocation4 + $0x7f0] sm:$0xf0] }
 0x189   :  { %2521 = vmatpush.bf16.msra.mxu3 %v6115_v43  ;;  %2499 = vmatpush.bf16.msra.mxu1 %v6495_v52  ;;  %v6403_v43 = vor.u32 %v8310_v35, %v6402_v34  ;;  %v6183_v52 = vor.u32 %v8250_v44, %v6180_v45  ;;  %v6562_v53 = vld [vmem:[#allocation4 + $0x6d0] sm:$0xf]  ;;  %v8218_v35 = vld [vmem:[#allocation4 + $0x2d4] sm:$0xf] }
 0x18a   :  { %v8350_v54 = vld [vmem:[#allocation4 + $0x6ec] sm:$0xf0] }
 0x18b   :  { %2507 = vmatpush.bf16.msra.mxu2 %v5891_v49  ;;  %2485 = vmatpush.bf16.msra.mxu0 %v6271_v60  ;;  %v8302_v49 = vld [vmem:[#allocation4 + $0x56c] sm:$0xf0]  ;;  %v6563_v2 = vor.u32 %v8350_v54, %v6562_v53 }
 0x18c   :  { %v6371_v57 = vor.u32 %v8302_v49, %v6370_v48  ;;  %v5698_v60 = vld [vmem:[#allocation4 + $0x10] sm:$0xf]  ;;  %v6020_v48 = vld [vmem:[#allocation4 + $0x2b0] sm:$0xf0] }
 0x18d   :  { %2522 = vmatpush.bf16.msra.mxu3 %v6083_v55  ;;  %2500 = vmatpush.bf16.msra.mxu1 %v6463_v4  ;;  %v5731_v55 = vor.u32 %v8142_v47, %v5730_v46  ;;  %v8134_v61 = vld [vmem:[#allocation4 + $0x2c] sm:$0xf0]  ;;  %v6151_v4 = vor.u32 %v8242_v58, %v6148_v59  ;;  %v8210_v47 = vld [vmem:[#allocation4 + $0x294] sm:$0xf] }
 0x18e   :  { %v6338_v62 = vld [vmem:[#allocation4 + $0x510] sm:$0xf]  ;;  %v5699_v5 = vor.u32 %v8134_v61, %v5698_v60  ;;  %v8314_v58 = vld [vmem:[#allocation4 + $0x5d4] sm:$0xf]  ;;  %v6023_v60 = vor.u32 %v8210_v47, %v6020_v48  ;;  %v6122_v47 = vld [vmem:[#allocation4 + $0x358] sm:$0xf] }
 0x18f   :  { %2508 = vmatpush.bf16.msra.mxu2 %v5859_v0  ;;  %2486 = vmatpush.bf16.msra.mxu0 %v6239_v11  ;;  %v8294_v63 = vld [vmem:[#allocation4 + $0x52c] sm:$0xf0]  ;;  %v8186_v0 = vld [vmem:[#allocation4 + $0x1d4] sm:$0xf] }
 0x190   :  { %2501 = vmatmul.bf16.vlgmr.msra.gmra.mxu1 %v9050_v56  ;;  %v6339_v6 = vor.u32 %v8294_v63, %v6338_v62  ;;  %v5927_v11 = vor.u32 %v8186_v0, %v5924_v1  ;;  %v6306_v13 = vld [vmem:[#allocation4 + $0x4d0] sm:$0xf]  ;;  %v6436_v59 = vld [vmem:[#allocation4 + $0x5f0] sm:$0xf0] }
 0x191   :  { %2523 = vmatpush.bf16.msra.mxu3 %v6051_v7  ;;  %2545 = vmatpush.bf16.msrb.mxu1 %v6691_v9  ;;  %v6530_v7 = vld [vmem:[#allocation4 + $0x690] sm:$0xf]  ;;  %v8202_v0 = vld [vmem:[#allocation4 + $0x254] sm:$0xf] }
 0x192   :  { %v8342_v9 = vld [vmem:[#allocation4 + $0x6ac] sm:$0xf0]  ;;  %v5988_v1 = vld [vmem:[#allocation4 + $0x270] sm:$0xf0] }
 0x193   :  { %2509 = vmatpush.bf16.msra.mxu2 %v5827_v15  ;;  %2487 = vmatpush.bf16.msra.mxu0 %v6207_v24  ;;  %v8286_v14 = vld [vmem:[#allocation4 + $0x4ec] sm:$0xf0]  ;;  %v8178_v15 = vld [vmem:[#allocation4 + $0x194] sm:$0xf]  ;;  %v6531_v8 = vor.u32 %v8342_v9, %v6530_v7 }
 0x194   :  { %v6307_v19 = vor.u32 %v8286_v14, %v6306_v13  ;;  %v6498_v20 = vld [vmem:[#allocation4 + $0x650] sm:$0xf]  ;;  %v6084_v24 = vld [vmem:[#allocation4 + $0x330] sm:$0xf0] }
 0x195   :  { %2524 = vmatpush.bf16.msra.mxu3 %v6019_v22  ;;  %2546 = vmatpush.bf16.msrb.mxu1 %v6659_v23  ;;  %v8334_v21 = vld [vmem:[#allocation4 + $0x66c] sm:$0xf0]  ;;  %v8226_v22 = vld [vmem:[#allocation4 + $0x314] sm:$0xf]  ;;  %v5895_v23 = vor.u32 %v8178_v15, %v5892_v16 }
 0x196   :  { %2488 = vmatmul.bf16.vlgmr.msra.gmra.mxu0 %v9054_v17  ;;  %v6274_v25 = vld [vmem:[#allocation4 + $0x490] sm:$0xf]  ;;  %v6499_v30 = vor.u32 %v8334_v21, %v6498_v20  ;;  %v6087_v32 = vor.u32 %v8226_v22, %v6084_v24  ;;  %v5764_v7 = vld [vmem:[#allocation4 + $0xb0] sm:$0xf0]  ;;  %v8255_v20 = vld [vmem:[#allocation4 + $0x3f4] sm:$0xf0] }
 0x197   :  { %2510 = vmatpush.bf16.msra.mxu2 %v5795_v28  ;;  %2532 = vmatpush.bf16.msrb.mxu0 %v6435_v29  ;;  %v8278_v27 = vld [vmem:[#allocation4 + $0x4ac] sm:$0xf0]  ;;  %v8170_v28 = vld [vmem:[#allocation4 + $0x154] sm:$0xf] }
 0x198   :  { %v5860_v29 = vld [vmem:[#allocation4 + $0x170] sm:$0xf0]  ;;  %v6466_v31 = vld [vmem:[#allocation4 + $0x610] sm:$0xf]  ;;  %v6275_v33 = vor.u32 %v8278_v27, %v6274_v25 }
 0x199   :  { %2525 = vmatpush.bf16.msra.mxu3 %v5987_v36  ;;  %2547 = vmatpush.bf16.msrb.mxu1 %v6627_v38  ;;  %v8326_v34 = vld [vmem:[#allocation4 + $0x62c] sm:$0xf0]  ;;  %v6052_v36 = vld [vmem:[#allocation4 + $0x2f0] sm:$0xf0]  ;;  %v5863_v37 = vor.u32 %v8170_v28, %v5860_v29 }
 0x19a   :  { %v8378_v38 = vld [vmem:[#allocation4 + $0x7d4] sm:$0xf]  ;;  %v6242_v40 = vld [vmem:[#allocation4 + $0x450] sm:$0xf]  ;;  %v6467_v44 = vor.u32 %v8326_v34, %v6466_v31  ;;  %v6055_v45 = vor.u32 %v8218_v35, %v6052_v36  ;;  %v8247_v34 = vld [vmem:[#allocation4 + $0x3b4] sm:$0xf0] }
 0x19b   :  { %2511 = vmatpush.bf16.msra.mxu2 %v5763_v42  ;;  %2533 = vmatpush.bf16.msrb.mxu0 %v6403_v43  ;;  %v8270_v41 = vld [vmem:[#allocation4 + $0x46c] sm:$0xf0]  ;;  %v8162_v42 = vld [vmem:[#allocation4 + $0x114] sm:$0xf]  ;;  %v6695_v46 = vor.u32 %v8378_v38, %v6692_v39  ;;  %v5930_v39 = vld [vmem:[#allocation4 + $0x1d8] sm:$0xf] }
 0x19c   :  { %v5828_v43 = vld [vmem:[#allocation4 + $0x130] sm:$0xf0]  ;;  %v6243_v49 = vor.u32 %v8270_v41, %v6242_v40  ;;  %v6210_v53 = vld [vmem:[#allocation4 + $0x410] sm:$0xf]  ;;  %v8191_v40 = vld [vmem:[#allocation4 + $0x1f4] sm:$0xf0] }
 0x19d   :  { %2526 = vmatpush.bf16.msra.mxu3 %v5955_v50  ;;  %2548 = vmatpush.bf16.msrb.mxu1 %v6595_v51  ;;  %v5831_v50 = vor.u32 %v8162_v42, %v5828_v43  ;;  %v8370_v51 = vld [vmem:[#allocation4 + $0x794] sm:$0xf]  ;;  %v8262_v54 = vld [vmem:[#allocation4 + $0x42c] sm:$0xf0]  ;;  %v5931_v48 = vor.u32 %v8191_v40, %v5930_v39 }
 0x19e   :  { %v6211_v62 = vor.u32 %v8262_v54, %v6210_v53  ;;  %v8306_v9 = vld [vmem:[#allocation4 + $0x594] sm:$0xf]  ;;  %v8183_v53 = vld [vmem:[#allocation4 + $0x1b4] sm:$0xf0] }
 0x19f   :  { %2512 = vmatpush.bf16.msra.mxu2 %v5731_v55  ;;  %2534 = vmatpush.bf16.msrb.mxu0 %v6371_v57  ;;  %v8154_v55 = vld [vmem:[#allocation4 + $0xd4] sm:$0xf] }
 0x1a0   :  { %2527 = vmatmul.bf16.vlgmr.msra.gmra.mxu3 %v9042_v3  ;;  %v5796_v57 = vld [vmem:[#allocation4 + $0xf0] sm:$0xf0] }
 0x1a1   :  { %2571 = vmatpush.bf16.msrb.mxu3 %v6183_v52  ;;  %2549 = vmatpush.bf16.msrb.mxu1 %v6563_v2  ;;  %v6660_v52 = vld [vmem:[#allocation4 + $0x7b0] sm:$0xf0]  ;;  %v5799_v63 = vor.u32 %v8154_v55, %v5796_v57 }
 0x1a2   :  { %v6663_v61 = vor.u32 %v8370_v51, %v6660_v52  ;;  %v8362_v2 = vld [vmem:[#allocation4 + $0x754] sm:$0xf]  ;;  %v5898_v52 = vld [vmem:[#allocation4 + $0x198] sm:$0xf] }
 0x1a3   :  { %2513 = vmatpush.bf16.msra.mxu2 %v5699_v5  ;;  %2535 = vmatpush.bf16.msrb.mxu0 %v6339_v6  ;;  %v6628_v5 = vld [vmem:[#allocation4 + $0x770] sm:$0xf0] }
 0x1a4   :  { %v8146_v6 = vld [vmem:[#allocation4 + $0x94] sm:$0xf]  ;;  %v6631_v13 = vor.u32 %v8362_v2, %v6628_v5  ;;  %v8175_v2 = vld [vmem:[#allocation4 + $0x174] sm:$0xf0] }
 0x1a5   :  { %2572 = vmatpush.bf16.msrb.mxu3 %v6151_v4  ;;  %2550 = vmatpush.bf16.msrb.mxu1 %v6531_v8  ;;  %v6439_v4 = vor.u32 %v8314_v58, %v6436_v59  ;;  %v5767_v14 = vor.u32 %v8146_v6, %v5764_v7  ;;  %v5956_v15 = vld [vmem:[#allocation4 + $0x230] sm:$0xf0] }
 0x1a6   :  { %2514 = vmatmul.bf16.vlgmr.msra.gmra.mxu2 %v9045_v26  ;;  %v8354_v16 = vld [vmem:[#allocation4 + $0x714] sm:$0xf]  ;;  %v5959_v25 = vor.u32 %v8194_v12, %v5956_v15 }
 0x1a7   :  { %2558 = vmatpush.bf16.msrb.mxu2 %v5927_v11  ;;  %2536 = vmatpush.bf16.msrb.mxu0 %v6307_v19  ;;  %v5991_v11 = vor.u32 %v8202_v0, %v5988_v1  ;;  %v6596_v8 = vld [vmem:[#allocation4 + $0x730] sm:$0xf0]  ;;  %v6186_v19 = vld [vmem:[#allocation4 + $0x3d8] sm:$0xf] }
 0x1a8   :  { %v8138_v21 = vld [vmem:[#allocation4 + $0x54] sm:$0xf]  ;;  %v6599_v27 = vor.u32 %v8354_v16, %v6596_v8  ;;  %v6187_v28 = vor.u32 %v8255_v20, %v6186_v19  ;;  %v5866_v1 = vld [vmem:[#allocation4 + $0x158] sm:$0xf] }
 0x1a9   :  { %2573 = vmatpush.bf16.msrb.mxu3 %v6119_v18  ;;  %2551 = vmatpush.bf16.msrb.mxu1 %v6499_v30  ;;  %v6407_v18 = vor.u32 %v8306_v9, %v6404_v10  ;;  %v5732_v22 = vld [vmem:[#allocation4 + $0x70] sm:$0xf0]  ;;  %v6058_v10 = vld [vmem:[#allocation4 + $0x2d8] sm:$0xf]  ;;  %v5867_v12 = vor.u32 %v8175_v2, %v5866_v1  ;;  %v8251_v1 = vld [vmem:[#allocation4 + $0x3dc] sm:$0xf] }
 0x1aa   :  { %v6372_v24 = vld [vmem:[#allocation4 + $0x570] sm:$0xf0]  ;;  %v5735_v31 = vor.u32 %v8138_v21, %v5732_v22  ;;  %v5834_v8 = vld [vmem:[#allocation4 + $0x118] sm:$0xf]  ;;  %v6188_v2 = vld [vmem:[#allocation4 + $0x3f8] sm:$0xf0] }
 0x1ab   :  { %2559 = vmatpush.bf16.msrb.mxu2 %v5895_v23  ;;  %2537 = vmatpush.bf16.msrb.mxu0 %v6275_v33  ;;  %v8298_v23 = vld [vmem:[#allocation4 + $0x554] sm:$0xf]  ;;  %v6154_v33 = vld [vmem:[#allocation4 + $0x398] sm:$0xf] }
 0x1ac   :  { %v8346_v29 = vld [vmem:[#allocation4 + $0x6d4] sm:$0xf]  ;;  %v6155_v42 = vor.u32 %v8247_v34, %v6154_v33  ;;  %v5802_v33 = vld [vmem:[#allocation4 + $0xd8] sm:$0xf] }
 0x1ad   :  { %2574 = vmatpush.bf16.msrb.mxu3 %v6087_v32  ;;  %2552 = vmatpush.bf16.msrb.mxu1 %v6467_v44  ;;  %v6564_v30 = vld [vmem:[#allocation4 + $0x6f0] sm:$0xf0]  ;;  %v6375_v32 = vor.u32 %v8298_v23, %v6372_v24  ;;  %v6026_v23 = vld [vmem:[#allocation4 + $0x298] sm:$0xf] }
 0x1ae   :  { %v8130_v35 = vld [vmem:[#allocation4 + $0x14] sm:$0xf]  ;;  %v6567_v41 = vor.u32 %v8346_v29, %v6564_v30  ;;  %v8215_v24 = vld [vmem:[#allocation4 + $0x2b4] sm:$0xf0] }
 0x1af   :  { %2560 = vmatpush.bf16.msrb.mxu2 %v5863_v37  ;;  %2538 = vmatpush.bf16.msrb.mxu0 %v6243_v49  ;;  %v5700_v36 = vld [vmem:[#allocation4 + $0x30] sm:$0xf0]  ;;  %v8239_v49 = vld [vmem:[#allocation4 + $0x374] sm:$0xf0] }
 0x1b0   :  { %2553 = vmatmul.bf16.vlgmr.msrb.gmra.mxu1 %v9050_v56  ;;  %v8290_v37 = vld [vmem:[#allocation4 + $0x514] sm:$0xf]  ;;  %v5703_v43 = vor.u32 %v8130_v35, %v5700_v36  ;;  %v6123_v55 = vor.u32 %v8239_v49, %v6122_v47  ;;  %v6666_v29 = vld [vmem:[#allocation4 + $0x798] sm:$0xf] }
 0x1b1   :  { %2575 = vmatpush.bf16.msrb.mxu3 %v6055_v45  ;;  %2597 = vmatpush.bf16.msra.mxu1 %v6695_v46  ;;  %v6340_v38 = vld [vmem:[#allocation4 + $0x530] sm:$0xf0]  ;;  %v8375_v30 = vld [vmem:[#allocation4 + $0x7b4] sm:$0xf0] }
 0x1b2   :  { %v6343_v44 = vor.u32 %v8290_v37, %v6340_v38  ;;  %v8338_v45 = vld [vmem:[#allocation4 + $0x694] sm:$0xf]  ;;  %v8159_v34 = vld [vmem:[#allocation4 + $0xf4] sm:$0xf0]  ;;  %v6027_v38 = vor.u32 %v8215_v24, %v6026_v23  ;;  %v6667_v39 = vor.u32 %v8375_v30, %v6666_v29 }
 0x1b3   :  { %2561 = vmatpush.bf16.msrb.mxu2 %v5831_v50  ;;  %2539 = vmatpush.bf16.msrb.mxu0 %v6211_v62  ;;  %v6532_v46 = vld [vmem:[#allocation4 + $0x6b0] sm:$0xf0]  ;;  %v8231_v62 = vld [vmem:[#allocation4 + $0x334] sm:$0xf0] }
 0x1b4   :  { %v8282_v50 = vld [vmem:[#allocation4 + $0x4d4] sm:$0xf]  ;;  %v6535_v54 = vor.u32 %v8338_v45, %v6532_v46  ;;  %v6442_v36 = vld [vmem:[#allocation4 + $0x5d8] sm:$0xf] }
 0x1b5   :  { %2576 = vmatpush.bf16.msrb.mxu3 %v6023_v60  ;;  %2598 = vmatpush.bf16.msra.mxu1 %v6663_v61  ;;  %v6308_v51 = vld [vmem:[#allocation4 + $0x4f0] sm:$0xf0]  ;;  %v6090_v60 = vld [vmem:[#allocation4 + $0x318] sm:$0xf]  ;;  %v5899_v61 = vor.u32 %v8183_v53, %v5898_v52 }
 0x1b6   :  { %2540 = vmatmul.bf16.vlgmr.msrb.gmra.mxu0 %v9054_v17  ;;  %v6311_v57 = vor.u32 %v8282_v50, %v6308_v51  ;;  %v8330_v58 = vld [vmem:[#allocation4 + $0x654] sm:$0xf]  ;;  %v6091_v6 = vor.u32 %v8231_v62, %v6090_v60  ;;  %v8319_v37 = vld [vmem:[#allocation4 + $0x5f4] sm:$0xf0] }
 0x1b7   :  { %2562 = vmatpush.bf16.msrb.mxu2 %v5799_v63  ;;  %2584 = vmatpush.bf16.msra.mxu0 %v6439_v4  ;;  %v6500_v59 = vld [vmem:[#allocation4 + $0x670] sm:$0xf0]  ;;  %v6443_v46 = vor.u32 %v8319_v37, %v6442_v36  ;;  %v8367_v47 = vld [vmem:[#allocation4 + $0x774] sm:$0xf0]  ;;  %v8235_v37 = vld [vmem:[#allocation4 + $0x35c] sm:$0xf] }
 0x1b8   :  { %v8274_v63 = vld [vmem:[#allocation4 + $0x494] sm:$0xf]  ;;  %v6503_v4 = vor.u32 %v8330_v58, %v6500_v59  ;;  %v8151_v49 = vld [vmem:[#allocation4 + $0xb4] sm:$0xf0] }
 0x1b9   :  { %2577 = vmatpush.bf16.msrb.mxu3 %v5991_v11  ;;  %2599 = vmatpush.bf16.msra.mxu1 %v6631_v13  ;;  %v6276_v0 = vld [vmem:[#allocation4 + $0x4b0] sm:$0xf0]  ;;  %v8223_v11 = vld [vmem:[#allocation4 + $0x2f4] sm:$0xf0] }
 0x1ba   :  { %v8322_v5 = vld [vmem:[#allocation4 + $0x614] sm:$0xf]  ;;  %v6279_v7 = vor.u32 %v8274_v63, %v6276_v0  ;;  %v6698_v13 = vld [vmem:[#allocation4 + $0x7d8] sm:$0xf]  ;;  %v6059_v21 = vor.u32 %v8223_v11, %v6058_v10  ;;  %v6191_v11 = vor.u32 %v8251_v1, %v6188_v2 }
 0x1bb   :  { %2563 = vmatpush.bf16.msrb.mxu2 %v5767_v14  ;;  %2585 = vmatpush.bf16.msra.mxu0 %v6407_v18  ;;  %v6468_v9 = vld [vmem:[#allocation4 + $0x630] sm:$0xf0]  ;;  %v8383_v14 = vld [vmem:[#allocation4 + $0x7f4] sm:$0xf0] }
 0x1bc   :  { %v8266_v15 = vld [vmem:[#allocation4 + $0x454] sm:$0xf]  ;;  %v8167_v18 = vld [vmem:[#allocation4 + $0x134] sm:$0xf0]  ;;  %v6471_v19 = vor.u32 %v8322_v5, %v6468_v9  ;;  %v6699_v22 = vor.u32 %v8383_v14, %v6698_v13 }
 0x1bd   :  { %2578 = vmatpush.bf16.msrb.mxu3 %v5959_v25  ;;  %2600 = vmatpush.bf16.msra.mxu1 %v6599_v27  ;;  %v6244_v16 = vld [vmem:[#allocation4 + $0x470] sm:$0xf0]  ;;  %v9077_v25 = vld [vmem:[%s9311_s6] sm:$0xff]  ;;  %v6410_v51 = vld [vmem:[#allocation4 + $0x598] sm:$0xf] }
 0x1be   :  { %v6247_v27 = vor.u32 %v8266_v15, %v6244_v16  ;;  %v1002_v35 = vperm.slane %v9077_v25, 0  ;;  %v8311_v52 = vld [vmem:[#allocation4 + $0x5b4] sm:$0xf0] }
 0x1bf   :  { %2564 = vmatpush.bf16.msrb.mxu2 %v5735_v31  ;;  %2586 = vmatpush.bf16.msra.mxu0 %v6375_v32  ;;  %v8258_v31 = vld [vmem:[#allocation4 + $0x414] sm:$0xf]  ;;  %v8199_v59 = vld [vmem:[#allocation4 + $0x234] sm:$0xf0]  ;;  %v6411_v0 = vor.u32 %v8311_v52, %v6410_v51  ;;  %v8227_v51 = vld [vmem:[#allocation4 + $0x31c] sm:$0xf] }
 0x1c0   :  { %2579 = vmatmul.bf16.vlgmr.msrb.gmra.mxu3 %v9042_v3  ;;  %v6212_v32 = vld [vmem:[#allocation4 + $0x430] sm:$0xf0]  ;;  %v6602_v60 = vld [vmem:[#allocation4 + $0x718] sm:$0xf] }
 0x1c1   :  { %2623 = vmatpush.bf16.msra.mxu3 %v6187_v28  ;;  %2601 = vmatpush.bf16.msra.mxu1 %v6567_v41  ;;  %v5835_v28 = vor.u32 %v8167_v18, %v5834_v8  ;;  %v6215_v40 = vor.u32 %v8258_v31, %v6212_v32  ;;  %v5803_v41 = vor.u32 %v8159_v34, %v5802_v33  ;;  %v8143_v5 = vld [vmem:[#allocation4 + $0x74] sm:$0xf0]  ;;  %v8243_v8 = vld [vmem:[#allocation4 + $0x39c] sm:$0xf] }
 0x1c2   :  { %v8351_v13 = vld [vmem:[#allocation4 + $0x6f4] sm:$0xf0]  ;;  %v6156_v18 = vld [vmem:[#allocation4 + $0x3b8] sm:$0xf0] }
 0x1c3   :  { %2565 = vmatpush.bf16.msrb.mxu2 %v5703_v43  ;;  %2587 = vmatpush.bf16.msra.mxu0 %v6343_v44  ;;  %v2320_v20 = vpop.f32.mrf.mxu3  ;;  %v8207_v43 = vld [vmem:[#allocation4 + $0x274] sm:$0xf0]  ;;  %v6159_v31 = vor.u32 %v8243_v8, %v6156_v18  ;;  %v8211_v18 = vld [vmem:[#allocation4 + $0x29c] sm:$0xf] }
 0x1c4   :  { %v6634_v44 = vld [vmem:[#allocation4 + $0x758] sm:$0xf] }
 0x1c5   :  { %2624 = vmatpush.bf16.msra.mxu3 %v6155_v42  ;;  %2602 = vmatpush.bf16.msra.mxu1 %v6535_v54  ;;  %v5994_v42 = vld [vmem:[#allocation4 + $0x258] sm:$0xf] }
 0x1c6   :  { %2566 = vmatmul.bf16.vlgmr.msrb.gmra.mxu2 %v9045_v26  ;;  %v5995_v54 = vor.u32 %v8207_v43, %v5994_v42  ;;  %v8343_v36 = vld [vmem:[#allocation4 + $0x6b4] sm:$0xf0]  ;;  %v8179_v43 = vld [vmem:[#allocation4 + $0x19c] sm:$0xf] }
 0x1c7   :  { %2610 = vmatpush.bf16.msra.mxu2 %v5931_v48  ;;  %2588 = vmatpush.bf16.msra.mxu0 %v6311_v57  ;;  %v5770_v48 = vld [vmem:[#allocation4 + $0x98] sm:$0xf]  ;;  %v6635_v57 = vor.u32 %v8367_v47, %v6634_v44  ;;  %v5900_v44 = vld [vmem:[#allocation4 + $0x1b8] sm:$0xf0] }
 0x1c8   :  { %v5771_v58 = vor.u32 %v8151_v49, %v5770_v48  ;;  %v8287_v42 = vld [vmem:[#allocation4 + $0x4f4] sm:$0xf0]  ;;  %v5903_v52 = vor.u32 %v8179_v43, %v5900_v44  ;;  %v8363_v43 = vld [vmem:[#allocation4 + $0x75c] sm:$0xf] }
 0x1c9   :  { %2625 = vmatpush.bf16.msra.mxu3 %v6123_v55  ;;  %2603 = vmatpush.bf16.msra.mxu1 %v6503_v4  ;;  %v2307_v45 = vpop.f32.mrf.mxu2  ;;  %v5962_v55 = vld [vmem:[#allocation4 + $0x218] sm:$0xf] }
 0x1ca   :  { %v2308_v50 = vadd.f32 %v2307_v45, %v1002_v35  ;;  %v5738_v4 = vld [vmem:[#allocation4 + $0x58] sm:$0xf]  ;;  %v5963_v9 = vor.u32 %v8199_v59, %v5962_v55  ;;  %v8171_v59 = vld [vmem:[#allocation4 + $0x15c] sm:$0xf] }
 0x1cb   :  { %2611 = vmatpush.bf16.msra.mxu2 %v5899_v61  ;;  %2589 = vmatpush.bf16.msra.mxu0 %v6279_v7  ;;  %v2322_v53 = vpop.f32.mrf.mxu3  ;;  %v8359_v61 = vld [vmem:[#allocation4 + $0x734] sm:$0xf0]  ;;  %v5739_v15 = vor.u32 %v8143_v5, %v5738_v4  ;;  %v8219_v4 = vld [vmem:[#allocation4 + $0x2dc] sm:$0xf] }
 0x1cc   :  { %v2321_v62 = vadd.f32 %v2320_v20, %v2308_v50  ;;  %v8303_v7 = vld [vmem:[#allocation4 + $0x574] sm:$0xf0]  ;;  %v6603_v10 = vor.u32 %v8359_v61, %v6602_v60  ;;  %v6092_v53 = vld [vmem:[#allocation4 + $0x338] sm:$0xf0] }
 0x1cd   :  { %2626 = vmatpush.bf16.msra.mxu3 %v6091_v6  ;;  %2604 = vmatpush.bf16.msra.mxu1 %v6471_v19  ;;  %v2346_v63 = vpop.f32.mrf.mxu1  ;;  %v6378_v6 = vld [vmem:[#allocation4 + $0x558] sm:$0xf]  ;;  %v5868_v60 = vld [vmem:[#allocation4 + $0x178] sm:$0xf0] }
 0x1ce   :  { %v6379_v16 = vor.u32 %v8303_v7, %v6378_v6  ;;  %v5706_v19 = vld [vmem:[#allocation4 + $0x18] sm:$0xf]  ;;  %v6060_v5 = vld [vmem:[#allocation4 + $0x2f8] sm:$0xf0]  ;;  %v5871_v6 = vor.u32 %v8171_v59, %v5868_v60 }
 0x1cf   :  { %2612 = vmatpush.bf16.msra.mxu2 %v5867_v12  ;;  %2590 = vmatpush.bf16.msra.mxu0 %v6247_v27  ;;  %v6570_v12 = vld [vmem:[#allocation4 + $0x6d8] sm:$0xf]  ;;  %v8187_v27 = vld [vmem:[#allocation4 + $0x1dc] sm:$0xf] }
 0x1d0   :  { %2605 = vmatmul.bf16.vlgmr.msra.gmra.mxu1 %v9050_v56  ;;  %v8135_v20 = vld [vmem:[#allocation4 + $0x34] sm:$0xf0]  ;;  %v6571_v30 = vor.u32 %v8351_v13, %v6570_v12  ;;  %v8379_v7 = vld [vmem:[#allocation4 + $0x7dc] sm:$0xf] }
 0x1d1   :  { %2627 = vmatpush.bf16.msra.mxu3 %v6059_v21  ;;  %2649 = vmatpush.bf16.msrb.mxu1 %v6699_v22  ;;  %v2309_v14 = vpop.f32.mrf.mxu2  ;;  %v6346_v21 = vld [vmem:[#allocation4 + $0x518] sm:$0xf]  ;;  %v5707_v33 = vor.u32 %v8135_v20, %v5706_v19  ;;  %v8163_v12 = vld [vmem:[#allocation4 + $0x11c] sm:$0xf] }
 0x1d2   :  { %v8295_v22 = vld [vmem:[#allocation4 + $0x534] sm:$0xf0]  ;;  %v5836_v13 = vld [vmem:[#allocation4 + $0x138] sm:$0xf0] }
 0x1d3   :  { %2613 = vmatpush.bf16.msra.mxu2 %v5835_v28  ;;  %2591 = vmatpush.bf16.msra.mxu0 %v6215_v40  ;;  %v2333_v23 = vpop.f32.mrf.mxu0  ;;  %v9082_v24 = vpop.f32.mrf.mxu3  ;;  %v5932_v28 = vld [vmem:[#allocation4 + $0x1f8] sm:$0xf0]  ;;  %v6347_v34 = vor.u32 %v8295_v22, %v6346_v21  ;;  %v6538_v35 = vld [vmem:[#allocation4 + $0x698] sm:$0xf]  ;;  %v5839_v21 = vor.u32 %v8163_v12, %v5836_v13 }
 0x1d4   :  { %v2334_v29 = vadd.f32 %v2333_v23, %v2321_v62  ;;  %v6124_v40 = vld [vmem:[#allocation4 + $0x378] sm:$0xf0]  ;;  %v6539_v45 = vor.u32 %v8343_v36, %v6538_v35  ;;  %v6506_v49 = vld [vmem:[#allocation4 + $0x658] sm:$0xf] }
 0x1d5   :  { %2628 = vmatpush.bf16.msra.mxu3 %v6027_v38  ;;  %2650 = vmatpush.bf16.msrb.mxu1 %v6667_v39  ;;  %v2348_v32 = vpop.f32.mrf.mxu1  ;;  %v5935_v39 = vor.u32 %v8187_v27, %v5932_v28  ;;  %v6127_v47 = vor.u32 %v8235_v37, %v6124_v40  ;;  %v8335_v50 = vld [vmem:[#allocation4 + $0x674] sm:$0xf0]  ;;  %v6028_v19 = vld [vmem:[#allocation4 + $0x2b8] sm:$0xf0] }
 0x1d6   :  { %2592 = vmatmul.bf16.vlgmr.msra.gmra.mxu0 %v9054_v17  ;;  %v9084_v38 = vadd.f32 %v2346_v63, %v2334_v29  ;;  %v8279_v55 = vld [vmem:[#allocation4 + $0x4b4] sm:$0xf0]  ;;  %v6507_v61 = vor.u32 %v8335_v50, %v6506_v49  ;;  %v8371_v22 = vld [vmem:[#allocation4 + $0x79c] sm:$0xf]  ;;  %v6031_v36 = vor.u32 %v8211_v18, %v6028_v19 }
 0x1d7   :  { %2614 = vmatpush.bf16.msra.mxu2 %v5803_v41  ;;  %2636 = vmatpush.bf16.msrb.mxu0 %v6443_v46  ;;  %v6314_v41 = vld [vmem:[#allocation4 + $0x4d8] sm:$0xf]  ;;  %v6668_v23 = vld [vmem:[#allocation4 + $0x7b8] sm:$0xf0] }
 0x1d8   :  { %v6315_v48 = vor.u32 %v8287_v42, %v6314_v41  ;;  %v6474_v62 = vld [vmem:[#allocation4 + $0x618] sm:$0xf]  ;;  %v5804_v32 = vld [vmem:[#allocation4 + $0xf8] sm:$0xf0]  ;;  %v6671_v37 = vor.u32 %v8371_v22, %v6668_v23  ;;  %v6818_v22 = vld [vmem:[#allocation6 + $0xe0] sm:$0xf] }
 0x1d9   :  { %2629 = vmatpush.bf16.msra.mxu3 %v5995_v54  ;;  %2651 = vmatpush.bf16.msrb.mxu1 %v6635_v57  ;;  %v9087_v46 = vpop.f32.mrf.mxu2  ;;  %v6282_v54 = vld [vmem:[#allocation4 + $0x498] sm:$0xf]  ;;  %v8203_v41 = vld [vmem:[#allocation4 + $0x25c] sm:$0xf]  ;;  %v8414_v23 = vld [vmem:[#allocation6 + $0xec] sm:$0xf0] }
 0x1da   :  { %v6283_v1 = vor.u32 %v8279_v55, %v6282_v54  ;;  %v8327_v2 = vld [vmem:[#allocation4 + $0x634] sm:$0xf0]  ;;  %v5996_v42 = vld [vmem:[#allocation4 + $0x278] sm:$0xf0] }
 0x1db   :  { %2615 = vmatpush.bf16.msra.mxu2 %v5771_v58  ;;  %2637 = vmatpush.bf16.msrb.mxu0 %v6411_v0  ;;  %v2335_v57 = vpop.f32.mrf.mxu0  ;;  %v2374_v58 = vpop.f32.mrf.mxu3  ;;  %v6095_v0 = vor.u32 %v8227_v51, %v6092_v53  ;;  %v6475_v14 = vor.u32 %v8327_v2, %v6474_v62  ;;  %v6218_v27 = vld [vmem:[#allocation4 + $0x418] sm:$0xf]  ;;  %v8307_v49 = vld [vmem:[#allocation4 + $0x59c] sm:$0xf]  ;;  %v5999_v51 = vor.u32 %v8203_v41, %v5996_v42 }
 0x1dc   :  { %v6412_v50 = vld [vmem:[#allocation4 + $0x5b8] sm:$0xf0] }
 0x1dd   :  { %2630 = vmatpush.bf16.msra.mxu3 %v5963_v9  ;;  %2652 = vmatpush.bf16.msrb.mxu1 %v6603_v10  ;;  %v9090_v63 = vpop.f32.mrf.mxu1  ;;  %v6700_v9 = vld [vmem:[#allocation4 + $0x7f8] sm:$0xf0]  ;;  %v6250_v10 = vld [vmem:[#allocation4 + $0x458] sm:$0xf]  ;;  %v6415_v62 = vor.u32 %v8307_v49, %v6412_v50 }
 0x1de   :  { %v6703_v8 = vor.u32 %v8379_v7, %v6700_v9  ;;  %v5964_v57 = vld [vmem:[#allocation4 + $0x238] sm:$0xf0] }
 0x1df   :  { %2616 = vmatpush.bf16.msra.mxu2 %v5739_v15  ;;  %2638 = vmatpush.bf16.msrb.mxu0 %v6379_v16  ;;  %v6063_v16 = vor.u32 %v8219_v4, %v6060_v5  ;;  %v8355_v58 = vld [vmem:[#allocation4 + $0x71c] sm:$0xf] }
 0x1e0   :  { %2631 = vmatmul.bf16.vlgmr.msra.gmra.mxu3 %v9042_v3  ;;  %v6604_v59 = vld [vmem:[#allocation4 + $0x738] sm:$0xf0] }
 0x1e1   :  { %2675 = vmatpush.bf16.msrb.mxu3 %v6191_v11  ;;  %2653 = vmatpush.bf16.msrb.mxu1 %v6571_v30  ;;  %v8271_v11 = vld [vmem:[#allocation4 + $0x474] sm:$0xf0]  ;;  %v2361_v15 = vpop.f32.mrf.mxu2  ;;  %v8139_v2 = vld [vmem:[#allocation4 + $0x5c] sm:$0xf] }
 0x1e2   :  { %v6251_v20 = vor.u32 %v8271_v11, %v6250_v10  ;;  %v8263_v30 = vld [vmem:[#allocation4 + $0x434] sm:$0xf0]  ;;  %v5740_v4 = vld [vmem:[#allocation4 + $0x78] sm:$0xf0]  ;;  %v6607_v10 = vor.u32 %v8355_v58, %v6604_v59  ;;  %v6786_v58 = vld [vmem:[#allocation6 + $0xa0] sm:$0xf] }
 0x1e3   :  { %2617 = vmatpush.bf16.msra.mxu2 %v5707_v33  ;;  %2639 = vmatpush.bf16.msrb.mxu0 %v6347_v34  ;;  %v9092_v28 = vpop.f32.mrf.mxu0  ;;  %v9094_v29 = vpop.f32.mrf.mxu3  ;;  %v8315_v33 = vld [vmem:[#allocation4 + $0x5dc] sm:$0xf]  ;;  %v8406_v59 = vld [vmem:[#allocation6 + $0xac] sm:$0xf0] }
 0x1e4   :  { %v6444_v34 = vld [vmem:[#allocation4 + $0x5f8] sm:$0xf0] }
 0x1e5   :  { %2676 = vmatpush.bf16.msrb.mxu3 %v6159_v31  ;;  %2654 = vmatpush.bf16.msrb.mxu1 %v6539_v45  ;;  %v8155_v31 = vld [vmem:[#allocation4 + $0xdc] sm:$0xf]  ;;  %v2400_v35 = vpop.f32.mrf.mxu1  ;;  %v6447_v44 = vor.u32 %v8315_v33, %v6444_v34 }
 0x1e6   :  { %2618 = vmatmul.bf16.vlgmr.msra.gmra.mxu2 %v9045_v26  ;;  %v5807_v40 = vor.u32 %v8155_v31, %v5804_v32  ;;  %v6636_v45 = vld [vmem:[#allocation4 + $0x778] sm:$0xf0] }
 0x1e7   :  { %2662 = vmatpush.bf16.msrb.mxu2 %v5935_v39  ;;  %2640 = vmatpush.bf16.msrb.mxu0 %v6315_v48  ;;  %v6219_v39 = vor.u32 %v8263_v30, %v6218_v27  ;;  %v5772_v48 = vld [vmem:[#allocation4 + $0xb8] sm:$0xf0]  ;;  %v6639_v54 = vor.u32 %v8363_v43, %v6636_v45  ;;  %v8410_v45 = vld [vmem:[#allocation6 + $0xcc] sm:$0xf0] }
 0x1e8   :  { %v8299_v5 = vld [vmem:[#allocation4 + $0x55c] sm:$0xf] }
 0x1e9   :  { %2677 = vmatpush.bf16.msrb.mxu3 %v6127_v47  ;;  %2655 = vmatpush.bf16.msrb.mxu1 %v6507_v61  ;;  %v8147_v47 = vld [vmem:[#allocation4 + $0x9c] sm:$0xf]  ;;  %v9097_v53 = vpop.f32.mrf.mxu2 }
 0x1ea   :  { %v5775_v55 = vor.u32 %v8147_v47, %v5772_v48  ;;  %v8347_v12 = vld [vmem:[#allocation4 + $0x6dc] sm:$0xf] }
 0x1eb   :  { %2663 = vmatpush.bf16.msrb.mxu2 %v5903_v52  ;;  %2641 = vmatpush.bf16.msrb.mxu0 %v6283_v1  ;;  %v8195_v52 = vld [vmem:[#allocation4 + $0x21c] sm:$0xf]  ;;  %v2387_v60 = vpop.f32.mrf.mxu0  ;;  %v2426_v61 = vpop.f32.mrf.mxu3  ;;  %v8446_v1 = vld [vmem:[#allocation6 + $0x1ec] sm:$0xf0] }
 0x1ec   :  { %v5967_v9 = vor.u32 %v8195_v52, %v5964_v57  ;;  %v6572_v13 = vld [vmem:[#allocation4 + $0x6f8] sm:$0xf0]  ;;  %v6898_v52 = vld [vmem:[#allocation6 + $0x180] sm:$0xf]  ;;  %v1003_v60 = vperm.slane %v9077_v25, 1 }
 0x1ed   :  { %2678 = vmatpush.bf16.msrb.mxu3 %v6095_v0  ;;  %2656 = vmatpush.bf16.msrb.mxu1 %v6475_v14  ;;  %v6946_v0 = vld [vmem:[#allocation6 + $0x1e0] sm:$0xf]  ;;  %v9100_v7 = vpop.f32.mrf.mxu1  ;;  %v5743_v14 = vor.u32 %v8139_v2, %v5740_v4  ;;  %v8131_v18 = vld [vmem:[#allocation4 + $0x1c] sm:$0xf]  ;;  %v6575_v30 = vor.u32 %v8347_v12, %v6572_v13 }
 0x1ee   :  { %v6947_v11 = vor.u32 %v8446_v1, %v6946_v0  ;;  %v5708_v19 = vld [vmem:[#allocation4 + $0x38] sm:$0xf0]  ;;  %v6882_v4 = vld [vmem:[#allocation6 + $0x160] sm:$0xf] }
 0x1ef   :  { %2664 = vmatpush.bf16.msrb.mxu2 %v5871_v6  ;;  %2642 = vmatpush.bf16.msrb.mxu0 %v6251_v20  ;;  %v6380_v6 = vld [vmem:[#allocation4 + $0x578] sm:$0xf0]  ;;  %v5711_v32 = vor.u32 %v8131_v18, %v5708_v19  ;;  %v6866_v19 = vld [vmem:[#allocation6 + $0x140] sm:$0xf] }
 0x1f0   :  { %2657 = vmatmul.bf16.vlgmr.msrb.gmra.mxu1 %v9050_v56  ;;  %v6383_v15 = vor.u32 %v8299_v5, %v6380_v6  ;;  %v8291_v20 = vld [vmem:[#allocation4 + $0x51c] sm:$0xf]  ;;  %v8430_v5 = vld [vmem:[#allocation6 + $0x16c] sm:$0xf0] }
 0x1f1   :  { %2679 = vmatpush.bf16.msrb.mxu3 %v6063_v16  ;;  %2701 = vmatpush.bf16.msra.mxu1 %v6703_v8  ;;  %v6930_v16 = vld [vmem:[#allocation6 + $0x1c0] sm:$0xf]  ;;  %v8442_v8 = vld [vmem:[#allocation6 + $0x1cc] sm:$0xf0]  ;;  %v2413_v27 = vpop.f32.mrf.mxu2  ;;  %v8339_v34 = vld [vmem:[#allocation4 + $0x69c] sm:$0xf] }
 0x1f2   :  { %v6931_v31 = vor.u32 %v8442_v8, %v6930_v16  ;;  %v6540_v35 = vld [vmem:[#allocation4 + $0x6b8] sm:$0xf0]  ;;  %v6883_v8 = vor.u32 %v8430_v5, %v6882_v4  ;;  %v7186_v27 = vld [vmem:[#allocation6 + $0x3c0] sm:$0xf]  ;;  %v8470_v5 = vld [vmem:[#allocation6 + $0x2ac] sm:$0xf0] }
 0x1f3   :  { %2665 = vmatpush.bf16.msrb.mxu2 %v5839_v21  ;;  %2643 = vmatpush.bf16.msrb.mxu0 %v6219_v39  ;;  %v6348_v21 = vld [vmem:[#allocation4 + $0x538] sm:$0xf0]  ;;  %v6819_v39 = vor.u32 %v8414_v23, %v6818_v22  ;;  %v6543_v47 = vor.u32 %v8339_v34, %v6540_v35  ;;  %v8398_v34 = vld [vmem:[#allocation6 + $0x6c] sm:$0xf0]  ;;  %v7074_v35 = vld [vmem:[#allocation6 + $0x2e0] sm:$0xf] }
 0x1f4   :  { %v6351_v33 = vor.u32 %v8291_v20, %v6348_v21  ;;  %v8283_v41 = vld [vmem:[#allocation4 + $0x4dc] sm:$0xf]  ;;  %v8426_v20 = vld [vmem:[#allocation6 + $0x14c] sm:$0xf0] }
 0x1f5   :  { %2680 = vmatpush.bf16.msrb.mxu3 %v6031_v36  ;;  %2702 = vmatpush.bf16.msra.mxu1 %v6671_v37  ;;  %v6914_v36 = vld [vmem:[#allocation6 + $0x1a0] sm:$0xf]  ;;  %v9103_v37 = vpop.f32.mrf.mxu0  ;;  %v6316_v42 = vld [vmem:[#allocation4 + $0x4f8] sm:$0xf0]  ;;  %v2452_v43 = vpop.f32.mrf.mxu1 }
 0x1f6   :  { %2644 = vmatmul.bf16.vlgmr.msrb.gmra.mxu0 %v9054_v17  ;;  %v6319_v49 = vor.u32 %v8283_v41, %v6316_v42  ;;  %v8331_v50 = vld [vmem:[#allocation4 + $0x65c] sm:$0xf] }
 0x1f7   :  { %2666 = vmatpush.bf16.msrb.mxu2 %v5807_v40  ;;  %2688 = vmatpush.bf16.msra.mxu0 %v6447_v44  ;;  %v8438_v40 = vld [vmem:[#allocation6 + $0x1ac] sm:$0xf0]  ;;  %v6802_v44 = vld [vmem:[#allocation6 + $0xc0] sm:$0xf]  ;;  %v6284_v57 = vld [vmem:[#allocation4 + $0x4b8] sm:$0xf0] }
 0x1f8   :  { %v6915_v48 = vor.u32 %v8438_v40, %v6914_v36  ;;  %v6476_v2 = vld [vmem:[#allocation4 + $0x638] sm:$0xf0]  ;;  %v8478_v36 = vld [vmem:[#allocation6 + $0x2ec] sm:$0xf0] }
 0x1f9   :  { %2681 = vmatpush.bf16.msrb.mxu3 %v5999_v51  ;;  %2703 = vmatpush.bf16.msra.mxu1 %v6639_v54  ;;  %v6508_v51 = vld [vmem:[#allocation4 + $0x678] sm:$0xf0]  ;;  %v8434_v54 = vld [vmem:[#allocation6 + $0x18c] sm:$0xf0] }
 0x1fa   :  { %v6511_v61 = vor.u32 %v8331_v50, %v6508_v51  ;;  %v6899_v0 = vor.u32 %v8434_v54, %v6898_v52  ;;  %v8267_v12 = vld [vmem:[#allocation4 + $0x45c] sm:$0xf]  ;;  %v8394_v50 = vld [vmem:[#allocation6 + $0x4c] sm:$0xf0]  ;;  %v7058_v52 = vld [vmem:[#allocation6 + $0x2c0] sm:$0xf] }
 0x1fb   :  { %2667 = vmatpush.bf16.msrb.mxu2 %v5775_v55  ;;  %2689 = vmatpush.bf16.msra.mxu0 %v6415_v62  ;;  %v8275_v55 = vld [vmem:[#allocation4 + $0x49c] sm:$0xf] }
 0x1fc   :  { %v8323_v62 = vld [vmem:[#allocation4 + $0x61c] sm:$0xf]  ;;  %v6287_v1 = vor.u32 %v8275_v55, %v6284_v57 }
 0x1fd   :  { %2682 = vmatpush.bf16.msrb.mxu3 %v5967_v9  ;;  %2704 = vmatpush.bf16.msra.mxu1 %v6607_v10  ;;  %v2439_v6 = vpop.f32.mrf.mxu0  ;;  %v6787_v9 = vor.u32 %v8406_v59, %v6786_v58  ;;  %v7202_v10 = vld [vmem:[#allocation6 + $0x3e0] sm:$0xf]  ;;  %v6252_v13 = vld [vmem:[#allocation4 + $0x478] sm:$0xf0]  ;;  %v6479_v16 = vor.u32 %v8323_v62, %v6476_v2 }
 0x1fe   :  { %v6255_v22 = vor.u32 %v8267_v12, %v6252_v13  ;;  %v7042_v2 = vld [vmem:[#allocation6 + $0x2a0] sm:$0xf]  ;;  %v1004_v12 = vperm.slane %v9077_v25, 2 }
 0x1ff   :  { %2668 = vmatpush.bf16.msrb.mxu2 %v5743_v14  ;;  %2690 = vmatpush.bf16.msra.mxu0 %v6383_v15  ;;  %v6770_v14 = vld [vmem:[#allocation6 + $0x80] sm:$0xf]  ;;  %v8402_v15 = vld [vmem:[#allocation6 + $0x8c] sm:$0xf0] }
 0x200   :  { %2683 = vmatmul.bf16.vlgmr.msrb.gmra.mxu3 %v9042_v3  ;;  %v6803_v3 = vor.u32 %v8410_v45, %v6802_v44  ;;  %v6771_v23 = vor.u32 %v8402_v15, %v6770_v14  ;;  %v6850_v44 = vld [vmem:[#allocation6 + $0x120] sm:$0xf]  ;;  %v8422_v45 = vld [vmem:[#allocation6 + $0x12c] sm:$0xf0] }
 0x201   :  { %4289 = vmatpush.bf16.msra.mxu3 %v6947_v11  ;;  %2705 = vmatpush.bf16.msra.mxu1 %v6575_v30  ;;  %v8510_v11 = vld [vmem:[#allocation6 + $0x3ec] sm:$0xf0]  ;;  %v6851_v54 = vor.u32 %v8422_v45, %v6850_v44  ;;  %v7458_v6 = vld [vmem:[#allocation6 + $0x5e0] sm:$0xf]  ;;  %v2412_v44 = vadd.f32 %v9097_v53, %v1004_v12 }
 0x202   :  { %v7203_v18 = vor.u32 %v8510_v11, %v7202_v10  ;;  %v8506_v30 = vld [vmem:[#allocation6 + $0x3cc] sm:$0xf0]  ;;  %v7138_v15 = vld [vmem:[#allocation6 + $0x360] sm:$0xf] }
 0x203   :  { %2669 = vmatpush.bf16.msrb.mxu2 %v5711_v32  ;;  %2691 = vmatpush.bf16.msra.mxu0 %v6351_v33  ;;  %v9108_v21 = vpop.f32.mrf.mxu3  ;;  %v6220_v32 = vld [vmem:[#allocation4 + $0x438] sm:$0xf0]  ;;  %v6754_v33 = vld [vmem:[#allocation6 + $0x60] sm:$0xf]  ;;  %v7187_v40 = vor.u32 %v8506_v30, %v7186_v27  ;;  %v8542_v27 = vld [vmem:[#allocation6 + $0x4ec] sm:$0xf0] }
 0x204   :  { %v6755_v43 = vor.u32 %v8398_v34, %v6754_v33  ;;  %v2714_v33 = vmax.f32 %v9084_v38, 0.0  ;;  %v8462_v38 = vld [vmem:[#allocation6 + $0x26c] sm:$0xf0] }
 0x205   :  { %4290 = vmatpush.bf16.msra.mxu3 %v6931_v31  ;;  %2706 = vmatpush.bf16.msra.mxu1 %v6543_v47  ;;  %v8259_v31 = vld [vmem:[#allocation4 + $0x41c] sm:$0xf]  ;;  %v7170_v47 = vld [vmem:[#allocation6 + $0x3a0] sm:$0xf]  ;;  %v8454_v12 = vld [vmem:[#allocation6 + $0x22c] sm:$0xf0] }
 0x206   :  { %2670 = vmatmul.bf16.vlgmr.msrb.gmra.mxu2 %v9045_v26  ;;  %v2360_v26 = vadd.f32 %v9087_v46, %v1003_v60  ;;  %v6223_v42 = vor.u32 %v8259_v31, %v6220_v32  ;;  %v8418_v60 = vld [vmem:[#allocation6 + $0x10c] sm:$0xf0]  ;;  %v7442_v31 = vld [vmem:[#allocation6 + $0x5c0] sm:$0xf] }
 0x207   :  { %4276 = vmatpush.bf16.msra.mxu2 %v6819_v39  ;;  %2692 = vmatpush.bf16.msra.mxu0 %v6319_v49  ;;  %v6867_v39 = vor.u32 %v8426_v20, %v6866_v19  ;;  %v6738_v49 = vld [vmem:[#allocation6 + $0x40] sm:$0xf]  ;;  %v8570_v32 = vld [vmem:[#allocation6 + $0x5cc] sm:$0xf0] }
 0x208   :  { %v2373_v46 = vadd.f32 %v9082_v24, %v2360_v26  ;;  %v8502_v24 = vld [vmem:[#allocation6 + $0x3ac] sm:$0xf0]  ;;  %v6739_v59 = vor.u32 %v8394_v50, %v6738_v49  ;;  %v7026_v19 = vld [vmem:[#allocation6 + $0x280] sm:$0xf] }
 0x209   :  { %4291 = vmatpush.bf16.msra.mxu3 %v6915_v48  ;;  %2707 = vmatpush.bf16.msra.mxu1 %v6511_v61  ;;  %v7075_v48 = vor.u32 %v8478_v36, %v7074_v35  ;;  %v2463_v51 = vpop.f32.mrf.mxu2  ;;  %v7171_v57 = vor.u32 %v8502_v24, %v7170_v47  ;;  %v8498_v61 = vld [vmem:[#allocation6 + $0x38c] sm:$0xf0]  ;;  %v7314_v47 = vld [vmem:[#allocation6 + $0x4c0] sm:$0xf]  ;;  %v7443_v24 = vor.u32 %v8570_v32, %v7442_v31 }
 0x20a   :  { %v2386_v41 = vadd.f32 %v9092_v28, %v2373_v46  ;;  %v6834_v28 = vld [vmem:[#allocation6 + $0x100] sm:$0xf]  ;;  %v8494_v26 = vld [vmem:[#allocation6 + $0x36c] sm:$0xf0] }
 0x20b   :  { %4277 = vmatpush.bf16.msra.mxu2 %v6803_v3  ;;  %2693 = vmatpush.bf16.msra.mxu0 %v6287_v1  ;;  %v8474_v3 = vld [vmem:[#allocation6 + $0x2cc] sm:$0xf0]  ;;  %v2478_v58 = vpop.f32.mrf.mxu3  ;;  %v6835_v10 = vor.u32 %v8418_v60, %v6834_v28  ;;  %v7139_v46 = vor.u32 %v8494_v26, %v7138_v15  ;;  %v7426_v50 = vld [vmem:[#allocation6 + $0x5a0] sm:$0xf] }
 0x20c   :  { %v2399_v55 = vadd.f32 %v9090_v63, %v2386_v41  ;;  %v7059_v62 = vor.u32 %v8474_v3, %v7058_v52  ;;  %v8390_v1 = vld [vmem:[#allocation6 + $0x2c] sm:$0xf0]  ;;  %v1005_v63 = vperm.slane %v9077_v25, 3  ;;  %v7122_v41 = vld [vmem:[#allocation6 + $0x340] sm:$0xf]  ;;  %v9125_v52 = vpack.c.bf16 %v2714_v33, %v2714_v33 }
 0x20d   :  { %4292 = vmatpush.bf16.msra.mxu3 %v6899_v0  ;;  %2708 = vmatpush.bf16.msra.mxu1 %v6479_v16  ;;  %v6722_v0 = vld [vmem:[#allocation6 + $0x20] sm:$0xf]  ;;  %v9114_v4 = vpop.f32.mrf.mxu1  ;;  %v7043_v16 = vor.u32 %v8470_v5, %v7042_v2  ;;  %v8458_v60 = vld [vmem:[#allocation6 + $0x24c] sm:$0xf0] }
 0x20e   :  { %v2715_v11 = vmax.f32 %v2399_v55, 0.0  ;;  %v6723_v14 = vor.u32 %v8390_v1, %v6722_v0  ;;  %v2464_v30 = vadd.f32 %v2463_v51, %v1005_v63  ;;  %v8566_v51 = vld [vmem:[#allocation6 + $0x5ac] sm:$0xf0]  ;;  %v7106_v55 = vld [vmem:[#allocation6 + $0x320] sm:$0xf] }
 0x20f   :  { %4278 = vmatpush.bf16.msra.mxu2 %v6787_v9  ;;  %2694 = vmatpush.bf16.msra.mxu0 %v6255_v22  ;;  %v8574_v9 = vld [vmem:[#allocation6 + $0x5ec] sm:$0xf0]  ;;  %v6994_v58 = vld [vmem:[#allocation6 + $0x240] sm:$0xf] }
 0x210   :  { %2709 = vmatmul.bf16.vlgmr.msra.gmra.mxu1 %v9050_v56  ;;  %v7154_v56 = vld [vmem:[#allocation6 + $0x380] sm:$0xf]  ;;  %v7459_v20 = vor.u32 %v8574_v9, %v7458_v6  ;;  %v9120_v34 = vpack.c.bf16 %v2715_v11, %v2715_v11  ;;  %v2477_v49 = vadd.f32 %v9108_v21, %v2464_v30  ;;  %v8534_v21 = vld [vmem:[#allocation6 + $0x4ac] sm:$0xf0]  ;;  %v6995_v9 = vor.u32 %v8458_v60, %v6994_v58 }
 0x211   :  { %4293 = vmatpush.bf16.msra.mxu3 %v6883_v8  ;;  %4315 = vmatpush.bf16.msrb.mxu1 %v7203_v18  ;;  %v7155_v13 = vor.u32 %v8498_v61, %v7154_v56  ;;  %v6706_v8 = vld [vmem:[#allocation6] sm:$0xf]  ;;  %v8386_v18 = vld [vmem:[#allocation6 + $0xc] sm:$0xf0]  ;;  %v2465_v22 = vpop.f32.mrf.mxu2  ;;  %v7427_v61 = vor.u32 %v8566_v51, %v7426_v50 }
 0x212   :  { %v6707_v36 = vor.u32 %v8386_v18, %v6706_v8  ;;  %v7298_v56 = vld [vmem:[#allocation6 + $0x4a0] sm:$0xf]  ;;  %v8562_v0 = vld [vmem:[#allocation6 + $0x58c] sm:$0xf0] }
 0x213   :  { %4279 = vmatpush.bf16.msra.mxu2 %v6771_v23  ;;  %2695 = vmatpush.bf16.msra.mxu0 %v6223_v42  ;;  %v8466_v23 = vld [vmem:[#allocation6 + $0x28c] sm:$0xf0]  ;;  %v2489_v35 = vpop.f32.mrf.mxu0  ;;  %v7090_v63 = vld [vmem:[#allocation6 + $0x300] sm:$0xf] }
 0x214   :  { %v8490_v42 = vld [vmem:[#allocation6 + $0x34c] sm:$0xf0]  ;;  %v6978_v11 = vld [vmem:[#allocation6 + $0x220] sm:$0xf] }
 0x215   :  { %4294 = vmatpush.bf16.msra.mxu3 %v6867_v39  ;;  %4316 = vmatpush.bf16.msrb.mxu1 %v7187_v40  ;;  %v7027_v39 = vor.u32 %v8466_v23, %v7026_v19  ;;  %v2504_v45 = vpop.f32.mrf.mxu1  ;;  %v7123_v3 = vor.u32 %v8490_v42, %v7122_v41  ;;  %v7394_v26 = vld [vmem:[#allocation6 + $0x560] sm:$0xf]  ;;  %v6979_v19 = vor.u32 %v8454_v12, %v6978_v11  ;;  %v8450_v23 = vld [vmem:[#allocation6 + $0x20c] sm:$0xf0]  ;;  %v8440_v11 = vld [vmem:[#allocation6 + $0x1c4] sm:$0xf] }
 0x216   :  { %2696 = vmatmul.bf16.vlgmr.msra.gmra.mxu0 %v9054_v17  ;;  %v7330_v17 = vld [vmem:[#allocation6 + $0x4e0] sm:$0xf]  ;;  %v8554_v32 = vld [vmem:[#allocation6 + $0x54c] sm:$0xf0]  ;;  %v6932_v12 = vld [vmem:[#allocation6 + $0x1d0] sm:$0xf0] }
 0x217   :  { %4280 = vmatpush.bf16.msra.mxu2 %v6755_v43  ;;  %4302 = vmatpush.bf16.msrb.mxu0 %v7075_v48  ;;  %v7331_v40 = vor.u32 %v8542_v27, %v7330_v17  ;;  %v7010_v43 = vld [vmem:[#allocation6 + $0x260] sm:$0xf]  ;;  %v8538_v48 = vld [vmem:[#allocation6 + $0x4cc] sm:$0xf0] }
 0x218   :  { %v7011_v53 = vor.u32 %v8462_v38, %v7010_v43  ;;  %v7315_v28 = vor.u32 %v8538_v48, %v7314_v47  ;;  %v6962_v22 = vld [vmem:[#allocation6 + $0x200] sm:$0xf]  ;;  %v8526_v27 = vld [vmem:[#allocation6 + $0x46c] sm:$0xf0] }
 0x219   :  { %4295 = vmatpush.bf16.msra.mxu3 %v6851_v54  ;;  %4317 = vmatpush.bf16.msrb.mxu1 %v7171_v57  ;;  %v2490_v54 = vadd.f32 %v2489_v35, %v2477_v49  ;;  %v8486_v57 = vld [vmem:[#allocation6 + $0x32c] sm:$0xf0]  ;;  %v7266_v17 = vld [vmem:[#allocation6 + $0x460] sm:$0xf] }
 0x21a   :  { %v7107_v2 = vor.u32 %v8486_v57, %v7106_v55  ;;  %v7378_v31 = vld [vmem:[#allocation6 + $0x540] sm:$0xf]  ;;  %v8522_v41 = vld [vmem:[#allocation6 + $0x44c] sm:$0xf0] }
 0x21b   :  { %4281 = vmatpush.bf16.msra.mxu2 %v6739_v59  ;;  %4303 = vmatpush.bf16.msrb.mxu0 %v7059_v62  ;;  %v2425_v59 = vadd.f32 %v9094_v29, %v2412_v44  ;;  %v7410_v62 = vld [vmem:[#allocation6 + $0x580] sm:$0xf]  ;;  %v2491_v5 = vpop.f32.mrf.mxu0  ;;  %v2503_v6 = vadd.f32 %v9114_v4, %v2490_v54  ;;  %v7299_v29 = vor.u32 %v8534_v21, %v7298_v56  ;;  %v8550_v38 = vld [vmem:[#allocation6 + $0x52c] sm:$0xf0]  ;;  %v8444_v56 = vld [vmem:[#allocation6 + $0x1e4] sm:$0xf] }
 0x21c   :  { %v7411_v15 = vor.u32 %v8562_v0, %v7410_v62  ;;  %v7586_v33 = vld [vmem:[#allocation6 + $0x6e0] sm:$0xf]  ;;  %v7379_v42 = vor.u32 %v8554_v32, %v7378_v31  ;;  %v8602_v48 = vld [vmem:[#allocation6 + $0x6cc] sm:$0xf0]  ;;  %v6948_v21 = vld [vmem:[#allocation6 + $0x1f0] sm:$0xf0] }
 0x21d   :  { %4296 = vmatpush.bf16.msra.mxu3 %v6835_v10  ;;  %4318 = vmatpush.bf16.msrb.mxu1 %v7155_v13  ;;  %v2438_v1 = vadd.f32 %v9103_v37, %v2425_v59  ;;  %v8482_v10 = vld [vmem:[#allocation6 + $0x30c] sm:$0xf0]  ;;  %v7282_v13 = vld [vmem:[#allocation6 + $0x480] sm:$0xf]  ;;  %v2717_v18 = vmax.f32 %v2503_v6, 0.0 }
 0x21e   :  { %v7091_v37 = vor.u32 %v8482_v10, %v7090_v63  ;;  %v7362_v43 = vld [vmem:[#allocation6 + $0x520] sm:$0xf]  ;;  %v8518_v54 = vld [vmem:[#allocation6 + $0x42c] sm:$0xf0]  ;;  %v8404_v31 = vld [vmem:[#allocation6 + $0xa4] sm:$0xf] }
 0x21f   :  { %4282 = vmatpush.bf16.msra.mxu2 %v6723_v14  ;;  %4304 = vmatpush.bf16.msrb.mxu0 %v7043_v16  ;;  %v8530_v14 = vld [vmem:[#allocation6 + $0x48c] sm:$0xf0]  ;;  %v2451_v8 = vadd.f32 %v9100_v7, %v2438_v1  ;;  %v9134_v7 = vpack.c.bf16 %v2717_v18, %v2717_v18  ;;  %v7570_v47 = vld [vmem:[#allocation6 + $0x6c0] sm:$0xf]  ;;  %v8412_v1 = vld [vmem:[#allocation6 + $0xe4] sm:$0xf] }
 0x220   :  { %4297 = vmatmul.bf16.vlgmr.msra.gmra.mxu3 %v9120_v34  ;;  %v8558_v16 = vld [vmem:[#allocation6 + $0x56c] sm:$0xf0]  ;;  %v7571_v55 = vor.u32 %v8602_v48, %v7570_v47  ;;  %v7554_v58 = vld [vmem:[#allocation6 + $0x6a0] sm:$0xf]  ;;  %v6804_v18 = vld [vmem:[#allocation6 + $0xd0] sm:$0xf0] }
 0x221   :  { %4341 = vmatpush.bf16.msrb.mxu3 %v7459_v20  ;;  %4319 = vmatpush.bf16.msrb.mxu1 %v7139_v46  ;;  %v7283_v20 = vor.u32 %v8530_v14, %v7282_v13  ;;  %v7395_v30 = vor.u32 %v8558_v16, %v7394_v26  ;;  %v8606_v46 = vld [vmem:[#allocation6 + $0x6ec] sm:$0xf0]  ;;  %v2716_v35 = vmax.f32 %v2451_v8, 0.0  ;;  %v7218_v62 = vld [vmem:[#allocation6 + $0x400] sm:$0xf] }
 0x222   :  { %v7587_v44 = vor.u32 %v8606_v46, %v7586_v33  ;;  %v8546_v57 = vld [vmem:[#allocation6 + $0x50c] sm:$0xf0]  ;;  %v7538_v63 = vld [vmem:[#allocation6 + $0x680] sm:$0xf]  ;;  %v8408_v16 = vld [vmem:[#allocation6 + $0xc4] sm:$0xf] }
 0x223   :  { %4283 = vmatpush.bf16.msra.mxu2 %v6707_v36  ;;  %4305 = vmatpush.bf16.msrb.mxu0 %v7027_v39  ;;  %v9132_v4 = vpop.f32.mrf.mxu3  ;;  %v6963_v36 = vor.u32 %v8450_v23, %v6962_v22  ;;  %v7267_v39 = vor.u32 %v8526_v27, %v7266_v17  ;;  %v9138_v51 = vpack.c.bf16 %v2716_v35, %v2716_v35  ;;  %v8598_v59 = vld [vmem:[#allocation6 + $0x6ac] sm:$0xf0]  ;;  %v8436_v17 = vld [vmem:[#allocation6 + $0x1a4] sm:$0xf]  ;;  %v6916_v27 = vld [vmem:[#allocation6 + $0x1b0] sm:$0xf0] }
 0x224   :  { %v8514_v0 = vld [vmem:[#allocation6 + $0x40c] sm:$0xf0]  ;;  %v7555_v5 = vor.u32 %v8598_v59, %v7554_v58  ;;  %v6788_v32 = vld [vmem:[#allocation6 + $0xb0] sm:$0xf0]  ;;  %v6919_v35 = vor.u32 %v8436_v17, %v6916_v27  ;;  %v8400_v47 = vld [vmem:[#allocation6 + $0x84] sm:$0xf] }
 0x225   :  { %4342 = vmatpush.bf16.msrb.mxu3 %v7443_v24  ;;  %4320 = vmatpush.bf16.msrb.mxu1 %v7123_v3  ;;  %v1006_v24 = vperm.slane %v9077_v25, 4  ;;  %v7234_v3 = vld [vmem:[#allocation6 + $0x420] sm:$0xf]  ;;  %v8594_v10 = vld [vmem:[#allocation6 + $0x68c] sm:$0xf0]  ;;  %v7219_v14 = vor.u32 %v8514_v0, %v7218_v62 }
 0x226   :  { %4284 = vmatmul.bf16.vlgmr.msra.gmra.mxu2 %v9125_v52  ;;  %v8590_v22 = vld [vmem:[#allocation6 + $0x66c] sm:$0xf0]  ;;  %v8388_v27 = vld [vmem:[#allocation6 + $0x24] sm:$0xf] }
 0x227   :  { %4328 = vmatpush.bf16.msrb.mxu2 %v7331_v40  ;;  %4306 = vmatpush.bf16.msrb.mxu0 %v7011_v53  ;;  %v7250_v40 = vld [vmem:[#allocation6 + $0x440] sm:$0xf]  ;;  %v7363_v53 = vor.u32 %v8550_v38, %v7362_v43  ;;  %v6791_v38 = vor.u32 %v8404_v31, %v6788_v32  ;;  %v8634_v58 = vld [vmem:[#allocation6 + $0x7cc] sm:$0xf0] }
 0x228   :  { %v7251_v50 = vor.u32 %v8522_v41, %v7250_v40  ;;  %v8432_v40 = vld [vmem:[#allocation6 + $0x184] sm:$0xf]  ;;  %v6900_v41 = vld [vmem:[#allocation6 + $0x190] sm:$0xf0]  ;;  %v7714_v43 = vld [vmem:[#allocation6 + $0x7e0] sm:$0xf] }
 0x229   :  { %4343 = vmatpush.bf16.msrb.mxu3 %v7427_v61  ;;  %4321 = vmatpush.bf16.msrb.mxu1 %v7107_v2  ;;  %v2515_v45 = vpop.f32.mrf.mxu2  ;;  %v7235_v61 = vor.u32 %v8518_v54, %v7234_v3  ;;  %v7490_v3 = vld [vmem:[#allocation6 + $0x620] sm:$0xf]  ;;  %v8582_v54 = vld [vmem:[#allocation6 + $0x62c] sm:$0xf0] }
 0x22a   :  { %v2516_v25 = vadd.f32 %v2515_v45, %v1006_v24 }
 0x22b   :  { %4329 = vmatpush.bf16.msrb.mxu2 %v7315_v28  ;;  %4307 = vmatpush.bf16.msrb.mxu0 %v6995_v9  ;;  %v2530_v49 = vpop.f32.mrf.mxu3  ;;  %v7346_v28 = vld [vmem:[#allocation6 + $0x500] sm:$0xf]  ;;  %v6820_v9 = vld [vmem:[#allocation6 + $0xf0] sm:$0xf0] }
 0x22c   :  { %v7347_v2 = vor.u32 %v8546_v57, %v7346_v28  ;;  %v2529_v13 = vadd.f32 %v9132_v4, %v2516_v25  ;;  %v6823_v26 = vor.u32 %v8412_v1, %v6820_v9  ;;  %v6807_v4 = vor.u32 %v8408_v16, %v6804_v18  ;;  %v6772_v49 = vld [vmem:[#allocation6 + $0x90] sm:$0xf0]  ;;  %v7698_v57 = vld [vmem:[#allocation6 + $0x7c0] sm:$0xf] }
 0x22d   :  { %4344 = vmatpush.bf16.msrb.mxu3 %v7411_v15  ;;  %4322 = vmatpush.bf16.msrb.mxu1 %v7091_v37  ;;  %v2554_v60 = vpop.f32.mrf.mxu1  ;;  %v7539_v37 = vor.u32 %v8594_v10, %v7538_v63  ;;  %v6884_v28 = vld [vmem:[#allocation6 + $0x170] sm:$0xf0]  ;;  %v6775_v59 = vor.u32 %v8400_v47, %v6772_v49  ;;  %v7491_v25 = vor.u32 %v8582_v54, %v7490_v3  ;;  %v7474_v1 = vld [vmem:[#allocation6 + $0x600] sm:$0xf]  ;;  %v8384_v47 = vld [vmem:[#allocation6 + $0x4] sm:$0xf] }
 0x22e   :  { %v7076_v9 = vld [vmem:[#allocation6 + $0x2f0] sm:$0xf0]  ;;  %v8464_v54 = vld [vmem:[#allocation6 + $0x284] sm:$0xf] }
 0x22f   :  { %4330 = vmatpush.bf16.msrb.mxu2 %v7299_v29  ;;  %4308 = vmatpush.bf16.msrb.mxu0 %v6979_v19  ;;  %v6951_v29 = vor.u32 %v8444_v56, %v6948_v21  ;;  %v6935_v19 = vor.u32 %v8440_v11, %v6932_v12  ;;  %v8424_v56 = vld [vmem:[#allocation6 + $0x144] sm:$0xf]  ;;  %v6868_v21 = vld [vmem:[#allocation6 + $0x150] sm:$0xf0] }
 0x230   :  { %4323 = vmatmul.bf16.vlgmr.msrb.gmra.mxu1 %v9134_v7  ;;  %v8392_v12 = vld [vmem:[#allocation6 + $0x44] sm:$0xf]  ;;  %v6852_v16 = vld [vmem:[#allocation6 + $0x130] sm:$0xf0] }
 0x231   :  { %4345 = vmatpush.bf16.msrb.mxu3 %v7395_v30  ;;  %v2517_v6 = vpop.f32.mrf.mxu2  ;;  %v7332_v3 = vld [vmem:[#allocation6 + $0x4f0] sm:$0xf0] }
 0x232   :  { %v8476_v6 = vld [vmem:[#allocation6 + $0x2e4] sm:$0xf] }
 0x233   :  { %4331 = vmatpush.bf16.msrb.mxu2 %v7283_v20  ;;  %4309 = vmatpush.bf16.msrb.mxu0 %v6963_v36  ;;  %v2541_v15 = vpop.f32.mrf.mxu0  ;;  %v7522_v20 = vld [vmem:[#allocation6 + $0x660] sm:$0xf] }
 0x234   :  { %v2542_v8 = vadd.f32 %v2541_v15, %v2529_v13  ;;  %v7523_v33 = vor.u32 %v8590_v22, %v7522_v20  ;;  %v7506_v36 = vld [vmem:[#allocation6 + $0x640] sm:$0xf]  ;;  %v6740_v13 = vld [vmem:[#allocation6 + $0x50] sm:$0xf0]  ;;  %v8420_v15 = vld [vmem:[#allocation6 + $0x124] sm:$0xf] }
 0x235   :  { %4346 = vmatpush.bf16.msrb.mxu3 %v7379_v42  ;;  %v2556_v23 = vpop.f32.mrf.mxu1  ;;  %v8626_v20 = vld [vmem:[#allocation6 + $0x78c] sm:$0xf0]  ;;  %v9150_v22 = vld [vmem:[%s9311_s6] sm:$0xff]  ;;  %v6743_v17 = vor.u32 %v8392_v12, %v6740_v13  ;;  %v6855_v32 = vor.u32 %v8420_v15, %v6852_v16  ;;  %v7460_v12 = vld [vmem:[#allocation6 + $0x5f0] sm:$0xf0] }
 0x236   :  { %4310 = vmatmul.bf16.vlgmr.msrb.gmra.mxu0 %v9138_v51  ;;  %v2555_v30 = vadd.f32 %v2554_v60, %v2542_v8  ;;  %v6756_v60 = vld [vmem:[#allocation6 + $0x70] sm:$0xf0]  ;;  %v1007_v23 = vperm.slane %v9150_v22, 5  ;;  %v8532_v13 = vld [vmem:[#allocation6 + $0x4a4] sm:$0xf] }
 0x237   :  { %4332 = vmatpush.bf16.msrb.mxu2 %v7267_v39  ;;  %4354 = vmatpush.bf16.msra.mxu0 %v7587_v44  ;;  %v8586_v39 = vld [vmem:[#allocation6 + $0x64c] sm:$0xf0]  ;;  %v7060_v8 = vld [vmem:[#allocation6 + $0x2d0] sm:$0xf0] }
 0x238   :  { %v2718_v46 = vmax.f32 %v2555_v30, 0.0  ;;  %v8638_v44 = vld [vmem:[#allocation6 + $0x7ec] sm:$0xf0]  ;;  %v7507_v48 = vor.u32 %v8586_v39, %v7506_v36  ;;  %v6724_v30 = vld [vmem:[#allocation6 + $0x30] sm:$0xf0] }
 0x239   :  { %4347 = vmatpush.bf16.msrb.mxu3 %v7363_v53  ;;  %v7715_v24 = vor.u32 %v8638_v44, %v7714_v43  ;;  %v8428_v53 = vld [vmem:[#allocation6 + $0x164] sm:$0xf]  ;;  %v7044_v39 = vld [vmem:[#allocation6 + $0x2b0] sm:$0xf0] }
 0x23a   :  { %v9142_v42 = vpack.c.bf16 %v2718_v46, %v2718_v46  ;;  %v6887_v0 = vor.u32 %v8428_v53, %v6884_v28  ;;  %v6836_v46 = vld [vmem:[#allocation6 + $0x110] sm:$0xf0]  ;;  %v8468_v36 = vld [vmem:[#allocation6 + $0x2a4] sm:$0xf] }
 0x23b   :  { %4333 = vmatpush.bf16.msrb.mxu2 %v7251_v50  ;;  %4355 = vmatpush.bf16.msra.mxu0 %v7571_v55  ;;  %v2543_v45 = vpop.f32.mrf.mxu0  ;;  %v6903_v50 = vor.u32 %v8432_v40, %v6900_v41  ;;  %v8396_v55 = vld [vmem:[#allocation6 + $0x64] sm:$0xf]  ;;  %v7650_v40 = vld [vmem:[#allocation6 + $0x760] sm:$0xf]  ;;  %v8622_v41 = vld [vmem:[#allocation6 + $0x76c] sm:$0xf0] }
 0x23c   :  { %4367 = vmatpush.bf16.msra.mxu1 %v7715_v24  ;;  %v6759_v10 = vor.u32 %v8396_v55, %v6756_v60  ;;  %v7651_v43 = vor.u32 %v8622_v41, %v7650_v40  ;;  %v6727_v45 = vor.u32 %v8388_v27, %v6724_v30  ;;  %v8540_v24 = vld [vmem:[#allocation6 + $0x4e4] sm:$0xf]  ;;  %v7028_v53 = vld [vmem:[#allocation6 + $0x290] sm:$0xf0]  ;;  %v7634_v55 = vld [vmem:[#allocation6 + $0x740] sm:$0xf] }
 0x23d   :  { %4348 = vmatpush.bf16.msrb.mxu3 %v7347_v2  ;;  %v8578_v2 = vld [vmem:[#allocation6 + $0x60c] sm:$0xf0]  ;;  %v7300_v15 = vld [vmem:[#allocation6 + $0x4b0] sm:$0xf0] }
 0x23e   :  { %v7475_v11 = vor.u32 %v8578_v2, %v7474_v1  ;;  %v8460_v1 = vld [vmem:[#allocation6 + $0x264] sm:$0xf]  ;;  %v7012_v2 = vld [vmem:[#allocation6 + $0x270] sm:$0xf0]  ;;  %v7303_v30 = vor.u32 %v8532_v13, %v7300_v15 }
 0x23f   :  { %4334 = vmatpush.bf16.msrb.mxu2 %v7235_v61  ;;  %4356 = vmatpush.bf16.msra.mxu0 %v7555_v5  ;;  %v7699_v61 = vor.u32 %v8634_v58, %v7698_v57  ;;  %v7682_v5 = vld [vmem:[#allocation6 + $0x7a0] sm:$0xf]  ;;  %v8618_v57 = vld [vmem:[#allocation6 + $0x74c] sm:$0xf0]  ;;  %v6996_v16 = vld [vmem:[#allocation6 + $0x250] sm:$0xf0] }
 0x240   :  { %v7140_v15 = vld [vmem:[#allocation6 + $0x370] sm:$0xf0] }
 0x241   :  { %4393 = vmatpush.bf16.msra.mxu3 %v6951_v29  ;;  %4368 = vmatpush.bf16.msra.mxu1 %v7699_v61  ;;  %v8630_v29 = vld [vmem:[#allocation6 + $0x7ac] sm:$0xf0] }
 0x242   :  { %v7683_v63 = vor.u32 %v8630_v29, %v7682_v5 }
 0x243   :  { %4335 = vmatpush.bf16.msrb.mxu2 %v7219_v14  ;;  %4357 = vmatpush.bf16.msra.mxu0 %v7539_v37  ;;  %v9145_v62 = vpop.f32.mrf.mxu3  ;;  %v6871_v14 = vor.u32 %v8424_v56, %v6868_v21  ;;  %v8472_v37 = vld [vmem:[#allocation6 + $0x2c4] sm:$0xf]  ;;  %v7335_v56 = vor.u32 %v8540_v24, %v7332_v3  ;;  %v7268_v24 = vld [vmem:[#allocation6 + $0x470] sm:$0xf0] }
 0x244   :  { %v8536_v21 = vld [vmem:[#allocation6 + $0x4c4] sm:$0xf] }
 0x245   :  { %4394 = vmatpush.bf16.msra.mxu3 %v6935_v19  ;;  %4369 = vmatpush.bf16.msra.mxu1 %v7683_v63  ;;  %v7666_v19 = vld [vmem:[#allocation6 + $0x780] sm:$0xf]  ;;  %v8448_v3 = vld [vmem:[#allocation6 + $0x204] sm:$0xf] }
 0x246   :  { %4336 = vmatmul.bf16.vlgmr.msrb.gmra.mxu2 %v9142_v42 }
 0x247   :  { %4380 = vmatpush.bf16.msra.mxu2 %v6823_v26  ;;  %4358 = vmatpush.bf16.msra.mxu0 %v7523_v33  ;;  %v7079_v26 = vor.u32 %v8476_v6, %v7076_v9  ;;  %v8416_v33 = vld [vmem:[#allocation6 + $0x104] sm:$0xf]  ;;  %v7618_v6 = vld [vmem:[#allocation6 + $0x720] sm:$0xf]  ;;  %v8614_v9 = vld [vmem:[#allocation6 + $0x72c] sm:$0xf0] }
 0x248   :  { %v6839_v49 = vor.u32 %v8416_v33, %v6836_v46  ;;  %v7619_v63 = vor.u32 %v8614_v9, %v7618_v6  ;;  %v7204_v33 = vld [vmem:[#allocation6 + $0x3f0] sm:$0xf0]  ;;  %v8556_v9 = vld [vmem:[#allocation6 + $0x564] sm:$0xf] }
 0x249   :  { %4395 = vmatpush.bf16.msra.mxu3 %v6919_v35  ;;  %v2567_v18 = vpop.f32.mrf.mxu2  ;;  %v7063_v35 = vor.u32 %v8472_v37, %v7060_v8  ;;  %v7602_v8 = vld [vmem:[#allocation6 + $0x700] sm:$0xf] }
 0x24b   :  { %4381 = vmatpush.bf16.msra.mxu2 %v6807_v4  ;;  %4359 = vmatpush.bf16.msra.mxu0 %v7507_v48  ;;  %v7667_v4 = vor.u32 %v8626_v20, %v7666_v19  ;;  %v2582_v31 = vpop.f32.mrf.mxu3  ;;  %v6708_v48 = vld [vmem:[#allocation6 + $0x10] sm:$0xf0]  ;;  %v8568_v20 = vld [vmem:[#allocation6 + $0x5c4] sm:$0xf] }
 0x24c   :  { %v6711_v58 = vor.u32 %v8384_v47, %v6708_v48  ;;  %v7428_v47 = vld [vmem:[#allocation6 + $0x5b0] sm:$0xf0]  ;;  %v8524_v48 = vld [vmem:[#allocation6 + $0x464] sm:$0xf] }
 0x24d   :  { %4396 = vmatpush.bf16.msra.mxu3 %v6903_v50  ;;  %4370 = vmatpush.bf16.msra.mxu1 %v7667_v4  ;;  %v2606_v44 = vpop.f32.mrf.mxu1  ;;  %v7047_v50 = vor.u32 %v8468_v36, %v7044_v39  ;;  %v8528_v4 = vld [vmem:[#allocation6 + $0x484] sm:$0xf]  ;;  %v6980_v39 = vld [vmem:[#allocation6 + $0x230] sm:$0xf0] }
 0x24e   :  { %v8452_v36 = vld [vmem:[#allocation6 + $0x224] sm:$0xf] }
 0x24f   :  { %4382 = vmatpush.bf16.msra.mxu2 %v6791_v38  ;;  %4360 = vmatpush.bf16.msra.mxu0 %v7491_v25  ;;  %v2568_v38 = vadd.f32 %v2567_v18, %v1007_v23  ;;  %v7031_v25 = vor.u32 %v8464_v54, %v7028_v53  ;;  %v8610_v18 = vld [vmem:[#allocation6 + $0x70c] sm:$0xf0]  ;;  %v7444_v23 = vld [vmem:[#allocation6 + $0x5d0] sm:$0xf0]  ;;  %v8500_v53 = vld [vmem:[#allocation6 + $0x3a4] sm:$0xf] }
 0x250   :  { %v7447_v41 = vor.u32 %v8568_v20, %v7444_v23  ;;  %v6964_v54 = vld [vmem:[#allocation6 + $0x210] sm:$0xf0] }
 0x251   :  { %4397 = vmatpush.bf16.msra.mxu3 %v6887_v0  ;;  %4371 = vmatpush.bf16.msra.mxu1 %v7651_v43  ;;  %v2569_v28 = vpop.f32.mrf.mxu2  ;;  %v2581_v60 = vadd.f32 %v9145_v62, %v2568_v38  ;;  %v7316_v0 = vld [vmem:[#allocation6 + $0x4d0] sm:$0xf0]  ;;  %v8572_v62 = vld [vmem:[#allocation6 + $0x5e4] sm:$0xf] }
 0x252   :  { %v7463_v19 = vor.u32 %v8572_v62, %v7460_v12  ;;  %v8564_v43 = vld [vmem:[#allocation6 + $0x5a4] sm:$0xf]  ;;  %v1008_v62 = vperm.slane %v9150_v22, 6  ;;  %v7220_v20 = vld [vmem:[#allocation6 + $0x410] sm:$0xf0] }
 0x253   :  { %4383 = vmatpush.bf16.msra.mxu2 %v6775_v59  ;;  %4361 = vmatpush.bf16.msra.mxu0 %v7475_v11  ;;  %v7635_v59 = vor.u32 %v8618_v57, %v7634_v55  ;;  %v2593_v61 = vpop.f32.mrf.mxu0  ;;  %v7319_v11 = vor.u32 %v8536_v21, %v7316_v0  ;;  %v7172_v55 = vld [vmem:[#allocation6 + $0x3b0] sm:$0xf0]  ;;  %v7431_v57 = vor.u32 %v8564_v43, %v7428_v47  ;;  %v6810_v43 = vld [vmem:[#allocation6 + $0xc8] sm:$0xf]  ;;  %v8484_v47 = vld [vmem:[#allocation6 + $0x324] sm:$0xf] }
 0x254   :  { %v2594_v5 = vadd.f32 %v2593_v61, %v2581_v60  ;;  %v8560_v60 = vld [vmem:[#allocation6 + $0x584] sm:$0xf]  ;;  %v6967_v21 = vor.u32 %v8448_v3, %v6964_v54  ;;  %v7252_v61 = vld [vmem:[#allocation6 + $0x450] sm:$0xf0] }
 0x255   :  { %4398 = vmatpush.bf16.msra.mxu3 %v6871_v14  ;;  %4372 = vmatpush.bf16.msra.mxu1 %v7635_v59  ;;  %v2608_v29 = vpop.f32.mrf.mxu1  ;;  %v7015_v14 = vor.u32 %v8460_v1, %v7012_v2  ;;  %v7271_v59 = vor.u32 %v8524_v48, %v7268_v24  ;;  %v8496_v1 = vld [vmem:[#allocation6 + $0x384] sm:$0xf]  ;;  %v7156_v2 = vld [vmem:[#allocation6 + $0x390] sm:$0xf0] }
 0x256   :  { %v7396_v29 = vld [vmem:[#allocation6 + $0x570] sm:$0xf0] }
 0x257   :  { %4384 = vmatpush.bf16.msra.mxu2 %v6759_v10  ;;  %4406 = vmatpush.bf16.msrb.mxu0 %v7079_v26  ;;  %v2607_v10 = vadd.f32 %v2606_v44, %v2594_v5  ;;  %v8456_v26 = vld [vmem:[#allocation6 + $0x244] sm:$0xf]  ;;  %v7399_v13 = vor.u32 %v8556_v9, %v7396_v29  ;;  %v7108_v48 = vld [vmem:[#allocation6 + $0x330] sm:$0xf0]  ;;  %v6938_v9 = vld [vmem:[#allocation6 + $0x1c8] sm:$0xf] }
 0x258   :  { %v6999_v31 = vor.u32 %v8456_v26, %v6996_v16  ;;  %v8504_v44 = vld [vmem:[#allocation6 + $0x3c4] sm:$0xf]  ;;  %v7111_v3 = vor.u32 %v8484_v47, %v7108_v48  ;;  %v8443_v29 = vld [vmem:[#allocation6 + $0x1d4] sm:$0xf0]  ;;  %v7524_v47 = vld [vmem:[#allocation6 + $0x670] sm:$0xf0] }
 0x259   :  { %4399 = vmatpush.bf16.msra.mxu3 %v6855_v32  ;;  %4373 = vmatpush.bf16.msra.mxu1 %v7619_v63  ;;  %v2719_v37 = vmax.f32 %v2607_v10, 0.0  ;;  %v8508_v32 = vld [vmem:[#allocation6 + $0x3e4] sm:$0xf]  ;;  %v7159_v63 = vor.u32 %v8496_v1, %v7156_v2  ;;  %v6730_v48 = vld [vmem:[#allocation6 + $0x28] sm:$0xf] }
 0x25a   :  { %v7207_v40 = vor.u32 %v8508_v32, %v7204_v33  ;;  %v8516_v10 = vld [vmem:[#allocation6 + $0x424] sm:$0xf]  ;;  %v7124_v32 = vld [vmem:[#allocation6 + $0x350] sm:$0xf0] }
 0x25b   :  { %4385 = vmatpush.bf16.msra.mxu2 %v6743_v17  ;;  %4407 = vmatpush.bf16.msrb.mxu0 %v7063_v35  ;;  %v7603_v17 = vor.u32 %v8610_v18, %v7602_v8  ;;  %v9155_v27 = vpack.c.bf16 %v2719_v37, %v2719_v37  ;;  %v2595_v46 = vpop.f32.mrf.mxu0  ;;  %v7284_v35 = vld [vmem:[#allocation6 + $0x490] sm:$0xf0]  ;;  %v8552_v16 = vld [vmem:[#allocation6 + $0x544] sm:$0xf] }
 0x25c   :  { %v7287_v38 = vor.u32 %v8528_v4, %v7284_v35  ;;  %v7380_v37 = vld [vmem:[#allocation6 + $0x550] sm:$0xf0]  ;;  %v8548_v35 = vld [vmem:[#allocation6 + $0x524] sm:$0xf] }
 0x25d   :  { %4400 = vmatpush.bf16.msra.mxu3 %v6839_v49  ;;  %4374 = vmatpush.bf16.msra.mxu1 %v7603_v17  ;;  %v6983_v49 = vor.u32 %v8452_v36, %v6980_v39  ;;  %v6826_v17 = vld [vmem:[#allocation6 + $0xe8] sm:$0xf]  ;;  %v7383_v4 = vor.u32 %v8552_v16, %v7380_v37  ;;  %v7364_v36 = vld [vmem:[#allocation6 + $0x530] sm:$0xf0]  ;;  %v8596_v16 = vld [vmem:[#allocation6 + $0x6a4] sm:$0xf] }
 0x25e   :  { %4349 = vmatmul.bf16.vlgmr.msrb.gmra.mxu3 %v9155_v27  ;;  %v6922_v37 = vld [vmem:[#allocation6 + $0x1a8] sm:$0xf] }
 0x25f   :  { %4386 = vmatpush.bf16.msra.mxu2 %v6727_v45  ;;  %4408 = vmatpush.bf16.msrb.mxu0 %v7047_v50  ;;  %v7188_v45 = vld [vmem:[#allocation6 + $0x3d0] sm:$0xf0] }
 0x260   :  { %v7191_v50 = vor.u32 %v8504_v44, %v7188_v45  ;;  %v8411_v44 = vld [vmem:[#allocation6 + $0xd4] sm:$0xf0] }
 0x261   :  { %4445 = vmatpush.bf16.msrb.mxu3 %v7463_v19  ;;  %4419 = vmatpush.bf16.msrb.mxu1 %v7207_v40  ;;  %v8512_v19 = vld [vmem:[#allocation6 + $0x404] sm:$0xf] }
 0x262   :  { %v7223_v46 = vor.u32 %v8512_v19, %v7220_v20  ;;  %v6762_v19 = vld [vmem:[#allocation6 + $0x68] sm:$0xf]  ;;  %v8399_v20 = vld [vmem:[#allocation6 + $0x74] sm:$0xf0] }
 0x263   :  { %4387 = vmatpush.bf16.msra.mxu2 %v6711_v58  ;;  %4409 = vmatpush.bf16.msrb.mxu0 %v7031_v25  ;;  %v2632_v28 = vpop.f32.mrf.mxu3  ;;  %v7175_v58 = vor.u32 %v8500_v53, %v7172_v55  ;;  %v8520_v25 = vld [vmem:[#allocation6 + $0x444] sm:$0xf]  ;;  %v6811_v53 = vor.u32 %v8411_v44, %v6810_v43  ;;  %v6890_v44 = vld [vmem:[#allocation6 + $0x168] sm:$0xf] }
 0x264   :  { %v7255_v6 = vor.u32 %v8520_v25, %v7252_v61  ;;  %v8604_v55 = vld [vmem:[#allocation6 + $0x6e4] sm:$0xf]  ;;  %v7092_v61 = vld [vmem:[#allocation6 + $0x310] sm:$0xf0] }
 0x265   :  { %4446 = vmatpush.bf16.msrb.mxu3 %v7447_v41  ;;  %4420 = vmatpush.bf16.msrb.mxu1 %v7191_v50  ;;  %v7348_v50 = vld [vmem:[#allocation6 + $0x510] sm:$0xf0]  ;;  %v8480_v25 = vld [vmem:[#allocation6 + $0x304] sm:$0xf] }
 0x266   :  { %4388 = vmatmul.bf16.vlgmr.msra.gmra.mxu2 %v9125_v52  ;;  %v8588_v43 = vld [vmem:[#allocation6 + $0x664] sm:$0xf] }
 0x267   :  { %4432 = vmatpush.bf16.msrb.mxu2 %v7335_v56  ;;  %4410 = vmatpush.bf16.msrb.mxu0 %v7015_v14  ;;  %v7412_v56 = vld [vmem:[#allocation6 + $0x590] sm:$0xf0]  ;;  %v8492_v14 = vld [vmem:[#allocation6 + $0x364] sm:$0xf] }
 0x268   :  { %v7415_v0 = vor.u32 %v8560_v60, %v7412_v56  ;;  %v7143_v8 = vor.u32 %v8492_v14, %v7140_v15  ;;  %v6794_v60 = vld [vmem:[#allocation6 + $0xa8] sm:$0xf]  ;;  %v8407_v56 = vld [vmem:[#allocation6 + $0xb4] sm:$0xf0]  ;;  %v6939_v14 = vor.u32 %v8443_v29, %v6938_v9  ;;  %v8580_v29 = vld [vmem:[#allocation6 + $0x624] sm:$0xf] }
 0x269   :  { %4447 = vmatpush.bf16.msrb.mxu3 %v7431_v57  ;;  %4421 = vmatpush.bf16.msrb.mxu1 %v7175_v58  ;;  %v2619_v5 = vpop.f32.mrf.mxu2  ;;  %v6954_v57 = vld [vmem:[#allocation6 + $0x1e8] sm:$0xf]  ;;  %v8447_v58 = vld [vmem:[#allocation6 + $0x1f4] sm:$0xf0] }
 0x26a   :  { %v2620_v23 = vadd.f32 %v2619_v5, %v1008_v62  ;;  %v6955_v1 = vor.u32 %v8447_v58, %v6954_v57  ;;  %v6795_v5 = vor.u32 %v8407_v56, %v6794_v60  ;;  %v8403_v62 = vld [vmem:[#allocation6 + $0x94] sm:$0xf0]  ;;  %v6874_v57 = vld [vmem:[#allocation6 + $0x148] sm:$0xf] }
 0x26b   :  { %4433 = vmatpush.bf16.msrb.mxu2 %v7319_v11  ;;  %4411 = vmatpush.bf16.msrb.mxu0 %v6999_v31  ;;  %v7236_v11 = vld [vmem:[#allocation6 + $0x430] sm:$0xf0]  ;;  %v2634_v12 = vpop.f32.mrf.mxu3  ;;  %v8488_v31 = vld [vmem:[#allocation6 + $0x344] sm:$0xf]  ;;  %v8427_v58 = vld [vmem:[#allocation6 + $0x154] sm:$0xf0] }
 0x26c   :  { %v7239_v26 = vor.u32 %v8516_v10, %v7236_v11  ;;  %v7127_v39 = vor.u32 %v8488_v31, %v7124_v32  ;;  %v2633_v41 = vadd.f32 %v2632_v28, %v2620_v23  ;;  %v7572_v10 = vld [vmem:[#allocation6 + $0x6d0] sm:$0xf0]  ;;  %v6778_v11 = vld [vmem:[#allocation6 + $0x88] sm:$0xf]  ;;  %v7095_v12 = vor.u32 %v8480_v25, %v7092_v61  ;;  %v8592_v31 = vld [vmem:[#allocation6 + $0x684] sm:$0xf] }
 0x26d   :  { %4448 = vmatpush.bf16.msrb.mxu3 %v7415_v0  ;;  %4422 = vmatpush.bf16.msrb.mxu1 %v7159_v63  ;;  %v2658_v18 = vpop.f32.mrf.mxu1  ;;  %v6906_v32 = vld [vmem:[#allocation6 + $0x188] sm:$0xf]  ;;  %v8387_v60 = vld [vmem:[#allocation6 + $0x14] sm:$0xf0] }
 0x26e   :  { %4401 = vmatmul.bf16.vlgmr.msra.gmra.mxu3 %v9120_v34  ;;  %v8543_v25 = vld [vmem:[#allocation6 + $0x4f4] sm:$0xf0] }
 0x26f   :  { %4434 = vmatpush.bf16.msrb.mxu2 %v7303_v30  ;;  %4412 = vmatpush.bf16.msrb.mxu0 %v6983_v49  ;;  %v8415_v30 = vld [vmem:[#allocation6 + $0xf4] sm:$0xf0]  ;;  %v8544_v49 = vld [vmem:[#allocation6 + $0x504] sm:$0xf] }
 0x270   :  { %v6827_v40 = vor.u32 %v8415_v30, %v6826_v17 }
 0x271   :  { %4449 = vmatpush.bf16.msrb.mxu3 %v7399_v13  ;;  %4423 = vmatpush.bf16.msrb.mxu1 %v7143_v8  ;;  %v2621_v33 = vpop.f32.mrf.mxu2  ;;  %v8439_v8 = vld [vmem:[#allocation6 + $0x1b4] sm:$0xf0] }
 0x272   :  { %v6923_v17 = vor.u32 %v8439_v8, %v6922_v37  ;;  %v8435_v33 = vld [vmem:[#allocation6 + $0x194] sm:$0xf0] }
 0x273   :  { %4435 = vmatpush.bf16.msrb.mxu2 %v7287_v38  ;;  %4413 = vmatpush.bf16.msrb.mxu0 %v6967_v21  ;;  %v2645_v45 = vpop.f32.mrf.mxu0  ;;  %v7367_v38 = vor.u32 %v8548_v35, %v7364_v36  ;;  %v7351_v21 = vor.u32 %v8544_v49, %v7348_v50  ;;  %v6746_v35 = vld [vmem:[#allocation6 + $0x48] sm:$0xf]  ;;  %v8395_v36 = vld [vmem:[#allocation6 + $0x54] sm:$0xf0]  ;;  %v1009_v49 = vperm.slane %v9150_v22, 7  ;;  %v6875_v22 = vor.u32 %v8427_v58, %v6874_v57 }
 0x274   :  { %v2646_v24 = vadd.f32 %v2645_v45, %v2633_v41  ;;  %v6747_v41 = vor.u32 %v8395_v36, %v6746_v35  ;;  %v8431_v45 = vld [vmem:[#allocation6 + $0x174] sm:$0xf0]  ;;  %v7306_v35 = vld [vmem:[#allocation6 + $0x4a8] sm:$0xf] }
 0x275   :  { %4450 = vmatpush.bf16.msrb.mxu3 %v7383_v4  ;;  %4424 = vmatpush.bf16.msrb.mxu1 %v7127_v39  ;;  %v2660_v54 = vpop.f32.mrf.mxu1  ;;  %v6763_v4 = vor.u32 %v8399_v20, %v6762_v19  ;;  %v6907_v39 = vor.u32 %v8435_v33, %v6906_v32  ;;  %v8419_v37 = vld [vmem:[#allocation6 + $0x114] sm:$0xf0]  ;;  %v7476_v19 = vld [vmem:[#allocation6 + $0x610] sm:$0xf0]  ;;  %v7466_v20 = vld [vmem:[#allocation6 + $0x5e8] sm:$0xf] }
 0x276   :  { %v2659_v28 = vadd.f32 %v2658_v18, %v2646_v24  ;;  %v7556_v18 = vld [vmem:[#allocation6 + $0x6b0] sm:$0xf0]  ;;  %v8391_v24 = vld [vmem:[#allocation6 + $0x34] sm:$0xf0]  ;;  %v7527_v54 = vor.u32 %v8588_v43, %v7524_v47 }
 0x277   :  { %4436 = vmatpush.bf16.msrb.mxu2 %v7271_v59  ;;  %v7588_v59 = vld [vmem:[#allocation6 + $0x6f0] sm:$0xf0]  ;;  %v7559_v30 = vor.u32 %v8596_v16, %v7556_v18  ;;  %v6842_v16 = vld [vmem:[#allocation6 + $0x108] sm:$0xf]  ;;  %v8479_v32 = vld [vmem:[#allocation6 + $0x2f4] sm:$0xf0] }
 0x278   :  { %v2720_v0 = vmax.f32 %v2659_v28, 0.0  ;;  %v7591_v2 = vor.u32 %v8604_v55, %v7588_v59  ;;  %v8584_v55 = vld [vmem:[#allocation6 + $0x644] sm:$0xf]  ;;  %v7508_v28 = vld [vmem:[#allocation6 + $0x650] sm:$0xf0]  ;;  %v6843_v33 = vor.u32 %v8419_v37, %v6842_v16 }
 0x279   :  { %4451 = vmatpush.bf16.msrb.mxu3 %v7367_v38  ;;  %4425 = vmatpush.bf16.msrb.mxu1 %v7111_v3  ;;  %v6891_v3 = vor.u32 %v8431_v45, %v6890_v44  ;;  %v6714_v59 = vld [vmem:[#allocation6 + $0x8] sm:$0xf]  ;;  %v8535_v36 = vld [vmem:[#allocation6 + $0x4b4] sm:$0xf0] }
 0x27a   :  { %v9161_v63 = vpack.c.bf16 %v2720_v0, %v2720_v0  ;;  %v7511_v0 = vor.u32 %v8584_v55, %v7508_v28  ;;  %v7450_v44 = vld [vmem:[#allocation6 + $0x5c8] sm:$0xf]  ;;  %v8571_v45 = vld [vmem:[#allocation6 + $0x5d4] sm:$0xf0]  ;;  %v7307_v47 = vor.u32 %v8535_v36, %v7306_v35  ;;  %v8628_v28 = vld [vmem:[#allocation6 + $0x7a4] sm:$0xf] }
 0x27b   :  { %4437 = vmatpush.bf16.msrb.mxu2 %v7255_v6  ;;  %v8600_v6 = vld [vmem:[#allocation6 + $0x6c4] sm:$0xf]  ;;  %v2647_v13 = vpop.f32.mrf.mxu0  ;;  %v7451_v57 = vor.u32 %v8571_v45, %v7450_v44  ;;  %v7258_v16 = vld [vmem:[#allocation6 + $0x448] sm:$0xf]  ;;  %v8523_v37 = vld [vmem:[#allocation6 + $0x454] sm:$0xf0] }
 0x27c   :  { %4362 = vmatmul.bf16.vlgmr.msra.gmra.mxu0 %v9161_v63  ;;  %v7575_v15 = vor.u32 %v8600_v6, %v7572_v10  ;;  %v7492_v10 = vld [vmem:[#allocation6 + $0x630] sm:$0xf0]  ;;  %v7242_v35 = vld [vmem:[#allocation6 + $0x428] sm:$0xf]  ;;  %v8519_v36 = vld [vmem:[#allocation6 + $0x434] sm:$0xf0] }
 0x27d   :  { %4452 = vmatpush.bf16.msrb.mxu3 %v7351_v21  ;;  %4458 = vmatpush.bf16.msra.mxu0 %v7591_v2  ;;  %v7338_v21 = vld [vmem:[#allocation6 + $0x4e8] sm:$0xf]  ;;  %v8555_v45 = vld [vmem:[#allocation6 + $0x554] sm:$0xf0] }
 0x27e   :  { %4426 = vmatpush.bf16.msrb.mxu1 %v7095_v12  ;;  %v6858_v2 = vld [vmem:[#allocation6 + $0x128] sm:$0xf]  ;;  %v7339_v9 = vor.u32 %v8543_v25, %v7338_v21 }
 0x27f   :  { %4438 = vmatpush.bf16.msrb.mxu2 %v7239_v26  ;;  %v6779_v26 = vor.u32 %v8403_v62, %v6778_v11  ;;  %v7322_v11 = vld [vmem:[#allocation6 + $0x4c8] sm:$0xf]  ;;  %v8539_v62 = vld [vmem:[#allocation6 + $0x4d4] sm:$0xf0] }
 0x280   :  { %4453 = vmatmul.bf16.vlgmr.msrb.gmra.mxu3 %v9155_v27  ;;  %v7323_v18 = vor.u32 %v8539_v62, %v7322_v11  ;;  %v7050_v25 = vld [vmem:[#allocation6 + $0x2a8] sm:$0xf]  ;;  %v8563_v11 = vld [vmem:[#allocation6 + $0x594] sm:$0xf0] }
 0x281   :  { %4497 = vmatpush.bf16.msra.mxu3 %v6955_v1  ;;  %4459 = vmatpush.bf16.msra.mxu0 %v7575_v15  ;;  %v6715_v1 = vor.u32 %v8387_v60, %v6714_v59  ;;  %v7495_v15 = vor.u32 %v8580_v29, %v7492_v10  ;;  %v7434_v59 = vld [vmem:[#allocation6 + $0x5a8] sm:$0xf]  ;;  %v8567_v60 = vld [vmem:[#allocation6 + $0x5b4] sm:$0xf0] }
 0x282   :  { %v7418_v10 = vld [vmem:[#allocation6 + $0x588] sm:$0xf] }
 0x283   :  { %4439 = vmatpush.bf16.msrb.mxu2 %v7223_v46  ;;  %v2684_v23 = vpop.f32.mrf.mxu3  ;;  %v7540_v46 = vld [vmem:[#allocation6 + $0x690] sm:$0xf0]  ;;  %v7386_v44 = vld [vmem:[#allocation6 + $0x548] sm:$0xf] }
 0x285   :  { %4498 = vmatpush.bf16.msra.mxu3 %v6939_v14  ;;  %4460 = vmatpush.bf16.msra.mxu0 %v7559_v30 }
 0x286   :  { %4440 = vmatmul.bf16.vlgmr.msrb.gmra.mxu2 %v9142_v42 }
 0x287   :  { %4484 = vmatpush.bf16.msra.mxu2 %v6827_v40  ;;  %v7543_v40 = vor.u32 %v8592_v31, %v7540_v46  ;;  %v7082_v31 = vld [vmem:[#allocation6 + $0x2e8] sm:$0xf]  ;;  %v7716_v46 = vld [vmem:[#allocation6 + $0x7f0] sm:$0xf0] }
 0x288   :  { %v7083_v43 = vor.u32 %v8479_v32, %v7082_v31  ;;  %v8620_v31 = vld [vmem:[#allocation6 + $0x764] sm:$0xf]  ;;  %v7018_v32 = vld [vmem:[#allocation6 + $0x268] sm:$0xf] }
 0x289   :  { %4499 = vmatpush.bf16.msra.mxu3 %v6923_v17  ;;  %v2671_v38 = vpop.f32.mrf.mxu2  ;;  %4461 = vmatpush.bf16.msra.mxu0 %v7543_v40  ;;  %v8575_v17 = vld [vmem:[#allocation6 + $0x5f4] sm:$0xf0] }
 0x28a   :  { %v2672_v61 = vadd.f32 %v2671_v38, %v1009_v49  ;;  %v7467_v40 = vor.u32 %v8575_v17, %v7466_v20  ;;  %v8475_v49 = vld [vmem:[#allocation6 + $0x2d4] sm:$0xf0] }
 0x28b   :  { %4485 = vmatpush.bf16.msra.mxu2 %v6811_v53  ;;  %v2686_v50 = vpop.f32.mrf.mxu3  ;;  %v6731_v53 = vor.u32 %v8391_v24, %v6730_v48  ;;  %v8632_v48 = vld [vmem:[#allocation6 + $0x7c4] sm:$0xf]  ;;  %v7066_v24 = vld [vmem:[#allocation6 + $0x2c8] sm:$0xf]  ;;  %v8559_v20 = vld [vmem:[#allocation6 + $0x574] sm:$0xf0] }
 0x28c   :  { %4414 = vmatmul.bf16.vlgmr.msrb.gmra.mxu0 %v9138_v51  ;;  %v2685_v12 = vadd.f32 %v2684_v23, %v2672_v61  ;;  %v7067_v58 = vor.u32 %v8475_v49, %v7066_v24  ;;  %v8471_v61 = vld [vmem:[#allocation6 + $0x2b4] sm:$0xf0]  ;;  %v7002_v24 = vld [vmem:[#allocation6 + $0x248] sm:$0xf] }
 0x28d   :  { %4500 = vmatpush.bf16.msra.mxu3 %v6907_v39  ;;  %v2710_v56 = vpop.f32.mrf.mxu1  ;;  %4462 = vmatpush.bf16.msra.mxu0 %v7527_v54  ;;  %v7290_v54 = vld [vmem:[#allocation6 + $0x488] sm:$0xf]  ;;  %v8459_v49 = vld [vmem:[#allocation6 + $0x254] sm:$0xf0] }
 0x28f   :  { %4486 = vmatpush.bf16.msra.mxu2 %v6795_v5  ;;  %v8423_v5 = vld [vmem:[#allocation6 + $0x134] sm:$0xf0] }
 0x290   :  { %v6859_v13 = vor.u32 %v8423_v5, %v6858_v2  ;;  %v8527_v2 = vld [vmem:[#allocation6 + $0x474] sm:$0xf0]  ;;  %v7435_v5 = vor.u32 %v8567_v60, %v7434_v59  ;;  %v7003_v59 = vor.u32 %v8459_v49, %v7002_v24  ;;  %v7370_v60 = vld [vmem:[#allocation6 + $0x528] sm:$0xf]  ;;  %v8401_v49 = vld [vmem:[#allocation6 + $0x8c] sm:$0xf] }
 0x291   :  { %4501 = vmatpush.bf16.msra.mxu3 %v6891_v3  ;;  %v2673_v6 = vpop.f32.mrf.mxu2  ;;  %4463 = vmatpush.bf16.msra.mxu0 %v7511_v0  ;;  %v7700_v3 = vld [vmem:[#allocation6 + $0x7d0] sm:$0xf0]  ;;  %v8507_v24 = vld [vmem:[#allocation6 + $0x3d4] sm:$0xf0] }
 0x292   :  { %v7684_v0 = vld [vmem:[#allocation6 + $0x7b0] sm:$0xf0] }
 0x293   :  { %4487 = vmatpush.bf16.msra.mxu2 %v6779_v26  ;;  %v2697_v14 = vpop.f32.mrf.mxu0  ;;  %v8576_v26 = vld [vmem:[#allocation6 + $0x604] sm:$0xf]  ;;  %v7687_v62 = vor.u32 %v8628_v28, %v7684_v0  ;;  %v6828_v28 = vld [vmem:[#allocation6 + $0xf8] sm:$0xf0]  ;;  %v8455_v0 = vld [vmem:[#allocation6 + $0x234] sm:$0xf0] }
 0x294   :  { %v2698_v8 = vadd.f32 %v2697_v14, %v2685_v12  ;;  %v7479_v39 = vor.u32 %v8576_v26, %v7476_v19  ;;  %v7034_v14 = vld [vmem:[#allocation6 + $0x288] sm:$0xf]  ;;  %v7668_v26 = vld [vmem:[#allocation6 + $0x790] sm:$0xf0] }
 0x295   :  { %4502 = vmatpush.bf16.msra.mxu3 %v6875_v22  ;;  %v2712_v30 = vpop.f32.mrf.mxu1  ;;  %4464 = vmatpush.bf16.msra.mxu0 %v7495_v15  ;;  %v2986_v22 = vld [vmem:[%s9313_s8] sm:$0xf]  ;;  %v8467_v15 = vld [vmem:[#allocation6 + $0x294] sm:$0xf0]  ;;  %v7402_v19 = vld [vmem:[#allocation6 + $0x568] sm:$0xf] }
 0x296   :  { %v2711_v23 = vadd.f32 %v2710_v56, %v2698_v8  ;;  %v7703_v56 = vor.u32 %v8632_v48, %v7700_v3  ;;  %v2988_v29 = vperm.slane %v2986_v22, 0  ;;  %v7419_v8 = vor.u32 %v8563_v11, %v7418_v10  ;;  %v8616_v48 = vld [vmem:[#allocation6 + $0x744] sm:$0xf]  ;;  %v7636_v3 = vld [vmem:[#allocation6 + $0x750] sm:$0xf0] }
 0x297   :  { %4488 = vmatpush.bf16.msra.mxu2 %v6763_v4  ;;  %v8636_v4 = vld [vmem:[#allocation6 + $0x7e4] sm:$0xf]  ;;  %v6986_v22 = vld [vmem:[#allocation6 + $0x228] sm:$0xf] }
 0x298   :  { %v7719_v38 = vor.u32 %v8636_v4, %v7716_v46  ;;  %v7259_v4 = vor.u32 %v8523_v37, %v7258_v16  ;;  %v7652_v46 = vld [vmem:[#allocation6 + $0x770] sm:$0xf0]  ;;  %v6987_v11 = vor.u32 %v8455_v0, %v6986_v22  ;;  %v8451_v37 = vld [vmem:[#allocation6 + $0x214] sm:$0xf0]  ;;  %v6764_v22 = vld [vmem:[#allocation6 + $0x78] sm:$0xf0] }
 0x299   :  { %4503 = vmatpush.bf16.msra.mxu3 %v6859_v13  ;;  %4465 = vmatpush.bf16.msra.mxu0 %v7479_v39  ;;  %v8624_v13 = vld [vmem:[#allocation6 + $0x784] sm:$0xf]  ;;  %v7403_v39 = vor.u32 %v8559_v20, %v7402_v19  ;;  %v7210_v20 = vld [vmem:[#allocation6 + $0x3e8] sm:$0xf] }
 0x29a   :  { %v7671_v30 = vor.u32 %v8624_v13, %v7668_v26  ;;  %v6970_v13 = vld [vmem:[#allocation6 + $0x208] sm:$0xf] }
 0x29b   :  { %4489 = vmatpush.bf16.msra.mxu2 %v6747_v41  ;;  %v2721_v41 = vmax.f32 %v2711_v23, 0.0  ;;  %v2699_v55 = vpop.f32.mrf.mxu0  ;;  %v8463_v23 = vld [vmem:[#allocation6 + $0x274] sm:$0xf0] }
 0x29c   :  { %4466 = vmatmul.bf16.vlgmr.msra.gmra.mxu0 %v9161_v63 }
 0x29d   :  { %v9168_v50 = vpack.c.bf16 %v2721_v41, %v2721_v41  ;;  %4504 = vmatpush.bf16.msra.mxu3 %v6843_v33  ;;  %4510 = vmatpush.bf16.msrb.mxu0 %v7083_v43  ;;  %v7019_v41 = vor.u32 %v8463_v23, %v7018_v32  ;;  %v8511_v32 = vld [vmem:[#allocation6 + $0x3f4] sm:$0xf0]  ;;  %v8405_v23 = vld [vmem:[#allocation6 + $0xac] sm:$0xf] }
 0x29f   :  { %4490 = vmatpush.bf16.msra.mxu2 %v6731_v53  ;;  %v8531_v53 = vld [vmem:[#allocation6 + $0x494] sm:$0xf0]  ;;  %4375 = vmatmul.bf16.vlgmr.msra.gmra.mxu1 %v9168_v50 }
 0x2a0   :  { %4471 = vmatpush.bf16.msra.mxu1 %v7719_v38  ;;  %v7291_v21 = vor.u32 %v8531_v53, %v7290_v54  ;;  %4505 = vmatmul.bf16.vlgmr.msra.gmra.mxu3 %v9120_v34  ;;  %v7655_v38 = vor.u32 %v8620_v31, %v7652_v46  ;;  %v7226_v54 = vld [vmem:[#allocation6 + $0x408] sm:$0xf]  ;;  %v8515_v53 = vld [vmem:[#allocation6 + $0x414] sm:$0xf0] }
 0x2a1   :  { %4549 = vmatpush.bf16.msrb.mxu3 %v7467_v40  ;;  %4511 = vmatpush.bf16.msrb.mxu0 %v7067_v58  ;;  %v8413_v58 = vld [vmem:[#allocation6 + $0xec] sm:$0xf] }
 0x2a3   :  { %4491 = vmatpush.bf16.msra.mxu2 %v6715_v1  ;;  %v7274_v1 = vld [vmem:[#allocation6 + $0x468] sm:$0xf]  ;;  %v4298_v6 = vpop.f32.mrf.mxu3 }
 0x2a4   :  { %4472 = vmatpush.bf16.msra.mxu1 %v7703_v56  ;;  %v7275_v12 = vor.u32 %v8527_v2, %v7274_v1  ;;  %v8551_v56 = vld [vmem:[#allocation6 + $0x534] sm:$0xf0]  ;;  %v6831_v1 = vor.u32 %v8413_v58, %v6828_v28  ;;  %v8612_v2 = vld [vmem:[#allocation6 + $0x724] sm:$0xf]  ;;  %v6924_v58 = vld [vmem:[#allocation6 + $0x1b8] sm:$0xf0] }
 0x2a5   :  { %4550 = vmatpush.bf16.msrb.mxu3 %v7451_v57  ;;  %v7387_v57 = vor.u32 %v8555_v45, %v7386_v44  ;;  %v7211_v44 = vor.u32 %v8511_v32, %v7210_v20  ;;  %v8591_v20 = vld [vmem:[#allocation6 + $0x674] sm:$0xf0] }
 0x2a6   :  { %4492 = vmatmul.bf16.vlgmr.msra.gmra.mxu2 %v9125_v52 }
 0x2a7   :  { %4536 = vmatpush.bf16.msrb.mxu2 %v7339_v9  ;;  %v7051_v9 = vor.u32 %v8471_v61, %v7050_v25  ;;  %v7639_v25 = vor.u32 %v8616_v48, %v7636_v3  ;;  %v7227_v61 = vor.u32 %v8515_v53, %v7226_v54  ;;  %v8603_v48 = vld [vmem:[#allocation6 + $0x6d4] sm:$0xf0]  ;;  %v6780_v3 = vld [vmem:[#allocation6 + $0x98] sm:$0xf0] }
 0x2a8   :  { %4473 = vmatpush.bf16.msra.mxu1 %v7687_v62  ;;  %v8608_v62 = vld [vmem:[#allocation6 + $0x704] sm:$0xf] }
 0x2a9   :  { %4551 = vmatpush.bf16.msrb.mxu3 %v7435_v5  ;;  %4512 = vmatpush.bf16.msrb.mxu0 %v7051_v9  ;;  %v4285_v17 = vpop.f32.mrf.mxu2  ;;  %v7620_v5 = vld [vmem:[#allocation6 + $0x730] sm:$0xf0]  ;;  %v8409_v9 = vld [vmem:[#allocation6 + $0xcc] sm:$0xf] }
 0x2aa   :  { %v4286_v33 = vadd.f32 %v4285_v17, %v2988_v29  ;;  %v6812_v29 = vld [vmem:[#allocation6 + $0xd8] sm:$0xf0]  ;;  %v7623_v16 = vor.u32 %v8612_v2, %v7620_v5  ;;  %v7594_v17 = vld [vmem:[#allocation6 + $0x6e8] sm:$0xf]  ;;  %v8433_v2 = vld [vmem:[#allocation6 + $0x18c] sm:$0xf] }
 0x2ab   :  { %4537 = vmatpush.bf16.msrb.mxu2 %v7323_v18  ;;  %v7035_v18 = vor.u32 %v8467_v15, %v7034_v14  ;;  %v4300_v40 = vpop.f32.mrf.mxu3  ;;  %v7354_v14 = vld [vmem:[#allocation6 + $0x508] sm:$0xf]  ;;  %v8547_v15 = vld [vmem:[#allocation6 + $0x514] sm:$0xf0]  ;;  %v6815_v19 = vor.u32 %v8409_v9, %v6812_v29  ;;  %v6908_v5 = vld [vmem:[#allocation6 + $0x198] sm:$0xf0] }
 0x2ac   :  { %v4299_v43 = vadd.f32 %v4298_v6, %v4286_v33  ;;  %4474 = vmatpush.bf16.msra.mxu1 %v7671_v30  ;;  %v7371_v6 = vor.u32 %v8551_v56, %v7370_v60  ;;  %v8607_v30 = vld [vmem:[#allocation6 + $0x6f4] sm:$0xf0]  ;;  %v7355_v31 = vor.u32 %v8547_v15, %v7354_v14  ;;  %v6796_v33 = vld [vmem:[#allocation6 + $0xb8] sm:$0xf0]  ;;  %v7178_v60 = vld [vmem:[#allocation6 + $0x3a8] sm:$0xf]  ;;  %v6911_v14 = vor.u32 %v8433_v2, %v6908_v5 }
 0x2ad   :  { %4552 = vmatpush.bf16.msrb.mxu3 %v7419_v8  ;;  %4513 = vmatpush.bf16.msrb.mxu0 %v7035_v18  ;;  %v4324_v55 = vpop.f32.mrf.mxu1  ;;  %v8445_v8 = vld [vmem:[#allocation6 + $0x1ec] sm:$0xf]  ;;  %v6956_v18 = vld [vmem:[#allocation6 + $0x1f8] sm:$0xf0]  ;;  %v7595_v40 = vor.u32 %v8607_v30, %v7594_v17  ;;  %v6799_v45 = vor.u32 %v8405_v23, %v6796_v33  ;;  %v7562_v56 = vld [vmem:[#allocation6 + $0x6a8] sm:$0xf] }
 0x2ae   :  { %v7162_v29 = vld [vmem:[#allocation6 + $0x388] sm:$0xf]  ;;  %v8495_v17 = vld [vmem:[#allocation6 + $0x374] sm:$0xf0]  ;;  %v8389_v30 = vld [vmem:[#allocation6 + $0x2c] sm:$0xf] }
 0x2af   :  { %4538 = vmatpush.bf16.msrb.mxu2 %v7307_v47  ;;  %v7243_v47 = vor.u32 %v8519_v36, %v7242_v35  ;;  %4427 = vmatmul.bf16.vlgmr.msrb.gmra.mxu1 %v9134_v7  ;;  %v6971_v35 = vor.u32 %v8451_v37, %v6970_v13  ;;  %v6959_v36 = vor.u32 %v8445_v8, %v6956_v18  ;;  %v6748_v13 = vld [vmem:[#allocation6 + $0x58] sm:$0xf0]  ;;  %v7146_v18 = vld [vmem:[#allocation6 + $0x368] sm:$0xf]  ;;  %v8425_v33 = vld [vmem:[#allocation6 + $0x14c] sm:$0xf] }
 0x2b0   :  { %4475 = vmatpush.bf16.msra.mxu1 %v7655_v38  ;;  %v7194_v38 = vld [vmem:[#allocation6 + $0x3c8] sm:$0xf]  ;;  %v8417_v5 = vld [vmem:[#allocation6 + $0x10c] sm:$0xf] }
 0x2b1   :  { %4553 = vmatpush.bf16.msrb.mxu3 %v7403_v39  ;;  %4514 = vmatpush.bf16.msrb.mxu0 %v7019_v41  ;;  %v8441_v41 = vld [vmem:[#allocation6 + $0x1cc] sm:$0xf]  ;;  %v7195_v28 = vor.u32 %v8507_v24, %v7194_v38  ;;  %v7482_v2 = vld [vmem:[#allocation6 + $0x608] sm:$0xf] }
 0x2b2   :  { %v8385_v38 = vld [vmem:[#allocation6 + $0xc] sm:$0xf] }
 0x2b3   :  { %4539 = vmatpush.bf16.msrb.mxu2 %v7291_v21  ;;  %v4287_v21 = vpop.f32.mrf.mxu2  ;;  %v4311_v10 = vpop.f32.mrf.mxu0  ;;  %v8541_v24 = vld [vmem:[#allocation6 + $0x4ec] sm:$0xf] }
 0x2b4   :  { %v4312_v26 = vadd.f32 %v4311_v10, %v4299_v43  ;;  %4476 = vmatpush.bf16.msra.mxu1 %v7639_v25  ;;  %v6940_v43 = vld [vmem:[#allocation6 + $0x1d8] sm:$0xf0]  ;;  %v8599_v21 = vld [vmem:[#allocation6 + $0x6b4] sm:$0xf0]  ;;  %v7546_v10 = vld [vmem:[#allocation6 + $0x688] sm:$0xf] }
 0x2b5   :  { %4554 = vmatpush.bf16.msrb.mxu3 %v7387_v57  ;;  %4515 = vmatpush.bf16.msrb.mxu0 %v7003_v59  ;;  %v6943_v53 = vor.u32 %v8441_v41, %v6940_v43  ;;  %v8437_v57 = vld [vmem:[#allocation6 + $0x1ac] sm:$0xf]  ;;  %v6783_v59 = vor.u32 %v8401_v49, %v6780_v3  ;;  %v8503_v25 = vld [vmem:[#allocation6 + $0x3b4] sm:$0xf0]  ;;  %v7130_v41 = vld [vmem:[#allocation6 + $0x348] sm:$0xf] }
 0x2b6   :  { %v9177_v46 = vadd.f32 %v4324_v55, %v4312_v26  ;;  %v6927_v0 = vor.u32 %v8437_v57, %v6924_v58  ;;  %v8429_v26 = vld [vmem:[#allocation6 + $0x16c] sm:$0xf]  ;;  %v7514_v43 = vld [vmem:[#allocation6 + $0x648] sm:$0xf]  ;;  %v7340_v49 = vld [vmem:[#allocation6 + $0x4f8] sm:$0xf0] }
 0x2b7   :  { %4540 = vmatpush.bf16.msrb.mxu2 %v7275_v12  ;;  %v7604_v12 = vld [vmem:[#allocation6 + $0x710] sm:$0xf0]  ;;  %v7498_v57 = vld [vmem:[#allocation6 + $0x628] sm:$0xf]  ;;  %v8583_v58 = vld [vmem:[#allocation6 + $0x634] sm:$0xf0] }
 0x2b8   :  { %4477 = vmatpush.bf16.msra.mxu1 %v7623_v16  ;;  %v7607_v39 = vor.u32 %v8608_v62, %v7604_v12  ;;  %v8499_v62 = vld [vmem:[#allocation6 + $0x394] sm:$0xf0]  ;;  %v8393_v12 = vld [vmem:[#allocation6 + $0x4c] sm:$0xf]  ;;  %v6892_v16 = vld [vmem:[#allocation6 + $0x178] sm:$0xf0] }
 0x2b9   :  { %4555 = vmatpush.bf16.msrb.mxu3 %v7371_v6  ;;  %4516 = vmatpush.bf16.msrb.mxu0 %v6987_v11  ;;  %v7179_v6 = vor.u32 %v8503_v25, %v7178_v60  ;;  %v8595_v11 = vld [vmem:[#allocation6 + $0x694] sm:$0xf0]  ;;  %v7163_v37 = vor.u32 %v8499_v62, %v7162_v29  ;;  %v6751_v8 = vor.u32 %v8393_v12, %v6748_v13  ;;  %v7324_v25 = vld [vmem:[#allocation6 + $0x4d8] sm:$0xf0]  ;;  %v7722_v12 = vld [vmem:[#allocation6 + $0x7e8] sm:$0xf] }
 0x2ba   :  { %v7547_v15 = vor.u32 %v8595_v11, %v7546_v10  ;;  %v8487_v60 = vld [vmem:[#allocation6 + $0x334] sm:$0xf0]  ;;  %v8573_v10 = vld [vmem:[#allocation6 + $0x5ec] sm:$0xf]  ;;  %v7468_v11 = vld [vmem:[#allocation6 + $0x5f8] sm:$0xf0] }
 0x2bb   :  { %4541 = vmatpush.bf16.msrb.mxu2 %v7259_v4  ;;  %v4326_v4 = vpop.f32.mrf.mxu1  ;;  %v4313_v54 = vpop.f32.mrf.mxu0  ;;  %v8579_v29 = vld [vmem:[#allocation6 + $0x614] sm:$0xf0]  ;;  %v8477_v13 = vld [vmem:[#allocation6 + $0x2ec] sm:$0xf] }
 0x2bc   :  { %4478 = vmatpush.bf16.msra.mxu1 %v7607_v39  ;;  %v6732_v4 = vld [vmem:[#allocation6 + $0x38] sm:$0xf0]  ;;  %v7147_v39 = vor.u32 %v8495_v17, %v7146_v18  ;;  %v8421_v54 = vld [vmem:[#allocation6 + $0x12c] sm:$0xf]  ;;  %v7471_v18 = vor.u32 %v8573_v10, %v7468_v11  ;;  %v8623_v11 = vld [vmem:[#allocation6 + $0x774] sm:$0xf0] }
 0x2bd   :  { %4556 = vmatpush.bf16.msrb.mxu3 %v7355_v31  ;;  %4517 = vmatpush.bf16.msrb.mxu0 %v6971_v35  ;;  %v6895_v31 = vor.u32 %v8429_v26, %v6892_v16  ;;  %v6876_v35 = vld [vmem:[#allocation6 + $0x158] sm:$0xf0]  ;;  %v8639_v26 = vld [vmem:[#allocation6 + $0x7f4] sm:$0xf0]  ;;  %v8533_v16 = vld [vmem:[#allocation6 + $0x4ac] sm:$0xf] }
 0x2be   :  { %v8569_v17 = vld [vmem:[#allocation6 + $0x5cc] sm:$0xf]  ;;  %v7020_v10 = vld [vmem:[#allocation6 + $0x278] sm:$0xf0] }
 0x2bf   :  { %4542 = vmatpush.bf16.msrb.mxu2 %v7243_v47  ;;  %v7578_v47 = vld [vmem:[#allocation6 + $0x6c8] sm:$0xf]  ;;  %4479 = vmatmul.bf16.vlgmr.msra.gmra.mxu1 %v9168_v50 }
 0x2c0   :  { %v7579_v55 = vor.u32 %v8603_v48, %v7578_v47  ;;  %4523 = vmatpush.bf16.msrb.mxu1 %v7211_v44  ;;  %4518 = vmatmul.bf16.vlgmr.msrb.gmra.mxu0 %v9138_v51  ;;  %v8587_v44 = vld [vmem:[#allocation6 + $0x654] sm:$0xf0]  ;;  %v6716_v47 = vld [vmem:[#allocation6 + $0x18] sm:$0xf0]  ;;  %v6879_v48 = vor.u32 %v8425_v33, %v6876_v35 }
 0x2c1   :  { %4601 = vmatpush.bf16.msra.mxu3 %v6959_v36  ;;  %4562 = vmatpush.bf16.msra.mxu0 %v7595_v40  ;;  %v6735_v40 = vor.u32 %v8389_v30, %v6732_v4  ;;  %v7515_v3 = vor.u32 %v8587_v44, %v7514_v43  ;;  %v7452_v30 = vld [vmem:[#allocation6 + $0x5d8] sm:$0xf0]  ;;  %v7723_v4 = vor.u32 %v8639_v26, %v7722_v12  ;;  %v8635_v35 = vld [vmem:[#allocation6 + $0x7d4] sm:$0xf0]  ;;  %v8565_v43 = vld [vmem:[#allocation6 + $0x5ac] sm:$0xf] }
 0x2c2   :  { %4557 = vmatmul.bf16.vlgmr.msrb.gmra.mxu3 %v9155_v27  ;;  %v7068_v33 = vld [vmem:[#allocation6 + $0x2d8] sm:$0xf0] }
 0x2c3   :  { %4543 = vmatpush.bf16.msrb.mxu2 %v7227_v61  ;;  %v8397_v61 = vld [vmem:[#allocation6 + $0x6c] sm:$0xf]  ;;  %v7436_v44 = vld [vmem:[#allocation6 + $0x5b8] sm:$0xf0] }
 0x2c4   :  { %4524 = vmatpush.bf16.msrb.mxu1 %v7195_v28  ;;  %v6767_v9 = vor.u32 %v8397_v61, %v6764_v22  ;;  %v7343_v28 = vor.u32 %v8541_v24, %v7340_v49  ;;  %v7499_v22 = vor.u32 %v8583_v58, %v7498_v57  ;;  %v7052_v24 = vld [vmem:[#allocation6 + $0x2b8] sm:$0xf0]  ;;  %v8631_v49 = vld [vmem:[#allocation6 + $0x7b4] sm:$0xf0] }
 0x2c5   :  { %4602 = vmatpush.bf16.msra.mxu3 %v6943_v53  ;;  %4563 = vmatpush.bf16.msra.mxu0 %v7579_v55  ;;  %v6860_v53 = vld [vmem:[#allocation6 + $0x138] sm:$0xf0]  ;;  %v6719_v55 = vor.u32 %v8385_v38, %v6716_v47  ;;  %v7690_v47 = vld [vmem:[#allocation6 + $0x7a8] sm:$0xf] }
 0x2c6   :  { %4544 = vmatmul.bf16.vlgmr.msrb.gmra.mxu2 %v9142_v42  ;;  %v7420_v57 = vld [vmem:[#allocation6 + $0x598] sm:$0xf0]  ;;  %v7691_v58 = vor.u32 %v8631_v49, %v7690_v47  ;;  %v8653_v49 = vld [vmem:[#allocation7 + $0x64] sm:$0xf0] }
 0x2c7   :  { %4588 = vmatpush.bf16.msra.mxu2 %v6831_v1  ;;  %v7563_v1 = vor.u32 %v8599_v21, %v7562_v56  ;;  %v6863_v56 = vor.u32 %v8421_v54, %v6860_v53  ;;  %v8537_v21 = vld [vmem:[#allocation6 + $0x4cc] sm:$0xf]  ;;  %v7276_v54 = vld [vmem:[#allocation6 + $0x478] sm:$0xf0]  ;;  %v7439_v53 = vor.u32 %v8565_v43, %v7436_v44 }
 0x2c8   :  { %4525 = vmatpush.bf16.msrb.mxu1 %v7179_v6  ;;  %v6844_v6 = vld [vmem:[#allocation6 + $0x118] sm:$0xf0]  ;;  %v7327_v62 = vor.u32 %v8537_v21, %v7324_v25  ;;  %v8627_v21 = vld [vmem:[#allocation6 + $0x794] sm:$0xf0]  ;;  %v8453_v43 = vld [vmem:[#allocation6 + $0x22c] sm:$0xf] }
 0x2c9   :  { %4603 = vmatpush.bf16.msra.mxu3 %v6927_v0  ;;  %4564 = vmatpush.bf16.msra.mxu0 %v7563_v1  ;;  %v4337_v32 = vpop.f32.mrf.mxu2  ;;  %v7098_v0 = vld [vmem:[#allocation6 + $0x308] sm:$0xf]  ;;  %v8483_v1 = vld [vmem:[#allocation6 + $0x314] sm:$0xf0]  ;;  %v7260_v25 = vld [vmem:[#allocation6 + $0x458] sm:$0xf0] }
 0x2ca   :  { %v9184_v36 = vadd.f32 %v4337_v32, %v9177_v46  ;;  %v7706_v32 = vld [vmem:[#allocation6 + $0x7c8] sm:$0xf]  ;;  %v7244_v12 = vld [vmem:[#allocation6 + $0x438] sm:$0xf0] }
 0x2cb   :  { %4589 = vmatpush.bf16.msra.mxu2 %v6815_v19  ;;  %v7530_v19 = vld [vmem:[#allocation6 + $0x668] sm:$0xf]  ;;  %v7388_v26 = vld [vmem:[#allocation6 + $0x558] sm:$0xf0] }
 0x2cc   :  { %v7531_v23 = vor.u32 %v8591_v20, %v7530_v19  ;;  %4526 = vmatpush.bf16.msrb.mxu1 %v7163_v37  ;;  %v7308_v37 = vld [vmem:[#allocation6 + $0x4b8] sm:$0xf0]  ;;  %v7099_v19 = vor.u32 %v8483_v1, %v7098_v0  ;;  %v8557_v0 = vld [vmem:[#allocation6 + $0x56c] sm:$0xf] }
 0x2cd   :  { %4604 = vmatpush.bf16.msra.mxu3 %v6911_v14  ;;  %4565 = vmatpush.bf16.msra.mxu0 %v7547_v15  ;;  %v7084_v14 = vld [vmem:[#allocation6 + $0x2f8] sm:$0xf0]  ;;  %v6847_v15 = vor.u32 %v8417_v5, %v6844_v6 }
 0x2ce   :  { %v7087_v20 = vor.u32 %v8477_v13, %v7084_v14  ;;  %v7404_v1 = vld [vmem:[#allocation6 + $0x578] sm:$0xf0] }
 0x2cf   :  { %4590 = vmatpush.bf16.msra.mxu2 %v6799_v45  ;;  %v8491_v45 = vld [vmem:[#allocation6 + $0x354] sm:$0xf0]  ;;  %v7407_v13 = vor.u32 %v8557_v0, %v7404_v1  ;;  %v6988_v44 = vld [vmem:[#allocation6 + $0x238] sm:$0xf0]  ;;  %v7770_v0 = vld [vmem:[#allocation7 + $0x50] sm:$0xf] }
 0x2d0   :  { %4527 = vmatpush.bf16.msrb.mxu1 %v7147_v39  ;;  %v7131_v46 = vor.u32 %v8491_v45, %v7130_v41  ;;  %v8529_v39 = vld [vmem:[#allocation6 + $0x48c] sm:$0xf]  ;;  %v7707_v45 = vor.u32 %v8635_v35, %v7706_v32  ;;  %v7786_v32 = vld [vmem:[#allocation7 + $0x70] sm:$0xf]  ;;  %v8651_v1 = vld [vmem:[#allocation7 + $0x54] sm:$0xf0] }
 0x2d1   :  { %4605 = vmatpush.bf16.msra.mxu3 %v6895_v31  ;;  %4566 = vmatpush.bf16.msra.mxu0 %v7531_v23  ;;  %v4339_v61 = vpop.f32.mrf.mxu2  ;;  %v7311_v31 = vor.u32 %v8533_v16, %v7308_v37  ;;  %v8473_v23 = vld [vmem:[#allocation6 + $0x2cc] sm:$0xf] }
 0x2d2   :  { %v7071_v41 = vor.u32 %v8473_v23, %v7068_v33  ;;  %v8655_v23 = vld [vmem:[#allocation7 + $0x74] sm:$0xf0]  ;;  %v8549_v35 = vld [vmem:[#allocation6 + $0x52c] sm:$0xf] }
 0x2d3   :  { %4591 = vmatpush.bf16.msra.mxu2 %v6783_v59  ;;  %v7114_v59 = vld [vmem:[#allocation6 + $0x328] sm:$0xf]  ;;  %v7787_v47 = vor.u32 %v8655_v23, %v7786_v32  ;;  %v8647_v32 = vld [vmem:[#allocation7 + $0x34] sm:$0xf0]  ;;  %v7842_v23 = vld [vmem:[#allocation7 + $0xe0] sm:$0xf] }
 0x2d4   :  { %4528 = vmatpush.bf16.msrb.mxu1 %v7131_v46 }
 0x2d5   :  { %4606 = vmatpush.bf16.msra.mxu3 %v6879_v48  ;;  %4567 = vmatpush.bf16.msra.mxu0 %v7515_v3  ;;  %v8469_v48 = vld [vmem:[#allocation6 + $0x2ac] sm:$0xf] }
 0x2d6   :  { %v8525_v3 = vld [vmem:[#allocation6 + $0x46c] sm:$0xf]  ;;  %v7055_v46 = vor.u32 %v8469_v48, %v7052_v24  ;;  %v7778_v24 = vld [vmem:[#allocation7 + $0x60] sm:$0xf] }
 0x2d7   :  { %4592 = vmatpush.bf16.msra.mxu2 %v6767_v9  ;;  %v7115_v9 = vor.u32 %v8487_v60, %v7114_v59  ;;  %v7674_v59 = vld [vmem:[#allocation6 + $0x788] sm:$0xf]  ;;  %v8465_v60 = vld [vmem:[#allocation6 + $0x28c] sm:$0xf] }
 0x2d8   :  { %v7675_v5 = vor.u32 %v8627_v21, %v7674_v59  ;;  %v8611_v59 = vld [vmem:[#allocation6 + $0x714] sm:$0xf0]  ;;  %v7779_v21 = vor.u32 %v8653_v49, %v7778_v24  ;;  %v7834_v24 = vld [vmem:[#allocation7 + $0xd0] sm:$0xf] }
 0x2d9   :  { %4607 = vmatpush.bf16.msra.mxu3 %v6863_v56  ;;  %4568 = vmatpush.bf16.msra.mxu0 %v7499_v22  ;;  %v7036_v56 = vld [vmem:[#allocation6 + $0x298] sm:$0xf0]  ;;  %v8667_v49 = vld [vmem:[#allocation7 + $0xd4] sm:$0xf0] }
 0x2da   :  { %4529 = vmatpush.bf16.msrb.mxu1 %v7115_v9  ;;  %v7039_v22 = vor.u32 %v8465_v60, %v7036_v56  ;;  %v7658_v9 = vld [vmem:[#allocation6 + $0x768] sm:$0xf]  ;;  %v8605_v60 = vld [vmem:[#allocation6 + $0x6ec] sm:$0xf]  ;;  %v7596_v56 = vld [vmem:[#allocation6 + $0x6f8] sm:$0xf0] }
 0x2db   :  { %4593 = vmatpush.bf16.msra.mxu2 %v6751_v8  ;;  %v7483_v8 = vor.u32 %v8579_v29, %v7482_v2  ;;  %v8461_v29 = vld [vmem:[#allocation6 + $0x26c] sm:$0xf]  ;;  %v7659_v37 = vor.u32 %v8623_v11, %v7658_v9 }
 0x2dc   :  { %v7023_v14 = vor.u32 %v8461_v29, %v7020_v10  ;;  %v8601_v29 = vld [vmem:[#allocation6 + $0x6cc] sm:$0xf]  ;;  %v7580_v10 = vld [vmem:[#allocation6 + $0x6d8] sm:$0xf0] }
 0x2dd   :  { %4608 = vmatpush.bf16.msra.mxu3 %v6847_v15  ;;  %4569 = vmatpush.bf16.msra.mxu0 %v7483_v8  ;;  %v8553_v15 = vld [vmem:[#allocation6 + $0x54c] sm:$0xf] }
 0x2de   :  { %4530 = vmatpush.bf16.msrb.mxu1 %v7099_v19  ;;  %v8457_v19 = vld [vmem:[#allocation6 + $0x24c] sm:$0xf] }
 0x2df   :  { %4594 = vmatpush.bf16.msra.mxu2 %v6735_v40  ;;  %v7292_v40 = vld [vmem:[#allocation6 + $0x498] sm:$0xf0]  ;;  %v8505_v11 = vld [vmem:[#allocation6 + $0x3cc] sm:$0xf] }
 0x2e0   :  { %v7295_v38 = vor.u32 %v8529_v39, %v7292_v40  ;;  %4570 = vmatmul.bf16.vlgmr.msra.gmra.mxu0 %v9161_v63  ;;  %4609 = vmatmul.bf16.vlgmr.msra.gmra.mxu3 %v9120_v34  ;;  %v8521_v34 = vld [vmem:[#allocation6 + $0x44c] sm:$0xf]  ;;  %v7372_v39 = vld [vmem:[#allocation6 + $0x538] sm:$0xf0] }
 0x2e1   :  { %4653 = vmatpush.bf16.msrb.mxu3 %v7471_v18  ;;  %4614 = vmatpush.bf16.msrb.mxu0 %v7087_v20  ;;  %v7263_v6 = vor.u32 %v8521_v34, %v7260_v25  ;;  %v9192_v16 = vpop.f32.mrf.mxu3  ;;  %v7642_v18 = vld [vmem:[#allocation6 + $0x748] sm:$0xf]  ;;  %v7004_v20 = vld [vmem:[#allocation6 + $0x258] sm:$0xf0]  ;;  %v7375_v48 = vor.u32 %v8549_v35, %v7372_v39  ;;  %v8509_v25 = vld [vmem:[#allocation6 + $0x3ec] sm:$0xf] }
 0x2e2   :  { %4575 = vmatpush.bf16.msra.mxu1 %v7723_v4  ;;  %v7228_v4 = vld [vmem:[#allocation6 + $0x418] sm:$0xf0]  ;;  %v7007_v33 = vor.u32 %v8457_v19, %v7004_v20 }
 0x2e3   :  { %4595 = vmatpush.bf16.msra.mxu2 %v6719_v55  ;;  %4531 = vmatmul.bf16.vlgmr.msrb.gmra.mxu1 %v9134_v7  ;;  %v8561_v55 = vld [vmem:[#allocation6 + $0x58c] sm:$0xf]  ;;  %v7564_v19 = vld [vmem:[#allocation6 + $0x6b8] sm:$0xf0] }
 0x2e4   :  { %v7423_v61 = vor.u32 %v8561_v55, %v7420_v57  ;;  %v7610_v57 = vld [vmem:[#allocation6 + $0x708] sm:$0xf] }
 0x2e5   :  { %4615 = vmatpush.bf16.msrb.mxu0 %v7071_v41 }
 0x2e6   :  { %4596 = vmatmul.bf16.vlgmr.msra.gmra.mxu2 %v9125_v52  ;;  %v7455_v52 = vor.u32 %v8569_v17, %v7452_v30  ;;  %4576 = vmatpush.bf16.msra.mxu1 %v7707_v45  ;;  %v8619_v17 = vld [vmem:[#allocation6 + $0x754] sm:$0xf0]  ;;  %v8513_v30 = vld [vmem:[#allocation6 + $0x40c] sm:$0xf]  ;;  %v7626_v45 = vld [vmem:[#allocation6 + $0x728] sm:$0xf] }
 0x2e7   :  { %4640 = vmatpush.bf16.msrb.mxu2 %v7343_v28  ;;  %v7279_v28 = vor.u32 %v8525_v3, %v7276_v54  ;;  %v7231_v41 = vor.u32 %v8513_v30, %v7228_v4  ;;  %v6991_v3 = vor.u32 %v8453_v43, %v6988_v44  ;;  %v8545_v54 = vld [vmem:[#allocation6 + $0x50c] sm:$0xf]  ;;  %v7180_v30 = vld [vmem:[#allocation6 + $0x3b8] sm:$0xf0]  ;;  %v7746_v44 = vld [vmem:[#allocation7 + $0x20] sm:$0xf] }
 0x2e8   :  { %4654 = vmatpush.bf16.msrb.mxu3 %v7455_v52  ;;  %v7643_v52 = vor.u32 %v8619_v17, %v7642_v18  ;;  %v8597_v18 = vld [vmem:[#allocation6 + $0x6ac] sm:$0xf] }
 0x2e9   :  { %4616 = vmatpush.bf16.msrb.mxu0 %v7055_v46  ;;  %v9190_v2 = vpop.f32.mrf.mxu2  ;;  %v4352_v46 = vpop.f32.mrf.mxu3  ;;  %v8501_v17 = vld [vmem:[#allocation6 + $0x3ac] sm:$0xf]  ;;  %v7567_v35 = vor.u32 %v8597_v18, %v7564_v19  ;;  %v7500_v18 = vld [vmem:[#allocation6 + $0x638] sm:$0xf0] }
 0x2ea   :  { %4577 = vmatpush.bf16.msra.mxu1 %v7691_v58  ;;  %v8449_v58 = vld [vmem:[#allocation6 + $0x20c] sm:$0xf]  ;;  %v7183_v39 = vor.u32 %v8501_v17, %v7180_v30  ;;  %v7532_v46 = vld [vmem:[#allocation6 + $0x678] sm:$0xf0] }
 0x2eb   :  { %4641 = vmatpush.bf16.msrb.mxu2 %v7327_v62  ;;  %v8517_v62 = vld [vmem:[#allocation6 + $0x42c] sm:$0xf]  ;;  %v7116_v17 = vld [vmem:[#allocation6 + $0x338] sm:$0xf0] }
 0x2ec   :  { %4655 = vmatpush.bf16.msrb.mxu3 %v7439_v53  ;;  %v7247_v8 = vor.u32 %v8517_v62, %v7244_v12  ;;  %v7356_v53 = vld [vmem:[#allocation6 + $0x518] sm:$0xf0]  ;;  %v7771_v12 = vor.u32 %v8651_v1, %v7770_v0  ;;  %v8489_v1 = vld [vmem:[#allocation6 + $0x34c] sm:$0xf] }
 0x2ed   :  { %4617 = vmatpush.bf16.msrb.mxu0 %v7039_v22  ;;  %v7359_v34 = vor.u32 %v8545_v54, %v7356_v53  ;;  %v7196_v62 = vld [vmem:[#allocation6 + $0x3d8] sm:$0xf0]  ;;  %v8589_v53 = vld [vmem:[#allocation6 + $0x66c] sm:$0xf] }
 0x2ee   :  { %4578 = vmatpush.bf16.msra.mxu1 %v7675_v5  ;;  %v7611_v5 = vor.u32 %v8611_v59, %v7610_v57  ;;  %v8493_v57 = vld [vmem:[#allocation6 + $0x36c] sm:$0xf]  ;;  %v7738_v59 = vld [vmem:[#allocation7 + $0x10] sm:$0xf] }
 0x2ef   :  { %4642 = vmatpush.bf16.msrb.mxu2 %v7311_v31  ;;  %v7391_v31 = vor.u32 %v8553_v15, %v7388_v26  ;;  %v7850_v15 = vld [vmem:[#allocation7 + $0xf0] sm:$0xf]  ;;  %v7583_v26 = vor.u32 %v8601_v29, %v7580_v10  ;;  %v8641_v29 = vld [vmem:[#allocation7 + $0x4] sm:$0xf0] }
 0x2f0   :  { %4656 = vmatpush.bf16.msrb.mxu3 %v7423_v61  ;;  %v7212_v61 = vld [vmem:[#allocation6 + $0x3f8] sm:$0xf0]  ;;  %v7818_v10 = vld [vmem:[#allocation7 + $0xb0] sm:$0xf] }
 0x2f1   :  { %4618 = vmatpush.bf16.msrb.mxu0 %v7023_v14  ;;  %v4391_v40 = vpop.f32.mrf.mxu2  ;;  %v7215_v9 = vor.u32 %v8509_v25, %v7212_v61  ;;  %v8649_v14 = vld [vmem:[#allocation7 + $0x44] sm:$0xf0]  ;;  %v8585_v61 = vld [vmem:[#allocation6 + $0x64c] sm:$0xf] }
 0x2f2   :  { %4579 = vmatpush.bf16.msra.mxu1 %v7659_v37  ;;  %v8671_v37 = vld [vmem:[#allocation7 + $0xf4] sm:$0xf0]  ;;  %v8593_v40 = vld [vmem:[#allocation6 + $0x68c] sm:$0xf] }
 0x2f3   :  { %4643 = vmatpush.bf16.msrb.mxu2 %v7295_v38  ;;  %v8615_v38 = vld [vmem:[#allocation6 + $0x734] sm:$0xf0]  ;;  %v7851_v20 = vor.u32 %v8671_v37, %v7850_v15 }
 0x2f4   :  { %4657 = vmatpush.bf16.msrb.mxu3 %v7407_v13  ;;  %v7627_v55 = vor.u32 %v8615_v38, %v7626_v45  ;;  %v7762_v13 = vld [vmem:[#allocation7 + $0x40] sm:$0xf]  ;;  %v8645_v45 = vld [vmem:[#allocation7 + $0x24] sm:$0xf0]  ;;  %v8663_v15 = vld [vmem:[#allocation7 + $0xb4] sm:$0xf0] }
 0x2f5   :  { %4619 = vmatpush.bf16.msrb.mxu0 %v7007_v33  ;;  %v7763_v4 = vor.u32 %v8649_v14, %v7762_v13  ;;  %v8669_v33 = vld [vmem:[#allocation7 + $0xe4] sm:$0xf0]  ;;  %v8654_v13 = vld [vmem:[#allocation7 + $0x74] sm:$0xf]  ;;  %v7788_v14 = vld [vmem:[#allocation7 + $0x78] sm:$0xf0]  ;;  %v7819_v19 = vor.u32 %v8663_v15, %v7818_v10 }
 0x2f6   :  { %4580 = vmatpush.bf16.msra.mxu1 %v7643_v52  ;;  %v7548_v52 = vld [vmem:[#allocation6 + $0x698] sm:$0xf0] }
 0x2f7   :  { %4644 = vmatpush.bf16.msrb.mxu2 %v7279_v28  ;;  %v6972_v28 = vld [vmem:[#allocation6 + $0x218] sm:$0xf0] }
 0x2f8   :  { %4658 = vmatpush.bf16.msrb.mxu3 %v7391_v31  ;;  %v6975_v22 = vor.u32 %v8449_v58, %v6972_v28  ;;  %v7754_v31 = vld [vmem:[#allocation7 + $0x30] sm:$0xf]  ;;  %v7148_v58 = vld [vmem:[#allocation6 + $0x378] sm:$0xf0]  ;;  %v7747_v28 = vor.u32 %v8645_v45, %v7746_v44 }
 0x2f9   :  { %4620 = vmatpush.bf16.msrb.mxu0 %v6991_v3  ;;  %v7755_v43 = vor.u32 %v8647_v32, %v7754_v31  ;;  %v9200_v38 = vpop.f32.mrf.mxu0  ;;  %v7151_v25 = vor.u32 %v8493_v57, %v7148_v58  ;;  %v7810_v31 = vld [vmem:[#allocation7 + $0xa0] sm:$0xf]  ;;  %v8661_v32 = vld [vmem:[#allocation7 + $0xa4] sm:$0xf0]  ;;  %v7724_v44 = vld [vmem:[#allocation6 + $0x7f8] sm:$0xf0] }
 0x2fa   :  { %4581 = vmatpush.bf16.msra.mxu1 %v7627_v55  ;;  %v7835_v55 = vor.u32 %v8667_v49, %v7834_v24  ;;  %v7692_v10 = vld [vmem:[#allocation6 + $0x7b8] sm:$0xf0] }
 0x2fb   :  { %4645 = vmatpush.bf16.msrb.mxu2 %v7263_v6  ;;  %v7599_v6 = vor.u32 %v8605_v60, %v7596_v56  ;;  %v8643_v60 = vld [vmem:[#allocation7 + $0x14] sm:$0xf0]  ;;  %v7826_v56 = vld [vmem:[#allocation7 + $0xc0] sm:$0xf] }
 0x2fc   :  { %4659 = vmatpush.bf16.msrb.mxu3 %v7375_v48  ;;  %v7551_v48 = vor.u32 %v8593_v40, %v7548_v52  ;;  %v8577_v40 = vld [vmem:[#allocation6 + $0x60c] sm:$0xf]  ;;  %v7484_v52 = vld [vmem:[#allocation6 + $0x618] sm:$0xf0] }
 0x2fd   :  { %4621 = vmatpush.bf16.msrb.mxu0 %v6975_v22  ;;  %v7516_v22 = vld [vmem:[#allocation6 + $0x658] sm:$0xf0]  ;;  %v7487_v49 = vor.u32 %v8577_v40, %v7484_v52  ;;  %v8664_v52 = vld [vmem:[#allocation7 + $0xc4] sm:$0xf] }
 0x2fe   :  { %4582 = vmatpush.bf16.msra.mxu1 %v7611_v5  ;;  %v7132_v5 = vld [vmem:[#allocation6 + $0x358] sm:$0xf0] }
 0x2ff   :  { %4646 = vmatpush.bf16.msrb.mxu2 %v7247_v8  ;;  %v7199_v8 = vor.u32 %v8505_v11, %v7196_v62  ;;  %v7135_v37 = vor.u32 %v8489_v1, %v7132_v5  ;;  %v7740_v40 = vld [vmem:[#allocation7 + $0x18] sm:$0xf0] }
 0x300   :  { %4660 = vmatpush.bf16.msrb.mxu3 %v7359_v34  ;;  %4622 = vmatmul.bf16.vlgmr.msrb.gmra.mxu0 %v9138_v51  ;;  %v7164_v51 = vld [vmem:[#allocation6 + $0x398] sm:$0xf0]  ;;  %v8665_v34 = vld [vmem:[#allocation7 + $0xc4] sm:$0xf0] }
 0x301   :  { %4666 = vmatpush.bf16.msra.mxu0 %v7599_v6  ;;  %4583 = vmatmul.bf16.vlgmr.msra.gmra.mxu1 %v9168_v50  ;;  %v7827_v0 = vor.u32 %v8665_v34, %v7826_v56  ;;  %v7739_v6 = vor.u32 %v8643_v60, %v7738_v59  ;;  %v4365_v11 = vpop.f32.mrf.mxu0  ;;  %v7708_v59 = vld [vmem:[#allocation6 + $0x7d8] sm:$0xf0]  ;;  %v8648_v56 = vld [vmem:[#allocation7 + $0x44] sm:$0xf]  ;;  %v8657_v34 = vld [vmem:[#allocation7 + $0x84] sm:$0xf0] }
 0x302   :  { %4627 = vmatpush.bf16.msrb.mxu1 %v7215_v9  ;;  %v7730_v9 = vld [vmem:[#allocation7] sm:$0xf] }
 0x303   :  { %4647 = vmatpush.bf16.msrb.mxu2 %v7231_v41  ;;  %4661 = vmatmul.bf16.vlgmr.msrb.gmra.mxu3 %v9155_v27  ;;  %v7843_v27 = vor.u32 %v8669_v33, %v7842_v23  ;;  %v8497_v41 = vld [vmem:[#allocation6 + $0x38c] sm:$0xf]  ;;  %v7731_v30 = vor.u32 %v8641_v29, %v7730_v9  ;;  %v8652_v33 = vld [vmem:[#allocation7 + $0x64] sm:$0xf] }
 0x304   :  { %5103 = vmatpush.bf16.msra.mxu3 %v7851_v20  ;;  %v7167_v54 = vor.u32 %v8497_v41, %v7164_v51  ;;  %v8485_v20 = vld [vmem:[#allocation6 + $0x32c] sm:$0xf]  ;;  %v7100_v51 = vld [vmem:[#allocation6 + $0x318] sm:$0xf0] }
 0x305   :  { %4667 = vmatpush.bf16.msra.mxu0 %v7583_v26  ;;  %v8481_v41 = vld [vmem:[#allocation6 + $0x30c] sm:$0xf] }
 0x306   :  { %4648 = vmatmul.bf16.vlgmr.msrb.gmra.mxu2 %v9142_v42  ;;  %v9195_v42 = vpop.f32.mrf.mxu3  ;;  %4628 = vmatpush.bf16.msrb.mxu1 %v7199_v8  ;;  %v8581_v8 = vld [vmem:[#allocation6 + $0x62c] sm:$0xf] }
 0x307   :  { %5090 = vmatpush.bf16.msra.mxu2 %v7787_v47  ;;  %v7503_v23 = vor.u32 %v8581_v8, %v7500_v18  ;;  %v7844_v9 = vld [vmem:[#allocation7 + $0xe8] sm:$0xf0]  ;;  %v7676_v18 = vld [vmem:[#allocation6 + $0x798] sm:$0xf0] }
 0x308   :  { %5104 = vmatpush.bf16.msra.mxu3 %v7843_v27  ;;  %v7811_v27 = vor.u32 %v8661_v32, %v7810_v31  ;;  %v8629_v29 = vld [vmem:[#allocation6 + $0x7ac] sm:$0xf] }
 0x309   :  { %4668 = vmatpush.bf16.msra.mxu0 %v7567_v35  ;;  %v9202_v3 = vpop.f32.mrf.mxu2  ;;  %v7780_v35 = vld [vmem:[#allocation7 + $0x68] sm:$0xf0] }
 0x30a   :  { %4629 = vmatpush.bf16.msrb.mxu1 %v7183_v39  ;;  %v7119_v39 = vor.u32 %v8485_v20, %v7116_v17  ;;  %v7783_v45 = vor.u32 %v8652_v33, %v7780_v35  ;;  %v8625_v8 = vld [vmem:[#allocation6 + $0x78c] sm:$0xf]  ;;  %v8666_v17 = vld [vmem:[#allocation7 + $0xd4] sm:$0xf] }
 0x30b   :  { %5091 = vmatpush.bf16.msra.mxu2 %v7779_v21  ;;  %v7535_v21 = vor.u32 %v8589_v53, %v7532_v46  ;;  %v7772_v53 = vld [vmem:[#allocation7 + $0x58] sm:$0xf0]  ;;  %v8659_v46 = vld [vmem:[#allocation7 + $0x94] sm:$0xf0]  ;;  %v7748_v20 = vld [vmem:[#allocation7 + $0x28] sm:$0xf0] }
 0x30c   :  { %5105 = vmatpush.bf16.msra.mxu3 %v7835_v55  ;;  %v7103_v55 = vor.u32 %v8481_v41, %v7100_v51  ;;  %v8621_v35 = vld [vmem:[#allocation6 + $0x76c] sm:$0xf] }
 0x30d   :  { %4669 = vmatpush.bf16.msra.mxu0 %v7551_v48  ;;  %v9206_v48 = vpop.f32.mrf.mxu0  ;;  %v7828_v41 = vld [vmem:[#allocation7 + $0xc8] sm:$0xf0] }
 0x30e   :  { %v4404_v47 = vpop.f32.mrf.mxu3  ;;  %4630 = vmatpush.bf16.msrb.mxu1 %v7167_v54  ;;  %v8650_v54 = vld [vmem:[#allocation7 + $0x54] sm:$0xf] }
 0x30f   :  { %5092 = vmatpush.bf16.msra.mxu2 %v7771_v12  ;;  %v7519_v12 = vor.u32 %v8585_v61, %v7516_v22  ;;  %v7802_v47 = vld [vmem:[#allocation7 + $0x90] sm:$0xf]  ;;  %v7775_v60 = vor.u32 %v8650_v54, %v7772_v53  ;;  %v8670_v22 = vld [vmem:[#allocation7 + $0xf4] sm:$0xf]  ;;  %v8640_v53 = vld [vmem:[#allocation7 + $0x4] sm:$0xf] }
 0x310   :  { %5106 = vmatpush.bf16.msra.mxu3 %v7827_v0  ;;  %v7803_v57 = vor.u32 %v8659_v46, %v7802_v47  ;;  %v7852_v0 = vld [vmem:[#allocation7 + $0xf8] sm:$0xf0]  ;;  %v7732_v46 = vld [vmem:[#allocation7 + $0x8] sm:$0xf0] }
 0x311   :  { %4670 = vmatpush.bf16.msra.mxu0 %v7535_v21  ;;  %v4443_v26 = vpop.f32.mrf.mxu2  ;;  %v7794_v21 = vld [vmem:[#allocation7 + $0x80] sm:$0xf]  ;;  %v7855_v1 = vor.u32 %v8670_v22, %v7852_v0  ;;  %v8613_v0 = vld [vmem:[#allocation6 + $0x72c] sm:$0xf] }
 0x312   :  { %4631 = vmatpush.bf16.msrb.mxu1 %v7151_v25  ;;  %v7764_v25 = vld [vmem:[#allocation7 + $0x48] sm:$0xf0]  ;;  %v7795_v61 = vor.u32 %v8657_v34, %v7794_v21  ;;  %v7695_v26 = vor.u32 %v8629_v29, %v7692_v10  ;;  %v8660_v21 = vld [vmem:[#allocation7 + $0xa4] sm:$0xf] }
 0x313   :  { %5093 = vmatpush.bf16.msra.mxu2 %v7763_v4  ;;  %v7791_v4 = vor.u32 %v8654_v13, %v7788_v14  ;;  %v7767_v11 = vor.u32 %v8648_v56, %v7764_v25  ;;  %v8646_v13 = vld [vmem:[#allocation7 + $0x34] sm:$0xf]  ;;  %v7756_v14 = vld [vmem:[#allocation7 + $0x38] sm:$0xf0]  ;;  %v7812_v34 = vld [vmem:[#allocation7 + $0xa8] sm:$0xf0] }
 0x314   :  { %5107 = vmatpush.bf16.msra.mxu3 %v7819_v19  ;;  %v8644_v19 = vld [vmem:[#allocation7 + $0x24] sm:$0xf]  ;;  %v8609_v10 = vld [vmem:[#allocation6 + $0x70c] sm:$0xf] }
 0x315   :  { %4671 = vmatpush.bf16.msra.mxu0 %v7519_v12  ;;  %v4417_v12 = vpop.f32.mrf.mxu0 }
 0x316   :  { %v9204_v62 = vpop.f32.mrf.mxu3  ;;  %4632 = vmatpush.bf16.msrb.mxu1 %v7135_v37  ;;  %v4351_v37 = vadd.f32 %v9192_v16, %v9184_v36  ;;  %v7751_v36 = vor.u32 %v8644_v19, %v7748_v20  ;;  %v8642_v16 = vld [vmem:[#allocation7 + $0x14] sm:$0xf] }
 0x317   :  { %5094 = vmatpush.bf16.msra.mxu2 %v7755_v43  ;;  %v8637_v43 = vld [vmem:[#allocation6 + $0x7ec] sm:$0xf]  ;;  %v7743_v54 = vor.u32 %v8642_v16, %v7740_v40  ;;  %v7890_v40 = vld [vmem:[#allocation7 + $0x140] sm:$0xf] }
 0x318   :  { %5108 = vmatpush.bf16.msra.mxu3 %v7811_v27  ;;  %v7727_v58 = vor.u32 %v8637_v43, %v7724_v44  ;;  %v7660_v27 = vld [vmem:[#allocation6 + $0x778] sm:$0xf0]  ;;  %v7831_v44 = vor.u32 %v8664_v52, %v7828_v41  ;;  %v8681_v52 = vld [vmem:[#allocation7 + $0x144] sm:$0xf0] }
 0x319   :  { %4672 = vmatpush.bf16.msra.mxu0 %v7503_v23  ;;  %v7679_v23 = vor.u32 %v8625_v8, %v7676_v18 }
 0x31a   :  { %4633 = vmatpush.bf16.msrb.mxu1 %v7119_v39 }
 0x31b   :  { %5095 = vmatpush.bf16.msra.mxu2 %v7747_v28  ;;  %v8633_v28 = vld [vmem:[#allocation6 + $0x7cc] sm:$0xf] }
 0x31c   :  { %5109 = vmatpush.bf16.msra.mxu3 %v7803_v57  ;;  %v7711_v5 = vor.u32 %v8633_v28, %v7708_v59  ;;  %v4376_v31 = vpop.f32.mrf.mxu1  ;;  %v7820_v57 = vld [vmem:[#allocation7 + $0xb8] sm:$0xf0] }
 0x31d   :  { %4673 = vmatpush.bf16.msra.mxu0 %v7487_v49  ;;  %v9213_v39 = vpop.f32.mrf.mxu0  ;;  %v7644_v49 = vld [vmem:[#allocation6 + $0x758] sm:$0xf0] }
 0x31e   :  { %v4456_v24 = vpop.f32.mrf.mxu3  ;;  %4634 = vmatpush.bf16.msrb.mxu1 %v7103_v55  ;;  %v8662_v55 = vld [vmem:[#allocation7 + $0xb4] sm:$0xf] }
 0x31f   :  { %5096 = vmatpush.bf16.msra.mxu2 %v7739_v6  ;;  %v8668_v6 = vld [vmem:[#allocation7 + $0xe4] sm:$0xf]  ;;  %v8617_v24 = vld [vmem:[#allocation6 + $0x74c] sm:$0xf]  ;;  %v7823_v28 = vor.u32 %v8662_v55, %v7820_v57 }
 0x320   :  { %4674 = vmatmul.bf16.vlgmr.msra.gmra.mxu0 %v9161_v63  ;;  %5110 = vmatpush.bf16.msra.mxu3 %v7795_v61  ;;  %v7847_v15 = vor.u32 %v8668_v6, %v7844_v9  ;;  %v7759_v63 = vor.u32 %v8646_v13, %v7756_v14  ;;  %v7647_v56 = vor.u32 %v8617_v24, %v7644_v49  ;;  %v8658_v13 = vld [vmem:[#allocation7 + $0x94] sm:$0xf]  ;;  %v7804_v14 = vld [vmem:[#allocation7 + $0x98] sm:$0xf0] }
 0x321   :  { %4635 = vmatmul.bf16.vlgmr.msrb.gmra.mxu1 %v9134_v7  ;;  %v4364_v7 = vadd.f32 %v9200_v38, %v4351_v37  ;;  %v9218_v38 = vld [vmem:[%s9313_s8] sm:$0xf]  ;;  %v7815_v9 = vor.u32 %v8660_v21, %v7812_v34  ;;  %v7807_v8 = vor.u32 %v8658_v13, %v7804_v14  ;;  %v8686_v21 = vld [vmem:[#allocation7 + $0x174] sm:$0xf]  ;;  %v7916_v34 = vld [vmem:[#allocation7 + $0x178] sm:$0xf0] }
 0x322   :  { %4679 = vmatpush.bf16.msra.mxu1 %v7727_v58  ;;  %v2990_v43 = vperm.slane %v9218_v38, 2  ;;  %v2989_v25 = vperm.slane %v9218_v38, 1  ;;  %v7892_v13 = vld [vmem:[#allocation7 + $0x148] sm:$0xf0] }
 0x323   :  { %5097 = vmatpush.bf16.msra.mxu2 %v7731_v30  ;;  %v7836_v30 = vld [vmem:[#allocation7 + $0xd8] sm:$0xf0]  ;;  %v4377_v33 = vadd.f32 %v4376_v31, %v4364_v7  ;;  %v7796_v7 = vld [vmem:[#allocation7 + $0x88] sm:$0xf0]  ;;  %v7906_v31 = vld [vmem:[#allocation7 + $0x160] sm:$0xf] }
 0x324   :  { %5155 = vmatpush.bf16.msrb.mxu3 %v7855_v1  ;;  %v4378_v59 = vpop.f32.mrf.mxu1  ;;  %v7628_v1 = vld [vmem:[#allocation6 + $0x738] sm:$0xf0]  ;;  %v4390_v12 = vadd.f32 %v9190_v2, %v2989_v25 }
 0x325   :  { %v4692_v51 = vmax.f32 %v4377_v33, 0.0  ;;  %v4469_v6 = vpop.f32.mrf.mxu0  ;;  %v7631_v29 = vor.u32 %v8613_v0, %v7628_v1  ;;  %v7858_v59 = vld [vmem:[#allocation7 + $0x100] sm:$0xf]  ;;  %v7919_v0 = vor.u32 %v8686_v21, %v7916_v34  ;;  %v8684_v1 = vld [vmem:[#allocation7 + $0x164] sm:$0xf] }
 0x326   :  { %4680 = vmatpush.bf16.msra.mxu1 %v7711_v5  ;;  %v7735_v5 = vor.u32 %v8640_v53, %v7732_v46  ;;  %v4403_v37 = vadd.f32 %v9195_v42, %v4390_v12  ;;  %v8677_v53 = vld [vmem:[#allocation7 + $0x124] sm:$0xf0]  ;;  %v8680_v12 = vld [vmem:[#allocation7 + $0x144] sm:$0xf] }
 0x327   :  { %5142 = vmatpush.bf16.msrb.mxu2 %v7791_v4  ;;  %v7839_v4 = vor.u32 %v8666_v17, %v7836_v30  ;;  %v4696_v47 = vpack.c.bf16 %v4692_v51, %v4692_v51  ;;  %v8656_v30 = vld [vmem:[#allocation7 + $0x84] sm:$0xf]  ;;  %v8693_v34 = vld [vmem:[#allocation7 + $0x1a4] sm:$0xf0] }
 0x328   :  { %5156 = vmatpush.bf16.msrb.mxu3 %v7847_v15  ;;  %v7914_v15 = vld [vmem:[#allocation7 + $0x170] sm:$0xf]  ;;  %v4416_v17 = vadd.f32 %v9206_v48, %v4403_v37  ;;  %v8683_v48 = vld [vmem:[#allocation7 + $0x154] sm:$0xf0] }
 0x329   :  { %v4493_v32 = vpop.f32.mrf.mxu2  ;;  %5098 = vmatmul.bf16.vlgmr.msra.gmra.mxu2 %v4696_v47 }
 0x32a   :  { %4681 = vmatpush.bf16.msra.mxu1 %v7695_v26  ;;  %v4494_v58 = vadd.f32 %v4493_v32, %v2990_v43  ;;  %v8687_v26 = vld [vmem:[#allocation7 + $0x174] sm:$0xf0]  ;;  %v8685_v32 = vld [vmem:[#allocation7 + $0x164] sm:$0xf0] }
 0x32b   :  { %5143 = vmatpush.bf16.msrb.mxu2 %v7783_v45  ;;  %v7663_v45 = vor.u32 %v8621_v35, %v7660_v27  ;;  %v7915_v18 = vor.u32 %v8687_v26, %v7914_v15  ;;  %v7898_v35 = vld [vmem:[#allocation7 + $0x150] sm:$0xf]  ;;  %v7895_v15 = vor.u32 %v8680_v12, %v7892_v13  ;;  %v2991_v26 = vperm.slane %v9218_v38, 3  ;;  %v8672_v38 = vld [vmem:[#allocation7 + $0x104] sm:$0xf] }
 0x32c   :  { %5157 = vmatpush.bf16.msrb.mxu3 %v7839_v4  ;;  %v7799_v4 = vor.u32 %v8656_v30, %v7796_v7  ;;  %v7876_v30 = vld [vmem:[#allocation7 + $0x128] sm:$0xf0]  ;;  %v8702_v13 = vld [vmem:[#allocation7 + $0x1f4] sm:$0xf] }
 0x32d   :  { %5116 = vmatpush.bf16.msrb.mxu0 %v7915_v18  ;;  %v7884_v18 = vld [vmem:[#allocation7 + $0x138] sm:$0xf0] }
 0x32e   :  { %4682 = vmatpush.bf16.msra.mxu1 %v7679_v23  ;;  %v7907_v23 = vor.u32 %v8685_v32, %v7906_v31 }
 0x32f   :  { %5144 = vmatpush.bf16.msrb.mxu2 %v7775_v60  ;;  %v4506_v60 = vpop.f32.mrf.mxu3 }
 0x330   :  { %5158 = vmatpush.bf16.msrb.mxu3 %v7831_v44  ;;  %v9222_v61 = vadd.f32 %v4506_v60, %v4494_v58  ;;  %v7882_v44 = vld [vmem:[#allocation7 + $0x130] sm:$0xf] }
 0x331   :  { %v4495_v22 = vpop.f32.mrf.mxu2  ;;  %5117 = vmatpush.bf16.msrb.mxu0 %v7907_v23  ;;  %v7868_v23 = vld [vmem:[#allocation7 + $0x118] sm:$0xf0] }
 0x332   :  { %4683 = vmatpush.bf16.msra.mxu1 %v7663_v45  ;;  %v8679_v45 = vld [vmem:[#allocation7 + $0x134] sm:$0xf0] }
 0x333   :  { %5145 = vmatpush.bf16.msrb.mxu2 %v7767_v11  ;;  %v7612_v11 = vld [vmem:[#allocation6 + $0x718] sm:$0xf0]  ;;  %v7883_v24 = vor.u32 %v8679_v45, %v7882_v44 }
 0x334   :  { %5159 = vmatpush.bf16.msrb.mxu3 %v7823_v28  ;;  %v7615_v20 = vor.u32 %v8609_v10, %v7612_v11  ;;  %v8675_v28 = vld [vmem:[#allocation7 + $0x114] sm:$0xf0] }
 0x336   :  { %4684 = vmatpush.bf16.msra.mxu1 %v7647_v56  ;;  %v8673_v56 = vld [vmem:[#allocation7 + $0x104] sm:$0xf0] }
 0x337   :  { %5146 = vmatpush.bf16.msrb.mxu2 %v7759_v63  ;;  %v4428_v63 = vpop.f32.mrf.mxu1  ;;  %v4508_v19 = vpop.f32.mrf.mxu3  ;;  %v7859_v22 = vor.u32 %v8673_v56, %v7858_v59 }
 0x338   :  { %5160 = vmatpush.bf16.msrb.mxu3 %v7815_v9  ;;  %v4429_v2 = vadd.f32 %v4428_v63, %v4416_v17  ;;  %v8682_v9 = vld [vmem:[#allocation7 + $0x154] sm:$0xf]  ;;  %v8676_v17 = vld [vmem:[#allocation7 + $0x124] sm:$0xf] }
 0x33a   :  { %4685 = vmatpush.bf16.msra.mxu1 %v7631_v29  ;;  %v4442_v42 = vadd.f32 %v9202_v3, %v4429_v2  ;;  %v7900_v29 = vld [vmem:[#allocation7 + $0x158] sm:$0xf0] }
 0x33b   :  { %5147 = vmatpush.bf16.msrb.mxu2 %v7751_v36  ;;  %v7899_v36 = vor.u32 %v8683_v48, %v7898_v35  ;;  %v7903_v10 = vor.u32 %v8682_v9, %v7900_v29  ;;  %v7860_v35 = vld [vmem:[#allocation7 + $0x108] sm:$0xf0]  ;;  %v7978_v48 = vld [vmem:[#allocation7 + $0x1f0] sm:$0xf] }
 0x33c   :  { %5161 = vmatpush.bf16.msrb.mxu3 %v7807_v8  ;;  %v4455_v27 = vadd.f32 %v9204_v62, %v4442_v42  ;;  %v8678_v8 = vld [vmem:[#allocation7 + $0x134] sm:$0xf] }
 0x33d   :  { %5118 = vmatpush.bf16.msrb.mxu0 %v7899_v36  ;;  %v9232_v41 = vpop.f32.mrf.mxu0  ;;  %v7887_v63 = vor.u32 %v8678_v8, %v7884_v18  ;;  %v8674_v42 = vld [vmem:[#allocation7 + $0x114] sm:$0xf] }
 0x33e   :  { %4686 = vmatpush.bf16.msra.mxu1 %v7615_v20  ;;  %v4468_v3 = vadd.f32 %v9213_v39, %v4455_v27  ;;  %v7866_v39 = vld [vmem:[#allocation7 + $0x110] sm:$0xf]  ;;  %v8703_v27 = vld [vmem:[#allocation7 + $0x1f4] sm:$0xf0]  ;;  %v8698_v18 = vld [vmem:[#allocation7 + $0x1d4] sm:$0xf] }
 0x33f   :  { %5148 = vmatpush.bf16.msrb.mxu2 %v7743_v54  ;;  %v4430_v33 = vpop.f32.mrf.mxu1  ;;  %v7874_v54 = vld [vmem:[#allocation7 + $0x120] sm:$0xf]  ;;  %v7867_v60 = vor.u32 %v8675_v28, %v7866_v39  ;;  %v7979_v36 = vor.u32 %v8703_v27, %v7978_v48  ;;  %v8695_v28 = vld [vmem:[#allocation7 + $0x1b4] sm:$0xf0]  ;;  %v8690_v27 = vld [vmem:[#allocation7 + $0x194] sm:$0xf] }
 0x340   :  { %5162 = vmatpush.bf16.msrb.mxu3 %v7799_v4  ;;  %v7875_v55 = vor.u32 %v8677_v53, %v7874_v54  ;;  %v7879_v4 = vor.u32 %v8676_v17, %v7876_v30  ;;  %v7871_v33 = vor.u32 %v8674_v42, %v7868_v23  ;;  %v7956_v17 = vld [vmem:[#allocation7 + $0x1c8] sm:$0xf0]  ;;  %v8692_v23 = vld [vmem:[#allocation7 + $0x1a4] sm:$0xf] }
 0x341   :  { %4687 = vmatmul.bf16.vlgmr.msra.gmra.mxu1 %v9168_v50  ;;  %v7891_v50 = vor.u32 %v8681_v52, %v7890_v40  ;;  %v7863_v52 = vor.u32 %v8672_v38, %v7860_v35  ;;  %v7940_v38 = vld [vmem:[#allocation7 + $0x1a8] sm:$0xf0] }
 0x342   :  { %5129 = vmatpush.bf16.msrb.mxu1 %v7979_v36  ;;  %v7932_v36 = vld [vmem:[#allocation7 + $0x198] sm:$0xf0] }
 0x343   :  { %5149 = vmatpush.bf16.msrb.mxu2 %v7735_v5  ;;  %5119 = vmatpush.bf16.msrb.mxu0 %v7891_v50  ;;  %v7908_v5 = vld [vmem:[#allocation7 + $0x168] sm:$0xf0] }
 0x344   :  { %v7911_v6 = vor.u32 %v8684_v1, %v7908_v5  ;;  %v8691_v1 = vld [vmem:[#allocation7 + $0x194] sm:$0xf0] }
 0x345   :  { %v9235_v62 = vpop.f32.mrf.mxu3  ;;  %v4521_v57 = vpop.f32.mrf.mxu0 }
 0x346   :  { %5150 = vmatmul.bf16.vlgmr.msrb.gmra.mxu2 %v4696_v47 }
 0x347   :  { %v4480_v51 = vpop.f32.mrf.mxu1  ;;  %5120 = vmatpush.bf16.msrb.mxu0 %v7883_v24  ;;  %v8699_v24 = vld [vmem:[#allocation7 + $0x1d4] sm:$0xf0] }
 0x348   :  { %v4481_v43 = vadd.f32 %v4480_v51, %v4468_v3  ;;  %v4520_v3 = vadd.f32 %v9232_v41, %v9222_v61  ;;  %v7970_v51 = vld [vmem:[#allocation7 + $0x1e0] sm:$0xf] }
 0x349   :  { %v9230_v16 = vpop.f32.mrf.mxu2 }
 0x34a   :  { %v4693_v47 = vmax.f32 %v4481_v43, 0.0  ;;  %v8701_v43 = vld [vmem:[#allocation7 + $0x1e4] sm:$0xf0] }
 0x34b   :  { %5121 = vmatpush.bf16.msrb.mxu0 %v7875_v55  ;;  %v7971_v45 = vor.u32 %v8701_v43, %v7970_v51  ;;  %v8697_v55 = vld [vmem:[#allocation7 + $0x1c4] sm:$0xf0] }
 0x34c   :  { %v4697_v49 = vpack.c.bf16 %v4693_v47, %v4693_v47  ;;  %v7962_v47 = vld [vmem:[#allocation7 + $0x1d0] sm:$0xf] }
 0x34d   :  { %v4560_v25 = vpop.f32.mrf.mxu3  ;;  %5130 = vmatpush.bf16.msrb.mxu1 %v7971_v45  ;;  %v7963_v54 = vor.u32 %v8699_v24, %v7962_v47 }
 0x34e   :  { %5111 = vmatmul.bf16.vlgmr.msra.gmra.mxu3 %v4697_v49 }
 0x34f   :  { %v4482_v58 = vpop.f32.mrf.mxu1  ;;  %5122 = vmatpush.bf16.msrb.mxu0 %v7867_v60 }
 0x351   :  { %v4547_v46 = vpop.f32.mrf.mxu2  ;;  %5131 = vmatpush.bf16.msrb.mxu1 %v7963_v54 }
 0x352   :  { %v7954_v46 = vld [vmem:[#allocation7 + $0x1c0] sm:$0xf] }
 0x353   :  { %5123 = vmatpush.bf16.msrb.mxu0 %v7859_v22  ;;  %v7955_v41 = vor.u32 %v8697_v55, %v7954_v46 }
 0x355   :  { %5132 = vmatpush.bf16.msrb.mxu1 %v7955_v41 }
 0x357   :  { %5168 = vmatpush.bf16.msra.mxu0 %v7919_v0  ;;  %v7930_v0 = vld [vmem:[#allocation7 + $0x190] sm:$0xf] }
 0x358   :  { %v7931_v9 = vor.u32 %v8691_v1, %v7930_v0  ;;  %v8710_v0 = vld [vmem:[%s9316_s11 + $0x30] sm:$0xff] }
 0x359   :  { %v8718_v1 = vld [vmem:[%s9316_s11 + $0x70] sm:$0xff] }
 0x35b   :  { %5169 = vmatpush.bf16.msra.mxu0 %v7911_v6 }
 0x35d   :  { %v4571_v14 = vpop.f32.mrf.mxu0 }
 0x35e   :  { %5163 = vmatmul.bf16.vlgmr.msrb.gmra.mxu3 %v4697_v49 }
 0x35f   :  { %5170 = vmatpush.bf16.msra.mxu0 %v7903_v10  ;;  %v7922_v10 = vld [vmem:[#allocation7 + $0x180] sm:$0xf] }
 0x360   :  { %v4532_v37 = vpop.f32.mrf.mxu1 }
 0x361   :  { %v4533_v50 = vadd.f32 %v4532_v37, %v4520_v3  ;;  %v7972_v37 = vld [vmem:[#allocation7 + $0x1e8] sm:$0xf0] }
 0x362   :  { %v7924_v3 = vld [vmem:[#allocation7 + $0x188] sm:$0xf0] }
 0x363   :  { %5171 = vmatpush.bf16.msra.mxu0 %v7895_v15  ;;  %v4610_v20 = vpop.f32.mrf.mxu3  ;;  %v4546_v44 = vadd.f32 %v9230_v16, %v4533_v50  ;;  %v7946_v16 = vld [vmem:[#allocation7 + $0x1b0] sm:$0xf] }
 0x364   :  { %v7947_v60 = vor.u32 %v8695_v28, %v7946_v16 }
 0x365   :  { %v4573_v31 = vpop.f32.mrf.mxu0  ;;  %v4559_v49 = vadd.f32 %v9235_v62, %v4546_v44  ;;  %v7938_v62 = vld [vmem:[#allocation7 + $0x1a0] sm:$0xf] }
 0x366   :  { %5133 = vmatpush.bf16.msrb.mxu1 %v7947_v60  ;;  %v7939_v22 = vor.u32 %v8693_v34, %v7938_v62  ;;  %v8694_v31 = vld [vmem:[#allocation7 + $0x1b4] sm:$0xf] }
 0x367   :  { %5172 = vmatpush.bf16.msra.mxu0 %v7887_v63  ;;  %v4572_v57 = vadd.f32 %v4571_v14, %v4559_v49  ;;  %v7980_v14 = vld [vmem:[#allocation7 + $0x1f8] sm:$0xf0] }
 0x368   :  { %v4534_v32 = vpop.f32.mrf.mxu1  ;;  %v7983_v15 = vor.u32 %v8702_v13, %v7980_v14  ;;  %v7964_v63 = vld [vmem:[#allocation7 + $0x1d8] sm:$0xf0]  ;;  %v8705_v14 = vld [vmem:[%s9316_s11 + $0x8] sm:$0xff] }
 0x369   :  { %v4597_v11 = vpop.f32.mrf.mxu2  ;;  %v7948_v32 = vld [vmem:[#allocation7 + $0x1b8] sm:$0xf0] }
 0x36a   :  { %v4598_v19 = vadd.f32 %v4597_v11, %v2991_v26  ;;  %5134 = vmatpush.bf16.msrb.mxu1 %v7939_v22  ;;  %v8689_v11 = vld [vmem:[#allocation7 + $0x184] sm:$0xf0]  ;;  %v8700_v26 = vld [vmem:[#allocation7 + $0x1e4] sm:$0xf]  ;;  %v7951_v42 = vor.u32 %v8694_v31, %v7948_v32  ;;  %v8719_v22 = vld [vmem:[%s9316_s11 + $0x78] sm:$0xff] }
 0x36b   :  { %5173 = vmatpush.bf16.msra.mxu0 %v7879_v4  ;;  %v4612_v40 = vpop.f32.mrf.mxu3  ;;  %v7923_v12 = vor.u32 %v8689_v11, %v7922_v10  ;;  %v7975_v8 = vor.u32 %v8700_v26, %v7972_v37  ;;  %5339 = vmatpush.bf16.msra.mxu3 %v8719_v22  ;;  %v8706_v11 = vld [vmem:[%s9316_s11 + $0x10] sm:$0xff]  ;;  %v8704_v26 = vld [vmem:[%s9316_s11] sm:$0xff] }
 0x36c   :  { %v9238_v7 = vadd.f32 %v4610_v20, %v4598_v19  ;;  %v7967_v19 = vor.u32 %v8698_v18, %v7964_v63  ;;  %v8696_v20 = vld [vmem:[#allocation7 + $0x1c4] sm:$0xf]  ;;  %v7935_v40 = vor.u32 %v8690_v27, %v7932_v36  ;;  %v8714_v18 = vld [vmem:[%s9316_s11 + $0x50] sm:$0xff]  ;;  %v8713_v63 = vld [vmem:[%s9316_s11 + $0x48] sm:$0xff] }
 0x36d   :  { %v8716_v37 = vld [vmem:[%s9316_s11 + $0x60] sm:$0xff] }
 0x36e   :  { %5135 = vmatpush.bf16.msrb.mxu1 %v7931_v9  ;;  %v8708_v9 = vld [vmem:[%s9316_s11 + $0x20] sm:$0xff] }
 0x36f   :  { %5174 = vmatpush.bf16.msra.mxu0 %v7871_v33  ;;  %v7943_v33 = vor.u32 %v8692_v23, %v7940_v38  ;;  %5340 = vmatpush.bf16.msra.mxu3 %v8718_v1 }
 0x371   :  { %v4599_v2 = vpop.f32.mrf.mxu2 }
 0x372   :  { %5136 = vmatpush.bf16.msrb.mxu1 %v7923_v12  ;;  %v7959_v2 = vor.u32 %v8696_v20, %v7956_v17 }
 0x373   :  { %5175 = vmatpush.bf16.msra.mxu0 %v7863_v52  ;;  %v8688_v52 = vld [vmem:[#allocation7 + $0x184] sm:$0xf] }
 0x374   :  { %v7927_v50 = vor.u32 %v8688_v52, %v7924_v3 }
 0x376   :  { %5181 = vmatpush.bf16.msra.mxu1 %v7983_v15  ;;  %v8717_v15 = vld [vmem:[%s9316_s11 + $0x68] sm:$0xff] }
 0x377   :  { %5341 = vmatpush.bf16.msra.mxu3 %v8717_v15 }
 0x37a   :  { %5182 = vmatpush.bf16.msra.mxu1 %v7975_v8  ;;  %v8715_v8 = vld [vmem:[%s9316_s11 + $0x58] sm:$0xff] }
 0x37b   :  { %5342 = vmatpush.bf16.msra.mxu3 %v8716_v37 }
 0x37d   :  { %v9246_v61 = vpop.f32.mrf.mxu0 }
 0x37e   :  { %v4584_v58 = vpop.f32.mrf.mxu1  ;;  %5183 = vmatpush.bf16.msra.mxu1 %v7967_v19  ;;  %v4624_v51 = vadd.f32 %v9246_v61, %v9238_v7  ;;  %v8712_v19 = vld [vmem:[%s9316_s11 + $0x40] sm:$0xff] }
 0x37f   :  { %v4585_v39 = vadd.f32 %v4584_v58, %v4572_v57  ;;  %5343 = vmatpush.bf16.msra.mxu3 %v8715_v8 }
 0x381   :  { %v4694_v59 = vmax.f32 %v4585_v39, 0.0  ;;  %v4764_v39 = vld [vmem:[%s9315_s10] sm:$0x3] }
 0x382   :  { %5184 = vmatpush.bf16.msra.mxu1 %v7959_v2  ;;  %v4766_v61 = vperm.slane %v4764_v39, 0  ;;  %v4767_v60 = vperm.slane %v4764_v39, 1 }
 0x383   :  { %v4698_v21 = vpack.c.bf16 %v4694_v59, %v4694_v59  ;;  %5344 = vmatpush.bf16.msra.mxu3 %v8714_v18 }
 0x385   :  { %5124 = vmatmul.bf16.vlgmr.msrb.gmra.mxu0 %v4698_v21  ;;  %v4625_v5 = vpop.f32.mrf.mxu0 }
 0x386   :  { %v4662_v56 = vpop.f32.mrf.mxu3  ;;  %v4586_v6 = vpop.f32.mrf.mxu1  ;;  %5185 = vmatpush.bf16.msra.mxu1 %v7951_v42  ;;  %v8709_v5 = vld [vmem:[%s9316_s11 + $0x28] sm:$0xff] }
 0x387   :  { %5345 = vmatpush.bf16.msra.mxu3 %v8713_v63 }
 0x389   :  { %v9244_v53 = vpop.f32.mrf.mxu2 }
 0x38a   :  { %5186 = vmatpush.bf16.msra.mxu1 %v7943_v33 }
 0x38b   :  { %5346 = vmatpush.bf16.msra.mxu3 %v8712_v19 }
 0x38e   :  { %v4664_v29 = vpop.f32.mrf.mxu3  ;;  %5187 = vmatpush.bf16.msra.mxu1 %v7935_v40 }
 0x38f   :  { %v8707_v29 = vld [vmem:[%s9316_s11 + $0x18] sm:$0xff] }
 0x391   :  { %v4651_v25 = vpop.f32.mrf.mxu2 }
 0x392   :  { %5188 = vmatpush.bf16.msra.mxu1 %v7927_v50  ;;  %v8711_v25 = vld [vmem:[%s9316_s11 + $0x38] sm:$0xff] }
 0x393   :  { %5326 = vmatpush.bf16.msra.mxu2 %v8711_v25 }
 0x395   :  { %5176 = vmatmul.bf16.vlgmr.msra.gmra.mxu0 %v4698_v21 }
 0x397   :  { %5327 = vmatpush.bf16.msra.mxu2 %v8710_v0 }
 0x39b   :  { %5328 = vmatpush.bf16.msra.mxu2 %v8709_v5 }
 0x39d   :  { %v4675_v30 = vpop.f32.mrf.mxu0 }
 0x39e   :  { %v4636_v4 = vpop.f32.mrf.mxu1 }
 0x39f   :  { %v4637_v43 = vadd.f32 %v4636_v4, %v4624_v51  ;;  %5329 = vmatpush.bf16.msra.mxu2 %v8708_v9 }
 0x3a1   :  { %v4650_v45 = vadd.f32 %v9244_v53, %v4637_v43 }
 0x3a3   :  { %v4663_v47 = vadd.f32 %v4662_v56, %v4650_v45  ;;  %5330 = vmatpush.bf16.msra.mxu2 %v8707_v29 }
 0x3a5   :  { %v4677_v35 = vpop.f32.mrf.mxu0  ;;  %v4676_v49 = vadd.f32 %v4675_v30, %v4663_v47 }
 0x3a6   :  { %v4638_v48 = vpop.f32.mrf.mxu1 }
 0x3a7   :  { %5331 = vmatpush.bf16.msra.mxu2 %v8706_v11 }
 0x3ab   :  { %5332 = vmatpush.bf16.msra.mxu2 %v8705_v14 }
 0x3ac   :  { %v5099_v44 = vpop.f32.mrf.mxu2 }
 0x3ad   :  { %v5100_v16 = vadd.f32 %v5099_v44, %v4766_v61 }
 0x3af   :  { %5333 = vmatpush.bf16.msra.mxu2 %v8704_v26 }
 0x3b4   :  { %v5101_v24 = vpop.f32.mrf.mxu2 }
 0x3be   :  { %v4688_v54 = vpop.f32.mrf.mxu1 }
 0x3bf   :  { %v4689_v46 = vadd.f32 %v4688_v54, %v4676_v49 }
 0x3c1   :  { %v4695_v55 = vmax.f32 %v4689_v46, 0.0 }
 0x3c3   :  { %v4699_v57 = vpack.c.bf16 %v4695_v55, %v4695_v55 }
 0x3c5   :  { %5137 = vmatmul.bf16.vlgmr.msrb.gmra.mxu1 %v4699_v57 }
 0x3c6   :  { %v4690_v58 = vpop.f32.mrf.mxu1 }
 0x3c9   :  { %v5151_v41 = vpop.f32.mrf.mxu2 }
 0x3ca   :  { %v5152_v56 = vadd.f32 %v5151_v41, %v4767_v60 }
 0x3d1   :  { %v5153_v7 = vpop.f32.mrf.mxu2  ;;  %v5112_v28 = vpop.f32.mrf.mxu3 }
 0x3d2   :  { %v5113_v59 = vadd.f32 %v5112_v28, %v5100_v16 }
 0x3d5   :  { %5189 = vmatmul.bf16.vlgmr.msra.gmra.mxu1 %v4699_v57 }
 0x3d9   :  { %v5114_v53 = vpop.f32.mrf.mxu3 }
 0x3e1   :  { %v5164_v21 = vpop.f32.mrf.mxu3 }
 0x3e2   :  { %v5165_v62 = vadd.f32 %v5164_v21, %v5152_v56 }
 0x3e9   :  { %v5166_v34 = vpop.f32.mrf.mxu3 }
 0x402   :  { %v5125_v6 = vpop.f32.mrf.mxu0 }
 0x403   :  { %v5126_v20 = vadd.f32 %v5125_v6, %v5113_v59 }
 0x40a   :  { %v5127_v10 = vpop.f32.mrf.mxu0 }
 0x412   :  { %v5177_v12 = vpop.f32.mrf.mxu0 }
 0x413   :  { %v5178_v32 = vadd.f32 %v5177_v12, %v5165_v62 }
 0x41a   :  { %v5179_v13 = vpop.f32.mrf.mxu0 }
 0x442   :  { %v5138_v17 = vpop.f32.mrf.mxu1 }
 0x443   :  { %v5139_v30 = vadd.f32 %v5138_v17, %v5126_v20 }
 0x445   :  { %v5194_v2 = vmax.f32 %v5139_v30, 0.0 }
 0x447   :  { %v5196_v4 = vpack.c.bf16 %v5194_v2, %v5194_v2 }
 0x449   :  { %5334 = vmatmul.bf16.vlgmr.msra.gmra.mxu2 %v5196_v4 }
 0x44a   :  { %v5140_v31 = vpop.f32.mrf.mxu1 }
 0x452   :  { %v5190_v42 = vpop.f32.mrf.mxu1 }
 0x453   :  { %v5191_v23 = vadd.f32 %v5190_v42, %v5178_v32 }
 0x455   :  { %v5195_v38 = vmax.f32 %v5191_v23, 0.0 }
 0x457   :  { %v5197_v33 = vpack.c.bf16 %v5195_v38, %v5195_v38 }
 0x459   :  { %5347 = vmatmul.bf16.vlgmr.msra.gmra.mxu3 %v5197_v33 }
 0x45a   :  { %v5192_v35 = vpop.f32.mrf.mxu1 }
 0x4cc   :  { %v5335_v48 = vpop.f32.mrf.mxu2 }
 0x4d4   :  { %v5337_v27 = vpop.f32.mrf.mxu2 }
 0x4dc   :  { %v5348_v36 = vpop.f32.mrf.mxu3 }
 0x4dd   :  { %v5349_v40 = vadd.f32 %v5348_v36, %v5335_v48 }
 0x4df   :  { %5352 = vst [vmem:[%s9317_s12] sm:$0x3] %v5349_v40 }
 0x4e4   :  { %v5350_v52 = vpop.f32.mrf.mxu3 }
 0x4e5   :  { %5357 = vsyncpa [#allocation3], 1 }
 0x4e6   :  { %5358 = vsyncpa [#allocation5], 1 }
 0x4e7   :  { %5359 = vsyncpa [#allocation8], 1 }

// kernel: _poly_forward_impl.1
= control target key start
LH: loop header
LB: loop body
LE: loop exit
PB: predicated region body
PF: predicated region fallthrough
CT: control target
= control target key end

     0   :  { %17 = vsyncpa [#allocation3], 0  ;;  %s9305_s0 = inlined_call_operand.vmem [shape: f32[2,128], index: 0, kind: input, shape index: {}]   ;;  %s9306_s1 = inlined_call_operand.vmem [shape: bf16[128,256], index: 1, kind: input, shape index: {}]   ;;  %s9307_s2 = inlined_call_operand.vmem [shape: f32[1,256], index: 2, kind: input, shape index: {}]   ;;  %s9308_s3 = inlined_call_operand.hbm [shape: bf16[256,512], index: 3, kind: input, shape index: {}]   ;;  %s9309_s4 = inlined_call_operand.vmem [shape: f32[1,512], index: 4, kind: input, shape index: {}]   ;;  %s9310_s5 = inlined_call_operand.hbm [shape: bf16[512,1024], index: 5, kind: input, shape index: {}]   ;;  %s9311_s6 = inlined_call_operand.vmem [shape: f32[1,1024], index: 6, kind: input, shape index: {}]   ;;  %s9312_s7 = inlined_call_operand.hbm [shape: bf16[1024,512], index: 7, kind: input, shape index: {}]   ;;  %s9313_s8 = inlined_call_operand.vmem [shape: f32[1,512], index: 8, kind: input, shape index: {}]   ;;  %s9314_s9 = inlined_call_operand.hbm [shape: bf16[512,256], index: 9, kind: input, shape index: {}]   ;;  %s9315_s10 = inlined_call_operand.vmem [shape: f32[1,256], index: 10, kind: input, shape index: {}]   ;;  %s9316_s11 = inlined_call_operand.vmem [shape: bf16[256,128], index: 11, kind: input, shape index: {}]   ;;  %s9317_s12 = inlined_call_operand.vmem [shape: f32[2,128], index: 12, kind: output, shape index: {}]  }
   0x1   :  { %18 = vsyncpa [#allocation5], 0  ;;  %s45_s23 = sshll.u32 %s9310_s5, 4  ;;  %s46_s23 = int_to_ptr.hbm [resolvable:$true] %s45_s23 }
   0x2   :  { %19 = vsyncpa [#allocation8], 0  ;;  %s8834_s24 = smov [#allocation4]   ;;  %s30_s28 = sshll.u32 %s9308_s3, 4  ;;  %s31_s28 = int_to_ptr.hbm [resolvable:$true] %s30_s28 }
   0x3   :  { %s47_s25 = sshll.u32 %s8834_s24, 4  ;;  %s8835_s29 = smov 512   ;;  %s48_s25 = int_to_ptr.vmem [resolvable:$true] %s47_s25 }
   0x4   :  { %s8836_s30 = smov 32   ;;  %s8837_s13 = smov [#allocation2]  }
   0x5   :  { %53 = dma.hbm_to_vmem [thread:$0]  %s46_s23, 32768, %s48_s25, [#allocation5], %s8835_s29, %s8835_s29, %s8836_s30  }
   0x6   :  { %s32_s14 = sshll.u32 %s8837_s13, 4  ;;  %s8838_s15 = smov 256   ;;  %s33_s14 = int_to_ptr.vmem [resolvable:$true] %s32_s14 }
   0x7   :  { %s8839_s16 = smov 16   ;;  %s60_s18 = sshll.u32 %s9312_s7, 4  ;;  %s61_s18 = int_to_ptr.hbm [resolvable:$true] %s60_s18 }
   0x8   :  { %38 = dma.hbm_to_vmem [thread:$0]  %s31_s28, 8192, %s33_s14, [#allocation3], %s8838_s15, %s8838_s15, %s8839_s16  }
   0x9   :  { %s8840_s19 = smov [#allocation6]   ;;  %s75_s22 = sshll.u32 %s9314_s9, 4  ;;  %s76_s22 = int_to_ptr.hbm [resolvable:$true] %s75_s22 }
   0xa   :  { %s62_s20 = sshll.u32 %s8840_s19, 4  ;;  %s8841_s23 = smov [#allocation7]   ;;  %s63_s20 = int_to_ptr.vmem [resolvable:$true] %s62_s20 }
   0xb   :  { %68 = dma.hbm_to_vmem [thread:$0]  %s61_s18, 32768, %s63_s20, [#allocation5], %s8838_s15, %s8838_s15, %s8839_s16  }
   0xc   :  { %s77_s24 = sshll.u32 %s8841_s23, 4  ;;  %s8842_s25 = smov 128   ;;  %s78_s24 = int_to_ptr.vmem [resolvable:$true] %s77_s24 }
   0xd   :  { %s8843_s26 = smov 8  }
   0xe   :  { %83 = dma.hbm_to_vmem [thread:$0]  %s76_s22, 8192, %s78_s24, [#allocation8], %s8842_s25, %s8842_s25, %s8843_s26  }
   0xf   :  { %8828 = dma.done.wait [#allocation3], 8192  }
  0x10   :  { %8829 = vsyncadd [#allocation3], 4294959104 }
  0x11   :  { %8830 = dma.done.wait [#allocation5], 65536  }
  0x12   :  { %8831 = vsyncadd [#allocation5], 4294901760 }
  0x13   :  { %8832 = dma.done.wait [#allocation8], 8192  }
  0x14   :  { %8833 = vsyncadd [#allocation8], 4294959104  ;;  %v5418_v0 = vld [vmem:[%s9306_s1 + $0x70] sm:$0xf]  ;;  %v8063_v1 = vld [vmem:[%s9306_s1 + $0x74] sm:$0xf0] }
  0x15   :  { %v8062_v2 = vld [vmem:[%s9306_s1 + $0x74] sm:$0xf]  ;;  %v5419_v3 = vor.u32 %v8063_v1, %v5418_v0  ;;  %v5420_v4 = vld [vmem:[%s9306_s1 + $0x78] sm:$0xf0]  ;;  %v5410_v5 = vld [vmem:[%s9306_s1 + $0x60] sm:$0xf] }
  0x16   :  { %v8061_v6 = vld [vmem:[%s9306_s1 + $0x64] sm:$0xf0]  ;;  %v5423_v7 = vor.u32 %v8062_v2, %v5420_v4  ;;  %v8060_v8 = vld [vmem:[%s9306_s1 + $0x64] sm:$0xf]  ;;  %v5412_v9 = vld [vmem:[%s9306_s1 + $0x68] sm:$0xf0] }
  0x17   :  { %208 = vmatpush.bf16.msra.mxu0 %v5419_v3  ;;  %v5411_v10 = vor.u32 %v8061_v6, %v5410_v5  ;;  %v5415_v11 = vor.u32 %v8060_v8, %v5412_v9  ;;  %v5402_v12 = vld [vmem:[%s9306_s1 + $0x50] sm:$0xf]  ;;  %v8059_v13 = vld [vmem:[%s9306_s1 + $0x54] sm:$0xf0]  ;;  %v8058_v14 = vld [vmem:[%s9306_s1 + $0x54] sm:$0xf] }
  0x18   :  { %221 = vmatpush.bf16.msra.mxu1 %v5423_v7  ;;  %v5404_v15 = vld [vmem:[%s9306_s1 + $0x58] sm:$0xf0]  ;;  %v5403_v16 = vor.u32 %v8059_v13, %v5402_v12  ;;  %v5394_v18 = vld [vmem:[%s9306_s1 + $0x40] sm:$0xf]  ;;  %v8057_v19 = vld [vmem:[%s9306_s1 + $0x44] sm:$0xf0] }
  0x19   :  { %v5407_v17 = vor.u32 %v8058_v14, %v5404_v15  ;;  %v8056_v20 = vld [vmem:[%s9306_s1 + $0x44] sm:$0xf]  ;;  %v5396_v21 = vld [vmem:[%s9306_s1 + $0x48] sm:$0xf0]  ;;  %v5395_v22 = vor.u32 %v8057_v19, %v5394_v18  ;;  %v5538_v23 = vld [vmem:[#allocation2 + $0xe0] sm:$0xf] }
  0x1a   :  { %v8094_v24 = vld [vmem:[#allocation2 + $0xec] sm:$0xf0]  ;;  %v5666_v25 = vld [vmem:[#allocation2 + $0x1e0] sm:$0xf]  ;;  %v5399_v26 = vor.u32 %v8056_v20, %v5396_v21  ;;  %v8055_v28 = vld [vmem:[%s9306_s1 + $0x34] sm:$0xf0] }
  0x1b   :  { %209 = vmatpush.bf16.msra.mxu0 %v5411_v10  ;;  %v5386_v27 = vld [vmem:[%s9306_s1 + $0x30] sm:$0xf]  ;;  %v5539_v29 = vor.u32 %v8094_v24, %v5538_v23  ;;  %v8054_v31 = vld [vmem:[%s9306_s1 + $0x34] sm:$0xf]  ;;  %v5388_v32 = vld [vmem:[%s9306_s1 + $0x38] sm:$0xf0] }
  0x1c   :  { %222 = vmatpush.bf16.msra.mxu1 %v5415_v11  ;;  %v8126_v30 = vld [vmem:[#allocation2 + $0x1ec] sm:$0xf0]  ;;  %v5522_v34 = vld [vmem:[#allocation2 + $0xc0] sm:$0xf]  ;;  %v5387_v38 = vor.u32 %v8055_v28, %v5386_v27  ;;  %v8053_v40 = vld [vmem:[%s9306_s1 + $0x24] sm:$0xf0]  ;;  %v5391_v43 = vor.u32 %v8054_v31, %v5388_v32 }
  0x1d   :  { %v5667_v33 = vor.u32 %v8126_v30, %v5666_v25  ;;  %632 = vmatpush.bf16.msra.mxu2 %v5539_v29  ;;  %v8090_v35 = vld [vmem:[#allocation2 + $0xcc] sm:$0xf0]  ;;  %v5650_v36 = vld [vmem:[#allocation2 + $0x1c0] sm:$0xf]  ;;  %v8052_v44 = vld [vmem:[%s9306_s1 + $0x24] sm:$0xf] }
  0x1e   :  { %v8122_v37 = vld [vmem:[#allocation2 + $0x1cc] sm:$0xf0]  ;;  %v5378_v39 = vld [vmem:[%s9306_s1 + $0x20] sm:$0xf]  ;;  %v5523_v41 = vor.u32 %v8090_v35, %v5522_v34  ;;  %v5380_v47 = vld [vmem:[%s9306_s1 + $0x28] sm:$0xf0] }
  0x1f   :  { %210 = vmatpush.bf16.msra.mxu0 %v5403_v16  ;;  %645 = vmatpush.bf16.msra.mxu3 %v5667_v33  ;;  %v5651_v42 = vor.u32 %v8122_v37, %v5650_v36  ;;  %v5506_v45 = vld [vmem:[#allocation2 + $0xa0] sm:$0xf]  ;;  %v8086_v46 = vld [vmem:[#allocation2 + $0xac] sm:$0xf0]  ;;  %v5379_v51 = vor.u32 %v8053_v40, %v5378_v39  ;;  %v5383_v56 = vor.u32 %v8052_v44, %v5380_v47  ;;  %v8051_v57 = vld [vmem:[%s9306_s1 + $0x14] sm:$0xf0] }
  0x20   :  { %223 = vmatpush.bf16.msra.mxu1 %v5407_v17  ;;  %v5634_v48 = vld [vmem:[#allocation2 + $0x1a0] sm:$0xf]  ;;  %v8118_v49 = vld [vmem:[#allocation2 + $0x1ac] sm:$0xf0]  ;;  %v5507_v50 = vor.u32 %v8086_v46, %v5506_v45  ;;  %v8050_v60 = vld [vmem:[%s9306_s1 + $0x14] sm:$0xf] }
  0x21   :  { %633 = vmatpush.bf16.msra.mxu2 %v5523_v41  ;;  %v5370_v52 = vld [vmem:[%s9306_s1 + $0x10] sm:$0xf]  ;;  %v5635_v53 = vor.u32 %v8118_v49, %v5634_v48  ;;  %v5490_v54 = vld [vmem:[#allocation2 + $0x80] sm:$0xf]  ;;  %v5372_v61 = vld [vmem:[%s9306_s1 + $0x18] sm:$0xf0] }
  0x22   :  { %v8082_v55 = vld [vmem:[#allocation2 + $0x8c] sm:$0xf0]  ;;  %v5618_v58 = vld [vmem:[#allocation2 + $0x180] sm:$0xf]  ;;  %v5371_v0 = vor.u32 %v8051_v57, %v5370_v52  ;;  %v8049_v1 = vld [vmem:[%s9306_s1 + $0x4] sm:$0xf0]  ;;  %v5375_v5 = vor.u32 %v8050_v60, %v5372_v61 }
  0x23   :  { %211 = vmatpush.bf16.msra.mxu0 %v5395_v22  ;;  %646 = vmatpush.bf16.msra.mxu3 %v5651_v42  ;;  %v8114_v59 = vld [vmem:[#allocation2 + $0x18c] sm:$0xf0]  ;;  %v5362_v62 = vld [vmem:[%s9306_s1] sm:$0xf]  ;;  %v5491_v63 = vor.u32 %v8082_v55, %v5490_v54  ;;  %v8048_v6 = vld [vmem:[%s9306_s1 + $0x4] sm:$0xf] }
  0x24   :  { %224 = vmatpush.bf16.msra.mxu1 %v5399_v26  ;;  %v5619_v2 = vor.u32 %v8114_v59, %v5618_v58  ;;  %v5474_v3 = vld [vmem:[#allocation2 + $0x60] sm:$0xf]  ;;  %v8078_v4 = vld [vmem:[#allocation2 + $0x6c] sm:$0xf0]  ;;  %v5364_v9 = vld [vmem:[%s9306_s1 + $0x8] sm:$0xf0]  ;;  %v5363_v15 = vor.u32 %v8049_v1, %v5362_v62 }
  0x25   :  { %634 = vmatpush.bf16.msra.mxu2 %v5507_v50  ;;  %v5602_v7 = vld [vmem:[#allocation2 + $0x160] sm:$0xf]  ;;  %v8110_v8 = vld [vmem:[#allocation2 + $0x16c] sm:$0xf0]  ;;  %v8092_v10 = vld [vmem:[#allocation2 + $0xe4] sm:$0xf]  ;;  %v5475_v14 = vor.u32 %v8078_v4, %v5474_v3  ;;  %v5367_v20 = vor.u32 %v8048_v6, %v5364_v9 }
  0x26   :  { %v5540_v11 = vld [vmem:[#allocation2 + $0xf0] sm:$0xf0]  ;;  %v8124_v12 = vld [vmem:[#allocation2 + $0x1e4] sm:$0xf]  ;;  %v104_v16 = vld [vmem:[%s9305_s0] sm:$0x3]  ;;  %v5603_v17 = vor.u32 %v8110_v8, %v5602_v7 }
  0x27   :  { %212 = vmatpush.bf16.msra.mxu0 %v5387_v38  ;;  %647 = vmatpush.bf16.msra.mxu3 %v5635_v53  ;;  %v5668_v13 = vld [vmem:[#allocation2 + $0x1f0] sm:$0xf0]  ;;  %v5458_v18 = vld [vmem:[#allocation2 + $0x40] sm:$0xf]  ;;  %v8074_v19 = vld [vmem:[#allocation2 + $0x4c] sm:$0xf0]  ;;  %v5543_v21 = vor.u32 %v8092_v10, %v5540_v11  ;;  %v105_v27 = vpack.c.bf16 %v104_v16, %v104_v16 }
  0x28   :  { %225 = vmatpush.bf16.msra.mxu1 %v5391_v43  ;;  %v5586_v22 = vld [vmem:[#allocation2 + $0x140] sm:$0xf]  ;;  %v8106_v23 = vld [vmem:[#allocation2 + $0x14c] sm:$0xf0]  ;;  %v5671_v24 = vor.u32 %v8124_v12, %v5668_v13  ;;  %v8088_v25 = vld [vmem:[#allocation2 + $0xc4] sm:$0xf]  ;;  %v5459_v30 = vor.u32 %v8074_v19, %v5458_v18 }
  0x29   :  { %635 = vmatpush.bf16.msra.mxu2 %v5491_v63  ;;  %v5524_v26 = vld [vmem:[#allocation2 + $0xd0] sm:$0xf0]  ;;  %v8120_v28 = vld [vmem:[#allocation2 + $0x1c4] sm:$0xf]  ;;  %v5587_v31 = vor.u32 %v8106_v23, %v5586_v22  ;;  %v5442_v32 = vld [vmem:[#allocation2 + $0x20] sm:$0xf] }
  0x2a   :  { %v5652_v29 = vld [vmem:[#allocation2 + $0x1d0] sm:$0xf0]  ;;  %v8070_v33 = vld [vmem:[#allocation2 + $0x2c] sm:$0xf0]  ;;  %v5527_v34 = vor.u32 %v8088_v25, %v5524_v26  ;;  %v5570_v35 = vld [vmem:[#allocation2 + $0x120] sm:$0xf] }
  0x2b   :  { %213 = vmatpush.bf16.msra.mxu0 %v5379_v51  ;;  %648 = vmatpush.bf16.msra.mxu3 %v5619_v2  ;;  %v8102_v36 = vld [vmem:[#allocation2 + $0x12c] sm:$0xf0]  ;;  %v5655_v37 = vor.u32 %v8120_v28, %v5652_v29  ;;  %v8084_v38 = vld [vmem:[#allocation2 + $0xa4] sm:$0xf]  ;;  %v5508_v39 = vld [vmem:[#allocation2 + $0xb0] sm:$0xf0]  ;;  %v5443_v42 = vor.u32 %v8070_v33, %v5442_v32 }
  0x2c   :  { %226 = vmatpush.bf16.msra.mxu1 %v5383_v56  ;;  %v8116_v40 = vld [vmem:[#allocation2 + $0x1a4] sm:$0xf]  ;;  %v5636_v41 = vld [vmem:[#allocation2 + $0x1b0] sm:$0xf0]  ;;  %v5571_v44 = vor.u32 %v8102_v36, %v5570_v35  ;;  %v5426_v45 = vld [vmem:[#allocation2] sm:$0xf]  ;;  %v5511_v48 = vor.u32 %v8084_v38, %v5508_v39 }
  0x2d   :  { %636 = vmatpush.bf16.msra.mxu2 %v5475_v14  ;;  %v8080_v43 = vld [vmem:[#allocation2 + $0x84] sm:$0xf]  ;;  %v8066_v46 = vld [vmem:[#allocation2 + $0xc] sm:$0xf0]  ;;  %v5554_v47 = vld [vmem:[#allocation2 + $0x100] sm:$0xf]  ;;  %v5639_v52 = vor.u32 %v8116_v40, %v5636_v41 }
  0x2e   :  { %v8098_v49 = vld [vmem:[#allocation2 + $0x10c] sm:$0xf0]  ;;  %v5546_v50 = vld [vmem:[#allocation2 + $0xe8] sm:$0xf]  ;;  %v8095_v51 = vld [vmem:[#allocation2 + $0xf4] sm:$0xf0]  ;;  %v5427_v58 = vor.u32 %v8066_v46, %v5426_v45 }
  0x2f   :  { %214 = vmatpush.bf16.msra.mxu0 %v5371_v0  ;;  %649 = vmatpush.bf16.msra.mxu3 %v5603_v17  ;;  %v5492_v53 = vld [vmem:[#allocation2 + $0x90] sm:$0xf0]  ;;  %v5674_v54 = vld [vmem:[#allocation2 + $0x1e8] sm:$0xf]  ;;  %v8127_v55 = vld [vmem:[#allocation2 + $0x1f4] sm:$0xf0]  ;;  %v5555_v59 = vor.u32 %v8098_v49, %v5554_v47  ;;  %v5547_v60 = vor.u32 %v8095_v51, %v5546_v50 }
  0x30   :  { %227 = vmatpush.bf16.msra.mxu1 %v5375_v5  ;;  %v8112_v56 = vld [vmem:[#allocation2 + $0x184] sm:$0xf]  ;;  %v5620_v57 = vld [vmem:[#allocation2 + $0x190] sm:$0xf0]  ;;  %v5495_v61 = vor.u32 %v8080_v43, %v5492_v53  ;;  %v5675_v63 = vor.u32 %v8127_v55, %v5674_v54  ;;  %v5530_v0 = vld [vmem:[#allocation2 + $0xc8] sm:$0xf] }
  0x31   :  { %637 = vmatpush.bf16.msra.mxu2 %v5459_v30  ;;  %v8076_v62 = vld [vmem:[#allocation2 + $0x64] sm:$0xf]  ;;  %v8091_v1 = vld [vmem:[#allocation2 + $0xd4] sm:$0xf0]  ;;  %v5623_v2 = vor.u32 %v8112_v56, %v5620_v57  ;;  %v5476_v3 = vld [vmem:[#allocation2 + $0x70] sm:$0xf0] }
  0x32   :  { %v5658_v4 = vld [vmem:[#allocation2 + $0x1c8] sm:$0xf]  ;;  %v8123_v5 = vld [vmem:[#allocation2 + $0x1d4] sm:$0xf0]  ;;  %v8108_v6 = vld [vmem:[#allocation2 + $0x164] sm:$0xf]  ;;  %v5531_v8 = vor.u32 %v8091_v1, %v5530_v0  ;;  %v5479_v9 = vor.u32 %v8076_v62, %v5476_v3 }
  0x33   :  { %215 = vmatpush.bf16.msra.mxu0 %v5363_v15  ;;  %650 = vmatpush.bf16.msra.mxu3 %v5587_v31  ;;  %v5604_v7 = vld [vmem:[#allocation2 + $0x170] sm:$0xf0]  ;;  %v5659_v10 = vor.u32 %v8123_v5, %v5658_v4  ;;  %v8072_v12 = vld [vmem:[#allocation2 + $0x44] sm:$0xf]  ;;  %v8093_v28 = vld [vmem:[#allocation2 + $0xec] sm:$0xf] }
  0x34   :  { %228 = vmatpush.bf16.msra.mxu1 %v5367_v20  ;;  %v5607_v11 = vor.u32 %v8108_v6, %v5604_v7  ;;  %v5460_v13 = vld [vmem:[#allocation2 + $0x50] sm:$0xf0]  ;;  %v8104_v14 = vld [vmem:[#allocation2 + $0x144] sm:$0xf]  ;;  %v5548_v29 = vld [vmem:[#allocation2 + $0xf8] sm:$0xf0] }
  0x35   :  { %638 = vmatpush.bf16.msra.mxu2 %v5443_v42  ;;  %v5588_v15 = vld [vmem:[#allocation2 + $0x150] sm:$0xf0]  ;;  %v5463_v16 = vor.u32 %v8072_v12, %v5460_v13  ;;  %v8068_v18 = vld [vmem:[#allocation2 + $0x24] sm:$0xf]  ;;  %v8125_v30 = vld [vmem:[#allocation2 + $0x1ec] sm:$0xf] }
  0x36   :  { %216 = vmatmul.bf16.vlgmr.msra.gmra.mxu0 %v105_v27  ;;  %v5591_v17 = vor.u32 %v8104_v14, %v5588_v15  ;;  %v5444_v19 = vld [vmem:[#allocation2 + $0x30] sm:$0xf0]  ;;  %v8100_v20 = vld [vmem:[#allocation2 + $0x124] sm:$0xf]  ;;  %v5676_v31 = vld [vmem:[#allocation2 + $0x1f8] sm:$0xf0] }
  0x37   :  { %658 = vmatpush.bf16.msrb.mxu0 %v5543_v21  ;;  %229 = vmatmul.bf16.vlgmr.msra.gmra.mxu1 %v105_v27  ;;  %v5572_v21 = vld [vmem:[#allocation2 + $0x130] sm:$0xf0]  ;;  %v5447_v22 = vor.u32 %v8068_v18, %v5444_v19  ;;  %v8096_v26 = vld [vmem:[#allocation2 + $0x104] sm:$0xf]  ;;  %v5679_v35 = vor.u32 %v8125_v30, %v5676_v31  ;;  %v8089_v36 = vld [vmem:[#allocation2 + $0xcc] sm:$0xf] }
  0x38   :  { %671 = vmatpush.bf16.msrb.mxu1 %v5671_v24  ;;  %651 = vmatpush.bf16.msra.mxu3 %v5571_v44  ;;  %v5575_v23 = vor.u32 %v8100_v20, %v5572_v21  ;;  %v8064_v24 = vld [vmem:[#allocation2 + $0x4] sm:$0xf]  ;;  %v5428_v25 = vld [vmem:[#allocation2 + $0x10] sm:$0xf0]  ;;  %v8121_v38 = vld [vmem:[#allocation2 + $0x1cc] sm:$0xf] }
  0x39   :  { %639 = vmatpush.bf16.msra.mxu2 %v5427_v58  ;;  %v5556_v27 = vld [vmem:[#allocation2 + $0x110] sm:$0xf0]  ;;  %v5431_v32 = vor.u32 %v8064_v24, %v5428_v25  ;;  %v5660_v39 = vld [vmem:[#allocation2 + $0x1d8] sm:$0xf0]  ;;  %v5514_v42 = vld [vmem:[#allocation2 + $0xa8] sm:$0xf] }
  0x3a   :  { %v5559_v33 = vor.u32 %v8096_v26, %v5556_v27  ;;  %v5663_v41 = vor.u32 %v8121_v38, %v5660_v39  ;;  %v8087_v43 = vld [vmem:[#allocation2 + $0xb4] sm:$0xf0]  ;;  %v5642_v44 = vld [vmem:[#allocation2 + $0x1a8] sm:$0xf]  ;;  %v8085_v47 = vld [vmem:[#allocation2 + $0xac] sm:$0xf] }
  0x3b   :  { %659 = vmatpush.bf16.msrb.mxu0 %v5527_v34  ;;  %v5551_v34 = vor.u32 %v8093_v28, %v5548_v29  ;;  %v5515_v45 = vor.u32 %v8087_v43, %v5514_v42  ;;  %v8119_v46 = vld [vmem:[#allocation2 + $0x1b4] sm:$0xf0]  ;;  %v8117_v51 = vld [vmem:[#allocation2 + $0x1ac] sm:$0xf]  ;;  %v5498_v54 = vld [vmem:[#allocation2 + $0x88] sm:$0xf] }
  0x3c   :  { %672 = vmatpush.bf16.msrb.mxu1 %v5655_v37  ;;  %652 = vmatpush.bf16.msra.mxu3 %v5555_v59  ;;  %v5532_v37 = vld [vmem:[#allocation2 + $0xd8] sm:$0xf0]  ;;  %v5643_v49 = vor.u32 %v8119_v46, %v5642_v44  ;;  %v8083_v55 = vld [vmem:[#allocation2 + $0x94] sm:$0xf0]  ;;  %v5626_v56 = vld [vmem:[#allocation2 + $0x188] sm:$0xf] }
  0x3d   :  { %684 = vmatpush.bf16.msrb.mxu2 %v5547_v60  ;;  %v5535_v40 = vor.u32 %v8089_v36, %v5532_v37  ;;  %v5499_v57 = vor.u32 %v8083_v55, %v5498_v54  ;;  %v8115_v58 = vld [vmem:[#allocation2 + $0x194] sm:$0xf0]  ;;  %v8081_v59 = vld [vmem:[#allocation2 + $0x8c] sm:$0xf]  ;;  %v5500_v60 = vld [vmem:[#allocation2 + $0x98] sm:$0xf0] }
  0x3e   :  { %v5503_v62 = vor.u32 %v8081_v59, %v5500_v60  ;;  %v5628_v0 = vld [vmem:[#allocation2 + $0x198] sm:$0xf0]  ;;  %v8079_v3 = vld [vmem:[#allocation2 + $0x74] sm:$0xf0]  ;;  %v5610_v4 = vld [vmem:[#allocation2 + $0x168] sm:$0xf] }
  0x3f   :  { %660 = vmatpush.bf16.msrb.mxu0 %v5511_v48  ;;  %v5516_v48 = vld [vmem:[#allocation2 + $0xb8] sm:$0xf0]  ;;  %v8111_v6 = vld [vmem:[#allocation2 + $0x174] sm:$0xf0]  ;;  %v8077_v7 = vld [vmem:[#allocation2 + $0x6c] sm:$0xf] }
  0x40   :  { %673 = vmatpush.bf16.msrb.mxu1 %v5639_v52  ;;  %697 = vmatpush.bf16.msrb.mxu3 %v5675_v63  ;;  %v5519_v50 = vor.u32 %v8085_v47, %v5516_v48  ;;  %v5644_v52 = vld [vmem:[#allocation2 + $0x1b8] sm:$0xf0]  ;;  %v8113_v63 = vld [vmem:[#allocation2 + $0x18c] sm:$0xf]  ;;  %v5466_v14 = vld [vmem:[#allocation2 + $0x48] sm:$0xf] }
  0x41   :  { %685 = vmatpush.bf16.msrb.mxu2 %v5531_v8  ;;  %v5647_v53 = vor.u32 %v8117_v51, %v5644_v52  ;;  %v5631_v1 = vor.u32 %v8113_v63, %v5628_v0  ;;  %v5484_v8 = vld [vmem:[#allocation2 + $0x78] sm:$0xf0]  ;;  %v8075_v15 = vld [vmem:[#allocation2 + $0x54] sm:$0xf0]  ;;  %v8073_v19 = vld [vmem:[#allocation2 + $0x4c] sm:$0xf] }
  0x42   :  { %v5612_v12 = vld [vmem:[#allocation2 + $0x178] sm:$0xf0]  ;;  %v8107_v18 = vld [vmem:[#allocation2 + $0x154] sm:$0xf0]  ;;  %v5450_v25 = vld [vmem:[#allocation2 + $0x28] sm:$0xf] }
  0x43   :  { %661 = vmatpush.bf16.msrb.mxu0 %v5495_v61  ;;  %v5627_v61 = vor.u32 %v8115_v58, %v5626_v56  ;;  %v5468_v20 = vld [vmem:[#allocation2 + $0x58] sm:$0xf0]  ;;  %v8071_v27 = vld [vmem:[#allocation2 + $0x34] sm:$0xf0]  ;;  %v5578_v28 = vld [vmem:[#allocation2 + $0x128] sm:$0xf] }
  0x44   :  { %674 = vmatpush.bf16.msrb.mxu1 %v5623_v2  ;;  %698 = vmatpush.bf16.msrb.mxu3 %v5659_v10  ;;  %v5482_v2 = vld [vmem:[#allocation2 + $0x68] sm:$0xf]  ;;  %v5487_v10 = vor.u32 %v8077_v7, %v5484_v8  ;;  %v5596_v24 = vld [vmem:[#allocation2 + $0x158] sm:$0xf0]  ;;  %v8103_v29 = vld [vmem:[#allocation2 + $0x134] sm:$0xf0]  ;;  %v5451_v30 = vor.u32 %v8071_v27, %v5450_v25 }
  0x45   :  { %686 = vmatpush.bf16.msrb.mxu2 %v5515_v45  ;;  %v5483_v5 = vor.u32 %v8079_v3, %v5482_v2  ;;  %v8069_v31 = vld [vmem:[#allocation2 + $0x2c] sm:$0xf]  ;;  %v5580_v36 = vld [vmem:[#allocation2 + $0x138] sm:$0xf0]  ;;  %v5434_v37 = vld [vmem:[#allocation2 + $0x8] sm:$0xf] }
  0x46   :  { %v8067_v38 = vld [vmem:[#allocation2 + $0x14] sm:$0xf0]  ;;  %v8065_v42 = vld [vmem:[#allocation2 + $0xc] sm:$0xf]  ;;  %v5436_v43 = vld [vmem:[#allocation2 + $0x18] sm:$0xf0] }
  0x47   :  { %662 = vmatpush.bf16.msrb.mxu0 %v5479_v9  ;;  %v5611_v9 = vor.u32 %v8111_v6, %v5610_v4  ;;  %v8097_v44 = vld [vmem:[#allocation2 + $0x10c] sm:$0xf]  ;;  %v5564_v45 = vld [vmem:[#allocation2 + $0x118] sm:$0xf0]  ;;  %v5435_v46 = vor.u32 %v8067_v38, %v5434_v37  ;;  %v5439_v48 = vor.u32 %v8065_v42, %v5436_v43  ;;  %v6162_v56 = vld [vmem:[#allocation4 + $0x3c0] sm:$0xf] }
  0x48   :  { %675 = vmatpush.bf16.msrb.mxu1 %v5607_v11  ;;  %699 = vmatpush.bf16.msrb.mxu3 %v5643_v49  ;;  %v8109_v11 = vld [vmem:[#allocation2 + $0x16c] sm:$0xf]  ;;  %v5567_v49 = vor.u32 %v8097_v44, %v5564_v45  ;;  %v5906_v58 = vld [vmem:[#allocation4 + $0x1c0] sm:$0xf] }
  0x49   :  { %687 = vmatpush.bf16.msrb.mxu2 %v5499_v57  ;;  %v5615_v13 = vor.u32 %v8109_v11, %v5612_v12  ;;  %v8252_v57 = vld [vmem:[#allocation4 + $0x3dc] sm:$0xf0] }
  0x4a   :  { %v8188_v60 = vld [vmem:[#allocation4 + $0x1dc] sm:$0xf0]  ;;  %v6163_v4 = vor.u32 %v8252_v57, %v6162_v56 }
  0x4b   :  { %663 = vmatpush.bf16.msrb.mxu0 %v5463_v16  ;;  %v5594_v16 = vld [vmem:[#allocation2 + $0x148] sm:$0xf]  ;;  %v6418_v0 = vld [vmem:[#allocation4 + $0x5c0] sm:$0xf]  ;;  %v5907_v7 = vor.u32 %v8188_v60, %v5906_v58 }
  0x4c   :  { %676 = vmatpush.bf16.msrb.mxu1 %v5591_v17  ;;  %700 = vmatpush.bf16.msrb.mxu3 %v5627_v61  ;;  %v5467_v17 = vor.u32 %v8075_v15, %v5466_v14  ;;  %v5595_v21 = vor.u32 %v8107_v18, %v5594_v16  ;;  %v6674_v61 = vld [vmem:[#allocation4 + $0x7c0] sm:$0xf] }
  0x4d   :  { %688 = vmatpush.bf16.msrb.mxu2 %v5483_v5  ;;  %v6130_v5 = vld [vmem:[#allocation4 + $0x380] sm:$0xf] }
  0x4e   :  { %v8244_v6 = vld [vmem:[#allocation4 + $0x39c] sm:$0xf0] }
  0x4f   :  { %664 = vmatpush.bf16.msrb.mxu0 %v5447_v22  ;;  %v5471_v22 = vor.u32 %v8073_v19, %v5468_v20  ;;  %v6642_v12 = vld [vmem:[#allocation4 + $0x780] sm:$0xf]  ;;  %v6131_v19 = vor.u32 %v8244_v6, %v6130_v5 }
  0x50   :  { %677 = vmatpush.bf16.msrb.mxu1 %v5575_v23  ;;  %701 = vmatpush.bf16.msrb.mxu3 %v5611_v9  ;;  %v8105_v23 = vld [vmem:[#allocation2 + $0x14c] sm:$0xf]  ;;  %v5874_v9 = vld [vmem:[#allocation4 + $0x180] sm:$0xf] }
  0x51   :  { %v5599_v26 = vor.u32 %v8105_v23, %v5596_v24  ;;  %689 = vmatpush.bf16.msrb.mxu2 %v5467_v17  ;;  %v8372_v14 = vld [vmem:[#allocation4 + $0x79c] sm:$0xf0] }
  0x52   :  { %v6386_v15 = vld [vmem:[#allocation4 + $0x580] sm:$0xf]  ;;  %v6643_v25 = vor.u32 %v8372_v14, %v6642_v12 }
  0x53   :  { %665 = vmatpush.bf16.msrb.mxu0 %v5431_v32  ;;  %v5452_v32 = vld [vmem:[#allocation2 + $0x38] sm:$0xf0]  ;;  %v8308_v16 = vld [vmem:[#allocation4 + $0x59c] sm:$0xf0] }
  0x54   :  { %678 = vmatpush.bf16.msrb.mxu1 %v5559_v33  ;;  %v8101_v33 = vld [vmem:[#allocation2 + $0x12c] sm:$0xf]  ;;  %702 = vmatpush.bf16.msrb.mxu3 %v5595_v21  ;;  %v6098_v20 = vld [vmem:[#allocation4 + $0x340] sm:$0xf]  ;;  %v6387_v27 = vor.u32 %v8308_v16, %v6386_v15 }
  0x55   :  { %v5583_v39 = vor.u32 %v8101_v33, %v5580_v36  ;;  %690 = vmatpush.bf16.msrb.mxu2 %v5451_v30  ;;  %v8236_v21 = vld [vmem:[#allocation4 + $0x35c] sm:$0xf0] }
  0x56   :  { %v5842_v23 = vld [vmem:[#allocation4 + $0x140] sm:$0xf] }
  0x57   :  { %710 = vmatpush.bf16.msra.mxu0 %v5551_v34  ;;  %v5579_v34 = vor.u32 %v8103_v29, %v5578_v28  ;;  %v8172_v24 = vld [vmem:[#allocation4 + $0x15c] sm:$0xf0] }
  0x58   :  { %723 = vmatpush.bf16.msra.mxu1 %v5679_v35  ;;  %v5455_v35 = vor.u32 %v8069_v31, %v5452_v32  ;;  %v8364_v28 = vld [vmem:[#allocation4 + $0x75c] sm:$0xf0]  ;;  %v6099_v31 = vor.u32 %v8236_v21, %v6098_v20 }
  0x59   :  { %703 = vmatpush.bf16.msrb.mxu3 %v5579_v34  ;;  %691 = vmatpush.bf16.msrb.mxu2 %v5435_v46  ;;  %v6354_v29 = vld [vmem:[#allocation4 + $0x540] sm:$0xf]  ;;  %v5843_v34 = vor.u32 %v8172_v24, %v5842_v23  ;;  %v6164_v24 = vld [vmem:[#allocation4 + $0x3e0] sm:$0xf0] }
  0x5a   :  { %v8300_v30 = vld [vmem:[#allocation4 + $0x55c] sm:$0xf0] }
  0x5b   :  { %711 = vmatpush.bf16.msra.mxu0 %v5535_v40  ;;  %v5562_v40 = vld [vmem:[#allocation2 + $0x108] sm:$0xf]  ;;  %v6066_v32 = vld [vmem:[#allocation4 + $0x300] sm:$0xf] }
  0x5c   :  { %724 = vmatpush.bf16.msra.mxu1 %v5663_v41  ;;  %v8099_v41 = vld [vmem:[#allocation2 + $0x114] sm:$0xf0]  ;;  %v8228_v33 = vld [vmem:[#allocation4 + $0x31c] sm:$0xf0] }
  0x5d   :  { %v5563_v47 = vor.u32 %v8099_v41, %v5562_v40  ;;  %v8164_v36 = vld [vmem:[#allocation4 + $0x11c] sm:$0xf0]  ;;  %v6067_v43 = vor.u32 %v8228_v33, %v6066_v32  ;;  %v6676_v32 = vld [vmem:[#allocation4 + $0x7e0] sm:$0xf0] }
  0x5e   :  { %v6578_v38 = vld [vmem:[#allocation4 + $0x700] sm:$0xf] }
  0x5f   :  { %712 = vmatpush.bf16.msra.mxu0 %v5519_v50  ;;  %704 = vmatpush.bf16.msrb.mxu3 %v5563_v47  ;;  %v122_v50 = vld [vmem:[%s9307_s2] sm:$0x3] }
  0x60   :  { %725 = vmatpush.bf16.msra.mxu1 %v5647_v53  ;;  %v124_v51 = vperm.slane %v122_v50, 0  ;;  %v125_v52 = vperm.slane %v122_v50, 1  ;;  %v8356_v40 = vld [vmem:[#allocation4 + $0x71c] sm:$0xf0] }
  0x61   :  { %v6322_v41 = vld [vmem:[#allocation4 + $0x500] sm:$0xf] }
  0x62   :  { %v8292_v42 = vld [vmem:[#allocation4 + $0x51c] sm:$0xf0] }
  0x63   :  { %713 = vmatpush.bf16.msra.mxu0 %v5503_v62  ;;  %v8380_v62 = vld [vmem:[#allocation4 + $0x7dc] sm:$0xf0] }
  0x64   :  { %726 = vmatpush.bf16.msra.mxu1 %v5631_v1  ;;  %v8316_v1 = vld [vmem:[#allocation4 + $0x5dc] sm:$0xf0]  ;;  %v6675_v11 = vor.u32 %v8380_v62, %v6674_v61 }
  0x65   :  { %v6034_v44 = vld [vmem:[#allocation4 + $0x2c0] sm:$0xf] }
  0x66   :  { %v8220_v45 = vld [vmem:[#allocation4 + $0x2dc] sm:$0xf0] }
  0x67   :  { %714 = vmatpush.bf16.msra.mxu0 %v5487_v10  ;;  %v8180_v10 = vld [vmem:[#allocation4 + $0x19c] sm:$0xf0] }
  0x68   :  { %727 = vmatpush.bf16.msra.mxu1 %v5615_v13  ;;  %v6419_v13 = vor.u32 %v8316_v1, %v6418_v0  ;;  %v5778_v47 = vld [vmem:[#allocation4 + $0xc0] sm:$0xf] }
  0x69   :  { %v6546_v50 = vld [vmem:[#allocation4 + $0x6c0] sm:$0xf] }
  0x6a   :  { %v6002_v56 = vld [vmem:[#allocation4 + $0x280] sm:$0xf] }
  0x6b   :  { %715 = vmatpush.bf16.msra.mxu0 %v5471_v22  ;;  %v5875_v22 = vor.u32 %v8180_v10, %v5874_v9  ;;  %v8212_v57 = vld [vmem:[#allocation4 + $0x29c] sm:$0xf0] }
  0x6c   :  { %728 = vmatpush.bf16.msra.mxu1 %v5599_v26  ;;  %v6610_v26 = vld [vmem:[#allocation4 + $0x740] sm:$0xf] }
  0x6d   :  { %v6611_v37 = vor.u32 %v8364_v28, %v6610_v26  ;;  %v8148_v60 = vld [vmem:[#allocation4 + $0x9c] sm:$0xf0]  ;;  %v5908_v26 = vld [vmem:[#allocation4 + $0x1e0] sm:$0xf0] }
  0x6e   :  { %v6514_v62 = vld [vmem:[#allocation4 + $0x680] sm:$0xf] }
  0x6f   :  { %716 = vmatpush.bf16.msra.mxu0 %v5455_v35  ;;  %v5810_v35 = vld [vmem:[#allocation4 + $0x100] sm:$0xf] }
  0x70   :  { %729 = vmatpush.bf16.msra.mxu1 %v5583_v39  ;;  %v6355_v39 = vor.u32 %v8300_v30, %v6354_v29  ;;  %v5811_v46 = vor.u32 %v8164_v36, %v5810_v35  ;;  %v8340_v0 = vld [vmem:[#allocation4 + $0x69c] sm:$0xf0]  ;;  %v6132_v36 = vld [vmem:[#allocation4 + $0x3a0] sm:$0xf0] }
  0x71   :  { %v6258_v1 = vld [vmem:[#allocation4 + $0x480] sm:$0xf] }
  0x72   :  { %v5970_v5 = vld [vmem:[#allocation4 + $0x240] sm:$0xf] }
  0x73   :  { %717 = vmatpush.bf16.msra.mxu0 %v5439_v48  ;;  %v8156_v48 = vld [vmem:[#allocation4 + $0xdc] sm:$0xf0] }
  0x74   :  { %730 = vmatpush.bf16.msra.mxu1 %v5567_v49  ;;  %v6579_v49 = vor.u32 %v8356_v40, %v6578_v38  ;;  %v5779_v58 = vor.u32 %v8156_v48, %v5778_v47  ;;  %v8204_v6 = vld [vmem:[#allocation4 + $0x25c] sm:$0xf0]  ;;  %v5876_v38 = vld [vmem:[#allocation4 + $0x1a0] sm:$0xf0] }
  0x75   :  { %v5714_v9 = vld [vmem:[#allocation4 + $0x40] sm:$0xf]  ;;  %v5971_v16 = vor.u32 %v8204_v6, %v5970_v5  ;;  %v8224_v48 = vld [vmem:[#allocation4 + $0x304] sm:$0xf] }
  0x76   :  { %v8140_v10 = vld [vmem:[#allocation4 + $0x5c] sm:$0xf0]  ;;  %v5780_v5 = vld [vmem:[#allocation4 + $0xe0] sm:$0xf0] }
  0x77   :  { %v6482_v12 = vld [vmem:[#allocation4 + $0x640] sm:$0xf]  ;;  %v8312_v6 = vld [vmem:[#allocation4 + $0x5c4] sm:$0xf] }
  0x78   :  { %v6226_v14 = vld [vmem:[#allocation4 + $0x440] sm:$0xf] }
  0x79   :  { %v8268_v15 = vld [vmem:[#allocation4 + $0x45c] sm:$0xf0] }
  0x7a   :  { %v5682_v20 = vld [vmem:[#allocation4] sm:$0xf]  ;;  %v6227_v23 = vor.u32 %v8268_v15, %v6226_v14  ;;  %v6612_v14 = vld [vmem:[#allocation4 + $0x760] sm:$0xf0] }
  0x7b   :  { %v8132_v21 = vld [vmem:[#allocation4 + $0x1c] sm:$0xf0] }
  0x7c   :  { %v8324_v28 = vld [vmem:[#allocation4 + $0x61c] sm:$0xf0]  ;;  %v5683_v30 = vor.u32 %v8132_v21, %v5682_v20  ;;  %v8192_v21 = vld [vmem:[#allocation4 + $0x204] sm:$0xf] }
  0xb3   :  { %v217_v53 = vpop.f32.mrf.mxu0 }
  0xb4   :  { %v218_v54 = vadd.f32 %v217_v53, %v124_v51  ;;  %v230_v55 = vpop.f32.mrf.mxu1  ;;  %v6323_v51 = vor.u32 %v8292_v42, %v6322_v41  ;;  %v6290_v53 = vld [vmem:[#allocation4 + $0x4c0] sm:$0xf]  ;;  %v8232_v42 = vld [vmem:[#allocation4 + $0x344] sm:$0xf] }
  0xb5   :  { %v231_v59 = vadd.f32 %v230_v55, %v125_v52  ;;  %v8348_v52 = vld [vmem:[#allocation4 + $0x6dc] sm:$0xf0]  ;;  %v6035_v55 = vor.u32 %v8220_v45, %v6034_v44  ;;  %v6100_v44 = vld [vmem:[#allocation4 + $0x360] sm:$0xf0] }
  0xb6   :  { %v234_v63 = vmax.f32 %v218_v54, 0.0  ;;  %v8284_v54 = vld [vmem:[#allocation4 + $0x4dc] sm:$0xf0]  ;;  %v6547_v61 = vor.u32 %v8348_v52, %v6546_v50  ;;  %v8168_v45 = vld [vmem:[#allocation4 + $0x144] sm:$0xf]  ;;  %v6103_v47 = vor.u32 %v8232_v42, %v6100_v44 }
  0xb7   :  { %v235_v2 = vmax.f32 %v231_v59, 0.0  ;;  %v5746_v59 = vld [vmem:[#allocation4 + $0x80] sm:$0xf]  ;;  %v6068_v50 = vld [vmem:[#allocation4 + $0x320] sm:$0xf0] }
  0xb8   :  { %v9023_v3 = vpack.c.bf16 %v234_v63, %v234_v63  ;;  %v6291_v63 = vor.u32 %v8284_v54, %v6290_v53  ;;  %v5812_v52 = vld [vmem:[#allocation4 + $0x120] sm:$0xf0]  ;;  %v6071_v53 = vor.u32 %v8224_v48, %v6068_v50 }
  0xb9   :  { %v9025_v8 = vpack.c.bf16 %v235_v2, %v235_v2  ;;  %v8276_v2 = vld [vmem:[#allocation4 + $0x49c] sm:$0xf0]  ;;  %v8336_v42 = vld [vmem:[#allocation4 + $0x684] sm:$0xf] }
  0xba   :  { %640 = vmatmul.bf16.vlgmr.msra.gmra.mxu2 %v9023_v3  ;;  %666 = vmatmul.bf16.vlgmr.msrb.gmra.mxu0 %v9023_v3  ;;  %v8328_v48 = vld [vmem:[#allocation4 + $0x644] sm:$0xf] }
  0xbb   :  { %653 = vmatmul.bf16.vlgmr.msra.gmra.mxu3 %v9025_v8  ;;  %679 = vmatmul.bf16.vlgmr.msrb.gmra.mxu1 %v9025_v8  ;;  %v219_v17 = vpop.f32.mrf.mxu0 }
  0xbc   :  { %v232_v18 = vpop.f32.mrf.mxu1  ;;  %2311 = vmatpush.bf16.msra.mxu3 %v6163_v4  ;;  %2298 = vmatpush.bf16.msra.mxu2 %v5907_v7  ;;  %v6003_v4 = vor.u32 %v8212_v57, %v6002_v56  ;;  %v5747_v7 = vor.u32 %v8148_v60, %v5746_v59  ;;  %v8196_v17 = vld [vmem:[#allocation4 + $0x21c] sm:$0xf0]  ;;  %v6036_v56 = vld [vmem:[#allocation4 + $0x2e0] sm:$0xf0] }
  0xbd   :  { %2337 = vmatpush.bf16.msrb.mxu1 %v6675_v11  ;;  %2324 = vmatpush.bf16.msrb.mxu0 %v6419_v13  ;;  %v6515_v11 = vor.u32 %v8340_v0, %v6514_v62  ;;  %v8332_v13 = vld [vmem:[#allocation4 + $0x65c] sm:$0xf0]  ;;  %v5715_v18 = vor.u32 %v8140_v10, %v5714_v9  ;;  %v6004_v59 = vld [vmem:[#allocation4 + $0x2a0] sm:$0xf0] }
  0xbe   :  { %v8368_v60 = vld [vmem:[#allocation4 + $0x784] sm:$0xf]  ;;  %v8260_v0 = vld [vmem:[#allocation4 + $0x41c] sm:$0xf0] }
  0xbf   :  { %v6644_v62 = vld [vmem:[#allocation4 + $0x7a0] sm:$0xf0] }
  0xc0   :  { %2312 = vmatpush.bf16.msra.mxu3 %v6131_v19  ;;  %2299 = vmatpush.bf16.msra.mxu2 %v5875_v22  ;;  %v8248_v19 = vld [vmem:[#allocation4 + $0x3c4] sm:$0xf]  ;;  %v6483_v22 = vor.u32 %v8332_v13, %v6482_v12 }
  0xc1   :  { %2338 = vmatpush.bf16.msrb.mxu1 %v6643_v25  ;;  %2325 = vmatpush.bf16.msrb.mxu0 %v6387_v27  ;;  %v8184_v25 = vld [vmem:[#allocation4 + $0x1c4] sm:$0xf]  ;;  %v6450_v27 = vld [vmem:[#allocation4 + $0x600] sm:$0xf]  ;;  %v6167_v33 = vor.u32 %v8248_v19, %v6164_v24 }
  0xc2   :  { %v5911_v35 = vor.u32 %v8184_v25, %v5908_v26  ;;  %v6420_v9 = vld [vmem:[#allocation4 + $0x5e0] sm:$0xf0] }
  0xc3   :  { %v6423_v10 = vor.u32 %v8312_v6, %v6420_v9  ;;  %v5972_v12 = vld [vmem:[#allocation4 + $0x260] sm:$0xf0]  ;;  %v8253_v9 = vld [vmem:[#allocation4 + $0x3e4] sm:$0xf0] }
  0xc4   :  { %2313 = vmatpush.bf16.msra.mxu3 %v6099_v31  ;;  %2300 = vmatpush.bf16.msra.mxu2 %v5843_v34  ;;  %v8376_v31 = vld [vmem:[#allocation4 + $0x7c4] sm:$0xf] }
  0xc5   :  { %2339 = vmatpush.bf16.msrb.mxu1 %v6611_v37  ;;  %2326 = vmatpush.bf16.msrb.mxu0 %v6355_v39  ;;  %v8240_v34 = vld [vmem:[#allocation4 + $0x384] sm:$0xf]  ;;  %v6451_v39 = vor.u32 %v8324_v28, %v6450_v27  ;;  %v6679_v40 = vor.u32 %v8376_v31, %v6676_v32 }
  0xc6   :  { %v8176_v37 = vld [vmem:[#allocation4 + $0x184] sm:$0xf]  ;;  %v6135_v41 = vor.u32 %v8240_v34, %v6132_v36 }
  0xc7   :  { %v6388_v19 = vld [vmem:[#allocation4 + $0x5a0] sm:$0xf0] }
  0xc8   :  { %2314 = vmatpush.bf16.msra.mxu3 %v6067_v43  ;;  %2301 = vmatpush.bf16.msra.mxu2 %v5811_v46  ;;  %v5879_v43 = vor.u32 %v8176_v37, %v5876_v38  ;;  %v5844_v46 = vld [vmem:[#allocation4 + $0x160] sm:$0xf0] }
  0xc9   :  { %2340 = vmatpush.bf16.msrb.mxu1 %v6579_v49  ;;  %2327 = vmatpush.bf16.msrb.mxu0 %v6323_v51  ;;  %v5847_v49 = vor.u32 %v8168_v45, %v5844_v46  ;;  %v8160_v51 = vld [vmem:[#allocation4 + $0x104] sm:$0xf] }
  0xca   :  { %692 = vmatmul.bf16.vlgmr.msrb.gmra.mxu2 %v9023_v3  ;;  %718 = vmatmul.bf16.vlgmr.msra.gmra.mxu0 %v9023_v3  ;;  %v6259_v3 = vor.u32 %v8276_v2, %v6258_v1  ;;  %v5815_v54 = vor.u32 %v8160_v51, %v5812_v52  ;;  %v6647_v1 = vor.u32 %v8368_v60, %v6644_v62  ;;  %v8352_v24 = vld [vmem:[#allocation4 + $0x704] sm:$0xf]  ;;  %v9038_v60 = vld [vmem:[%s9309_s4] sm:$0xf] }
  0xcb   :  { %705 = vmatmul.bf16.vlgmr.msrb.gmra.mxu3 %v9025_v8  ;;  %731 = vmatmul.bf16.vlgmr.msra.gmra.mxu1 %v9025_v8  ;;  %v5938_v8 = vld [vmem:[#allocation4 + $0x200] sm:$0xf]  ;;  %v6580_v25 = vld [vmem:[#allocation4 + $0x720] sm:$0xf0]  ;;  %v304_v6 = vperm.slane %v9038_v60, 0 }
  0xcc   :  { %2315 = vmatpush.bf16.msra.mxu3 %v6035_v55  ;;  %2302 = vmatpush.bf16.msra.mxu2 %v5779_v58  ;;  %v5939_v29 = vor.u32 %v8196_v17, %v5938_v8  ;;  %v8216_v55 = vld [vmem:[#allocation4 + $0x2c4] sm:$0xf]  ;;  %v6583_v26 = vor.u32 %v8352_v24, %v6580_v25  ;;  %v8237_v24 = vld [vmem:[#allocation4 + $0x364] sm:$0xf0] }
  0xcd   :  { %2341 = vmatpush.bf16.msrb.mxu1 %v6547_v61  ;;  %2328 = vmatpush.bf16.msrb.mxu0 %v6291_v63  ;;  %v6039_v57 = vor.u32 %v8216_v55, %v6036_v56  ;;  %v8208_v58 = vld [vmem:[#allocation4 + $0x284] sm:$0xf]  ;;  %v6194_v63 = vld [vmem:[#allocation4 + $0x400] sm:$0xf] }
  0xce   :  { %v6007_v61 = vor.u32 %v8208_v58, %v6004_v59  ;;  %v6195_v2 = vor.u32 %v8260_v0, %v6194_v63  ;;  %v5748_v8 = vld [vmem:[#allocation4 + $0xa0] sm:$0xf0]  ;;  %v305_v63 = vperm.slane %v9038_v60, 1 }
  0xcf   :  { %v8304_v17 = vld [vmem:[#allocation4 + $0x584] sm:$0xf] }
  0xd0   :  { %2316 = vmatpush.bf16.msra.mxu3 %v6003_v4  ;;  %2303 = vmatpush.bf16.msra.mxu2 %v5747_v7  ;;  %v8152_v4 = vld [vmem:[#allocation4 + $0xc4] sm:$0xf]  ;;  %v6391_v20 = vor.u32 %v8304_v17, %v6388_v19  ;;  %v5914_v19 = vld [vmem:[#allocation4 + $0x1c8] sm:$0xf] }
  0xd1   :  { %2342 = vmatpush.bf16.msrb.mxu1 %v6515_v11  ;;  %2329 = vmatpush.bf16.msrb.mxu0 %v6259_v3  ;;  %v5783_v7 = vor.u32 %v8152_v4, %v5780_v5  ;;  %v8200_v11 = vld [vmem:[#allocation4 + $0x244] sm:$0xf] }
  0xd2   :  { %v8360_v3 = vld [vmem:[#allocation4 + $0x744] sm:$0xf]  ;;  %v5975_v13 = vor.u32 %v8200_v11, %v5972_v12 }
  0xd3   :  { %v6615_v15 = vor.u32 %v8360_v3, %v6612_v14  ;;  %v8136_v27 = vld [vmem:[#allocation4 + $0x44] sm:$0xf] }
  0xd4   :  { %2317 = vmatpush.bf16.msra.mxu3 %v5971_v16  ;;  %2304 = vmatpush.bf16.msra.mxu2 %v5715_v18  ;;  %v8144_v16 = vld [vmem:[#allocation4 + $0x84] sm:$0xf] }
  0xd5   :  { %2343 = vmatpush.bf16.msrb.mxu1 %v6483_v22  ;;  %2330 = vmatpush.bf16.msrb.mxu0 %v6227_v23  ;;  %v5751_v18 = vor.u32 %v8144_v16, %v5748_v8  ;;  %v5940_v22 = vld [vmem:[#allocation4 + $0x220] sm:$0xf0]  ;;  %v8245_v16 = vld [vmem:[#allocation4 + $0x3a4] sm:$0xf0] }
  0xd6   :  { %v5943_v23 = vor.u32 %v8192_v21, %v5940_v22  ;;  %v5716_v28 = vld [vmem:[#allocation4 + $0x60] sm:$0xf0] }
  0xd7   :  { %v6356_v31 = vld [vmem:[#allocation4 + $0x560] sm:$0xf0] }
  0xd8   :  { %2318 = vmatpush.bf16.msra.mxu3 %v5939_v29  ;;  %2305 = vmatpush.bf16.msra.mxu2 %v5683_v30  ;;  %v5719_v29 = vor.u32 %v8136_v27, %v5716_v28  ;;  %v8296_v30 = vld [vmem:[#allocation4 + $0x544] sm:$0xf]  ;;  %v307_v27 = vperm.slane %v9038_v60, 3  ;;  %v5882_v28 = vld [vmem:[#allocation4 + $0x188] sm:$0xf] }
  0xd9   :  { %2344 = vmatpush.bf16.msrb.mxu1 %v6451_v39  ;;  %2331 = vmatpush.bf16.msrb.mxu0 %v6195_v2  ;;  %v6359_v32 = vor.u32 %v8296_v30, %v6356_v31  ;;  %v6548_v34 = vld [vmem:[#allocation4 + $0x6e0] sm:$0xf0] }
  0xda   :  { %v8128_v36 = vld [vmem:[#allocation4 + $0x4] sm:$0xf] }
  0xdb   :  { %v5684_v37 = vld [vmem:[#allocation4 + $0x20] sm:$0xf0] }
  0xdc   :  { %2363 = vmatpush.bf16.msrb.mxu3 %v6167_v33  ;;  %2350 = vmatpush.bf16.msrb.mxu2 %v5911_v35  ;;  %v8344_v33 = vld [vmem:[#allocation4 + $0x6c4] sm:$0xf]  ;;  %v5687_v39 = vor.u32 %v8128_v36, %v5684_v37 }
  0xdd   :  { %2389 = vmatpush.bf16.msra.mxu1 %v6679_v40  ;;  %2376 = vmatpush.bf16.msra.mxu0 %v6423_v10  ;;  %v6551_v35 = vor.u32 %v8344_v33, %v6548_v34  ;;  %v8288_v38 = vld [vmem:[#allocation4 + $0x504] sm:$0xf]  ;;  %v6074_v33 = vld [vmem:[#allocation4 + $0x308] sm:$0xf] }
  0xde   :  { %v6324_v40 = vld [vmem:[#allocation4 + $0x520] sm:$0xf0]  ;;  %v8229_v34 = vld [vmem:[#allocation4 + $0x324] sm:$0xf0] }
  0xdf   :  { %v8280_v45 = vld [vmem:[#allocation4 + $0x4c4] sm:$0xf] }
  0xe0   :  { %2364 = vmatpush.bf16.msrb.mxu3 %v6135_v41  ;;  %2351 = vmatpush.bf16.msrb.mxu2 %v5879_v43  ;;  %v6327_v41 = vor.u32 %v8288_v38, %v6324_v40  ;;  %v6516_v43 = vld [vmem:[#allocation4 + $0x6a0] sm:$0xf0]  ;;  %v8173_v40 = vld [vmem:[#allocation4 + $0x164] sm:$0xf0] }
  0xe1   :  { %2390 = vmatpush.bf16.msra.mxu1 %v6647_v1  ;;  %2377 = vmatpush.bf16.msra.mxu0 %v6391_v20  ;;  %v6519_v44 = vor.u32 %v8336_v42, %v6516_v43  ;;  %v6292_v46 = vld [vmem:[#allocation4 + $0x4e0] sm:$0xf0]  ;;  %v8189_v20 = vld [vmem:[#allocation4 + $0x1e4] sm:$0xf0]  ;;  %v306_v42 = vperm.slane %v9038_v60, 2 }
  0xe2   :  { %v8272_v51 = vld [vmem:[#allocation4 + $0x484] sm:$0xf]  ;;  %v5915_v25 = vor.u32 %v8189_v20, %v5914_v19  ;;  %v6042_v43 = vld [vmem:[#allocation4 + $0x2c8] sm:$0xf] }
  0xe3   :  { %v6260_v52 = vld [vmem:[#allocation4 + $0x4a0] sm:$0xf0]  ;;  %v6650_v60 = vld [vmem:[#allocation4 + $0x788] sm:$0xf] }
  0xe4   :  { %2365 = vmatpush.bf16.msrb.mxu3 %v6103_v47  ;;  %2352 = vmatpush.bf16.msrb.mxu2 %v5847_v49  ;;  %v6295_v47 = vor.u32 %v8280_v45, %v6292_v46  ;;  %v6484_v49 = vld [vmem:[#allocation4 + $0x660] sm:$0xf0]  ;;  %v8221_v45 = vld [vmem:[#allocation4 + $0x2e4] sm:$0xf0] }
  0xe5   :  { %2391 = vmatpush.bf16.msra.mxu1 %v6615_v15  ;;  %2378 = vmatpush.bf16.msra.mxu0 %v6359_v32  ;;  %v6487_v50 = vor.u32 %v8328_v48, %v6484_v49  ;;  %v6452_v55 = vld [vmem:[#allocation4 + $0x620] sm:$0xf0]  ;;  %v6138_v15 = vld [vmem:[#allocation4 + $0x388] sm:$0xf] }
  0xe6   :  { %v6228_v58 = vld [vmem:[#allocation4 + $0x460] sm:$0xf0]  ;;  %v6139_v21 = vor.u32 %v8245_v16, %v6138_v15  ;;  %v6682_v46 = vld [vmem:[#allocation4 + $0x7c8] sm:$0xf] }
  0xe7   :  { %v6196_v62 = vld [vmem:[#allocation4 + $0x420] sm:$0xf0]  ;;  %v6394_v19 = vld [vmem:[#allocation4 + $0x588] sm:$0xf] }
  0xe8   :  { %2366 = vmatpush.bf16.msrb.mxu3 %v6071_v53  ;;  %2353 = vmatpush.bf16.msrb.mxu2 %v5815_v54  ;;  %v6263_v53 = vor.u32 %v8272_v51, %v6260_v52  ;;  %v8320_v54 = vld [vmem:[#allocation4 + $0x604] sm:$0xf]  ;;  %v8165_v51 = vld [vmem:[#allocation4 + $0x124] sm:$0xf0] }
  0xe9   :  { %2392 = vmatpush.bf16.msra.mxu1 %v6583_v26  ;;  %2379 = vmatpush.bf16.msra.mxu0 %v6327_v41  ;;  %v6455_v56 = vor.u32 %v8320_v54, %v6452_v55  ;;  %v6075_v41 = vor.u32 %v8229_v34, %v6074_v33  ;;  %v6010_v55 = vld [vmem:[#allocation4 + $0x288] sm:$0xf]  ;;  %v6172_v33 = vld [vmem:[#allocation4 + $0x3e8] sm:$0xf0] }
  0xea   :  { %v8309_v20 = vld [vmem:[#allocation4 + $0x5a4] sm:$0xf0] }
  0xeb   :  { %v5722_v34 = vld [vmem:[#allocation4 + $0x48] sm:$0xf] }
  0xec   :  { %2367 = vmatpush.bf16.msrb.mxu3 %v6039_v57  ;;  %2354 = vmatpush.bf16.msrb.mxu2 %v5783_v7  ;;  %v8264_v57 = vld [vmem:[#allocation4 + $0x444] sm:$0xf]  ;;  %v6170_v7 = vld [vmem:[#allocation4 + $0x3c8] sm:$0xf] }
  0xed   :  { %2393 = vmatpush.bf16.msra.mxu1 %v6551_v35  ;;  %2380 = vmatpush.bf16.msra.mxu0 %v6295_v47  ;;  %v6231_v59 = vor.u32 %v8264_v57, %v6228_v58  ;;  %v6171_v12 = vor.u32 %v8253_v9, %v6170_v7  ;;  %v8381_v47 = vld [vmem:[#allocation4 + $0x7e4] sm:$0xf0] }
  0xee   :  { %v6683_v54 = vor.u32 %v8381_v47, %v6682_v46  ;;  %v6140_v46 = vld [vmem:[#allocation4 + $0x3a8] sm:$0xf0]  ;;  %v5690_v47 = vld [vmem:[#allocation4 + $0x8] sm:$0xf] }
  0xf0   :  { %2368 = vmatpush.bf16.msrb.mxu3 %v6007_v61  ;;  %2355 = vmatpush.bf16.msrb.mxu2 %v5751_v18  ;;  %v8256_v61 = vld [vmem:[#allocation4 + $0x404] sm:$0xf] }
  0xf1   :  { %2394 = vmatpush.bf16.msra.mxu1 %v6519_v44  ;;  %2381 = vmatpush.bf16.msra.mxu0 %v6263_v53  ;;  %v6199_v0 = vor.u32 %v8256_v61, %v6196_v62  ;;  %v6043_v53 = vor.u32 %v8221_v45, %v6042_v43  ;;  %v8373_v61 = vld [vmem:[#allocation4 + $0x7a4] sm:$0xf0]  ;;  %v8241_v45 = vld [vmem:[#allocation4 + $0x38c] sm:$0xf] }
  0xf2   :  { %v6651_v9 = vor.u32 %v8373_v61, %v6650_v60  ;;  %v8233_v60 = vld [vmem:[#allocation4 + $0x34c] sm:$0xf] }
  0xf3   :  { %v6108_v61 = vld [vmem:[#allocation4 + $0x368] sm:$0xf0] }
  0xf4   :  { %2369 = vmatpush.bf16.msrb.mxu3 %v5975_v13  ;;  %2356 = vmatpush.bf16.msrb.mxu2 %v5719_v29  ;;  %v8181_v29 = vld [vmem:[#allocation4 + $0x1a4] sm:$0xf0] }
  0xf5   :  { %2395 = vmatpush.bf16.msra.mxu1 %v6487_v50  ;;  %2382 = vmatpush.bf16.msra.mxu0 %v6231_v59  ;;  %v5883_v36 = vor.u32 %v8181_v29, %v5882_v28  ;;  %v5818_v50 = vld [vmem:[#allocation4 + $0x108] sm:$0xf] }
  0xf6   :  { %v8213_v59 = vld [vmem:[#allocation4 + $0x2a4] sm:$0xf0] }
  0xf7   :  { %v6011_v7 = vor.u32 %v8213_v59, %v6010_v55  ;;  %v6586_v28 = vld [vmem:[#allocation4 + $0x708] sm:$0xf] }
  0xf8   :  { %2370 = vmatpush.bf16.msrb.mxu3 %v5943_v23  ;;  %2357 = vmatpush.bf16.msrb.mxu2 %v5687_v39  ;;  %v6106_v23 = vld [vmem:[#allocation4 + $0x348] sm:$0xf] }
  0xf9   :  { %2396 = vmatpush.bf16.msra.mxu1 %v6455_v56  ;;  %2383 = vmatpush.bf16.msra.mxu0 %v6199_v0  ;;  %v6107_v31 = vor.u32 %v8237_v24, %v6106_v23  ;;  %v5850_v39 = vld [vmem:[#allocation4 + $0x148] sm:$0xf] }
  0xfa   :  { %v5851_v48 = vor.u32 %v8173_v40, %v5850_v39  ;;  %v5786_v0 = vld [vmem:[#allocation4 + $0xc8] sm:$0xf] }
  0xfb   :  { %v5946_v24 = vld [vmem:[#allocation4 + $0x208] sm:$0xf] }
  0xfc   :  { %v8357_v29 = vld [vmem:[#allocation4 + $0x724] sm:$0xf0] }
  0xfd   :  { %v6587_v39 = vor.u32 %v8357_v29, %v6586_v28  ;;  %v6522_v55 = vld [vmem:[#allocation4 + $0x688] sm:$0xf] }
  0xfe   :  { %v6234_v28 = vld [vmem:[#allocation4 + $0x448] sm:$0xf] }
  0xff   :  { %v8269_v29 = vld [vmem:[#allocation4 + $0x464] sm:$0xf0] }
 0x137   :  { %v667_v1 = vpop.f32.mrf.mxu0 }
 0x138   :  { %v668_v2 = vadd.f32 %v667_v1, %v305_v63  ;;  %v680_v4 = vpop.f32.mrf.mxu1  ;;  %v5819_v63 = vor.u32 %v8165_v51, %v5818_v50  ;;  %v8293_v50 = vld [vmem:[#allocation4 + $0x524] sm:$0xf0] }
 0x13a   :  { %v681_v5 = vadd.f32 %v680_v4, %v668_v2  ;;  %v8157_v4 = vld [vmem:[#allocation4 + $0xe4] sm:$0xf0] }
 0x13b   :  { %v5787_v15 = vor.u32 %v8157_v4, %v5786_v0  ;;  %v8285_v0 = vld [vmem:[#allocation4 + $0x4e4] sm:$0xf0]  ;;  %v5884_v4 = vld [vmem:[#allocation4 + $0x1a8] sm:$0xf0] }
 0x13c   :  { %v737_v10 = vmax.f32 %v681_v5, 0.0  ;;  %v6426_v5 = vld [vmem:[#allocation4 + $0x5c8] sm:$0xf] }
 0x13d   :  { %v641_v11 = vpop.f32.mrf.mxu2 }
 0x13e   :  { %v9042_v3 = vpack.c.bf16 %v737_v10, %v737_v10  ;;  %v642_v13 = vadd.f32 %v641_v11, %v304_v6  ;;  %v654_v14 = vpop.f32.mrf.mxu3  ;;  %v8317_v6 = vld [vmem:[#allocation4 + $0x5e4] sm:$0xf0] }
 0x13f   :  { %v669_v8 = vpop.f32.mrf.mxu0  ;;  %v5978_v10 = vld [vmem:[#allocation4 + $0x248] sm:$0xf]  ;;  %v6427_v16 = vor.u32 %v8317_v6, %v6426_v5  ;;  %v6111_v5 = vor.u32 %v8233_v60, %v6108_v61  ;;  %v6396_v60 = vld [vmem:[#allocation4 + $0x5a8] sm:$0xf0] }
 0x140   :  { %v655_v17 = vadd.f32 %v654_v14, %v642_v13  ;;  %v682_v18 = vpop.f32.mrf.mxu1  ;;  %2319 = vmatmul.bf16.vlgmr.msra.gmra.mxu3 %v9042_v3  ;;  %v8205_v11 = vld [vmem:[#allocation4 + $0x264] sm:$0xf0] }
 0x141   :  { %2415 = vmatpush.bf16.msra.mxu3 %v6171_v12  ;;  %v6618_v13 = vld [vmem:[#allocation4 + $0x748] sm:$0xf] }
 0x142   :  { %v736_v22 = vmax.f32 %v655_v17, 0.0  ;;  %v8365_v14 = vld [vmem:[#allocation4 + $0x764] sm:$0xf0] }
 0x143   :  { %v5754_v8 = vld [vmem:[#allocation4 + $0x88] sm:$0xf]  ;;  %v6619_v23 = vor.u32 %v8365_v14, %v6618_v13 }
 0x144   :  { %v9045_v26 = vpack.c.bf16 %v736_v22, %v736_v22  ;;  %v8149_v18 = vld [vmem:[#allocation4 + $0xa4] sm:$0xf0]  ;;  %v5979_v22 = vor.u32 %v8205_v11, %v5978_v10  ;;  %v8225_v10 = vld [vmem:[#allocation4 + $0x30c] sm:$0xf] }
 0x145   :  { %2416 = vmatpush.bf16.msra.mxu3 %v6139_v21  ;;  %v643_v30 = vpop.f32.mrf.mxu2  ;;  %v6490_v6 = vld [vmem:[#allocation4 + $0x648] sm:$0xf]  ;;  %v6076_v11 = vld [vmem:[#allocation4 + $0x328] sm:$0xf0] }
 0x146   :  { %v656_v32 = vpop.f32.mrf.mxu3  ;;  %2306 = vmatmul.bf16.vlgmr.msra.gmra.mxu2 %v9045_v26  ;;  %v5755_v30 = vor.u32 %v8149_v18, %v5754_v8  ;;  %v6266_v13 = vld [vmem:[#allocation4 + $0x488] sm:$0xf]  ;;  %v5852_v8 = vld [vmem:[#allocation4 + $0x168] sm:$0xf0]  ;;  %v6079_v18 = vor.u32 %v8225_v10, %v6076_v11 }
 0x147   :  { %2402 = vmatpush.bf16.msra.mxu2 %v5915_v25  ;;  %v719_v35 = vpop.f32.mrf.mxu0  ;;  %v8249_v32 = vld [vmem:[#allocation4 + $0x3cc] sm:$0xf]  ;;  %v8277_v14 = vld [vmem:[#allocation4 + $0x4a4] sm:$0xf0] }
 0x148   :  { %v720_v37 = vadd.f32 %v719_v35, %v307_v27  ;;  %v732_v38 = vpop.f32.mrf.mxu1  ;;  %v8197_v27 = vld [vmem:[#allocation4 + $0x224] sm:$0xf0]  ;;  %v6175_v40 = vor.u32 %v8249_v32, %v6172_v33  ;;  %v5820_v32 = vld [vmem:[#allocation4 + $0x128] sm:$0xf0] }
 0x149   :  { %2417 = vmatpush.bf16.msra.mxu3 %v6107_v31  ;;  %v6395_v31 = vor.u32 %v8309_v20, %v6394_v19  ;;  %v8141_v35 = vld [vmem:[#allocation4 + $0x64] sm:$0xf0]  ;;  %v5724_v10 = vld [vmem:[#allocation4 + $0x68] sm:$0xf0] }
 0x14a   :  { %v733_v44 = vadd.f32 %v732_v38, %v720_v37  ;;  %v8301_v37 = vld [vmem:[#allocation4 + $0x564] sm:$0xf0]  ;;  %v5947_v38 = vor.u32 %v8197_v27, %v5946_v24  ;;  %v5723_v43 = vor.u32 %v8141_v35, %v5722_v34  ;;  %v8377_v24 = vld [vmem:[#allocation4 + $0x7cc] sm:$0xf] }
 0x14b   :  { %2403 = vmatpush.bf16.msra.mxu2 %v5883_v36  ;;  %v6362_v36 = vld [vmem:[#allocation4 + $0x548] sm:$0xf]  ;;  %v8209_v35 = vld [vmem:[#allocation4 + $0x28c] sm:$0xf] }
 0x14c   :  { %v739_v49 = vmax.f32 %v733_v44, 0.0  ;;  %v6363_v44 = vor.u32 %v8301_v37, %v6362_v36  ;;  %v6458_v19 = vld [vmem:[#allocation4 + $0x608] sm:$0xf]  ;;  %v6235_v36 = vor.u32 %v8269_v29, %v6234_v28  ;;  %v6012_v37 = vld [vmem:[#allocation4 + $0x2a8] sm:$0xf0] }
 0x14d   :  { %2418 = vmatpush.bf16.msra.mxu3 %v6075_v41  ;;  %v693_v52 = vpop.f32.mrf.mxu2  ;;  %v6554_v41 = vld [vmem:[#allocation4 + $0x6c8] sm:$0xf]  ;;  %v8297_v11 = vld [vmem:[#allocation4 + $0x54c] sm:$0xf]  ;;  %v5922_v28 = vld [vmem:[#allocation4 + $0x1d0] sm:$0xf] }
 0x14e   :  { %v9050_v56 = vpack.c.bf16 %v739_v49, %v739_v49  ;;  %v694_v57 = vadd.f32 %v693_v52, %v306_v42  ;;  %v706_v58 = vpop.f32.mrf.mxu3  ;;  %v8349_v42 = vld [vmem:[#allocation4 + $0x6e4] sm:$0xf0]  ;;  %v8185_v52 = vld [vmem:[#allocation4 + $0x1cc] sm:$0xf]  ;;  %v8190_v29 = vld [vmem:[#allocation4 + $0x1ec] sm:$0xf0] }
 0x14f   :  { %2404 = vmatpush.bf16.msra.mxu2 %v5851_v48  ;;  %v721_v62 = vpop.f32.mrf.mxu0  ;;  %v8133_v48 = vld [vmem:[#allocation4 + $0x24] sm:$0xf0]  ;;  %v6555_v51 = vor.u32 %v8349_v42, %v6554_v41 }
 0x150   :  { %v707_v1 = vadd.f32 %v706_v58, %v694_v57  ;;  %v734_v2 = vpop.f32.mrf.mxu1  ;;  %2345 = vmatmul.bf16.vlgmr.msrb.gmra.mxu1 %v9050_v56  ;;  %2371 = vmatmul.bf16.vlgmr.msrb.gmra.mxu3 %v9042_v3  ;;  %v6330_v49 = vld [vmem:[#allocation4 + $0x508] sm:$0xf]  ;;  %v5691_v58 = vor.u32 %v8133_v48, %v5690_v47  ;;  %v6015_v47 = vor.u32 %v8209_v35, %v6012_v37  ;;  %v6114_v35 = vld [vmem:[#allocation4 + $0x350] sm:$0xf] }
 0x151   :  { %2419 = vmatpush.bf16.msra.mxu3 %v6043_v53  ;;  %2441 = vmatpush.bf16.msrb.mxu1 %v6683_v54  ;;  %v5916_v53 = vld [vmem:[#allocation4 + $0x1e8] sm:$0xf0]  ;;  %v6143_v54 = vor.u32 %v8241_v45, %v6140_v46  ;;  %v8341_v57 = vld [vmem:[#allocation4 + $0x6a4] sm:$0xf0]  ;;  %v6331_v59 = vor.u32 %v8293_v50, %v6330_v49  ;;  %v5923_v37 = vor.u32 %v8190_v29, %v5922_v28 }
 0x152   :  { %v738_v12 = vmax.f32 %v707_v1, 0.0  ;;  %v5919_v62 = vor.u32 %v8185_v52, %v5916_v53  ;;  %v6523_v1 = vor.u32 %v8341_v57, %v6522_v55  ;;  %v8177_v2 = vld [vmem:[#allocation4 + $0x18c] sm:$0xf]  ;;  %v8325_v20 = vld [vmem:[#allocation4 + $0x624] sm:$0xf0] }
 0x153   :  { %2405 = vmatpush.bf16.msra.mxu2 %v5819_v63  ;;  %v6298_v63 = vld [vmem:[#allocation4 + $0x4c8] sm:$0xf]  ;;  %v8313_v45 = vld [vmem:[#allocation4 + $0x5cc] sm:$0xf] }
 0x154   :  { %v9054_v17 = vpack.c.bf16 %v738_v12, %v738_v12  ;;  %v5887_v12 = vor.u32 %v8177_v2, %v5884_v4  ;;  %v6202_v41 = vld [vmem:[#allocation4 + $0x408] sm:$0xf]  ;;  %v6428_v46 = vld [vmem:[#allocation4 + $0x5e8] sm:$0xf0] }
 0x155   :  { %2420 = vmatpush.bf16.msra.mxu3 %v6011_v7  ;;  %2442 = vmatpush.bf16.msrb.mxu1 %v6651_v9  ;;  %v695_v21 = vpop.f32.mrf.mxu2  ;;  %v8333_v7 = vld [vmem:[#allocation4 + $0x664] sm:$0xf0]  ;;  %v6299_v9 = vor.u32 %v8285_v0, %v6298_v63  ;;  %v8201_v49 = vld [vmem:[#allocation4 + $0x24c] sm:$0xf]  ;;  %v6431_v55 = vor.u32 %v8313_v45, %v6428_v46 }
 0x156   :  { %v708_v25 = vpop.f32.mrf.mxu3  ;;  %2332 = vmatmul.bf16.vlgmr.msrb.gmra.mxu0 %v9054_v17  ;;  %2358 = vmatmul.bf16.vlgmr.msrb.gmra.mxu2 %v9045_v26  ;;  %v8217_v21 = vld [vmem:[#allocation4 + $0x2cc] sm:$0xf]  ;;  %v8261_v42 = vld [vmem:[#allocation4 + $0x424] sm:$0xf0] }
 0x157   :  { %2406 = vmatpush.bf16.msra.mxu2 %v5787_v15  ;;  %2428 = vmatpush.bf16.msrb.mxu0 %v6427_v16  ;;  %v6491_v15 = vor.u32 %v8333_v7, %v6490_v6  ;;  %v8169_v16 = vld [vmem:[#allocation4 + $0x14c] sm:$0xf]  ;;  %v6203_v50 = vor.u32 %v8261_v42, %v6202_v41  ;;  %v6178_v6 = vld [vmem:[#allocation4 + $0x3d0] sm:$0xf] }
 0x158   :  { %v6684_v25 = vld [vmem:[#allocation4 + $0x7e8] sm:$0xf0]  ;;  %v5855_v27 = vor.u32 %v8169_v16, %v5852_v8  ;;  %v8254_v7 = vld [vmem:[#allocation4 + $0x3ec] sm:$0xf0] }
 0x159   :  { %2421 = vmatpush.bf16.msra.mxu3 %v5979_v22  ;;  %2443 = vmatpush.bf16.msrb.mxu1 %v6619_v23  ;;  %v6267_v22 = vor.u32 %v8277_v14, %v6266_v13  ;;  %v6044_v23 = vld [vmem:[#allocation4 + $0x2e8] sm:$0xf0]  ;;  %v6687_v34 = vor.u32 %v8377_v24, %v6684_v25  ;;  %v5890_v41 = vld [vmem:[#allocation4 + $0x190] sm:$0xf] }
 0x15a   :  { %v6047_v33 = vor.u32 %v8217_v21, %v6044_v23  ;;  %v8361_v52 = vld [vmem:[#allocation4 + $0x74c] sm:$0xf]  ;;  %v8246_v21 = vld [vmem:[#allocation4 + $0x3ac] sm:$0xf0] }
 0x15b   :  { %2407 = vmatpush.bf16.msra.mxu2 %v5755_v30  ;;  %2429 = vmatpush.bf16.msrb.mxu0 %v6395_v31  ;;  %v6459_v30 = vor.u32 %v8325_v20, %v6458_v19  ;;  %v8161_v31 = vld [vmem:[#allocation4 + $0x10c] sm:$0xf]  ;;  %v6146_v20 = vld [vmem:[#allocation4 + $0x390] sm:$0xf] }
 0x15c   :  { %v6620_v53 = vld [vmem:[#allocation4 + $0x768] sm:$0xf0]  ;;  %v8182_v42 = vld [vmem:[#allocation4 + $0x1ac] sm:$0xf0] }
 0x15d   :  { %2422 = vmatpush.bf16.msra.mxu3 %v5947_v38  ;;  %2444 = vmatpush.bf16.msrb.mxu1 %v6587_v39  ;;  %v8369_v38 = vld [vmem:[#allocation4 + $0x78c] sm:$0xf] }
 0x15e   :  { %v6652_v39 = vld [vmem:[#allocation4 + $0x7a8] sm:$0xf0] }
 0x15f   :  { %2408 = vmatpush.bf16.msra.mxu2 %v5723_v43  ;;  %2430 = vmatpush.bf16.msrb.mxu0 %v6363_v44  ;;  %v8153_v43 = vld [vmem:[#allocation4 + $0xcc] sm:$0xf]  ;;  %v6655_v48 = vor.u32 %v8369_v38, %v6652_v39 }
 0x160   :  { %2397 = vmatmul.bf16.vlgmr.msra.gmra.mxu1 %v9050_v56  ;;  %2423 = vmatmul.bf16.vlgmr.msra.gmra.mxu3 %v9042_v3  ;;  %v5788_v44 = vld [vmem:[#allocation4 + $0xe8] sm:$0xf0] }
 0x161   :  { %2467 = vmatpush.bf16.msrb.mxu3 %v6175_v40  ;;  %2445 = vmatpush.bf16.msrb.mxu1 %v6555_v51  ;;  %v5823_v40 = vor.u32 %v8161_v31, %v5820_v32  ;;  %v5980_v51 = vld [vmem:[#allocation4 + $0x268] sm:$0xf0] }
 0x162   :  { %v8145_v57 = vld [vmem:[#allocation4 + $0x8c] sm:$0xf]  ;;  %v5983_v61 = vor.u32 %v8201_v49, %v5980_v51  ;;  %v5891_v49 = vor.u32 %v8182_v42, %v5890_v41  ;;  %v8358_v41 = vld [vmem:[#allocation4 + $0x72c] sm:$0xf0] }
 0x163   :  { %2409 = vmatpush.bf16.msra.mxu2 %v5691_v58  ;;  %2431 = vmatpush.bf16.msrb.mxu0 %v6331_v59  ;;  %v5756_v58 = vld [vmem:[#allocation4 + $0xa8] sm:$0xf0] }
 0x164   :  { %v8305_v59 = vld [vmem:[#allocation4 + $0x58c] sm:$0xf]  ;;  %v5759_v4 = vor.u32 %v8145_v57, %v5756_v58 }
 0x165   :  { %2468 = vmatpush.bf16.msrb.mxu3 %v6143_v54  ;;  %2446 = vmatpush.bf16.msrb.mxu1 %v6523_v1  ;;  %v5791_v54 = vor.u32 %v8153_v43, %v5788_v44  ;;  %v8193_v63 = vld [vmem:[#allocation4 + $0x20c] sm:$0xf] }
 0x166   :  { %2384 = vmatmul.bf16.vlgmr.msra.gmra.mxu0 %v9054_v17  ;;  %2410 = vmatmul.bf16.vlgmr.msra.gmra.mxu2 %v9045_v26  ;;  %v5948_v0 = vld [vmem:[#allocation4 + $0x228] sm:$0xf0] }
 0x167   :  { %2454 = vmatpush.bf16.msrb.mxu2 %v5919_v62  ;;  %2432 = vmatpush.bf16.msrb.mxu0 %v6299_v9  ;;  %v6623_v62 = vor.u32 %v8361_v52, %v6620_v53  ;;  %v8353_v1 = vld [vmem:[#allocation4 + $0x70c] sm:$0xf]  ;;  %v5951_v13 = vor.u32 %v8193_v63, %v5948_v0  ;;  %v5858_v53 = vld [vmem:[#allocation4 + $0x150] sm:$0xf] }
 0x168   :  { %v6588_v2 = vld [vmem:[#allocation4 + $0x728] sm:$0xf0]  ;;  %v8382_v63 = vld [vmem:[#allocation4 + $0x7ec] sm:$0xf0] }
 0x169   :  { %2469 = vmatpush.bf16.msrb.mxu3 %v6111_v5  ;;  %2447 = vmatpush.bf16.msrb.mxu1 %v6491_v15  ;;  %v6399_v5 = vor.u32 %v8305_v59, %v6396_v60  ;;  %v8137_v9 = vld [vmem:[#allocation4 + $0x4c] sm:$0xf]  ;;  %v6591_v14 = vor.u32 %v8353_v1, %v6588_v2  ;;  %v6179_v15 = vor.u32 %v8254_v7, %v6178_v6  ;;  %v6050_v59 = vld [vmem:[#allocation4 + $0x2d0] sm:$0xf] }
 0x16a   :  { %v8345_v16 = vld [vmem:[#allocation4 + $0x6cc] sm:$0xf]  ;;  %v8166_v6 = vld [vmem:[#allocation4 + $0x12c] sm:$0xf0] }
 0x16b   :  { %2455 = vmatpush.bf16.msrb.mxu2 %v5887_v12  ;;  %2433 = vmatpush.bf16.msrb.mxu0 %v6267_v22  ;;  %v6364_v12 = vld [vmem:[#allocation4 + $0x568] sm:$0xf0] }
 0x16c   :  { %v6556_v8 = vld [vmem:[#allocation4 + $0x6e8] sm:$0xf0]  ;;  %v6367_v19 = vor.u32 %v8297_v11, %v6364_v12  ;;  %v8214_v12 = vld [vmem:[#allocation4 + $0x2ac] sm:$0xf0] }
 0x16d   :  { %2470 = vmatpush.bf16.msrb.mxu3 %v6079_v18  ;;  %2448 = vmatpush.bf16.msrb.mxu1 %v6459_v30  ;;  %v5727_v18 = vor.u32 %v8137_v9, %v5724_v10  ;;  %v8129_v22 = vld [vmem:[#allocation4 + $0xc] sm:$0xf]  ;;  %v6147_v30 = vor.u32 %v8246_v21, %v6146_v20  ;;  %v6018_v10 = vld [vmem:[#allocation4 + $0x290] sm:$0xf] }
 0x16e   :  { %v5692_v23 = vld [vmem:[#allocation4 + $0x28] sm:$0xf0]  ;;  %v6434_v20 = vld [vmem:[#allocation4 + $0x5d0] sm:$0xf] }
 0x16f   :  { %2456 = vmatpush.bf16.msrb.mxu2 %v5855_v27  ;;  %2434 = vmatpush.bf16.msrb.mxu0 %v6235_v36  ;;  %v8289_v24 = vld [vmem:[#allocation4 + $0x50c] sm:$0xf]  ;;  %v6559_v27 = vor.u32 %v8345_v16, %v6556_v8  ;;  %v8238_v36 = vld [vmem:[#allocation4 + $0x36c] sm:$0xf0] }
 0x170   :  { %2449 = vmatmul.bf16.vlgmr.msrb.gmra.mxu1 %v9050_v56  ;;  %v6332_v25 = vld [vmem:[#allocation4 + $0x528] sm:$0xf0]  ;;  %v6115_v43 = vor.u32 %v8238_v36, %v6114_v35  ;;  %v8318_v21 = vld [vmem:[#allocation4 + $0x5ec] sm:$0xf0] }
 0x171   :  { %2471 = vmatpush.bf16.msrb.mxu3 %v6047_v33  ;;  %2493 = vmatpush.bf16.msra.mxu1 %v6687_v34  ;;  %v8337_v31 = vld [vmem:[#allocation4 + $0x68c] sm:$0xf]  ;;  %v5695_v33 = vor.u32 %v8129_v22, %v5692_v23  ;;  %v6335_v34 = vor.u32 %v8289_v24, %v6332_v25  ;;  %v6019_v22 = vor.u32 %v8214_v12, %v6018_v10  ;;  %v5986_v25 = vld [vmem:[#allocation4 + $0x250] sm:$0xf]  ;;  %v8234_v10 = vld [vmem:[#allocation4 + $0x354] sm:$0xf] }
 0x172   :  { %v6524_v32 = vld [vmem:[#allocation4 + $0x6a8] sm:$0xf0]  ;;  %v6435_v29 = vor.u32 %v8318_v21, %v6434_v20  ;;  %v8310_v35 = vld [vmem:[#allocation4 + $0x5ac] sm:$0xf0]  ;;  %v6116_v12 = vld [vmem:[#allocation4 + $0x370] sm:$0xf0] }
 0x173   :  { %2457 = vmatpush.bf16.msrb.mxu2 %v5823_v40  ;;  %2435 = vmatpush.bf16.msrb.mxu0 %v6203_v50  ;;  %v8281_v38 = vld [vmem:[#allocation4 + $0x4cc] sm:$0xf]  ;;  %v6527_v40 = vor.u32 %v8337_v31, %v6524_v32  ;;  %v8366_v31 = vld [vmem:[#allocation4 + $0x76c] sm:$0xf0] }
 0x174   :  { %v6300_v39 = vld [vmem:[#allocation4 + $0x4e8] sm:$0xf0]  ;;  %v5762_v32 = vld [vmem:[#allocation4 + $0x90] sm:$0xf] }
 0x175   :  { %2472 = vmatpush.bf16.msrb.mxu3 %v6015_v47  ;;  %2494 = vmatpush.bf16.msra.mxu1 %v6655_v48  ;;  %v8329_v44 = vld [vmem:[#allocation4 + $0x64c] sm:$0xf]  ;;  %v6303_v46 = vor.u32 %v8281_v38, %v6300_v39  ;;  %v6082_v47 = vld [vmem:[#allocation4 + $0x310] sm:$0xf] }
 0x176   :  { %2436 = vmatmul.bf16.vlgmr.msrb.gmra.mxu0 %v9054_v17  ;;  %v6492_v45 = vld [vmem:[#allocation4 + $0x668] sm:$0xf0]  ;;  %v8230_v48 = vld [vmem:[#allocation4 + $0x32c] sm:$0xf0] }
 0x177   :  { %2458 = vmatpush.bf16.msrb.mxu2 %v5791_v54  ;;  %2480 = vmatpush.bf16.msra.mxu0 %v6431_v55  ;;  %v8273_v50 = vld [vmem:[#allocation4 + $0x48c] sm:$0xf]  ;;  %v6495_v52 = vor.u32 %v8329_v44, %v6492_v45  ;;  %v8174_v54 = vld [vmem:[#allocation4 + $0x16c] sm:$0xf0]  ;;  %v6083_v55 = vor.u32 %v8230_v48, %v6082_v47  ;;  %v8250_v44 = vld [vmem:[#allocation4 + $0x3d4] sm:$0xf] }
 0x178   :  { %v6268_v51 = vld [vmem:[#allocation4 + $0x4a8] sm:$0xf0]  ;;  %v5859_v0 = vor.u32 %v8174_v54, %v5858_v53  ;;  %v8198_v39 = vld [vmem:[#allocation4 + $0x22c] sm:$0xf0]  ;;  %v6180_v45 = vld [vmem:[#allocation4 + $0x3f0] sm:$0xf0] }
 0x179   :  { %2473 = vmatpush.bf16.msrb.mxu3 %v5983_v61  ;;  %2495 = vmatpush.bf16.msra.mxu1 %v6623_v62  ;;  %v8321_v57 = vld [vmem:[#allocation4 + $0x60c] sm:$0xf]  ;;  %v6271_v60 = vor.u32 %v8273_v50, %v6268_v51  ;;  %v8222_v61 = vld [vmem:[#allocation4 + $0x2ec] sm:$0xf0] }
 0x17a   :  { %v6460_v58 = vld [vmem:[#allocation4 + $0x628] sm:$0xf0]  ;;  %v6690_v62 = vld [vmem:[#allocation4 + $0x7d0] sm:$0xf]  ;;  %v6051_v7 = vor.u32 %v8222_v61, %v6050_v59  ;;  %v6148_v59 = vld [vmem:[#allocation4 + $0x3b0] sm:$0xf0] }
 0x17b   :  { %2459 = vmatpush.bf16.msrb.mxu2 %v5759_v4  ;;  %2481 = vmatpush.bf16.msra.mxu0 %v6399_v5  ;;  %v8265_v1 = vld [vmem:[#allocation4 + $0x44c] sm:$0xf]  ;;  %v6463_v4 = vor.u32 %v8321_v57, %v6460_v58  ;;  %v5826_v5 = vld [vmem:[#allocation4 + $0x110] sm:$0xf]  ;;  %v6691_v9 = vor.u32 %v8382_v63, %v6690_v62  ;;  %v8242_v58 = vld [vmem:[#allocation4 + $0x394] sm:$0xf] }
 0x17c   :  { %v6236_v2 = vld [vmem:[#allocation4 + $0x468] sm:$0xf0]  ;;  %v8142_v47 = vld [vmem:[#allocation4 + $0x6c] sm:$0xf0] }
 0x17d   :  { %2474 = vmatpush.bf16.msrb.mxu3 %v5951_v13  ;;  %2496 = vmatpush.bf16.msra.mxu1 %v6591_v14  ;;  %v6239_v11 = vor.u32 %v8265_v1, %v6236_v2  ;;  %v6658_v13 = vld [vmem:[#allocation4 + $0x790] sm:$0xf]  ;;  %v8257_v16 = vld [vmem:[#allocation4 + $0x40c] sm:$0xf]  ;;  %v5924_v1 = vld [vmem:[#allocation4 + $0x1f0] sm:$0xf0] }
 0x17e   :  { %v8374_v14 = vld [vmem:[#allocation4 + $0x7ac] sm:$0xf0]  ;;  %v6204_v8 = vld [vmem:[#allocation4 + $0x428] sm:$0xf0] }
 0x17f   :  { %2460 = vmatpush.bf16.msrb.mxu2 %v5727_v18  ;;  %2482 = vmatpush.bf16.msra.mxu0 %v6367_v19  ;;  %v5794_v18 = vld [vmem:[#allocation4 + $0xd0] sm:$0xf]  ;;  %v6659_v23 = vor.u32 %v8374_v14, %v6658_v13  ;;  %v6207_v24 = vor.u32 %v8257_v16, %v6204_v8  ;;  %v5892_v16 = vld [vmem:[#allocation4 + $0x1b0] sm:$0xf0] }
 0x180   :  { %2475 = vmatmul.bf16.vlgmr.msrb.gmra.mxu3 %v9042_v3  ;;  %v8158_v19 = vld [vmem:[#allocation4 + $0xec] sm:$0xf0] }
 0x181   :  { %2519 = vmatpush.bf16.msra.mxu3 %v6179_v15  ;;  %2497 = vmatpush.bf16.msra.mxu1 %v6559_v27  ;;  %v5827_v15 = vor.u32 %v8166_v6, %v5826_v5  ;;  %v8206_v27 = vld [vmem:[#allocation4 + $0x26c] sm:$0xf0]  ;;  %v5795_v28 = vor.u32 %v8158_v19, %v5794_v18  ;;  %v6119_v18 = vor.u32 %v8234_v10, %v6116_v12  ;;  %v6404_v10 = vld [vmem:[#allocation4 + $0x5b0] sm:$0xf0] }
 0x182   :  { %v5987_v36 = vor.u32 %v8206_v27, %v5986_v25  ;;  %v6370_v48 = vld [vmem:[#allocation4 + $0x550] sm:$0xf]  ;;  %v8194_v12 = vld [vmem:[#allocation4 + $0x214] sm:$0xf] }
 0x183   :  { %2461 = vmatpush.bf16.msrb.mxu2 %v5695_v33  ;;  %2483 = vmatpush.bf16.msra.mxu0 %v6335_v34  ;;  %v8150_v33 = vld [vmem:[#allocation4 + $0xac] sm:$0xf0] }
 0x184   :  { %v6402_v34 = vld [vmem:[#allocation4 + $0x590] sm:$0xf]  ;;  %v5763_v42 = vor.u32 %v8150_v33, %v5762_v32 }
 0x185   :  { %2520 = vmatpush.bf16.msra.mxu3 %v6147_v30  ;;  %2498 = vmatpush.bf16.msra.mxu1 %v6527_v40  ;;  %v6626_v30 = vld [vmem:[#allocation4 + $0x750] sm:$0xf] }
 0x186   :  { %2462 = vmatmul.bf16.vlgmr.msrb.gmra.mxu2 %v9045_v26  ;;  %v6627_v38 = vor.u32 %v8366_v31, %v6626_v30  ;;  %v6594_v40 = vld [vmem:[#allocation4 + $0x710] sm:$0xf] }
 0x187   :  { %2506 = vmatpush.bf16.msra.mxu2 %v5923_v37  ;;  %2484 = vmatpush.bf16.msra.mxu0 %v6303_v46  ;;  %v5954_v37 = vld [vmem:[#allocation4 + $0x210] sm:$0xf]  ;;  %v6595_v51 = vor.u32 %v8358_v41, %v6594_v40 }
 0x188   :  { %v5730_v46 = vld [vmem:[#allocation4 + $0x50] sm:$0xf]  ;;  %v5955_v50 = vor.u32 %v8198_v39, %v5954_v37  ;;  %v6692_v39 = vld [vmem:[#allocation4 + $0x7f0] sm:$0xf0] }
 0x189   :  { %2521 = vmatpush.bf16.msra.mxu3 %v6115_v43  ;;  %2499 = vmatpush.bf16.msra.mxu1 %v6495_v52  ;;  %v6403_v43 = vor.u32 %v8310_v35, %v6402_v34  ;;  %v6183_v52 = vor.u32 %v8250_v44, %v6180_v45  ;;  %v6562_v53 = vld [vmem:[#allocation4 + $0x6d0] sm:$0xf]  ;;  %v8218_v35 = vld [vmem:[#allocation4 + $0x2d4] sm:$0xf] }
 0x18a   :  { %v8350_v54 = vld [vmem:[#allocation4 + $0x6ec] sm:$0xf0] }
 0x18b   :  { %2507 = vmatpush.bf16.msra.mxu2 %v5891_v49  ;;  %2485 = vmatpush.bf16.msra.mxu0 %v6271_v60  ;;  %v8302_v49 = vld [vmem:[#allocation4 + $0x56c] sm:$0xf0]  ;;  %v6563_v2 = vor.u32 %v8350_v54, %v6562_v53 }
 0x18c   :  { %v6371_v57 = vor.u32 %v8302_v49, %v6370_v48  ;;  %v5698_v60 = vld [vmem:[#allocation4 + $0x10] sm:$0xf]  ;;  %v6020_v48 = vld [vmem:[#allocation4 + $0x2b0] sm:$0xf0] }
 0x18d   :  { %2522 = vmatpush.bf16.msra.mxu3 %v6083_v55  ;;  %2500 = vmatpush.bf16.msra.mxu1 %v6463_v4  ;;  %v5731_v55 = vor.u32 %v8142_v47, %v5730_v46  ;;  %v8134_v61 = vld [vmem:[#allocation4 + $0x2c] sm:$0xf0]  ;;  %v6151_v4 = vor.u32 %v8242_v58, %v6148_v59  ;;  %v8210_v47 = vld [vmem:[#allocation4 + $0x294] sm:$0xf] }
 0x18e   :  { %v6338_v62 = vld [vmem:[#allocation4 + $0x510] sm:$0xf]  ;;  %v5699_v5 = vor.u32 %v8134_v61, %v5698_v60  ;;  %v8314_v58 = vld [vmem:[#allocation4 + $0x5d4] sm:$0xf]  ;;  %v6023_v60 = vor.u32 %v8210_v47, %v6020_v48  ;;  %v6122_v47 = vld [vmem:[#allocation4 + $0x358] sm:$0xf] }
 0x18f   :  { %2508 = vmatpush.bf16.msra.mxu2 %v5859_v0  ;;  %2486 = vmatpush.bf16.msra.mxu0 %v6239_v11  ;;  %v8294_v63 = vld [vmem:[#allocation4 + $0x52c] sm:$0xf0]  ;;  %v8186_v0 = vld [vmem:[#allocation4 + $0x1d4] sm:$0xf] }
 0x190   :  { %2501 = vmatmul.bf16.vlgmr.msra.gmra.mxu1 %v9050_v56  ;;  %v6339_v6 = vor.u32 %v8294_v63, %v6338_v62  ;;  %v5927_v11 = vor.u32 %v8186_v0, %v5924_v1  ;;  %v6306_v13 = vld [vmem:[#allocation4 + $0x4d0] sm:$0xf]  ;;  %v6436_v59 = vld [vmem:[#allocation4 + $0x5f0] sm:$0xf0] }
 0x191   :  { %2523 = vmatpush.bf16.msra.mxu3 %v6051_v7  ;;  %2545 = vmatpush.bf16.msrb.mxu1 %v6691_v9  ;;  %v6530_v7 = vld [vmem:[#allocation4 + $0x690] sm:$0xf]  ;;  %v8202_v0 = vld [vmem:[#allocation4 + $0x254] sm:$0xf] }
 0x192   :  { %v8342_v9 = vld [vmem:[#allocation4 + $0x6ac] sm:$0xf0]  ;;  %v5988_v1 = vld [vmem:[#allocation4 + $0x270] sm:$0xf0] }
 0x193   :  { %2509 = vmatpush.bf16.msra.mxu2 %v5827_v15  ;;  %2487 = vmatpush.bf16.msra.mxu0 %v6207_v24  ;;  %v8286_v14 = vld [vmem:[#allocation4 + $0x4ec] sm:$0xf0]  ;;  %v8178_v15 = vld [vmem:[#allocation4 + $0x194] sm:$0xf]  ;;  %v6531_v8 = vor.u32 %v8342_v9, %v6530_v7 }
 0x194   :  { %v6307_v19 = vor.u32 %v8286_v14, %v6306_v13  ;;  %v6498_v20 = vld [vmem:[#allocation4 + $0x650] sm:$0xf]  ;;  %v6084_v24 = vld [vmem:[#allocation4 + $0x330] sm:$0xf0] }
 0x195   :  { %2524 = vmatpush.bf16.msra.mxu3 %v6019_v22  ;;  %2546 = vmatpush.bf16.msrb.mxu1 %v6659_v23  ;;  %v8334_v21 = vld [vmem:[#allocation4 + $0x66c] sm:$0xf0]  ;;  %v8226_v22 = vld [vmem:[#allocation4 + $0x314] sm:$0xf]  ;;  %v5895_v23 = vor.u32 %v8178_v15, %v5892_v16 }
 0x196   :  { %2488 = vmatmul.bf16.vlgmr.msra.gmra.mxu0 %v9054_v17  ;;  %v6274_v25 = vld [vmem:[#allocation4 + $0x490] sm:$0xf]  ;;  %v6499_v30 = vor.u32 %v8334_v21, %v6498_v20  ;;  %v6087_v32 = vor.u32 %v8226_v22, %v6084_v24  ;;  %v5764_v7 = vld [vmem:[#allocation4 + $0xb0] sm:$0xf0]  ;;  %v8255_v20 = vld [vmem:[#allocation4 + $0x3f4] sm:$0xf0] }
 0x197   :  { %2510 = vmatpush.bf16.msra.mxu2 %v5795_v28  ;;  %2532 = vmatpush.bf16.msrb.mxu0 %v6435_v29  ;;  %v8278_v27 = vld [vmem:[#allocation4 + $0x4ac] sm:$0xf0]  ;;  %v8170_v28 = vld [vmem:[#allocation4 + $0x154] sm:$0xf] }
 0x198   :  { %v5860_v29 = vld [vmem:[#allocation4 + $0x170] sm:$0xf0]  ;;  %v6466_v31 = vld [vmem:[#allocation4 + $0x610] sm:$0xf]  ;;  %v6275_v33 = vor.u32 %v8278_v27, %v6274_v25 }
 0x199   :  { %2525 = vmatpush.bf16.msra.mxu3 %v5987_v36  ;;  %2547 = vmatpush.bf16.msrb.mxu1 %v6627_v38  ;;  %v8326_v34 = vld [vmem:[#allocation4 + $0x62c] sm:$0xf0]  ;;  %v6052_v36 = vld [vmem:[#allocation4 + $0x2f0] sm:$0xf0]  ;;  %v5863_v37 = vor.u32 %v8170_v28, %v5860_v29 }
 0x19a   :  { %v8378_v38 = vld [vmem:[#allocation4 + $0x7d4] sm:$0xf]  ;;  %v6242_v40 = vld [vmem:[#allocation4 + $0x450] sm:$0xf]  ;;  %v6467_v44 = vor.u32 %v8326_v34, %v6466_v31  ;;  %v6055_v45 = vor.u32 %v8218_v35, %v6052_v36  ;;  %v8247_v34 = vld [vmem:[#allocation4 + $0x3b4] sm:$0xf0] }
 0x19b   :  { %2511 = vmatpush.bf16.msra.mxu2 %v5763_v42  ;;  %2533 = vmatpush.bf16.msrb.mxu0 %v6403_v43  ;;  %v8270_v41 = vld [vmem:[#allocation4 + $0x46c] sm:$0xf0]  ;;  %v8162_v42 = vld [vmem:[#allocation4 + $0x114] sm:$0xf]  ;;  %v6695_v46 = vor.u32 %v8378_v38, %v6692_v39  ;;  %v5930_v39 = vld [vmem:[#allocation4 + $0x1d8] sm:$0xf] }
 0x19c   :  { %v5828_v43 = vld [vmem:[#allocation4 + $0x130] sm:$0xf0]  ;;  %v6243_v49 = vor.u32 %v8270_v41, %v6242_v40  ;;  %v6210_v53 = vld [vmem:[#allocation4 + $0x410] sm:$0xf]  ;;  %v8191_v40 = vld [vmem:[#allocation4 + $0x1f4] sm:$0xf0] }
 0x19d   :  { %2526 = vmatpush.bf16.msra.mxu3 %v5955_v50  ;;  %2548 = vmatpush.bf16.msrb.mxu1 %v6595_v51  ;;  %v5831_v50 = vor.u32 %v8162_v42, %v5828_v43  ;;  %v8370_v51 = vld [vmem:[#allocation4 + $0x794] sm:$0xf]  ;;  %v8262_v54 = vld [vmem:[#allocation4 + $0x42c] sm:$0xf0]  ;;  %v5931_v48 = vor.u32 %v8191_v40, %v5930_v39 }
 0x19e   :  { %v6211_v62 = vor.u32 %v8262_v54, %v6210_v53  ;;  %v8306_v9 = vld [vmem:[#allocation4 + $0x594] sm:$0xf]  ;;  %v8183_v53 = vld [vmem:[#allocation4 + $0x1b4] sm:$0xf0] }
 0x19f   :  { %2512 = vmatpush.bf16.msra.mxu2 %v5731_v55  ;;  %2534 = vmatpush.bf16.msrb.mxu0 %v6371_v57  ;;  %v8154_v55 = vld [vmem:[#allocation4 + $0xd4] sm:$0xf] }
 0x1a0   :  { %2527 = vmatmul.bf16.vlgmr.msra.gmra.mxu3 %v9042_v3  ;;  %v5796_v57 = vld [vmem:[#allocation4 + $0xf0] sm:$0xf0] }
 0x1a1   :  { %2571 = vmatpush.bf16.msrb.mxu3 %v6183_v52  ;;  %2549 = vmatpush.bf16.msrb.mxu1 %v6563_v2  ;;  %v6660_v52 = vld [vmem:[#allocation4 + $0x7b0] sm:$0xf0]  ;;  %v5799_v63 = vor.u32 %v8154_v55, %v5796_v57 }
 0x1a2   :  { %v6663_v61 = vor.u32 %v8370_v51, %v6660_v52  ;;  %v8362_v2 = vld [vmem:[#allocation4 + $0x754] sm:$0xf]  ;;  %v5898_v52 = vld [vmem:[#allocation4 + $0x198] sm:$0xf] }
 0x1a3   :  { %2513 = vmatpush.bf16.msra.mxu2 %v5699_v5  ;;  %2535 = vmatpush.bf16.msrb.mxu0 %v6339_v6  ;;  %v6628_v5 = vld [vmem:[#allocation4 + $0x770] sm:$0xf0] }
 0x1a4   :  { %v8146_v6 = vld [vmem:[#allocation4 + $0x94] sm:$0xf]  ;;  %v6631_v13 = vor.u32 %v8362_v2, %v6628_v5  ;;  %v8175_v2 = vld [vmem:[#allocation4 + $0x174] sm:$0xf0] }
 0x1a5   :  { %2572 = vmatpush.bf16.msrb.mxu3 %v6151_v4  ;;  %2550 = vmatpush.bf16.msrb.mxu1 %v6531_v8  ;;  %v6439_v4 = vor.u32 %v8314_v58, %v6436_v59  ;;  %v5767_v14 = vor.u32 %v8146_v6, %v5764_v7  ;;  %v5956_v15 = vld [vmem:[#allocation4 + $0x230] sm:$0xf0] }
 0x1a6   :  { %2514 = vmatmul.bf16.vlgmr.msra.gmra.mxu2 %v9045_v26  ;;  %v8354_v16 = vld [vmem:[#allocation4 + $0x714] sm:$0xf]  ;;  %v5959_v25 = vor.u32 %v8194_v12, %v5956_v15 }
 0x1a7   :  { %2558 = vmatpush.bf16.msrb.mxu2 %v5927_v11  ;;  %2536 = vmatpush.bf16.msrb.mxu0 %v6307_v19  ;;  %v5991_v11 = vor.u32 %v8202_v0, %v5988_v1  ;;  %v6596_v8 = vld [vmem:[#allocation4 + $0x730] sm:$0xf0]  ;;  %v6186_v19 = vld [vmem:[#allocation4 + $0x3d8] sm:$0xf] }
 0x1a8   :  { %v8138_v21 = vld [vmem:[#allocation4 + $0x54] sm:$0xf]  ;;  %v6599_v27 = vor.u32 %v8354_v16, %v6596_v8  ;;  %v6187_v28 = vor.u32 %v8255_v20, %v6186_v19  ;;  %v5866_v1 = vld [vmem:[#allocation4 + $0x158] sm:$0xf] }
 0x1a9   :  { %2573 = vmatpush.bf16.msrb.mxu3 %v6119_v18  ;;  %2551 = vmatpush.bf16.msrb.mxu1 %v6499_v30  ;;  %v6407_v18 = vor.u32 %v8306_v9, %v6404_v10  ;;  %v5732_v22 = vld [vmem:[#allocation4 + $0x70] sm:$0xf0]  ;;  %v6058_v10 = vld [vmem:[#allocation4 + $0x2d8] sm:$0xf]  ;;  %v5867_v12 = vor.u32 %v8175_v2, %v5866_v1  ;;  %v8251_v1 = vld [vmem:[#allocation4 + $0x3dc] sm:$0xf] }
 0x1aa   :  { %v6372_v24 = vld [vmem:[#allocation4 + $0x570] sm:$0xf0]  ;;  %v5735_v31 = vor.u32 %v8138_v21, %v5732_v22  ;;  %v5834_v8 = vld [vmem:[#allocation4 + $0x118] sm:$0xf]  ;;  %v6188_v2 = vld [vmem:[#allocation4 + $0x3f8] sm:$0xf0] }
 0x1ab   :  { %2559 = vmatpush.bf16.msrb.mxu2 %v5895_v23  ;;  %2537 = vmatpush.bf16.msrb.mxu0 %v6275_v33  ;;  %v8298_v23 = vld [vmem:[#allocation4 + $0x554] sm:$0xf]  ;;  %v6154_v33 = vld [vmem:[#allocation4 + $0x398] sm:$0xf] }
 0x1ac   :  { %v8346_v29 = vld [vmem:[#allocation4 + $0x6d4] sm:$0xf]  ;;  %v6155_v42 = vor.u32 %v8247_v34, %v6154_v33  ;;  %v5802_v33 = vld [vmem:[#allocation4 + $0xd8] sm:$0xf] }
 0x1ad   :  { %2574 = vmatpush.bf16.msrb.mxu3 %v6087_v32  ;;  %2552 = vmatpush.bf16.msrb.mxu1 %v6467_v44  ;;  %v6564_v30 = vld [vmem:[#allocation4 + $0x6f0] sm:$0xf0]  ;;  %v6375_v32 = vor.u32 %v8298_v23, %v6372_v24  ;;  %v6026_v23 = vld [vmem:[#allocation4 + $0x298] sm:$0xf] }
 0x1ae   :  { %v8130_v35 = vld [vmem:[#allocation4 + $0x14] sm:$0xf]  ;;  %v6567_v41 = vor.u32 %v8346_v29, %v6564_v30  ;;  %v8215_v24 = vld [vmem:[#allocation4 + $0x2b4] sm:$0xf0] }
 0x1af   :  { %2560 = vmatpush.bf16.msrb.mxu2 %v5863_v37  ;;  %2538 = vmatpush.bf16.msrb.mxu0 %v6243_v49  ;;  %v5700_v36 = vld [vmem:[#allocation4 + $0x30] sm:$0xf0]  ;;  %v8239_v49 = vld [vmem:[#allocation4 + $0x374] sm:$0xf0] }
 0x1b0   :  { %2553 = vmatmul.bf16.vlgmr.msrb.gmra.mxu1 %v9050_v56  ;;  %v8290_v37 = vld [vmem:[#allocation4 + $0x514] sm:$0xf]  ;;  %v5703_v43 = vor.u32 %v8130_v35, %v5700_v36  ;;  %v6123_v55 = vor.u32 %v8239_v49, %v6122_v47  ;;  %v6666_v29 = vld [vmem:[#allocation4 + $0x798] sm:$0xf] }
 0x1b1   :  { %2575 = vmatpush.bf16.msrb.mxu3 %v6055_v45  ;;  %2597 = vmatpush.bf16.msra.mxu1 %v6695_v46  ;;  %v6340_v38 = vld [vmem:[#allocation4 + $0x530] sm:$0xf0]  ;;  %v8375_v30 = vld [vmem:[#allocation4 + $0x7b4] sm:$0xf0] }
 0x1b2   :  { %v6343_v44 = vor.u32 %v8290_v37, %v6340_v38  ;;  %v8338_v45 = vld [vmem:[#allocation4 + $0x694] sm:$0xf]  ;;  %v8159_v34 = vld [vmem:[#allocation4 + $0xf4] sm:$0xf0]  ;;  %v6027_v38 = vor.u32 %v8215_v24, %v6026_v23  ;;  %v6667_v39 = vor.u32 %v8375_v30, %v6666_v29 }
 0x1b3   :  { %2561 = vmatpush.bf16.msrb.mxu2 %v5831_v50  ;;  %2539 = vmatpush.bf16.msrb.mxu0 %v6211_v62  ;;  %v6532_v46 = vld [vmem:[#allocation4 + $0x6b0] sm:$0xf0]  ;;  %v8231_v62 = vld [vmem:[#allocation4 + $0x334] sm:$0xf0] }
 0x1b4   :  { %v8282_v50 = vld [vmem:[#allocation4 + $0x4d4] sm:$0xf]  ;;  %v6535_v54 = vor.u32 %v8338_v45, %v6532_v46  ;;  %v6442_v36 = vld [vmem:[#allocation4 + $0x5d8] sm:$0xf] }
 0x1b5   :  { %2576 = vmatpush.bf16.msrb.mxu3 %v6023_v60  ;;  %2598 = vmatpush.bf16.msra.mxu1 %v6663_v61  ;;  %v6308_v51 = vld [vmem:[#allocation4 + $0x4f0] sm:$0xf0]  ;;  %v6090_v60 = vld [vmem:[#allocation4 + $0x318] sm:$0xf]  ;;  %v5899_v61 = vor.u32 %v8183_v53, %v5898_v52 }
 0x1b6   :  { %2540 = vmatmul.bf16.vlgmr.msrb.gmra.mxu0 %v9054_v17  ;;  %v6311_v57 = vor.u32 %v8282_v50, %v6308_v51  ;;  %v8330_v58 = vld [vmem:[#allocation4 + $0x654] sm:$0xf]  ;;  %v6091_v6 = vor.u32 %v8231_v62, %v6090_v60  ;;  %v8319_v37 = vld [vmem:[#allocation4 + $0x5f4] sm:$0xf0] }
 0x1b7   :  { %2562 = vmatpush.bf16.msrb.mxu2 %v5799_v63  ;;  %2584 = vmatpush.bf16.msra.mxu0 %v6439_v4  ;;  %v6500_v59 = vld [vmem:[#allocation4 + $0x670] sm:$0xf0]  ;;  %v6443_v46 = vor.u32 %v8319_v37, %v6442_v36  ;;  %v8367_v47 = vld [vmem:[#allocation4 + $0x774] sm:$0xf0]  ;;  %v8235_v37 = vld [vmem:[#allocation4 + $0x35c] sm:$0xf] }
 0x1b8   :  { %v8274_v63 = vld [vmem:[#allocation4 + $0x494] sm:$0xf]  ;;  %v6503_v4 = vor.u32 %v8330_v58, %v6500_v59  ;;  %v8151_v49 = vld [vmem:[#allocation4 + $0xb4] sm:$0xf0] }
 0x1b9   :  { %2577 = vmatpush.bf16.msrb.mxu3 %v5991_v11  ;;  %2599 = vmatpush.bf16.msra.mxu1 %v6631_v13  ;;  %v6276_v0 = vld [vmem:[#allocation4 + $0x4b0] sm:$0xf0]  ;;  %v8223_v11 = vld [vmem:[#allocation4 + $0x2f4] sm:$0xf0] }
 0x1ba   :  { %v8322_v5 = vld [vmem:[#allocation4 + $0x614] sm:$0xf]  ;;  %v6279_v7 = vor.u32 %v8274_v63, %v6276_v0  ;;  %v6698_v13 = vld [vmem:[#allocation4 + $0x7d8] sm:$0xf]  ;;  %v6059_v21 = vor.u32 %v8223_v11, %v6058_v10  ;;  %v6191_v11 = vor.u32 %v8251_v1, %v6188_v2 }
 0x1bb   :  { %2563 = vmatpush.bf16.msrb.mxu2 %v5767_v14  ;;  %2585 = vmatpush.bf16.msra.mxu0 %v6407_v18  ;;  %v6468_v9 = vld [vmem:[#allocation4 + $0x630] sm:$0xf0]  ;;  %v8383_v14 = vld [vmem:[#allocation4 + $0x7f4] sm:$0xf0] }
 0x1bc   :  { %v8266_v15 = vld [vmem:[#allocation4 + $0x454] sm:$0xf]  ;;  %v8167_v18 = vld [vmem:[#allocation4 + $0x134] sm:$0xf0]  ;;  %v6471_v19 = vor.u32 %v8322_v5, %v6468_v9  ;;  %v6699_v22 = vor.u32 %v8383_v14, %v6698_v13 }
 0x1bd   :  { %2578 = vmatpush.bf16.msrb.mxu3 %v5959_v25  ;;  %2600 = vmatpush.bf16.msra.mxu1 %v6599_v27  ;;  %v6244_v16 = vld [vmem:[#allocation4 + $0x470] sm:$0xf0]  ;;  %v9077_v25 = vld [vmem:[%s9311_s6] sm:$0xff]  ;;  %v6410_v51 = vld [vmem:[#allocation4 + $0x598] sm:$0xf] }
 0x1be   :  { %v6247_v27 = vor.u32 %v8266_v15, %v6244_v16  ;;  %v1002_v35 = vperm.slane %v9077_v25, 0  ;;  %v8311_v52 = vld [vmem:[#allocation4 + $0x5b4] sm:$0xf0] }
 0x1bf   :  { %2564 = vmatpush.bf16.msrb.mxu2 %v5735_v31  ;;  %2586 = vmatpush.bf16.msra.mxu0 %v6375_v32  ;;  %v8258_v31 = vld [vmem:[#allocation4 + $0x414] sm:$0xf]  ;;  %v8199_v59 = vld [vmem:[#allocation4 + $0x234] sm:$0xf0]  ;;  %v6411_v0 = vor.u32 %v8311_v52, %v6410_v51  ;;  %v8227_v51 = vld [vmem:[#allocation4 + $0x31c] sm:$0xf] }
 0x1c0   :  { %2579 = vmatmul.bf16.vlgmr.msrb.gmra.mxu3 %v9042_v3  ;;  %v6212_v32 = vld [vmem:[#allocation4 + $0x430] sm:$0xf0]  ;;  %v6602_v60 = vld [vmem:[#allocation4 + $0x718] sm:$0xf] }
 0x1c1   :  { %2623 = vmatpush.bf16.msra.mxu3 %v6187_v28  ;;  %2601 = vmatpush.bf16.msra.mxu1 %v6567_v41  ;;  %v5835_v28 = vor.u32 %v8167_v18, %v5834_v8  ;;  %v6215_v40 = vor.u32 %v8258_v31, %v6212_v32  ;;  %v5803_v41 = vor.u32 %v8159_v34, %v5802_v33  ;;  %v8143_v5 = vld [vmem:[#allocation4 + $0x74] sm:$0xf0]  ;;  %v8243_v8 = vld [vmem:[#allocation4 + $0x39c] sm:$0xf] }
 0x1c2   :  { %v8351_v13 = vld [vmem:[#allocation4 + $0x6f4] sm:$0xf0]  ;;  %v6156_v18 = vld [vmem:[#allocation4 + $0x3b8] sm:$0xf0] }
 0x1c3   :  { %2565 = vmatpush.bf16.msrb.mxu2 %v5703_v43  ;;  %2587 = vmatpush.bf16.msra.mxu0 %v6343_v44  ;;  %v2320_v20 = vpop.f32.mrf.mxu3  ;;  %v8207_v43 = vld [vmem:[#allocation4 + $0x274] sm:$0xf0]  ;;  %v6159_v31 = vor.u32 %v8243_v8, %v6156_v18  ;;  %v8211_v18 = vld [vmem:[#allocation4 + $0x29c] sm:$0xf] }
 0x1c4   :  { %v6634_v44 = vld [vmem:[#allocation4 + $0x758] sm:$0xf] }
 0x1c5   :  { %2624 = vmatpush.bf16.msra.mxu3 %v6155_v42  ;;  %2602 = vmatpush.bf16.msra.mxu1 %v6535_v54  ;;  %v5994_v42 = vld [vmem:[#allocation4 + $0x258] sm:$0xf] }
 0x1c6   :  { %2566 = vmatmul.bf16.vlgmr.msrb.gmra.mxu2 %v9045_v26  ;;  %v5995_v54 = vor.u32 %v8207_v43, %v5994_v42  ;;  %v8343_v36 = vld [vmem:[#allocation4 + $0x6b4] sm:$0xf0]  ;;  %v8179_v43 = vld [vmem:[#allocation4 + $0x19c] sm:$0xf] }
 0x1c7   :  { %2610 = vmatpush.bf16.msra.mxu2 %v5931_v48  ;;  %2588 = vmatpush.bf16.msra.mxu0 %v6311_v57  ;;  %v5770_v48 = vld [vmem:[#allocation4 + $0x98] sm:$0xf]  ;;  %v6635_v57 = vor.u32 %v8367_v47, %v6634_v44  ;;  %v5900_v44 = vld [vmem:[#allocation4 + $0x1b8] sm:$0xf0] }
 0x1c8   :  { %v5771_v58 = vor.u32 %v8151_v49, %v5770_v48  ;;  %v8287_v42 = vld [vmem:[#allocation4 + $0x4f4] sm:$0xf0]  ;;  %v5903_v52 = vor.u32 %v8179_v43, %v5900_v44  ;;  %v8363_v43 = vld [vmem:[#allocation4 + $0x75c] sm:$0xf] }
 0x1c9   :  { %2625 = vmatpush.bf16.msra.mxu3 %v6123_v55  ;;  %2603 = vmatpush.bf16.msra.mxu1 %v6503_v4  ;;  %v2307_v45 = vpop.f32.mrf.mxu2  ;;  %v5962_v55 = vld [vmem:[#allocation4 + $0x218] sm:$0xf] }
 0x1ca   :  { %v2308_v50 = vadd.f32 %v2307_v45, %v1002_v35  ;;  %v5738_v4 = vld [vmem:[#allocation4 + $0x58] sm:$0xf]  ;;  %v5963_v9 = vor.u32 %v8199_v59, %v5962_v55  ;;  %v8171_v59 = vld [vmem:[#allocation4 + $0x15c] sm:$0xf] }
 0x1cb   :  { %2611 = vmatpush.bf16.msra.mxu2 %v5899_v61  ;;  %2589 = vmatpush.bf16.msra.mxu0 %v6279_v7  ;;  %v2322_v53 = vpop.f32.mrf.mxu3  ;;  %v8359_v61 = vld [vmem:[#allocation4 + $0x734] sm:$0xf0]  ;;  %v5739_v15 = vor.u32 %v8143_v5, %v5738_v4  ;;  %v8219_v4 = vld [vmem:[#allocation4 + $0x2dc] sm:$0xf] }
 0x1cc   :  { %v2321_v62 = vadd.f32 %v2320_v20, %v2308_v50  ;;  %v8303_v7 = vld [vmem:[#allocation4 + $0x574] sm:$0xf0]  ;;  %v6603_v10 = vor.u32 %v8359_v61, %v6602_v60  ;;  %v6092_v53 = vld [vmem:[#allocation4 + $0x338] sm:$0xf0] }
 0x1cd   :  { %2626 = vmatpush.bf16.msra.mxu3 %v6091_v6  ;;  %2604 = vmatpush.bf16.msra.mxu1 %v6471_v19  ;;  %v2346_v63 = vpop.f32.mrf.mxu1  ;;  %v6378_v6 = vld [vmem:[#allocation4 + $0x558] sm:$0xf]  ;;  %v5868_v60 = vld [vmem:[#allocation4 + $0x178] sm:$0xf0] }
 0x1ce   :  { %v6379_v16 = vor.u32 %v8303_v7, %v6378_v6  ;;  %v5706_v19 = vld [vmem:[#allocation4 + $0x18] sm:$0xf]  ;;  %v6060_v5 = vld [vmem:[#allocation4 + $0x2f8] sm:$0xf0]  ;;  %v5871_v6 = vor.u32 %v8171_v59, %v5868_v60 }
 0x1cf   :  { %2612 = vmatpush.bf16.msra.mxu2 %v5867_v12  ;;  %2590 = vmatpush.bf16.msra.mxu0 %v6247_v27  ;;  %v6570_v12 = vld [vmem:[#allocation4 + $0x6d8] sm:$0xf]  ;;  %v8187_v27 = vld [vmem:[#allocation4 + $0x1dc] sm:$0xf] }
 0x1d0   :  { %2605 = vmatmul.bf16.vlgmr.msra.gmra.mxu1 %v9050_v56  ;;  %v8135_v20 = vld [vmem:[#allocation4 + $0x34] sm:$0xf0]  ;;  %v6571_v30 = vor.u32 %v8351_v13, %v6570_v12  ;;  %v8379_v7 = vld [vmem:[#allocation4 + $0x7dc] sm:$0xf] }
 0x1d1   :  { %2627 = vmatpush.bf16.msra.mxu3 %v6059_v21  ;;  %2649 = vmatpush.bf16.msrb.mxu1 %v6699_v22  ;;  %v2309_v14 = vpop.f32.mrf.mxu2  ;;  %v6346_v21 = vld [vmem:[#allocation4 + $0x518] sm:$0xf]  ;;  %v5707_v33 = vor.u32 %v8135_v20, %v5706_v19  ;;  %v8163_v12 = vld [vmem:[#allocation4 + $0x11c] sm:$0xf] }
 0x1d2   :  { %v8295_v22 = vld [vmem:[#allocation4 + $0x534] sm:$0xf0]  ;;  %v5836_v13 = vld [vmem:[#allocation4 + $0x138] sm:$0xf0] }
 0x1d3   :  { %2613 = vmatpush.bf16.msra.mxu2 %v5835_v28  ;;  %2591 = vmatpush.bf16.msra.mxu0 %v6215_v40  ;;  %v2333_v23 = vpop.f32.mrf.mxu0  ;;  %v9082_v24 = vpop.f32.mrf.mxu3  ;;  %v5932_v28 = vld [vmem:[#allocation4 + $0x1f8] sm:$0xf0]  ;;  %v6347_v34 = vor.u32 %v8295_v22, %v6346_v21  ;;  %v6538_v35 = vld [vmem:[#allocation4 + $0x698] sm:$0xf]  ;;  %v5839_v21 = vor.u32 %v8163_v12, %v5836_v13 }
 0x1d4   :  { %v2334_v29 = vadd.f32 %v2333_v23, %v2321_v62  ;;  %v6124_v40 = vld [vmem:[#allocation4 + $0x378] sm:$0xf0]  ;;  %v6539_v45 = vor.u32 %v8343_v36, %v6538_v35  ;;  %v6506_v49 = vld [vmem:[#allocation4 + $0x658] sm:$0xf] }
 0x1d5   :  { %2628 = vmatpush.bf16.msra.mxu3 %v6027_v38  ;;  %2650 = vmatpush.bf16.msrb.mxu1 %v6667_v39  ;;  %v2348_v32 = vpop.f32.mrf.mxu1  ;;  %v5935_v39 = vor.u32 %v8187_v27, %v5932_v28  ;;  %v6127_v47 = vor.u32 %v8235_v37, %v6124_v40  ;;  %v8335_v50 = vld [vmem:[#allocation4 + $0x674] sm:$0xf0]  ;;  %v6028_v19 = vld [vmem:[#allocation4 + $0x2b8] sm:$0xf0] }
 0x1d6   :  { %2592 = vmatmul.bf16.vlgmr.msra.gmra.mxu0 %v9054_v17  ;;  %v9084_v38 = vadd.f32 %v2346_v63, %v2334_v29  ;;  %v8279_v55 = vld [vmem:[#allocation4 + $0x4b4] sm:$0xf0]  ;;  %v6507_v61 = vor.u32 %v8335_v50, %v6506_v49  ;;  %v8371_v22 = vld [vmem:[#allocation4 + $0x79c] sm:$0xf]  ;;  %v6031_v36 = vor.u32 %v8211_v18, %v6028_v19 }
 0x1d7   :  { %2614 = vmatpush.bf16.msra.mxu2 %v5803_v41  ;;  %2636 = vmatpush.bf16.msrb.mxu0 %v6443_v46  ;;  %v6314_v41 = vld [vmem:[#allocation4 + $0x4d8] sm:$0xf]  ;;  %v6668_v23 = vld [vmem:[#allocation4 + $0x7b8] sm:$0xf0] }
 0x1d8   :  { %v6315_v48 = vor.u32 %v8287_v42, %v6314_v41  ;;  %v6474_v62 = vld [vmem:[#allocation4 + $0x618] sm:$0xf]  ;;  %v5804_v32 = vld [vmem:[#allocation4 + $0xf8] sm:$0xf0]  ;;  %v6671_v37 = vor.u32 %v8371_v22, %v6668_v23  ;;  %v6818_v22 = vld [vmem:[#allocation6 + $0xe0] sm:$0xf] }
 0x1d9   :  { %2629 = vmatpush.bf16.msra.mxu3 %v5995_v54  ;;  %2651 = vmatpush.bf16.msrb.mxu1 %v6635_v57  ;;  %v9087_v46 = vpop.f32.mrf.mxu2  ;;  %v6282_v54 = vld [vmem:[#allocation4 + $0x498] sm:$0xf]  ;;  %v8203_v41 = vld [vmem:[#allocation4 + $0x25c] sm:$0xf]  ;;  %v8414_v23 = vld [vmem:[#allocation6 + $0xec] sm:$0xf0] }
 0x1da   :  { %v6283_v1 = vor.u32 %v8279_v55, %v6282_v54  ;;  %v8327_v2 = vld [vmem:[#allocation4 + $0x634] sm:$0xf0]  ;;  %v5996_v42 = vld [vmem:[#allocation4 + $0x278] sm:$0xf0] }
 0x1db   :  { %2615 = vmatpush.bf16.msra.mxu2 %v5771_v58  ;;  %2637 = vmatpush.bf16.msrb.mxu0 %v6411_v0  ;;  %v2335_v57 = vpop.f32.mrf.mxu0  ;;  %v2374_v58 = vpop.f32.mrf.mxu3  ;;  %v6095_v0 = vor.u32 %v8227_v51, %v6092_v53  ;;  %v6475_v14 = vor.u32 %v8327_v2, %v6474_v62  ;;  %v6218_v27 = vld [vmem:[#allocation4 + $0x418] sm:$0xf]  ;;  %v8307_v49 = vld [vmem:[#allocation4 + $0x59c] sm:$0xf]  ;;  %v5999_v51 = vor.u32 %v8203_v41, %v5996_v42 }
 0x1dc   :  { %v6412_v50 = vld [vmem:[#allocation4 + $0x5b8] sm:$0xf0] }
 0x1dd   :  { %2630 = vmatpush.bf16.msra.mxu3 %v5963_v9  ;;  %2652 = vmatpush.bf16.msrb.mxu1 %v6603_v10  ;;  %v9090_v63 = vpop.f32.mrf.mxu1  ;;  %v6700_v9 = vld [vmem:[#allocation4 + $0x7f8] sm:$0xf0]  ;;  %v6250_v10 = vld [vmem:[#allocation4 + $0x458] sm:$0xf]  ;;  %v6415_v62 = vor.u32 %v8307_v49, %v6412_v50 }
 0x1de   :  { %v6703_v8 = vor.u32 %v8379_v7, %v6700_v9  ;;  %v5964_v57 = vld [vmem:[#allocation4 + $0x238] sm:$0xf0] }
 0x1df   :  { %2616 = vmatpush.bf16.msra.mxu2 %v5739_v15  ;;  %2638 = vmatpush.bf16.msrb.mxu0 %v6379_v16  ;;  %v6063_v16 = vor.u32 %v8219_v4, %v6060_v5  ;;  %v8355_v58 = vld [vmem:[#allocation4 + $0x71c] sm:$0xf] }
 0x1e0   :  { %2631 = vmatmul.bf16.vlgmr.msra.gmra.mxu3 %v9042_v3  ;;  %v6604_v59 = vld [vmem:[#allocation4 + $0x738] sm:$0xf0] }
 0x1e1   :  { %2675 = vmatpush.bf16.msrb.mxu3 %v6191_v11  ;;  %2653 = vmatpush.bf16.msrb.mxu1 %v6571_v30  ;;  %v8271_v11 = vld [vmem:[#allocation4 + $0x474] sm:$0xf0]  ;;  %v2361_v15 = vpop.f32.mrf.mxu2  ;;  %v8139_v2 = vld [vmem:[#allocation4 + $0x5c] sm:$0xf] }
 0x1e2   :  { %v6251_v20 = vor.u32 %v8271_v11, %v6250_v10  ;;  %v8263_v30 = vld [vmem:[#allocation4 + $0x434] sm:$0xf0]  ;;  %v5740_v4 = vld [vmem:[#allocation4 + $0x78] sm:$0xf0]  ;;  %v6607_v10 = vor.u32 %v8355_v58, %v6604_v59  ;;  %v6786_v58 = vld [vmem:[#allocation6 + $0xa0] sm:$0xf] }
 0x1e3   :  { %2617 = vmatpush.bf16.msra.mxu2 %v5707_v33  ;;  %2639 = vmatpush.bf16.msrb.mxu0 %v6347_v34  ;;  %v9092_v28 = vpop.f32.mrf.mxu0  ;;  %v9094_v29 = vpop.f32.mrf.mxu3  ;;  %v8315_v33 = vld [vmem:[#allocation4 + $0x5dc] sm:$0xf]  ;;  %v8406_v59 = vld [vmem:[#allocation6 + $0xac] sm:$0xf0] }
 0x1e4   :  { %v6444_v34 = vld [vmem:[#allocation4 + $0x5f8] sm:$0xf0] }
 0x1e5   :  { %2676 = vmatpush.bf16.msrb.mxu3 %v6159_v31  ;;  %2654 = vmatpush.bf16.msrb.mxu1 %v6539_v45  ;;  %v8155_v31 = vld [vmem:[#allocation4 + $0xdc] sm:$0xf]  ;;  %v2400_v35 = vpop.f32.mrf.mxu1  ;;  %v6447_v44 = vor.u32 %v8315_v33, %v6444_v34 }
 0x1e6   :  { %2618 = vmatmul.bf16.vlgmr.msra.gmra.mxu2 %v9045_v26  ;;  %v5807_v40 = vor.u32 %v8155_v31, %v5804_v32  ;;  %v6636_v45 = vld [vmem:[#allocation4 + $0x778] sm:$0xf0] }
 0x1e7   :  { %2662 = vmatpush.bf16.msrb.mxu2 %v5935_v39  ;;  %2640 = vmatpush.bf16.msrb.mxu0 %v6315_v48  ;;  %v6219_v39 = vor.u32 %v8263_v30, %v6218_v27  ;;  %v5772_v48 = vld [vmem:[#allocation4 + $0xb8] sm:$0xf0]  ;;  %v6639_v54 = vor.u32 %v8363_v43, %v6636_v45  ;;  %v8410_v45 = vld [vmem:[#allocation6 + $0xcc] sm:$0xf0] }
 0x1e8   :  { %v8299_v5 = vld [vmem:[#allocation4 + $0x55c] sm:$0xf] }
 0x1e9   :  { %2677 = vmatpush.bf16.msrb.mxu3 %v6127_v47  ;;  %2655 = vmatpush.bf16.msrb.mxu1 %v6507_v61  ;;  %v8147_v47 = vld [vmem:[#allocation4 + $0x9c] sm:$0xf]  ;;  %v9097_v53 = vpop.f32.mrf.mxu2 }
 0x1ea   :  { %v5775_v55 = vor.u32 %v8147_v47, %v5772_v48  ;;  %v8347_v12 = vld [vmem:[#allocation4 + $0x6dc] sm:$0xf] }
 0x1eb   :  { %2663 = vmatpush.bf16.msrb.mxu2 %v5903_v52  ;;  %2641 = vmatpush.bf16.msrb.mxu0 %v6283_v1  ;;  %v8195_v52 = vld [vmem:[#allocation4 + $0x21c] sm:$0xf]  ;;  %v2387_v60 = vpop.f32.mrf.mxu0  ;;  %v2426_v61 = vpop.f32.mrf.mxu3  ;;  %v8446_v1 = vld [vmem:[#allocation6 + $0x1ec] sm:$0xf0] }
 0x1ec   :  { %v5967_v9 = vor.u32 %v8195_v52, %v5964_v57  ;;  %v6572_v13 = vld [vmem:[#allocation4 + $0x6f8] sm:$0xf0]  ;;  %v6898_v52 = vld [vmem:[#allocation6 + $0x180] sm:$0xf]  ;;  %v1003_v60 = vperm.slane %v9077_v25, 1 }
 0x1ed   :  { %2678 = vmatpush.bf16.msrb.mxu3 %v6095_v0  ;;  %2656 = vmatpush.bf16.msrb.mxu1 %v6475_v14  ;;  %v6946_v0 = vld [vmem:[#allocation6 + $0x1e0] sm:$0xf]  ;;  %v9100_v7 = vpop.f32.mrf.mxu1  ;;  %v5743_v14 = vor.u32 %v8139_v2, %v5740_v4  ;;  %v8131_v18 = vld [vmem:[#allocation4 + $0x1c] sm:$0xf]  ;;  %v6575_v30 = vor.u32 %v8347_v12, %v6572_v13 }
 0x1ee   :  { %v6947_v11 = vor.u32 %v8446_v1, %v6946_v0  ;;  %v5708_v19 = vld [vmem:[#allocation4 + $0x38] sm:$0xf0]  ;;  %v6882_v4 = vld [vmem:[#allocation6 + $0x160] sm:$0xf] }
 0x1ef   :  { %2664 = vmatpush.bf16.msrb.mxu2 %v5871_v6  ;;  %2642 = vmatpush.bf16.msrb.mxu0 %v6251_v20  ;;  %v6380_v6 = vld [vmem:[#allocation4 + $0x578] sm:$0xf0]  ;;  %v5711_v32 = vor.u32 %v8131_v18, %v5708_v19  ;;  %v6866_v19 = vld [vmem:[#allocation6 + $0x140] sm:$0xf] }
 0x1f0   :  { %2657 = vmatmul.bf16.vlgmr.msrb.gmra.mxu1 %v9050_v56  ;;  %v6383_v15 = vor.u32 %v8299_v5, %v6380_v6  ;;  %v8291_v20 = vld [vmem:[#allocation4 + $0x51c] sm:$0xf]  ;;  %v8430_v5 = vld [vmem:[#allocation6 + $0x16c] sm:$0xf0] }
 0x1f1   :  { %2679 = vmatpush.bf16.msrb.mxu3 %v6063_v16  ;;  %2701 = vmatpush.bf16.msra.mxu1 %v6703_v8  ;;  %v6930_v16 = vld [vmem:[#allocation6 + $0x1c0] sm:$0xf]  ;;  %v8442_v8 = vld [vmem:[#allocation6 + $0x1cc] sm:$0xf0]  ;;  %v2413_v27 = vpop.f32.mrf.mxu2  ;;  %v8339_v34 = vld [vmem:[#allocation4 + $0x69c] sm:$0xf] }
 0x1f2   :  { %v6931_v31 = vor.u32 %v8442_v8, %v6930_v16  ;;  %v6540_v35 = vld [vmem:[#allocation4 + $0x6b8] sm:$0xf0]  ;;  %v6883_v8 = vor.u32 %v8430_v5, %v6882_v4  ;;  %v7186_v27 = vld [vmem:[#allocation6 + $0x3c0] sm:$0xf]  ;;  %v8470_v5 = vld [vmem:[#allocation6 + $0x2ac] sm:$0xf0] }
 0x1f3   :  { %2665 = vmatpush.bf16.msrb.mxu2 %v5839_v21  ;;  %2643 = vmatpush.bf16.msrb.mxu0 %v6219_v39  ;;  %v6348_v21 = vld [vmem:[#allocation4 + $0x538] sm:$0xf0]  ;;  %v6819_v39 = vor.u32 %v8414_v23, %v6818_v22  ;;  %v6543_v47 = vor.u32 %v8339_v34, %v6540_v35  ;;  %v8398_v34 = vld [vmem:[#allocation6 + $0x6c] sm:$0xf0]  ;;  %v7074_v35 = vld [vmem:[#allocation6 + $0x2e0] sm:$0xf] }
 0x1f4   :  { %v6351_v33 = vor.u32 %v8291_v20, %v6348_v21  ;;  %v8283_v41 = vld [vmem:[#allocation4 + $0x4dc] sm:$0xf]  ;;  %v8426_v20 = vld [vmem:[#allocation6 + $0x14c] sm:$0xf0] }
 0x1f5   :  { %2680 = vmatpush.bf16.msrb.mxu3 %v6031_v36  ;;  %2702 = vmatpush.bf16.msra.mxu1 %v6671_v37  ;;  %v6914_v36 = vld [vmem:[#allocation6 + $0x1a0] sm:$0xf]  ;;  %v9103_v37 = vpop.f32.mrf.mxu0  ;;  %v6316_v42 = vld [vmem:[#allocation4 + $0x4f8] sm:$0xf0]  ;;  %v2452_v43 = vpop.f32.mrf.mxu1 }
 0x1f6   :  { %2644 = vmatmul.bf16.vlgmr.msrb.gmra.mxu0 %v9054_v17  ;;  %v6319_v49 = vor.u32 %v8283_v41, %v6316_v42  ;;  %v8331_v50 = vld [vmem:[#allocation4 + $0x65c] sm:$0xf] }
 0x1f7   :  { %2666 = vmatpush.bf16.msrb.mxu2 %v5807_v40  ;;  %2688 = vmatpush.bf16.msra.mxu0 %v6447_v44  ;;  %v8438_v40 = vld [vmem:[#allocation6 + $0x1ac] sm:$0xf0]  ;;  %v6802_v44 = vld [vmem:[#allocation6 + $0xc0] sm:$0xf]  ;;  %v6284_v57 = vld [vmem:[#allocation4 + $0x4b8] sm:$0xf0] }
 0x1f8   :  { %v6915_v48 = vor.u32 %v8438_v40, %v6914_v36  ;;  %v6476_v2 = vld [vmem:[#allocation4 + $0x638] sm:$0xf0]  ;;  %v8478_v36 = vld [vmem:[#allocation6 + $0x2ec] sm:$0xf0] }
 0x1f9   :  { %2681 = vmatpush.bf16.msrb.mxu3 %v5999_v51  ;;  %2703 = vmatpush.bf16.msra.mxu1 %v6639_v54  ;;  %v6508_v51 = vld [vmem:[#allocation4 + $0x678] sm:$0xf0]  ;;  %v8434_v54 = vld [vmem:[#allocation6 + $0x18c] sm:$0xf0] }
 0x1fa   :  { %v6511_v61 = vor.u32 %v8331_v50, %v6508_v51  ;;  %v6899_v0 = vor.u32 %v8434_v54, %v6898_v52  ;;  %v8267_v12 = vld [vmem:[#allocation4 + $0x45c] sm:$0xf]  ;;  %v8394_v50 = vld [vmem:[#allocation6 + $0x4c] sm:$0xf0]  ;;  %v7058_v52 = vld [vmem:[#allocation6 + $0x2c0] sm:$0xf] }
 0x1fb   :  { %2667 = vmatpush.bf16.msrb.mxu2 %v5775_v55  ;;  %2689 = vmatpush.bf16.msra.mxu0 %v6415_v62  ;;  %v8275_v55 = vld [vmem:[#allocation4 + $0x49c] sm:$0xf] }
 0x1fc   :  { %v8323_v62 = vld [vmem:[#allocation4 + $0x61c] sm:$0xf]  ;;  %v6287_v1 = vor.u32 %v8275_v55, %v6284_v57 }
 0x1fd   :  { %2682 = vmatpush.bf16.msrb.mxu3 %v5967_v9  ;;  %2704 = vmatpush.bf16.msra.mxu1 %v6607_v10  ;;  %v2439_v6 = vpop.f32.mrf.mxu0  ;;  %v6787_v9 = vor.u32 %v8406_v59, %v6786_v58  ;;  %v7202_v10 = vld [vmem:[#allocation6 + $0x3e0] sm:$0xf]  ;;  %v6252_v13 = vld [vmem:[#allocation4 + $0x478] sm:$0xf0]  ;;  %v6479_v16 = vor.u32 %v8323_v62, %v6476_v2 }
 0x1fe   :  { %v6255_v22 = vor.u32 %v8267_v12, %v6252_v13  ;;  %v7042_v2 = vld [vmem:[#allocation6 + $0x2a0] sm:$0xf]  ;;  %v1004_v12 = vperm.slane %v9077_v25, 2 }
 0x1ff   :  { %2668 = vmatpush.bf16.msrb.mxu2 %v5743_v14  ;;  %2690 = vmatpush.bf16.msra.mxu0 %v6383_v15  ;;  %v6770_v14 = vld [vmem:[#allocation6 + $0x80] sm:$0xf]  ;;  %v8402_v15 = vld [vmem:[#allocation6 + $0x8c] sm:$0xf0] }
 0x200   :  { %2683 = vmatmul.bf16.vlgmr.msrb.gmra.mxu3 %v9042_v3  ;;  %v6803_v3 = vor.u32 %v8410_v45, %v6802_v44  ;;  %v6771_v23 = vor.u32 %v8402_v15, %v6770_v14  ;;  %v6850_v44 = vld [vmem:[#allocation6 + $0x120] sm:$0xf]  ;;  %v8422_v45 = vld [vmem:[#allocation6 + $0x12c] sm:$0xf0] }
 0x201   :  { %4289 = vmatpush.bf16.msra.mxu3 %v6947_v11  ;;  %2705 = vmatpush.bf16.msra.mxu1 %v6575_v30  ;;  %v8510_v11 = vld [vmem:[#allocation6 + $0x3ec] sm:$0xf0]  ;;  %v6851_v54 = vor.u32 %v8422_v45, %v6850_v44  ;;  %v7458_v6 = vld [vmem:[#allocation6 + $0x5e0] sm:$0xf]  ;;  %v2412_v44 = vadd.f32 %v9097_v53, %v1004_v12 }
 0x202   :  { %v7203_v18 = vor.u32 %v8510_v11, %v7202_v10  ;;  %v8506_v30 = vld [vmem:[#allocation6 + $0x3cc] sm:$0xf0]  ;;  %v7138_v15 = vld [vmem:[#allocation6 + $0x360] sm:$0xf] }
 0x203   :  { %2669 = vmatpush.bf16.msrb.mxu2 %v5711_v32  ;;  %2691 = vmatpush.bf16.msra.mxu0 %v6351_v33  ;;  %v9108_v21 = vpop.f32.mrf.mxu3  ;;  %v6220_v32 = vld [vmem:[#allocation4 + $0x438] sm:$0xf0]  ;;  %v6754_v33 = vld [vmem:[#allocation6 + $0x60] sm:$0xf]  ;;  %v7187_v40 = vor.u32 %v8506_v30, %v7186_v27  ;;  %v8542_v27 = vld [vmem:[#allocation6 + $0x4ec] sm:$0xf0] }
 0x204   :  { %v6755_v43 = vor.u32 %v8398_v34, %v6754_v33  ;;  %v2714_v33 = vmax.f32 %v9084_v38, 0.0  ;;  %v8462_v38 = vld [vmem:[#allocation6 + $0x26c] sm:$0xf0] }
 0x205   :  { %4290 = vmatpush.bf16.msra.mxu3 %v6931_v31  ;;  %2706 = vmatpush.bf16.msra.mxu1 %v6543_v47  ;;  %v8259_v31 = vld [vmem:[#allocation4 + $0x41c] sm:$0xf]  ;;  %v7170_v47 = vld [vmem:[#allocation6 + $0x3a0] sm:$0xf]  ;;  %v8454_v12 = vld [vmem:[#allocation6 + $0x22c] sm:$0xf0] }
 0x206   :  { %2670 = vmatmul.bf16.vlgmr.msrb.gmra.mxu2 %v9045_v26  ;;  %v2360_v26 = vadd.f32 %v9087_v46, %v1003_v60  ;;  %v6223_v42 = vor.u32 %v8259_v31, %v6220_v32  ;;  %v8418_v60 = vld [vmem:[#allocation6 + $0x10c] sm:$0xf0]  ;;  %v7442_v31 = vld [vmem:[#allocation6 + $0x5c0] sm:$0xf] }
 0x207   :  { %4276 = vmatpush.bf16.msra.mxu2 %v6819_v39  ;;  %2692 = vmatpush.bf16.msra.mxu0 %v6319_v49  ;;  %v6867_v39 = vor.u32 %v8426_v20, %v6866_v19  ;;  %v6738_v49 = vld [vmem:[#allocation6 + $0x40] sm:$0xf]  ;;  %v8570_v32 = vld [vmem:[#allocation6 + $0x5cc] sm:$0xf0] }
 0x208   :  { %v2373_v46 = vadd.f32 %v9082_v24, %v2360_v26  ;;  %v8502_v24 = vld [vmem:[#allocation6 + $0x3ac] sm:$0xf0]  ;;  %v6739_v59 = vor.u32 %v8394_v50, %v6738_v49  ;;  %v7026_v19 = vld [vmem:[#allocation6 + $0x280] sm:$0xf] }
 0x209   :  { %4291 = vmatpush.bf16.msra.mxu3 %v6915_v48  ;;  %2707 = vmatpush.bf16.msra.mxu1 %v6511_v61  ;;  %v7075_v48 = vor.u32 %v8478_v36, %v7074_v35  ;;  %v2463_v51 = vpop.f32.mrf.mxu2  ;;  %v7171_v57 = vor.u32 %v8502_v24, %v7170_v47  ;;  %v8498_v61 = vld [vmem:[#allocation6 + $0x38c] sm:$0xf0]  ;;  %v7314_v47 = vld [vmem:[#allocation6 + $0x4c0] sm:$0xf]  ;;  %v7443_v24 = vor.u32 %v8570_v32, %v7442_v31 }
 0x20a   :  { %v2386_v41 = vadd.f32 %v9092_v28, %v2373_v46  ;;  %v6834_v28 = vld [vmem:[#allocation6 + $0x100] sm:$0xf]  ;;  %v8494_v26 = vld [vmem:[#allocation6 + $0x36c] sm:$0xf0] }
 0x20b   :  { %4277 = vmatpush.bf16.msra.mxu2 %v6803_v3  ;;  %2693 = vmatpush.bf16.msra.mxu0 %v6287_v1  ;;  %v8474_v3 = vld [vmem:[#allocation6 + $0x2cc] sm:$0xf0]  ;;  %v2478_v58 = vpop.f32.mrf.mxu3  ;;  %v6835_v10 = vor.u32 %v8418_v60, %v6834_v28  ;;  %v7139_v46 = vor.u32 %v8494_v26, %v7138_v15  ;;  %v7426_v50 = vld [vmem:[#allocation6 + $0x5a0] sm:$0xf] }
 0x20c   :  { %v2399_v55 = vadd.f32 %v9090_v63, %v2386_v41  ;;  %v7059_v62 = vor.u32 %v8474_v3, %v7058_v52  ;;  %v8390_v1 = vld [vmem:[#allocation6 + $0x2c] sm:$0xf0]  ;;  %v1005_v63 = vperm.slane %v9077_v25, 3  ;;  %v7122_v41 = vld [vmem:[#allocation6 + $0x340] sm:$0xf]  ;;  %v9125_v52 = vpack.c.bf16 %v2714_v33, %v2714_v33 }
 0x20d   :  { %4292 = vmatpush.bf16.msra.mxu3 %v6899_v0  ;;  %2708 = vmatpush.bf16.msra.mxu1 %v6479_v16  ;;  %v6722_v0 = vld [vmem:[#allocation6 + $0x20] sm:$0xf]  ;;  %v9114_v4 = vpop.f32.mrf.mxu1  ;;  %v7043_v16 = vor.u32 %v8470_v5, %v7042_v2  ;;  %v8458_v60 = vld [vmem:[#allocation6 + $0x24c] sm:$0xf0] }
 0x20e   :  { %v2715_v11 = vmax.f32 %v2399_v55, 0.0  ;;  %v6723_v14 = vor.u32 %v8390_v1, %v6722_v0  ;;  %v2464_v30 = vadd.f32 %v2463_v51, %v1005_v63  ;;  %v8566_v51 = vld [vmem:[#allocation6 + $0x5ac] sm:$0xf0]  ;;  %v7106_v55 = vld [vmem:[#allocation6 + $0x320] sm:$0xf] }
 0x20f   :  { %4278 = vmatpush.bf16.msra.mxu2 %v6787_v9  ;;  %2694 = vmatpush.bf16.msra.mxu0 %v6255_v22  ;;  %v8574_v9 = vld [vmem:[#allocation6 + $0x5ec] sm:$0xf0]  ;;  %v6994_v58 = vld [vmem:[#allocation6 + $0x240] sm:$0xf] }
 0x210   :  { %2709 = vmatmul.bf16.vlgmr.msra.gmra.mxu1 %v9050_v56  ;;  %v7154_v56 = vld [vmem:[#allocation6 + $0x380] sm:$0xf]  ;;  %v7459_v20 = vor.u32 %v8574_v9, %v7458_v6  ;;  %v9120_v34 = vpack.c.bf16 %v2715_v11, %v2715_v11  ;;  %v2477_v49 = vadd.f32 %v9108_v21, %v2464_v30  ;;  %v8534_v21 = vld [vmem:[#allocation6 + $0x4ac] sm:$0xf0]  ;;  %v6995_v9 = vor.u32 %v8458_v60, %v6994_v58 }
 0x211   :  { %4293 = vmatpush.bf16.msra.mxu3 %v6883_v8  ;;  %4315 = vmatpush.bf16.msrb.mxu1 %v7203_v18  ;;  %v7155_v13 = vor.u32 %v8498_v61, %v7154_v56  ;;  %v6706_v8 = vld [vmem:[#allocation6] sm:$0xf]  ;;  %v8386_v18 = vld [vmem:[#allocation6 + $0xc] sm:$0xf0]  ;;  %v2465_v22 = vpop.f32.mrf.mxu2  ;;  %v7427_v61 = vor.u32 %v8566_v51, %v7426_v50 }
 0x212   :  { %v6707_v36 = vor.u32 %v8386_v18, %v6706_v8  ;;  %v7298_v56 = vld [vmem:[#allocation6 + $0x4a0] sm:$0xf]  ;;  %v8562_v0 = vld [vmem:[#allocation6 + $0x58c] sm:$0xf0] }
 0x213   :  { %4279 = vmatpush.bf16.msra.mxu2 %v6771_v23  ;;  %2695 = vmatpush.bf16.msra.mxu0 %v6223_v42  ;;  %v8466_v23 = vld [vmem:[#allocation6 + $0x28c] sm:$0xf0]  ;;  %v2489_v35 = vpop.f32.mrf.mxu0  ;;  %v7090_v63 = vld [vmem:[#allocation6 + $0x300] sm:$0xf] }
 0x214   :  { %v8490_v42 = vld [vmem:[#allocation6 + $0x34c] sm:$0xf0]  ;;  %v6978_v11 = vld [vmem:[#allocation6 + $0x220] sm:$0xf] }
 0x215   :  { %4294 = vmatpush.bf16.msra.mxu3 %v6867_v39  ;;  %4316 = vmatpush.bf16.msrb.mxu1 %v7187_v40  ;;  %v7027_v39 = vor.u32 %v8466_v23, %v7026_v19  ;;  %v2504_v45 = vpop.f32.mrf.mxu1  ;;  %v7123_v3 = vor.u32 %v8490_v42, %v7122_v41  ;;  %v7394_v26 = vld [vmem:[#allocation6 + $0x560] sm:$0xf]  ;;  %v6979_v19 = vor.u32 %v8454_v12, %v6978_v11  ;;  %v8450_v23 = vld [vmem:[#allocation6 + $0x20c] sm:$0xf0]  ;;  %v8440_v11 = vld [vmem:[#allocation6 + $0x1c4] sm:$0xf] }
 0x216   :  { %2696 = vmatmul.bf16.vlgmr.msra.gmra.mxu0 %v9054_v17  ;;  %v7330_v17 = vld [vmem:[#allocation6 + $0x4e0] sm:$0xf]  ;;  %v8554_v32 = vld [vmem:[#allocation6 + $0x54c] sm:$0xf0]  ;;  %v6932_v12 = vld [vmem:[#allocation6 + $0x1d0] sm:$0xf0] }
 0x217   :  { %4280 = vmatpush.bf16.msra.mxu2 %v6755_v43  ;;  %4302 = vmatpush.bf16.msrb.mxu0 %v7075_v48  ;;  %v7331_v40 = vor.u32 %v8542_v27, %v7330_v17  ;;  %v7010_v43 = vld [vmem:[#allocation6 + $0x260] sm:$0xf]  ;;  %v8538_v48 = vld [vmem:[#allocation6 + $0x4cc] sm:$0xf0] }
 0x218   :  { %v7011_v53 = vor.u32 %v8462_v38, %v7010_v43  ;;  %v7315_v28 = vor.u32 %v8538_v48, %v7314_v47  ;;  %v6962_v22 = vld [vmem:[#allocation6 + $0x200] sm:$0xf]  ;;  %v8526_v27 = vld [vmem:[#allocation6 + $0x46c] sm:$0xf0] }
 0x219   :  { %4295 = vmatpush.bf16.msra.mxu3 %v6851_v54  ;;  %4317 = vmatpush.bf16.msrb.mxu1 %v7171_v57  ;;  %v2490_v54 = vadd.f32 %v2489_v35, %v2477_v49  ;;  %v8486_v57 = vld [vmem:[#allocation6 + $0x32c] sm:$0xf0]  ;;  %v7266_v17 = vld [vmem:[#allocation6 + $0x460] sm:$0xf] }
 0x21a   :  { %v7107_v2 = vor.u32 %v8486_v57, %v7106_v55  ;;  %v7378_v31 = vld [vmem:[#allocation6 + $0x540] sm:$0xf]  ;;  %v8522_v41 = vld [vmem:[#allocation6 + $0x44c] sm:$0xf0] }
 0x21b   :  { %4281 = vmatpush.bf16.msra.mxu2 %v6739_v59  ;;  %4303 = vmatpush.bf16.msrb.mxu0 %v7059_v62  ;;  %v2425_v59 = vadd.f32 %v9094_v29, %v2412_v44  ;;  %v7410_v62 = vld [vmem:[#allocation6 + $0x580] sm:$0xf]  ;;  %v2491_v5 = vpop.f32.mrf.mxu0  ;;  %v2503_v6 = vadd.f32 %v9114_v4, %v2490_v54  ;;  %v7299_v29 = vor.u32 %v8534_v21, %v7298_v56  ;;  %v8550_v38 = vld [vmem:[#allocation6 + $0x52c] sm:$0xf0]  ;;  %v8444_v56 = vld [vmem:[#allocation6 + $0x1e4] sm:$0xf] }
 0x21c   :  { %v7411_v15 = vor.u32 %v8562_v0, %v7410_v62  ;;  %v7586_v33 = vld [vmem:[#allocation6 + $0x6e0] sm:$0xf]  ;;  %v7379_v42 = vor.u32 %v8554_v32, %v7378_v31  ;;  %v8602_v48 = vld [vmem:[#allocation6 + $0x6cc] sm:$0xf0]  ;;  %v6948_v21 = vld [vmem:[#allocation6 + $0x1f0] sm:$0xf0] }
 0x21d   :  { %4296 = vmatpush.bf16.msra.mxu3 %v6835_v10  ;;  %4318 = vmatpush.bf16.msrb.mxu1 %v7155_v13  ;;  %v2438_v1 = vadd.f32 %v9103_v37, %v2425_v59  ;;  %v8482_v10 = vld [vmem:[#allocation6 + $0x30c] sm:$0xf0]  ;;  %v7282_v13 = vld [vmem:[#allocation6 + $0x480] sm:$0xf]  ;;  %v2717_v18 = vmax.f32 %v2503_v6, 0.0 }
 0x21e   :  { %v7091_v37 = vor.u32 %v8482_v10, %v7090_v63  ;;  %v7362_v43 = vld [vmem:[#allocation6 + $0x520] sm:$0xf]  ;;  %v8518_v54 = vld [vmem:[#allocation6 + $0x42c] sm:$0xf0]  ;;  %v8404_v31 = vld [vmem:[#allocation6 + $0xa4] sm:$0xf] }
 0x21f   :  { %4282 = vmatpush.bf16.msra.mxu2 %v6723_v14  ;;  %4304 = vmatpush.bf16.msrb.mxu0 %v7043_v16  ;;  %v8530_v14 = vld [vmem:[#allocation6 + $0x48c] sm:$0xf0]  ;;  %v2451_v8 = vadd.f32 %v9100_v7, %v2438_v1  ;;  %v9134_v7 = vpack.c.bf16 %v2717_v18, %v2717_v18  ;;  %v7570_v47 = vld [vmem:[#allocation6 + $0x6c0] sm:$0xf]  ;;  %v8412_v1 = vld [vmem:[#allocation6 + $0xe4] sm:$0xf] }
 0x220   :  { %4297 = vmatmul.bf16.vlgmr.msra.gmra.mxu3 %v9120_v34  ;;  %v8558_v16 = vld [vmem:[#allocation6 + $0x56c] sm:$0xf0]  ;;  %v7571_v55 = vor.u32 %v8602_v48, %v7570_v47  ;;  %v7554_v58 = vld [vmem:[#allocation6 + $0x6a0] sm:$0xf]  ;;  %v6804_v18 = vld [vmem:[#allocation6 + $0xd0] sm:$0xf0] }
 0x221   :  { %4341 = vmatpush.bf16.msrb.mxu3 %v7459_v20  ;;  %4319 = vmatpush.bf16.msrb.mxu1 %v7139_v46  ;;  %v7283_v20 = vor.u32 %v8530_v14, %v7282_v13  ;;  %v7395_v30 = vor.u32 %v8558_v16, %v7394_v26  ;;  %v8606_v46 = vld [vmem:[#allocation6 + $0x6ec] sm:$0xf0]  ;;  %v2716_v35 = vmax.f32 %v2451_v8, 0.0  ;;  %v7218_v62 = vld [vmem:[#allocation6 + $0x400] sm:$0xf] }
 0x222   :  { %v7587_v44 = vor.u32 %v8606_v46, %v7586_v33  ;;  %v8546_v57 = vld [vmem:[#allocation6 + $0x50c] sm:$0xf0]  ;;  %v7538_v63 = vld [vmem:[#allocation6 + $0x680] sm:$0xf]  ;;  %v8408_v16 = vld [vmem:[#allocation6 + $0xc4] sm:$0xf] }
 0x223   :  { %4283 = vmatpush.bf16.msra.mxu2 %v6707_v36  ;;  %4305 = vmatpush.bf16.msrb.mxu0 %v7027_v39  ;;  %v9132_v4 = vpop.f32.mrf.mxu3  ;;  %v6963_v36 = vor.u32 %v8450_v23, %v6962_v22  ;;  %v7267_v39 = vor.u32 %v8526_v27, %v7266_v17  ;;  %v9138_v51 = vpack.c.bf16 %v2716_v35, %v2716_v35  ;;  %v8598_v59 = vld [vmem:[#allocation6 + $0x6ac] sm:$0xf0]  ;;  %v8436_v17 = vld [vmem:[#allocation6 + $0x1a4] sm:$0xf]  ;;  %v6916_v27 = vld [vmem:[#allocation6 + $0x1b0] sm:$0xf0] }
 0x224   :  { %v8514_v0 = vld [vmem:[#allocation6 + $0x40c] sm:$0xf0]  ;;  %v7555_v5 = vor.u32 %v8598_v59, %v7554_v58  ;;  %v6788_v32 = vld [vmem:[#allocation6 + $0xb0] sm:$0xf0]  ;;  %v6919_v35 = vor.u32 %v8436_v17, %v6916_v27  ;;  %v8400_v47 = vld [vmem:[#allocation6 + $0x84] sm:$0xf] }
 0x225   :  { %4342 = vmatpush.bf16.msrb.mxu3 %v7443_v24  ;;  %4320 = vmatpush.bf16.msrb.mxu1 %v7123_v3  ;;  %v1006_v24 = vperm.slane %v9077_v25, 4  ;;  %v7234_v3 = vld [vmem:[#allocation6 + $0x420] sm:$0xf]  ;;  %v8594_v10 = vld [vmem:[#allocation6 + $0x68c] sm:$0xf0]  ;;  %v7219_v14 = vor.u32 %v8514_v0, %v7218_v62 }
 0x226   :  { %4284 = vmatmul.bf16.vlgmr.msra.gmra.mxu2 %v9125_v52  ;;  %v8590_v22 = vld [vmem:[#allocation6 + $0x66c] sm:$0xf0]  ;;  %v8388_v27 = vld [vmem:[#allocation6 + $0x24] sm:$0xf] }
 0x227   :  { %4328 = vmatpush.bf16.msrb.mxu2 %v7331_v40  ;;  %4306 = vmatpush.bf16.msrb.mxu0 %v7011_v53  ;;  %v7250_v40 = vld [vmem:[#allocation6 + $0x440] sm:$0xf]  ;;  %v7363_v53 = vor.u32 %v8550_v38, %v7362_v43  ;;  %v6791_v38 = vor.u32 %v8404_v31, %v6788_v32  ;;  %v8634_v58 = vld [vmem:[#allocation6 + $0x7cc] sm:$0xf0] }
 0x228   :  { %v7251_v50 = vor.u32 %v8522_v41, %v7250_v40  ;;  %v8432_v40 = vld [vmem:[#allocation6 + $0x184] sm:$0xf]  ;;  %v6900_v41 = vld [vmem:[#allocation6 + $0x190] sm:$0xf0]  ;;  %v7714_v43 = vld [vmem:[#allocation6 + $0x7e0] sm:$0xf] }
 0x229   :  { %4343 = vmatpush.bf16.msrb.mxu3 %v7427_v61  ;;  %4321 = vmatpush.bf16.msrb.mxu1 %v7107_v2  ;;  %v2515_v45 = vpop.f32.mrf.mxu2  ;;  %v7235_v61 = vor.u32 %v8518_v54, %v7234_v3  ;;  %v7490_v3 = vld [vmem:[#allocation6 + $0x620] sm:$0xf]  ;;  %v8582_v54 = vld [vmem:[#allocation6 + $0x62c] sm:$0xf0] }
 0x22a   :  { %v2516_v25 = vadd.f32 %v2515_v45, %v1006_v24 }
 0x22b   :  { %4329 = vmatpush.bf16.msrb.mxu2 %v7315_v28  ;;  %4307 = vmatpush.bf16.msrb.mxu0 %v6995_v9  ;;  %v2530_v49 = vpop.f32.mrf.mxu3  ;;  %v7346_v28 = vld [vmem:[#allocation6 + $0x500] sm:$0xf]  ;;  %v6820_v9 = vld [vmem:[#allocation6 + $0xf0] sm:$0xf0] }
 0x22c   :  { %v7347_v2 = vor.u32 %v8546_v57, %v7346_v28  ;;  %v2529_v13 = vadd.f32 %v9132_v4, %v2516_v25  ;;  %v6823_v26 = vor.u32 %v8412_v1, %v6820_v9  ;;  %v6807_v4 = vor.u32 %v8408_v16, %v6804_v18  ;;  %v6772_v49 = vld [vmem:[#allocation6 + $0x90] sm:$0xf0]  ;;  %v7698_v57 = vld [vmem:[#allocation6 + $0x7c0] sm:$0xf] }
 0x22d   :  { %4344 = vmatpush.bf16.msrb.mxu3 %v7411_v15  ;;  %4322 = vmatpush.bf16.msrb.mxu1 %v7091_v37  ;;  %v2554_v60 = vpop.f32.mrf.mxu1  ;;  %v7539_v37 = vor.u32 %v8594_v10, %v7538_v63  ;;  %v6884_v28 = vld [vmem:[#allocation6 + $0x170] sm:$0xf0]  ;;  %v6775_v59 = vor.u32 %v8400_v47, %v6772_v49  ;;  %v7491_v25 = vor.u32 %v8582_v54, %v7490_v3  ;;  %v7474_v1 = vld [vmem:[#allocation6 + $0x600] sm:$0xf]  ;;  %v8384_v47 = vld [vmem:[#allocation6 + $0x4] sm:$0xf] }
 0x22e   :  { %v7076_v9 = vld [vmem:[#allocation6 + $0x2f0] sm:$0xf0]  ;;  %v8464_v54 = vld [vmem:[#allocation6 + $0x284] sm:$0xf] }
 0x22f   :  { %4330 = vmatpush.bf16.msrb.mxu2 %v7299_v29  ;;  %4308 = vmatpush.bf16.msrb.mxu0 %v6979_v19  ;;  %v6951_v29 = vor.u32 %v8444_v56, %v6948_v21  ;;  %v6935_v19 = vor.u32 %v8440_v11, %v6932_v12  ;;  %v8424_v56 = vld [vmem:[#allocation6 + $0x144] sm:$0xf]  ;;  %v6868_v21 = vld [vmem:[#allocation6 + $0x150] sm:$0xf0] }
 0x230   :  { %4323 = vmatmul.bf16.vlgmr.msrb.gmra.mxu1 %v9134_v7  ;;  %v8392_v12 = vld [vmem:[#allocation6 + $0x44] sm:$0xf]  ;;  %v6852_v16 = vld [vmem:[#allocation6 + $0x130] sm:$0xf0] }
 0x231   :  { %4345 = vmatpush.bf16.msrb.mxu3 %v7395_v30  ;;  %v2517_v6 = vpop.f32.mrf.mxu2  ;;  %v7332_v3 = vld [vmem:[#allocation6 + $0x4f0] sm:$0xf0] }
 0x232   :  { %v8476_v6 = vld [vmem:[#allocation6 + $0x2e4] sm:$0xf] }
 0x233   :  { %4331 = vmatpush.bf16.msrb.mxu2 %v7283_v20  ;;  %4309 = vmatpush.bf16.msrb.mxu0 %v6963_v36  ;;  %v2541_v15 = vpop.f32.mrf.mxu0  ;;  %v7522_v20 = vld [vmem:[#allocation6 + $0x660] sm:$0xf] }
 0x234   :  { %v2542_v8 = vadd.f32 %v2541_v15, %v2529_v13  ;;  %v7523_v33 = vor.u32 %v8590_v22, %v7522_v20  ;;  %v7506_v36 = vld [vmem:[#allocation6 + $0x640] sm:$0xf]  ;;  %v6740_v13 = vld [vmem:[#allocation6 + $0x50] sm:$0xf0]  ;;  %v8420_v15 = vld [vmem:[#allocation6 + $0x124] sm:$0xf] }
 0x235   :  { %4346 = vmatpush.bf16.msrb.mxu3 %v7379_v42  ;;  %v2556_v23 = vpop.f32.mrf.mxu1  ;;  %v8626_v20 = vld [vmem:[#allocation6 + $0x78c] sm:$0xf0]  ;;  %v9150_v22 = vld [vmem:[%s9311_s6] sm:$0xff]  ;;  %v6743_v17 = vor.u32 %v8392_v12, %v6740_v13  ;;  %v6855_v32 = vor.u32 %v8420_v15, %v6852_v16  ;;  %v7460_v12 = vld [vmem:[#allocation6 + $0x5f0] sm:$0xf0] }
 0x236   :  { %4310 = vmatmul.bf16.vlgmr.msrb.gmra.mxu0 %v9138_v51  ;;  %v2555_v30 = vadd.f32 %v2554_v60, %v2542_v8  ;;  %v6756_v60 = vld [vmem:[#allocation6 + $0x70] sm:$0xf0]  ;;  %v1007_v23 = vperm.slane %v9150_v22, 5  ;;  %v8532_v13 = vld [vmem:[#allocation6 + $0x4a4] sm:$0xf] }
 0x237   :  { %4332 = vmatpush.bf16.msrb.mxu2 %v7267_v39  ;;  %4354 = vmatpush.bf16.msra.mxu0 %v7587_v44  ;;  %v8586_v39 = vld [vmem:[#allocation6 + $0x64c] sm:$0xf0]  ;;  %v7060_v8 = vld [vmem:[#allocation6 + $0x2d0] sm:$0xf0] }
 0x238   :  { %v2718_v46 = vmax.f32 %v2555_v30, 0.0  ;;  %v8638_v44 = vld [vmem:[#allocation6 + $0x7ec] sm:$0xf0]  ;;  %v7507_v48 = vor.u32 %v8586_v39, %v7506_v36  ;;  %v6724_v30 = vld [vmem:[#allocation6 + $0x30] sm:$0xf0] }
 0x239   :  { %4347 = vmatpush.bf16.msrb.mxu3 %v7363_v53  ;;  %v7715_v24 = vor.u32 %v8638_v44, %v7714_v43  ;;  %v8428_v53 = vld [vmem:[#allocation6 + $0x164] sm:$0xf]  ;;  %v7044_v39 = vld [vmem:[#allocation6 + $0x2b0] sm:$0xf0] }
 0x23a   :  { %v9142_v42 = vpack.c.bf16 %v2718_v46, %v2718_v46  ;;  %v6887_v0 = vor.u32 %v8428_v53, %v6884_v28  ;;  %v6836_v46 = vld [vmem:[#allocation6 + $0x110] sm:$0xf0]  ;;  %v8468_v36 = vld [vmem:[#allocation6 + $0x2a4] sm:$0xf] }
 0x23b   :  { %4333 = vmatpush.bf16.msrb.mxu2 %v7251_v50  ;;  %4355 = vmatpush.bf16.msra.mxu0 %v7571_v55  ;;  %v2543_v45 = vpop.f32.mrf.mxu0  ;;  %v6903_v50 = vor.u32 %v8432_v40, %v6900_v41  ;;  %v8396_v55 = vld [vmem:[#allocation6 + $0x64] sm:$0xf]  ;;  %v7650_v40 = vld [vmem:[#allocation6 + $0x760] sm:$0xf]  ;;  %v8622_v41 = vld [vmem:[#allocation6 + $0x76c] sm:$0xf0] }
 0x23c   :  { %4367 = vmatpush.bf16.msra.mxu1 %v7715_v24  ;;  %v6759_v10 = vor.u32 %v8396_v55, %v6756_v60  ;;  %v7651_v43 = vor.u32 %v8622_v41, %v7650_v40  ;;  %v6727_v45 = vor.u32 %v8388_v27, %v6724_v30  ;;  %v8540_v24 = vld [vmem:[#allocation6 + $0x4e4] sm:$0xf]  ;;  %v7028_v53 = vld [vmem:[#allocation6 + $0x290] sm:$0xf0]  ;;  %v7634_v55 = vld [vmem:[#allocation6 + $0x740] sm:$0xf] }
 0x23d   :  { %4348 = vmatpush.bf16.msrb.mxu3 %v7347_v2  ;;  %v8578_v2 = vld [vmem:[#allocation6 + $0x60c] sm:$0xf0]  ;;  %v7300_v15 = vld [vmem:[#allocation6 + $0x4b0] sm:$0xf0] }
 0x23e   :  { %v7475_v11 = vor.u32 %v8578_v2, %v7474_v1  ;;  %v8460_v1 = vld [vmem:[#allocation6 + $0x264] sm:$0xf]  ;;  %v7012_v2 = vld [vmem:[#allocation6 + $0x270] sm:$0xf0]  ;;  %v7303_v30 = vor.u32 %v8532_v13, %v7300_v15 }
 0x23f   :  { %4334 = vmatpush.bf16.msrb.mxu2 %v7235_v61  ;;  %4356 = vmatpush.bf16.msra.mxu0 %v7555_v5  ;;  %v7699_v61 = vor.u32 %v8634_v58, %v7698_v57  ;;  %v7682_v5 = vld [vmem:[#allocation6 + $0x7a0] sm:$0xf]  ;;  %v8618_v57 = vld [vmem:[#allocation6 + $0x74c] sm:$0xf0]  ;;  %v6996_v16 = vld [vmem:[#allocation6 + $0x250] sm:$0xf0] }
 0x240   :  { %v7140_v15 = vld [vmem:[#allocation6 + $0x370] sm:$0xf0] }
 0x241   :  { %4393 = vmatpush.bf16.msra.mxu3 %v6951_v29  ;;  %4368 = vmatpush.bf16.msra.mxu1 %v7699_v61  ;;  %v8630_v29 = vld [vmem:[#allocation6 + $0x7ac] sm:$0xf0] }
 0x242   :  { %v7683_v63 = vor.u32 %v8630_v29, %v7682_v5 }
 0x243   :  { %4335 = vmatpush.bf16.msrb.mxu2 %v7219_v14  ;;  %4357 = vmatpush.bf16.msra.mxu0 %v7539_v37  ;;  %v9145_v62 = vpop.f32.mrf.mxu3  ;;  %v6871_v14 = vor.u32 %v8424_v56, %v6868_v21  ;;  %v8472_v37 = vld [vmem:[#allocation6 + $0x2c4] sm:$0xf]  ;;  %v7335_v56 = vor.u32 %v8540_v24, %v7332_v3  ;;  %v7268_v24 = vld [vmem:[#allocation6 + $0x470] sm:$0xf0] }
 0x244   :  { %v8536_v21 = vld [vmem:[#allocation6 + $0x4c4] sm:$0xf] }
 0x245   :  { %4394 = vmatpush.bf16.msra.mxu3 %v6935_v19  ;;  %4369 = vmatpush.bf16.msra.mxu1 %v7683_v63  ;;  %v7666_v19 = vld [vmem:[#allocation6 + $0x780] sm:$0xf]  ;;  %v8448_v3 = vld [vmem:[#allocation6 + $0x204] sm:$0xf] }
 0x246   :  { %4336 = vmatmul.bf16.vlgmr.msrb.gmra.mxu2 %v9142_v42 }
 0x247   :  { %4380 = vmatpush.bf16.msra.mxu2 %v6823_v26  ;;  %4358 = vmatpush.bf16.msra.mxu0 %v7523_v33  ;;  %v7079_v26 = vor.u32 %v8476_v6, %v7076_v9  ;;  %v8416_v33 = vld [vmem:[#allocation6 + $0x104] sm:$0xf]  ;;  %v7618_v6 = vld [vmem:[#allocation6 + $0x720] sm:$0xf]  ;;  %v8614_v9 = vld [vmem:[#allocation6 + $0x72c] sm:$0xf0] }
 0x248   :  { %v6839_v49 = vor.u32 %v8416_v33, %v6836_v46  ;;  %v7619_v63 = vor.u32 %v8614_v9, %v7618_v6  ;;  %v7204_v33 = vld [vmem:[#allocation6 + $0x3f0] sm:$0xf0]  ;;  %v8556_v9 = vld [vmem:[#allocation6 + $0x564] sm:$0xf] }
 0x249   :  { %4395 = vmatpush.bf16.msra.mxu3 %v6919_v35  ;;  %v2567_v18 = vpop.f32.mrf.mxu2  ;;  %v7063_v35 = vor.u32 %v8472_v37, %v7060_v8  ;;  %v7602_v8 = vld [vmem:[#allocation6 + $0x700] sm:$0xf] }
 0x24b   :  { %4381 = vmatpush.bf16.msra.mxu2 %v6807_v4  ;;  %4359 = vmatpush.bf16.msra.mxu0 %v7507_v48  ;;  %v7667_v4 = vor.u32 %v8626_v20, %v7666_v19  ;;  %v2582_v31 = vpop.f32.mrf.mxu3  ;;  %v6708_v48 = vld [vmem:[#allocation6 + $0x10] sm:$0xf0]  ;;  %v8568_v20 = vld [vmem:[#allocation6 + $0x5c4] sm:$0xf] }
 0x24c   :  { %v6711_v58 = vor.u32 %v8384_v47, %v6708_v48  ;;  %v7428_v47 = vld [vmem:[#allocation6 + $0x5b0] sm:$0xf0]  ;;  %v8524_v48 = vld [vmem:[#allocation6 + $0x464] sm:$0xf] }
 0x24d   :  { %4396 = vmatpush.bf16.msra.mxu3 %v6903_v50  ;;  %4370 = vmatpush.bf16.msra.mxu1 %v7667_v4  ;;  %v2606_v44 = vpop.f32.mrf.mxu1  ;;  %v7047_v50 = vor.u32 %v8468_v36, %v7044_v39  ;;  %v8528_v4 = vld [vmem:[#allocation6 + $0x484] sm:$0xf]  ;;  %v6980_v39 = vld [vmem:[#allocation6 + $0x230] sm:$0xf0] }
 0x24e   :  { %v8452_v36 = vld [vmem:[#allocation6 + $0x224] sm:$0xf] }
 0x24f   :  { %4382 = vmatpush.bf16.msra.mxu2 %v6791_v38  ;;  %4360 = vmatpush.bf16.msra.mxu0 %v7491_v25  ;;  %v2568_v38 = vadd.f32 %v2567_v18, %v1007_v23  ;;  %v7031_v25 = vor.u32 %v8464_v54, %v7028_v53  ;;  %v8610_v18 = vld [vmem:[#allocation6 + $0x70c] sm:$0xf0]  ;;  %v7444_v23 = vld [vmem:[#allocation6 + $0x5d0] sm:$0xf0]  ;;  %v8500_v53 = vld [vmem:[#allocation6 + $0x3a4] sm:$0xf] }
 0x250   :  { %v7447_v41 = vor.u32 %v8568_v20, %v7444_v23  ;;  %v6964_v54 = vld [vmem:[#allocation6 + $0x210] sm:$0xf0] }
 0x251   :  { %4397 = vmatpush.bf16.msra.mxu3 %v6887_v0  ;;  %4371 = vmatpush.bf16.msra.mxu1 %v7651_v43  ;;  %v2569_v28 = vpop.f32.mrf.mxu2  ;;  %v2581_v60 = vadd.f32 %v9145_v62, %v2568_v38  ;;  %v7316_v0 = vld [vmem:[#allocation6 + $0x4d0] sm:$0xf0]  ;;  %v8572_v62 = vld [vmem:[#allocation6 + $0x5e4] sm:$0xf] }
 0x252   :  { %v7463_v19 = vor.u32 %v8572_v62, %v7460_v12  ;;  %v8564_v43 = vld [vmem:[#allocation6 + $0x5a4] sm:$0xf]  ;;  %v1008_v62 = vperm.slane %v9150_v22, 6  ;;  %v7220_v20 = vld [vmem:[#allocation6 + $0x410] sm:$0xf0] }
 0x253   :  { %4383 = vmatpush.bf16.msra.mxu2 %v6775_v59  ;;  %4361 = vmatpush.bf16.msra.mxu0 %v7475_v11  ;;  %v7635_v59 = vor.u32 %v8618_v57, %v7634_v55  ;;  %v2593_v61 = vpop.f32.mrf.mxu0  ;;  %v7319_v11 = vor.u32 %v8536_v21, %v7316_v0  ;;  %v7172_v55 = vld [vmem:[#allocation6 + $0x3b0] sm:$0xf0]  ;;  %v7431_v57 = vor.u32 %v8564_v43, %v7428_v47  ;;  %v6810_v43 = vld [vmem:[#allocation6 + $0xc8] sm:$0xf]  ;;  %v8484_v47 = vld [vmem:[#allocation6 + $0x324] sm:$0xf] }
 0x254   :  { %v2594_v5 = vadd.f32 %v2593_v61, %v2581_v60  ;;  %v8560_v60 = vld [vmem:[#allocation6 + $0x584] sm:$0xf]  ;;  %v6967_v21 = vor.u32 %v8448_v3, %v6964_v54  ;;  %v7252_v61 = vld [vmem:[#allocation6 + $0x450] sm:$0xf0] }
 0x255   :  { %4398 = vmatpush.bf16.msra.mxu3 %v6871_v14  ;;  %4372 = vmatpush.bf16.msra.mxu1 %v7635_v59  ;;  %v2608_v29 = vpop.f32.mrf.mxu1  ;;  %v7015_v14 = vor.u32 %v8460_v1, %v7012_v2  ;;  %v7271_v59 = vor.u32 %v8524_v48, %v7268_v24  ;;  %v8496_v1 = vld [vmem:[#allocation6 + $0x384] sm:$0xf]  ;;  %v7156_v2 = vld [vmem:[#allocation6 + $0x390] sm:$0xf0] }
 0x256   :  { %v7396_v29 = vld [vmem:[#allocation6 + $0x570] sm:$0xf0] }
 0x257   :  { %4384 = vmatpush.bf16.msra.mxu2 %v6759_v10  ;;  %4406 = vmatpush.bf16.msrb.mxu0 %v7079_v26  ;;  %v2607_v10 = vadd.f32 %v2606_v44, %v2594_v5  ;;  %v8456_v26 = vld [vmem:[#allocation6 + $0x244] sm:$0xf]  ;;  %v7399_v13 = vor.u32 %v8556_v9, %v7396_v29  ;;  %v7108_v48 = vld [vmem:[#allocation6 + $0x330] sm:$0xf0]  ;;  %v6938_v9 = vld [vmem:[#allocation6 + $0x1c8] sm:$0xf] }
 0x258   :  { %v6999_v31 = vor.u32 %v8456_v26, %v6996_v16  ;;  %v8504_v44 = vld [vmem:[#allocation6 + $0x3c4] sm:$0xf]  ;;  %v7111_v3 = vor.u32 %v8484_v47, %v7108_v48  ;;  %v8443_v29 = vld [vmem:[#allocation6 + $0x1d4] sm:$0xf0]  ;;  %v7524_v47 = vld [vmem:[#allocation6 + $0x670] sm:$0xf0] }
 0x259   :  { %4399 = vmatpush.bf16.msra.mxu3 %v6855_v32  ;;  %4373 = vmatpush.bf16.msra.mxu1 %v7619_v63  ;;  %v2719_v37 = vmax.f32 %v2607_v10, 0.0  ;;  %v8508_v32 = vld [vmem:[#allocation6 + $0x3e4] sm:$0xf]  ;;  %v7159_v63 = vor.u32 %v8496_v1, %v7156_v2  ;;  %v6730_v48 = vld [vmem:[#allocation6 + $0x28] sm:$0xf] }
 0x25a   :  { %v7207_v40 = vor.u32 %v8508_v32, %v7204_v33  ;;  %v8516_v10 = vld [vmem:[#allocation6 + $0x424] sm:$0xf]  ;;  %v7124_v32 = vld [vmem:[#allocation6 + $0x350] sm:$0xf0] }
 0x25b   :  { %4385 = vmatpush.bf16.msra.mxu2 %v6743_v17  ;;  %4407 = vmatpush.bf16.msrb.mxu0 %v7063_v35  ;;  %v7603_v17 = vor.u32 %v8610_v18, %v7602_v8  ;;  %v9155_v27 = vpack.c.bf16 %v2719_v37, %v2719_v37  ;;  %v2595_v46 = vpop.f32.mrf.mxu0  ;;  %v7284_v35 = vld [vmem:[#allocation6 + $0x490] sm:$0xf0]  ;;  %v8552_v16 = vld [vmem:[#allocation6 + $0x544] sm:$0xf] }
 0x25c   :  { %v7287_v38 = vor.u32 %v8528_v4, %v7284_v35  ;;  %v7380_v37 = vld [vmem:[#allocation6 + $0x550] sm:$0xf0]  ;;  %v8548_v35 = vld [vmem:[#allocation6 + $0x524] sm:$0xf] }
 0x25d   :  { %4400 = vmatpush.bf16.msra.mxu3 %v6839_v49  ;;  %4374 = vmatpush.bf16.msra.mxu1 %v7603_v17  ;;  %v6983_v49 = vor.u32 %v8452_v36, %v6980_v39  ;;  %v6826_v17 = vld [vmem:[#allocation6 + $0xe8] sm:$0xf]  ;;  %v7383_v4 = vor.u32 %v8552_v16, %v7380_v37  ;;  %v7364_v36 = vld [vmem:[#allocation6 + $0x530] sm:$0xf0]  ;;  %v8596_v16 = vld [vmem:[#allocation6 + $0x6a4] sm:$0xf] }
 0x25e   :  { %4349 = vmatmul.bf16.vlgmr.msrb.gmra.mxu3 %v9155_v27  ;;  %v6922_v37 = vld [vmem:[#allocation6 + $0x1a8] sm:$0xf] }
 0x25f   :  { %4386 = vmatpush.bf16.msra.mxu2 %v6727_v45  ;;  %4408 = vmatpush.bf16.msrb.mxu0 %v7047_v50  ;;  %v7188_v45 = vld [vmem:[#allocation6 + $0x3d0] sm:$0xf0] }
 0x260   :  { %v7191_v50 = vor.u32 %v8504_v44, %v7188_v45  ;;  %v8411_v44 = vld [vmem:[#allocation6 + $0xd4] sm:$0xf0] }
 0x261   :  { %4445 = vmatpush.bf16.msrb.mxu3 %v7463_v19  ;;  %4419 = vmatpush.bf16.msrb.mxu1 %v7207_v40  ;;  %v8512_v19 = vld [vmem:[#allocation6 + $0x404] sm:$0xf] }
 0x262   :  { %v7223_v46 = vor.u32 %v8512_v19, %v7220_v20  ;;  %v6762_v19 = vld [vmem:[#allocation6 + $0x68] sm:$0xf]  ;;  %v8399_v20 = vld [vmem:[#allocation6 + $0x74] sm:$0xf0] }
 0x263   :  { %4387 = vmatpush.bf16.msra.mxu2 %v6711_v58  ;;  %4409 = vmatpush.bf16.msrb.mxu0 %v7031_v25  ;;  %v2632_v28 = vpop.f32.mrf.mxu3  ;;  %v7175_v58 = vor.u32 %v8500_v53, %v7172_v55  ;;  %v8520_v25 = vld [vmem:[#allocation6 + $0x444] sm:$0xf]  ;;  %v6811_v53 = vor.u32 %v8411_v44, %v6810_v43  ;;  %v6890_v44 = vld [vmem:[#allocation6 + $0x168] sm:$0xf] }
 0x264   :  { %v7255_v6 = vor.u32 %v8520_v25, %v7252_v61  ;;  %v8604_v55 = vld [vmem:[#allocation6 + $0x6e4] sm:$0xf]  ;;  %v7092_v61 = vld [vmem:[#allocation6 + $0x310] sm:$0xf0] }
 0x265   :  { %4446 = vmatpush.bf16.msrb.mxu3 %v7447_v41  ;;  %4420 = vmatpush.bf16.msrb.mxu1 %v7191_v50  ;;  %v7348_v50 = vld [vmem:[#allocation6 + $0x510] sm:$0xf0]  ;;  %v8480_v25 = vld [vmem:[#allocation6 + $0x304] sm:$0xf] }
 0x266   :  { %4388 = vmatmul.bf16.vlgmr.msra.gmra.mxu2 %v9125_v52  ;;  %v8588_v43 = vld [vmem:[#allocation6 + $0x664] sm:$0xf] }
 0x267   :  { %4432 = vmatpush.bf16.msrb.mxu2 %v7335_v56  ;;  %4410 = vmatpush.bf16.msrb.mxu0 %v7015_v14  ;;  %v7412_v56 = vld [vmem:[#allocation6 + $0x590] sm:$0xf0]  ;;  %v8492_v14 = vld [vmem:[#allocation6 + $0x364] sm:$0xf] }
 0x268   :  { %v7415_v0 = vor.u32 %v8560_v60, %v7412_v56  ;;  %v7143_v8 = vor.u32 %v8492_v14, %v7140_v15  ;;  %v6794_v60 = vld [vmem:[#allocation6 + $0xa8] sm:$0xf]  ;;  %v8407_v56 = vld [vmem:[#allocation6 + $0xb4] sm:$0xf0]  ;;  %v6939_v14 = vor.u32 %v8443_v29, %v6938_v9  ;;  %v8580_v29 = vld [vmem:[#allocation6 + $0x624] sm:$0xf] }
 0x269   :  { %4447 = vmatpush.bf16.msrb.mxu3 %v7431_v57  ;;  %4421 = vmatpush.bf16.msrb.mxu1 %v7175_v58  ;;  %v2619_v5 = vpop.f32.mrf.mxu2  ;;  %v6954_v57 = vld [vmem:[#allocation6 + $0x1e8] sm:$0xf]  ;;  %v8447_v58 = vld [vmem:[#allocation6 + $0x1f4] sm:$0xf0] }
 0x26a   :  { %v2620_v23 = vadd.f32 %v2619_v5, %v1008_v62  ;;  %v6955_v1 = vor.u32 %v8447_v58, %v6954_v57  ;;  %v6795_v5 = vor.u32 %v8407_v56, %v6794_v60  ;;  %v8403_v62 = vld [vmem:[#allocation6 + $0x94] sm:$0xf0]  ;;  %v6874_v57 = vld [vmem:[#allocation6 + $0x148] sm:$0xf] }
 0x26b   :  { %4433 = vmatpush.bf16.msrb.mxu2 %v7319_v11  ;;  %4411 = vmatpush.bf16.msrb.mxu0 %v6999_v31  ;;  %v7236_v11 = vld [vmem:[#allocation6 + $0x430] sm:$0xf0]  ;;  %v2634_v12 = vpop.f32.mrf.mxu3  ;;  %v8488_v31 = vld [vmem:[#allocation6 + $0x344] sm:$0xf]  ;;  %v8427_v58 = vld [vmem:[#allocation6 + $0x154] sm:$0xf0] }
 0x26c   :  { %v7239_v26 = vor.u32 %v8516_v10, %v7236_v11  ;;  %v7127_v39 = vor.u32 %v8488_v31, %v7124_v32  ;;  %v2633_v41 = vadd.f32 %v2632_v28, %v2620_v23  ;;  %v7572_v10 = vld [vmem:[#allocation6 + $0x6d0] sm:$0xf0]  ;;  %v6778_v11 = vld [vmem:[#allocation6 + $0x88] sm:$0xf]  ;;  %v7095_v12 = vor.u32 %v8480_v25, %v7092_v61  ;;  %v8592_v31 = vld [vmem:[#allocation6 + $0x684] sm:$0xf] }
 0x26d   :  { %4448 = vmatpush.bf16.msrb.mxu3 %v7415_v0  ;;  %4422 = vmatpush.bf16.msrb.mxu1 %v7159_v63  ;;  %v2658_v18 = vpop.f32.mrf.mxu1  ;;  %v6906_v32 = vld [vmem:[#allocation6 + $0x188] sm:$0xf]  ;;  %v8387_v60 = vld [vmem:[#allocation6 + $0x14] sm:$0xf0] }
 0x26e   :  { %4401 = vmatmul.bf16.vlgmr.msra.gmra.mxu3 %v9120_v34  ;;  %v8543_v25 = vld [vmem:[#allocation6 + $0x4f4] sm:$0xf0] }
 0x26f   :  { %4434 = vmatpush.bf16.msrb.mxu2 %v7303_v30  ;;  %4412 = vmatpush.bf16.msrb.mxu0 %v6983_v49  ;;  %v8415_v30 = vld [vmem:[#allocation6 + $0xf4] sm:$0xf0]  ;;  %v8544_v49 = vld [vmem:[#allocation6 + $0x504] sm:$0xf] }
 0x270   :  { %v6827_v40 = vor.u32 %v8415_v30, %v6826_v17 }
 0x271   :  { %4449 = vmatpush.bf16.msrb.mxu3 %v7399_v13  ;;  %4423 = vmatpush.bf16.msrb.mxu1 %v7143_v8  ;;  %v2621_v33 = vpop.f32.mrf.mxu2  ;;  %v8439_v8 = vld [vmem:[#allocation6 + $0x1b4] sm:$0xf0] }
 0x272   :  { %v6923_v17 = vor.u32 %v8439_v8, %v6922_v37  ;;  %v8435_v33 = vld [vmem:[#allocation6 + $0x194] sm:$0xf0] }
 0x273   :  { %4435 = vmatpush.bf16.msrb.mxu2 %v7287_v38  ;;  %4413 = vmatpush.bf16.msrb.mxu0 %v6967_v21  ;;  %v2645_v45 = vpop.f32.mrf.mxu0  ;;  %v7367_v38 = vor.u32 %v8548_v35, %v7364_v36  ;;  %v7351_v21 = vor.u32 %v8544_v49, %v7348_v50  ;;  %v6746_v35 = vld [vmem:[#allocation6 + $0x48] sm:$0xf]  ;;  %v8395_v36 = vld [vmem:[#allocation6 + $0x54] sm:$0xf0]  ;;  %v1009_v49 = vperm.slane %v9150_v22, 7  ;;  %v6875_v22 = vor.u32 %v8427_v58, %v6874_v57 }
 0x274   :  { %v2646_v24 = vadd.f32 %v2645_v45, %v2633_v41  ;;  %v6747_v41 = vor.u32 %v8395_v36, %v6746_v35  ;;  %v8431_v45 = vld [vmem:[#allocation6 + $0x174] sm:$0xf0]  ;;  %v7306_v35 = vld [vmem:[#allocation6 + $0x4a8] sm:$0xf] }
 0x275   :  { %4450 = vmatpush.bf16.msrb.mxu3 %v7383_v4  ;;  %4424 = vmatpush.bf16.msrb.mxu1 %v7127_v39  ;;  %v2660_v54 = vpop.f32.mrf.mxu1  ;;  %v6763_v4 = vor.u32 %v8399_v20, %v6762_v19  ;;  %v6907_v39 = vor.u32 %v8435_v33, %v6906_v32  ;;  %v8419_v37 = vld [vmem:[#allocation6 + $0x114] sm:$0xf0]  ;;  %v7476_v19 = vld [vmem:[#allocation6 + $0x610] sm:$0xf0]  ;;  %v7466_v20 = vld [vmem:[#allocation6 + $0x5e8] sm:$0xf] }
 0x276   :  { %v2659_v28 = vadd.f32 %v2658_v18, %v2646_v24  ;;  %v7556_v18 = vld [vmem:[#allocation6 + $0x6b0] sm:$0xf0]  ;;  %v8391_v24 = vld [vmem:[#allocation6 + $0x34] sm:$0xf0]  ;;  %v7527_v54 = vor.u32 %v8588_v43, %v7524_v47 }
 0x277   :  { %4436 = vmatpush.bf16.msrb.mxu2 %v7271_v59  ;;  %v7588_v59 = vld [vmem:[#allocation6 + $0x6f0] sm:$0xf0]  ;;  %v7559_v30 = vor.u32 %v8596_v16, %v7556_v18  ;;  %v6842_v16 = vld [vmem:[#allocation6 + $0x108] sm:$0xf]  ;;  %v8479_v32 = vld [vmem:[#allocation6 + $0x2f4] sm:$0xf0] }
 0x278   :  { %v2720_v0 = vmax.f32 %v2659_v28, 0.0  ;;  %v7591_v2 = vor.u32 %v8604_v55, %v7588_v59  ;;  %v8584_v55 = vld [vmem:[#allocation6 + $0x644] sm:$0xf]  ;;  %v7508_v28 = vld [vmem:[#allocation6 + $0x650] sm:$0xf0]  ;;  %v6843_v33 = vor.u32 %v8419_v37, %v6842_v16 }
 0x279   :  { %4451 = vmatpush.bf16.msrb.mxu3 %v7367_v38  ;;  %4425 = vmatpush.bf16.msrb.mxu1 %v7111_v3  ;;  %v6891_v3 = vor.u32 %v8431_v45, %v6890_v44  ;;  %v6714_v59 = vld [vmem:[#allocation6 + $0x8] sm:$0xf]  ;;  %v8535_v36 = vld [vmem:[#allocation6 + $0x4b4] sm:$0xf0] }
 0x27a   :  { %v9161_v63 = vpack.c.bf16 %v2720_v0, %v2720_v0  ;;  %v7511_v0 = vor.u32 %v8584_v55, %v7508_v28  ;;  %v7450_v44 = vld [vmem:[#allocation6 + $0x5c8] sm:$0xf]  ;;  %v8571_v45 = vld [vmem:[#allocation6 + $0x5d4] sm:$0xf0]  ;;  %v7307_v47 = vor.u32 %v8535_v36, %v7306_v35  ;;  %v8628_v28 = vld [vmem:[#allocation6 + $0x7a4] sm:$0xf] }
 0x27b   :  { %4437 = vmatpush.bf16.msrb.mxu2 %v7255_v6  ;;  %v8600_v6 = vld [vmem:[#allocation6 + $0x6c4] sm:$0xf]  ;;  %v2647_v13 = vpop.f32.mrf.mxu0  ;;  %v7451_v57 = vor.u32 %v8571_v45, %v7450_v44  ;;  %v7258_v16 = vld [vmem:[#allocation6 + $0x448] sm:$0xf]  ;;  %v8523_v37 = vld [vmem:[#allocation6 + $0x454] sm:$0xf0] }
 0x27c   :  { %4362 = vmatmul.bf16.vlgmr.msra.gmra.mxu0 %v9161_v63  ;;  %v7575_v15 = vor.u32 %v8600_v6, %v7572_v10  ;;  %v7492_v10 = vld [vmem:[#allocation6 + $0x630] sm:$0xf0]  ;;  %v7242_v35 = vld [vmem:[#allocation6 + $0x428] sm:$0xf]  ;;  %v8519_v36 = vld [vmem:[#allocation6 + $0x434] sm:$0xf0] }
 0x27d   :  { %4452 = vmatpush.bf16.msrb.mxu3 %v7351_v21  ;;  %4458 = vmatpush.bf16.msra.mxu0 %v7591_v2  ;;  %v7338_v21 = vld [vmem:[#allocation6 + $0x4e8] sm:$0xf]  ;;  %v8555_v45 = vld [vmem:[#allocation6 + $0x554] sm:$0xf0] }
 0x27e   :  { %4426 = vmatpush.bf16.msrb.mxu1 %v7095_v12  ;;  %v6858_v2 = vld [vmem:[#allocation6 + $0x128] sm:$0xf]  ;;  %v7339_v9 = vor.u32 %v8543_v25, %v7338_v21 }
 0x27f   :  { %4438 = vmatpush.bf16.msrb.mxu2 %v7239_v26  ;;  %v6779_v26 = vor.u32 %v8403_v62, %v6778_v11  ;;  %v7322_v11 = vld [vmem:[#allocation6 + $0x4c8] sm:$0xf]  ;;  %v8539_v62 = vld [vmem:[#allocation6 + $0x4d4] sm:$0xf0] }
 0x280   :  { %4453 = vmatmul.bf16.vlgmr.msrb.gmra.mxu3 %v9155_v27  ;;  %v7323_v18 = vor.u32 %v8539_v62, %v7322_v11  ;;  %v7050_v25 = vld [vmem:[#allocation6 + $0x2a8] sm:$0xf]  ;;  %v8563_v11 = vld [vmem:[#allocation6 + $0x594] sm:$0xf0] }
 0x281   :  { %4497 = vmatpush.bf16.msra.mxu3 %v6955_v1  ;;  %4459 = vmatpush.bf16.msra.mxu0 %v7575_v15  ;;  %v6715_v1 = vor.u32 %v8387_v60, %v6714_v59  ;;  %v7495_v15 = vor.u32 %v8580_v29, %v7492_v10  ;;  %v7434_v59 = vld [vmem:[#allocation6 + $0x5a8] sm:$0xf]  ;;  %v8567_v60 = vld [vmem:[#allocation6 + $0x5b4] sm:$0xf0] }
 0x282   :  { %v7418_v10 = vld [vmem:[#allocation6 + $0x588] sm:$0xf] }
 0x283   :  { %4439 = vmatpush.bf16.msrb.mxu2 %v7223_v46  ;;  %v2684_v23 = vpop.f32.mrf.mxu3  ;;  %v7540_v46 = vld [vmem:[#allocation6 + $0x690] sm:$0xf0]  ;;  %v7386_v44 = vld [vmem:[#allocation6 + $0x548] sm:$0xf] }
 0x285   :  { %4498 = vmatpush.bf16.msra.mxu3 %v6939_v14  ;;  %4460 = vmatpush.bf16.msra.mxu0 %v7559_v30 }
 0x286   :  { %4440 = vmatmul.bf16.vlgmr.msrb.gmra.mxu2 %v9142_v42 }
 0x287   :  { %4484 = vmatpush.bf16.msra.mxu2 %v6827_v40  ;;  %v7543_v40 = vor.u32 %v8592_v31, %v7540_v46  ;;  %v7082_v31 = vld [vmem:[#allocation6 + $0x2e8] sm:$0xf]  ;;  %v7716_v46 = vld [vmem:[#allocation6 + $0x7f0] sm:$0xf0] }
 0x288   :  { %v7083_v43 = vor.u32 %v8479_v32, %v7082_v31  ;;  %v8620_v31 = vld [vmem:[#allocation6 + $0x764] sm:$0xf]  ;;  %v7018_v32 = vld [vmem:[#allocation6 + $0x268] sm:$0xf] }
 0x289   :  { %4499 = vmatpush.bf16.msra.mxu3 %v6923_v17  ;;  %v2671_v38 = vpop.f32.mrf.mxu2  ;;  %4461 = vmatpush.bf16.msra.mxu0 %v7543_v40  ;;  %v8575_v17 = vld [vmem:[#allocation6 + $0x5f4] sm:$0xf0] }
 0x28a   :  { %v2672_v61 = vadd.f32 %v2671_v38, %v1009_v49  ;;  %v7467_v40 = vor.u32 %v8575_v17, %v7466_v20  ;;  %v8475_v49 = vld [vmem:[#allocation6 + $0x2d4] sm:$0xf0] }
 0x28b   :  { %4485 = vmatpush.bf16.msra.mxu2 %v6811_v53  ;;  %v2686_v50 = vpop.f32.mrf.mxu3  ;;  %v6731_v53 = vor.u32 %v8391_v24, %v6730_v48  ;;  %v8632_v48 = vld [vmem:[#allocation6 + $0x7c4] sm:$0xf]  ;;  %v7066_v24 = vld [vmem:[#allocation6 + $0x2c8] sm:$0xf]  ;;  %v8559_v20 = vld [vmem:[#allocation6 + $0x574] sm:$0xf0] }
 0x28c   :  { %4414 = vmatmul.bf16.vlgmr.msrb.gmra.mxu0 %v9138_v51  ;;  %v2685_v12 = vadd.f32 %v2684_v23, %v2672_v61  ;;  %v7067_v58 = vor.u32 %v8475_v49, %v7066_v24  ;;  %v8471_v61 = vld [vmem:[#allocation6 + $0x2b4] sm:$0xf0]  ;;  %v7002_v24 = vld [vmem:[#allocation6 + $0x248] sm:$0xf] }
 0x28d   :  { %4500 = vmatpush.bf16.msra.mxu3 %v6907_v39  ;;  %v2710_v56 = vpop.f32.mrf.mxu1  ;;  %4462 = vmatpush.bf16.msra.mxu0 %v7527_v54  ;;  %v7290_v54 = vld [vmem:[#allocation6 + $0x488] sm:$0xf]  ;;  %v8459_v49 = vld [vmem:[#allocation6 + $0x254] sm:$0xf0] }
 0x28f   :  { %4486 = vmatpush.bf16.msra.mxu2 %v6795_v5  ;;  %v8423_v5 = vld [vmem:[#allocation6 + $0x134] sm:$0xf0] }
 0x290   :  { %v6859_v13 = vor.u32 %v8423_v5, %v6858_v2  ;;  %v8527_v2 = vld [vmem:[#allocation6 + $0x474] sm:$0xf0]  ;;  %v7435_v5 = vor.u32 %v8567_v60, %v7434_v59  ;;  %v7003_v59 = vor.u32 %v8459_v49, %v7002_v24  ;;  %v7370_v60 = vld [vmem:[#allocation6 + $0x528] sm:$0xf]  ;;  %v8401_v49 = vld [vmem:[#allocation6 + $0x8c] sm:$0xf] }
 0x291   :  { %4501 = vmatpush.bf16.msra.mxu3 %v6891_v3  ;;  %v2673_v6 = vpop.f32.mrf.mxu2  ;;  %4463 = vmatpush.bf16.msra.mxu0 %v7511_v0  ;;  %v7700_v3 = vld [vmem:[#allocation6 + $0x7d0] sm:$0xf0]  ;;  %v8507_v24 = vld [vmem:[#allocation6 + $0x3d4] sm:$0xf0] }
 0x292   :  { %v7684_v0 = vld [vmem:[#allocation6 + $0x7b0] sm:$0xf0] }
 0x293   :  { %4487 = vmatpush.bf16.msra.mxu2 %v6779_v26  ;;  %v2697_v14 = vpop.f32.mrf.mxu0  ;;  %v8576_v26 = vld [vmem:[#allocation6 + $0x604] sm:$0xf]  ;;  %v7687_v62 = vor.u32 %v8628_v28, %v7684_v0  ;;  %v6828_v28 = vld [vmem:[#allocation6 + $0xf8] sm:$0xf0]  ;;  %v8455_v0 = vld [vmem:[#allocation6 + $0x234] sm:$0xf0] }
 0x294   :  { %v2698_v8 = vadd.f32 %v2697_v14, %v2685_v12  ;;  %v7479_v39 = vor.u32 %v8576_v26, %v7476_v19  ;;  %v7034_v14 = vld [vmem:[#allocation6 + $0x288] sm:$0xf]  ;;  %v7668_v26 = vld [vmem:[#allocation6 + $0x790] sm:$0xf0] }
 0x295   :  { %4502 = vmatpush.bf16.msra.mxu3 %v6875_v22  ;;  %v2712_v30 = vpop.f32.mrf.mxu1  ;;  %4464 = vmatpush.bf16.msra.mxu0 %v7495_v15  ;;  %v2986_v22 = vld [vmem:[%s9313_s8] sm:$0xf]  ;;  %v8467_v15 = vld [vmem:[#allocation6 + $0x294] sm:$0xf0]  ;;  %v7402_v19 = vld [vmem:[#allocation6 + $0x568] sm:$0xf] }
 0x296   :  { %v2711_v23 = vadd.f32 %v2710_v56, %v2698_v8  ;;  %v7703_v56 = vor.u32 %v8632_v48, %v7700_v3  ;;  %v2988_v29 = vperm.slane %v2986_v22, 0  ;;  %v7419_v8 = vor.u32 %v8563_v11, %v7418_v10  ;;  %v8616_v48 = vld [vmem:[#allocation6 + $0x744] sm:$0xf]  ;;  %v7636_v3 = vld [vmem:[#allocation6 + $0x750] sm:$0xf0] }
 0x297   :  { %4488 = vmatpush.bf16.msra.mxu2 %v6763_v4  ;;  %v8636_v4 = vld [vmem:[#allocation6 + $0x7e4] sm:$0xf]  ;;  %v6986_v22 = vld [vmem:[#allocation6 + $0x228] sm:$0xf] }
 0x298   :  { %v7719_v38 = vor.u32 %v8636_v4, %v7716_v46  ;;  %v7259_v4 = vor.u32 %v8523_v37, %v7258_v16  ;;  %v7652_v46 = vld [vmem:[#allocation6 + $0x770] sm:$0xf0]  ;;  %v6987_v11 = vor.u32 %v8455_v0, %v6986_v22  ;;  %v8451_v37 = vld [vmem:[#allocation6 + $0x214] sm:$0xf0]  ;;  %v6764_v22 = vld [vmem:[#allocation6 + $0x78] sm:$0xf0] }
 0x299   :  { %4503 = vmatpush.bf16.msra.mxu3 %v6859_v13  ;;  %4465 = vmatpush.bf16.msra.mxu0 %v7479_v39  ;;  %v8624_v13 = vld [vmem:[#allocation6 + $0x784] sm:$0xf]  ;;  %v7403_v39 = vor.u32 %v8559_v20, %v7402_v19  ;;  %v7210_v20 = vld [vmem:[#allocation6 + $0x3e8] sm:$0xf] }
 0x29a   :  { %v7671_v30 = vor.u32 %v8624_v13, %v7668_v26  ;;  %v6970_v13 = vld [vmem:[#allocation6 + $0x208] sm:$0xf] }
 0x29b   :  { %4489 = vmatpush.bf16.msra.mxu2 %v6747_v41  ;;  %v2721_v41 = vmax.f32 %v2711_v23, 0.0  ;;  %v2699_v55 = vpop.f32.mrf.mxu0  ;;  %v8463_v23 = vld [vmem:[#allocation6 + $0x274] sm:$0xf0] }
 0x29c   :  { %4466 = vmatmul.bf16.vlgmr.msra.gmra.mxu0 %v9161_v63 }
 0x29d   :  { %v9168_v50 = vpack.c.bf16 %v2721_v41, %v2721_v41  ;;  %4504 = vmatpush.bf16.msra.mxu3 %v6843_v33  ;;  %4510 = vmatpush.bf16.msrb.mxu0 %v7083_v43  ;;  %v7019_v41 = vor.u32 %v8463_v23, %v7018_v32  ;;  %v8511_v32 = vld [vmem:[#allocation6 + $0x3f4] sm:$0xf0]  ;;  %v8405_v23 = vld [vmem:[#allocation6 + $0xac] sm:$0xf] }
 0x29f   :  { %4490 = vmatpush.bf16.msra.mxu2 %v6731_v53  ;;  %v8531_v53 = vld [vmem:[#allocation6 + $0x494] sm:$0xf0]  ;;  %4375 = vmatmul.bf16.vlgmr.msra.gmra.mxu1 %v9168_v50 }
 0x2a0   :  { %4471 = vmatpush.bf16.msra.mxu1 %v7719_v38  ;;  %v7291_v21 = vor.u32 %v8531_v53, %v7290_v54  ;;  %4505 = vmatmul.bf16.vlgmr.msra.gmra.mxu3 %v9120_v34  ;;  %v7655_v38 = vor.u32 %v8620_v31, %v7652_v46  ;;  %v7226_v54 = vld [vmem:[#allocation6 + $0x408] sm:$0xf]  ;;  %v8515_v53 = vld [vmem:[#allocation6 + $0x414] sm:$0xf0] }
 0x2a1   :  { %4549 = vmatpush.bf16.msrb.mxu3 %v7467_v40  ;;  %4511 = vmatpush.bf16.msrb.mxu0 %v7067_v58  ;;  %v8413_v58 = vld [vmem:[#allocation6 + $0xec] sm:$0xf] }
 0x2a3   :  { %4491 = vmatpush.bf16.msra.mxu2 %v6715_v1  ;;  %v7274_v1 = vld [vmem:[#allocation6 + $0x468] sm:$0xf]  ;;  %v4298_v6 = vpop.f32.mrf.mxu3 }
 0x2a4   :  { %4472 = vmatpush.bf16.msra.mxu1 %v7703_v56  ;;  %v7275_v12 = vor.u32 %v8527_v2, %v7274_v1  ;;  %v8551_v56 = vld [vmem:[#allocation6 + $0x534] sm:$0xf0]  ;;  %v6831_v1 = vor.u32 %v8413_v58, %v6828_v28  ;;  %v8612_v2 = vld [vmem:[#allocation6 + $0x724] sm:$0xf]  ;;  %v6924_v58 = vld [vmem:[#allocation6 + $0x1b8] sm:$0xf0] }
 0x2a5   :  { %4550 = vmatpush.bf16.msrb.mxu3 %v7451_v57  ;;  %v7387_v57 = vor.u32 %v8555_v45, %v7386_v44  ;;  %v7211_v44 = vor.u32 %v8511_v32, %v7210_v20  ;;  %v8591_v20 = vld [vmem:[#allocation6 + $0x674] sm:$0xf0] }
 0x2a6   :  { %4492 = vmatmul.bf16.vlgmr.msra.gmra.mxu2 %v9125_v52 }
 0x2a7   :  { %4536 = vmatpush.bf16.msrb.mxu2 %v7339_v9  ;;  %v7051_v9 = vor.u32 %v8471_v61, %v7050_v25  ;;  %v7639_v25 = vor.u32 %v8616_v48, %v7636_v3  ;;  %v7227_v61 = vor.u32 %v8515_v53, %v7226_v54  ;;  %v8603_v48 = vld [vmem:[#allocation6 + $0x6d4] sm:$0xf0]  ;;  %v6780_v3 = vld [vmem:[#allocation6 + $0x98] sm:$0xf0] }
 0x2a8   :  { %4473 = vmatpush.bf16.msra.mxu1 %v7687_v62  ;;  %v8608_v62 = vld [vmem:[#allocation6 + $0x704] sm:$0xf] }
 0x2a9   :  { %4551 = vmatpush.bf16.msrb.mxu3 %v7435_v5  ;;  %4512 = vmatpush.bf16.msrb.mxu0 %v7051_v9  ;;  %v4285_v17 = vpop.f32.mrf.mxu2  ;;  %v7620_v5 = vld [vmem:[#allocation6 + $0x730] sm:$0xf0]  ;;  %v8409_v9 = vld [vmem:[#allocation6 + $0xcc] sm:$0xf] }
 0x2aa   :  { %v4286_v33 = vadd.f32 %v4285_v17, %v2988_v29  ;;  %v6812_v29 = vld [vmem:[#allocation6 + $0xd8] sm:$0xf0]  ;;  %v7623_v16 = vor.u32 %v8612_v2, %v7620_v5  ;;  %v7594_v17 = vld [vmem:[#allocation6 + $0x6e8] sm:$0xf]  ;;  %v8433_v2 = vld [vmem:[#allocation6 + $0x18c] sm:$0xf] }
 0x2ab   :  { %4537 = vmatpush.bf16.msrb.mxu2 %v7323_v18  ;;  %v7035_v18 = vor.u32 %v8467_v15, %v7034_v14  ;;  %v4300_v40 = vpop.f32.mrf.mxu3  ;;  %v7354_v14 = vld [vmem:[#allocation6 + $0x508] sm:$0xf]  ;;  %v8547_v15 = vld [vmem:[#allocation6 + $0x514] sm:$0xf0]  ;;  %v6815_v19 = vor.u32 %v8409_v9, %v6812_v29  ;;  %v6908_v5 = vld [vmem:[#allocation6 + $0x198] sm:$0xf0] }
 0x2ac   :  { %v4299_v43 = vadd.f32 %v4298_v6, %v4286_v33  ;;  %4474 = vmatpush.bf16.msra.mxu1 %v7671_v30  ;;  %v7371_v6 = vor.u32 %v8551_v56, %v7370_v60  ;;  %v8607_v30 = vld [vmem:[#allocation6 + $0x6f4] sm:$0xf0]  ;;  %v7355_v31 = vor.u32 %v8547_v15, %v7354_v14  ;;  %v6796_v33 = vld [vmem:[#allocation6 + $0xb8] sm:$0xf0]  ;;  %v7178_v60 = vld [vmem:[#allocation6 + $0x3a8] sm:$0xf]  ;;  %v6911_v14 = vor.u32 %v8433_v2, %v6908_v5 }
 0x2ad   :  { %4552 = vmatpush.bf16.msrb.mxu3 %v7419_v8  ;;  %4513 = vmatpush.bf16.msrb.mxu0 %v7035_v18  ;;  %v4324_v55 = vpop.f32.mrf.mxu1  ;;  %v8445_v8 = vld [vmem:[#allocation6 + $0x1ec] sm:$0xf]  ;;  %v6956_v18 = vld [vmem:[#allocation6 + $0x1f8] sm:$0xf0]  ;;  %v7595_v40 = vor.u32 %v8607_v30, %v7594_v17  ;;  %v6799_v45 = vor.u32 %v8405_v23, %v6796_v33  ;;  %v7562_v56 = vld [vmem:[#allocation6 + $0x6a8] sm:$0xf] }
 0x2ae   :  { %v7162_v29 = vld [vmem:[#allocation6 + $0x388] sm:$0xf]  ;;  %v8495_v17 = vld [vmem:[#allocation6 + $0x374] sm:$0xf0]  ;;  %v8389_v30 = vld [vmem:[#allocation6 + $0x2c] sm:$0xf] }
 0x2af   :  { %4538 = vmatpush.bf16.msrb.mxu2 %v7307_v47  ;;  %v7243_v47 = vor.u32 %v8519_v36, %v7242_v35  ;;  %4427 = vmatmul.bf16.vlgmr.msrb.gmra.mxu1 %v9134_v7  ;;  %v6971_v35 = vor.u32 %v8451_v37, %v6970_v13  ;;  %v6959_v36 = vor.u32 %v8445_v8, %v6956_v18  ;;  %v6748_v13 = vld [vmem:[#allocation6 + $0x58] sm:$0xf0]  ;;  %v7146_v18 = vld [vmem:[#allocation6 + $0x368] sm:$0xf]  ;;  %v8425_v33 = vld [vmem:[#allocation6 + $0x14c] sm:$0xf] }
 0x2b0   :  { %4475 = vmatpush.bf16.msra.mxu1 %v7655_v38  ;;  %v7194_v38 = vld [vmem:[#allocation6 + $0x3c8] sm:$0xf]  ;;  %v8417_v5 = vld [vmem:[#allocation6 + $0x10c] sm:$0xf] }
 0x2b1   :  { %4553 = vmatpush.bf16.msrb.mxu3 %v7403_v39  ;;  %4514 = vmatpush.bf16.msrb.mxu0 %v7019_v41  ;;  %v8441_v41 = vld [vmem:[#allocation6 + $0x1cc] sm:$0xf]  ;;  %v7195_v28 = vor.u32 %v8507_v24, %v7194_v38  ;;  %v7482_v2 = vld [vmem:[#allocation6 + $0x608] sm:$0xf] }
 0x2b2   :  { %v8385_v38 = vld [vmem:[#allocation6 + $0xc] sm:$0xf] }
 0x2b3   :  { %4539 = vmatpush.bf16.msrb.mxu2 %v7291_v21  ;;  %v4287_v21 = vpop.f32.mrf.mxu2  ;;  %v4311_v10 = vpop.f32.mrf.mxu0  ;;  %v8541_v24 = vld [vmem:[#allocation6 + $0x4ec] sm:$0xf] }
 0x2b4   :  { %v4312_v26 = vadd.f32 %v4311_v10, %v4299_v43  ;;  %4476 = vmatpush.bf16.msra.mxu1 %v7639_v25  ;;  %v6940_v43 = vld [vmem:[#allocation6 + $0x1d8] sm:$0xf0]  ;;  %v8599_v21 = vld [vmem:[#allocation6 + $0x6b4] sm:$0xf0]  ;;  %v7546_v10 = vld [vmem:[#allocation6 + $0x688] sm:$0xf] }
 0x2b5   :  { %4554 = vmatpush.bf16.msrb.mxu3 %v7387_v57  ;;  %4515 = vmatpush.bf16.msrb.mxu0 %v7003_v59  ;;  %v6943_v53 = vor.u32 %v8441_v41, %v6940_v43  ;;  %v8437_v57 = vld [vmem:[#allocation6 + $0x1ac] sm:$0xf]  ;;  %v6783_v59 = vor.u32 %v8401_v49, %v6780_v3  ;;  %v8503_v25 = vld [vmem:[#allocation6 + $0x3b4] sm:$0xf0]  ;;  %v7130_v41 = vld [vmem:[#allocation6 + $0x348] sm:$0xf] }
 0x2b6   :  { %v9177_v46 = vadd.f32 %v4324_v55, %v4312_v26  ;;  %v6927_v0 = vor.u32 %v8437_v57, %v6924_v58  ;;  %v8429_v26 = vld [vmem:[#allocation6 + $0x16c] sm:$0xf]  ;;  %v7514_v43 = vld [vmem:[#allocation6 + $0x648] sm:$0xf]  ;;  %v7340_v49 = vld [vmem:[#allocation6 + $0x4f8] sm:$0xf0] }
 0x2b7   :  { %4540 = vmatpush.bf16.msrb.mxu2 %v7275_v12  ;;  %v7604_v12 = vld [vmem:[#allocation6 + $0x710] sm:$0xf0]  ;;  %v7498_v57 = vld [vmem:[#allocation6 + $0x628] sm:$0xf]  ;;  %v8583_v58 = vld [vmem:[#allocation6 + $0x634] sm:$0xf0] }
 0x2b8   :  { %4477 = vmatpush.bf16.msra.mxu1 %v7623_v16  ;;  %v7607_v39 = vor.u32 %v8608_v62, %v7604_v12  ;;  %v8499_v62 = vld [vmem:[#allocation6 + $0x394] sm:$0xf0]  ;;  %v8393_v12 = vld [vmem:[#allocation6 + $0x4c] sm:$0xf]  ;;  %v6892_v16 = vld [vmem:[#allocation6 + $0x178] sm:$0xf0] }
 0x2b9   :  { %4555 = vmatpush.bf16.msrb.mxu3 %v7371_v6  ;;  %4516 = vmatpush.bf16.msrb.mxu0 %v6987_v11  ;;  %v7179_v6 = vor.u32 %v8503_v25, %v7178_v60  ;;  %v8595_v11 = vld [vmem:[#allocation6 + $0x694] sm:$0xf0]  ;;  %v7163_v37 = vor.u32 %v8499_v62, %v7162_v29  ;;  %v6751_v8 = vor.u32 %v8393_v12, %v6748_v13  ;;  %v7324_v25 = vld [vmem:[#allocation6 + $0x4d8] sm:$0xf0]  ;;  %v7722_v12 = vld [vmem:[#allocation6 + $0x7e8] sm:$0xf] }
 0x2ba   :  { %v7547_v15 = vor.u32 %v8595_v11, %v7546_v10  ;;  %v8487_v60 = vld [vmem:[#allocation6 + $0x334] sm:$0xf0]  ;;  %v8573_v10 = vld [vmem:[#allocation6 + $0x5ec] sm:$0xf]  ;;  %v7468_v11 = vld [vmem:[#allocation6 + $0x5f8] sm:$0xf0] }
 0x2bb   :  { %4541 = vmatpush.bf16.msrb.mxu2 %v7259_v4  ;;  %v4326_v4 = vpop.f32.mrf.mxu1  ;;  %v4313_v54 = vpop.f32.mrf.mxu0  ;;  %v8579_v29 = vld [vmem:[#allocation6 + $0x614] sm:$0xf0]  ;;  %v8477_v13 = vld [vmem:[#allocation6 + $0x2ec] sm:$0xf] }
 0x2bc   :  { %4478 = vmatpush.bf16.msra.mxu1 %v7607_v39  ;;  %v6732_v4 = vld [vmem:[#allocation6 + $0x38] sm:$0xf0]  ;;  %v7147_v39 = vor.u32 %v8495_v17, %v7146_v18  ;;  %v8421_v54 = vld [vmem:[#allocation6 + $0x12c] sm:$0xf]  ;;  %v7471_v18 = vor.u32 %v8573_v10, %v7468_v11  ;;  %v8623_v11 = vld [vmem:[#allocation6 + $0x774] sm:$0xf0] }
 0x2bd   :  { %4556 = vmatpush.bf16.msrb.mxu3 %v7355_v31  ;;  %4517 = vmatpush.bf16.msrb.mxu0 %v6971_v35  ;;  %v6895_v31 = vor.u32 %v8429_v26, %v6892_v16  ;;  %v6876_v35 = vld [vmem:[#allocation6 + $0x158] sm:$0xf0]  ;;  %v8639_v26 = vld [vmem:[#allocation6 + $0x7f4] sm:$0xf0]  ;;  %v8533_v16 = vld [vmem:[#allocation6 + $0x4ac] sm:$0xf] }
 0x2be   :  { %v8569_v17 = vld [vmem:[#allocation6 + $0x5cc] sm:$0xf]  ;;  %v7020_v10 = vld [vmem:[#allocation6 + $0x278] sm:$0xf0] }
 0x2bf   :  { %4542 = vmatpush.bf16.msrb.mxu2 %v7243_v47  ;;  %v7578_v47 = vld [vmem:[#allocation6 + $0x6c8] sm:$0xf]  ;;  %4479 = vmatmul.bf16.vlgmr.msra.gmra.mxu1 %v9168_v50 }
 0x2c0   :  { %v7579_v55 = vor.u32 %v8603_v48, %v7578_v47  ;;  %4523 = vmatpush.bf16.msrb.mxu1 %v7211_v44  ;;  %4518 = vmatmul.bf16.vlgmr.msrb.gmra.mxu0 %v9138_v51  ;;  %v8587_v44 = vld [vmem:[#allocation6 + $0x654] sm:$0xf0]  ;;  %v6716_v47 = vld [vmem:[#allocation6 + $0x18] sm:$0xf0]  ;;  %v6879_v48 = vor.u32 %v8425_v33, %v6876_v35 }
 0x2c1   :  { %4601 = vmatpush.bf16.msra.mxu3 %v6959_v36  ;;  %4562 = vmatpush.bf16.msra.mxu0 %v7595_v40  ;;  %v6735_v40 = vor.u32 %v8389_v30, %v6732_v4  ;;  %v7515_v3 = vor.u32 %v8587_v44, %v7514_v43  ;;  %v7452_v30 = vld [vmem:[#allocation6 + $0x5d8] sm:$0xf0]  ;;  %v7723_v4 = vor.u32 %v8639_v26, %v7722_v12  ;;  %v8635_v35 = vld [vmem:[#allocation6 + $0x7d4] sm:$0xf0]  ;;  %v8565_v43 = vld [vmem:[#allocation6 + $0x5ac] sm:$0xf] }
 0x2c2   :  { %4557 = vmatmul.bf16.vlgmr.msrb.gmra.mxu3 %v9155_v27  ;;  %v7068_v33 = vld [vmem:[#allocation6 + $0x2d8] sm:$0xf0] }
 0x2c3   :  { %4543 = vmatpush.bf16.msrb.mxu2 %v7227_v61  ;;  %v8397_v61 = vld [vmem:[#allocation6 + $0x6c] sm:$0xf]  ;;  %v7436_v44 = vld [vmem:[#allocation6 + $0x5b8] sm:$0xf0] }
 0x2c4   :  { %4524 = vmatpush.bf16.msrb.mxu1 %v7195_v28  ;;  %v6767_v9 = vor.u32 %v8397_v61, %v6764_v22  ;;  %v7343_v28 = vor.u32 %v8541_v24, %v7340_v49  ;;  %v7499_v22 = vor.u32 %v8583_v58, %v7498_v57  ;;  %v7052_v24 = vld [vmem:[#allocation6 + $0x2b8] sm:$0xf0]  ;;  %v8631_v49 = vld [vmem:[#allocation6 + $0x7b4] sm:$0xf0] }
 0x2c5   :  { %4602 = vmatpush.bf16.msra.mxu3 %v6943_v53  ;;  %4563 = vmatpush.bf16.msra.mxu0 %v7579_v55  ;;  %v6860_v53 = vld [vmem:[#allocation6 + $0x138] sm:$0xf0]  ;;  %v6719_v55 = vor.u32 %v8385_v38, %v6716_v47  ;;  %v7690_v47 = vld [vmem:[#allocation6 + $0x7a8] sm:$0xf] }
 0x2c6   :  { %4544 = vmatmul.bf16.vlgmr.msrb.gmra.mxu2 %v9142_v42  ;;  %v7420_v57 = vld [vmem:[#allocation6 + $0x598] sm:$0xf0]  ;;  %v7691_v58 = vor.u32 %v8631_v49, %v7690_v47  ;;  %v8653_v49 = vld [vmem:[#allocation7 + $0x64] sm:$0xf0] }
 0x2c7   :  { %4588 = vmatpush.bf16.msra.mxu2 %v6831_v1  ;;  %v7563_v1 = vor.u32 %v8599_v21, %v7562_v56  ;;  %v6863_v56 = vor.u32 %v8421_v54, %v6860_v53  ;;  %v8537_v21 = vld [vmem:[#allocation6 + $0x4cc] sm:$0xf]  ;;  %v7276_v54 = vld [vmem:[#allocation6 + $0x478] sm:$0xf0]  ;;  %v7439_v53 = vor.u32 %v8565_v43, %v7436_v44 }
 0x2c8   :  { %4525 = vmatpush.bf16.msrb.mxu1 %v7179_v6  ;;  %v6844_v6 = vld [vmem:[#allocation6 + $0x118] sm:$0xf0]  ;;  %v7327_v62 = vor.u32 %v8537_v21, %v7324_v25  ;;  %v8627_v21 = vld [vmem:[#allocation6 + $0x794] sm:$0xf0]  ;;  %v8453_v43 = vld [vmem:[#allocation6 + $0x22c] sm:$0xf] }
 0x2c9   :  { %4603 = vmatpush.bf16.msra.mxu3 %v6927_v0  ;;  %4564 = vmatpush.bf16.msra.mxu0 %v7563_v1  ;;  %v4337_v32 = vpop.f32.mrf.mxu2  ;;  %v7098_v0 = vld [vmem:[#allocation6 + $0x308] sm:$0xf]  ;;  %v8483_v1 = vld [vmem:[#allocation6 + $0x314] sm:$0xf0]  ;;  %v7260_v25 = vld [vmem:[#allocation6 + $0x458] sm:$0xf0] }
 0x2ca   :  { %v9184_v36 = vadd.f32 %v4337_v32, %v9177_v46  ;;  %v7706_v32 = vld [vmem:[#allocation6 + $0x7c8] sm:$0xf]  ;;  %v7244_v12 = vld [vmem:[#allocation6 + $0x438] sm:$0xf0] }
 0x2cb   :  { %4589 = vmatpush.bf16.msra.mxu2 %v6815_v19  ;;  %v7530_v19 = vld [vmem:[#allocation6 + $0x668] sm:$0xf]  ;;  %v7388_v26 = vld [vmem:[#allocation6 + $0x558] sm:$0xf0] }
 0x2cc   :  { %v7531_v23 = vor.u32 %v8591_v20, %v7530_v19  ;;  %4526 = vmatpush.bf16.msrb.mxu1 %v7163_v37  ;;  %v7308_v37 = vld [vmem:[#allocation6 + $0x4b8] sm:$0xf0]  ;;  %v7099_v19 = vor.u32 %v8483_v1, %v7098_v0  ;;  %v8557_v0 = vld [vmem:[#allocation6 + $0x56c] sm:$0xf] }
 0x2cd   :  { %4604 = vmatpush.bf16.msra.mxu3 %v6911_v14  ;;  %4565 = vmatpush.bf16.msra.mxu0 %v7547_v15  ;;  %v7084_v14 = vld [vmem:[#allocation6 + $0x2f8] sm:$0xf0]  ;;  %v6847_v15 = vor.u32 %v8417_v5, %v6844_v6 }
 0x2ce   :  { %v7087_v20 = vor.u32 %v8477_v13, %v7084_v14  ;;  %v7404_v1 = vld [vmem:[#allocation6 + $0x578] sm:$0xf0] }
 0x2cf   :  { %4590 = vmatpush.bf16.msra.mxu2 %v6799_v45  ;;  %v8491_v45 = vld [vmem:[#allocation6 + $0x354] sm:$0xf0]  ;;  %v7407_v13 = vor.u32 %v8557_v0, %v7404_v1  ;;  %v6988_v44 = vld [vmem:[#allocation6 + $0x238] sm:$0xf0]  ;;  %v7770_v0 = vld [vmem:[#allocation7 + $0x50] sm:$0xf] }
 0x2d0   :  { %4527 = vmatpush.bf16.msrb.mxu1 %v7147_v39  ;;  %v7131_v46 = vor.u32 %v8491_v45, %v7130_v41  ;;  %v8529_v39 = vld [vmem:[#allocation6 + $0x48c] sm:$0xf]  ;;  %v7707_v45 = vor.u32 %v8635_v35, %v7706_v32  ;;  %v7786_v32 = vld [vmem:[#allocation7 + $0x70] sm:$0xf]  ;;  %v8651_v1 = vld [vmem:[#allocation7 + $0x54] sm:$0xf0] }
 0x2d1   :  { %4605 = vmatpush.bf16.msra.mxu3 %v6895_v31  ;;  %4566 = vmatpush.bf16.msra.mxu0 %v7531_v23  ;;  %v4339_v61 = vpop.f32.mrf.mxu2  ;;  %v7311_v31 = vor.u32 %v8533_v16, %v7308_v37  ;;  %v8473_v23 = vld [vmem:[#allocation6 + $0x2cc] sm:$0xf] }
 0x2d2   :  { %v7071_v41 = vor.u32 %v8473_v23, %v7068_v33  ;;  %v8655_v23 = vld [vmem:[#allocation7 + $0x74] sm:$0xf0]  ;;  %v8549_v35 = vld [vmem:[#allocation6 + $0x52c] sm:$0xf] }
 0x2d3   :  { %4591 = vmatpush.bf16.msra.mxu2 %v6783_v59  ;;  %v7114_v59 = vld [vmem:[#allocation6 + $0x328] sm:$0xf]  ;;  %v7787_v47 = vor.u32 %v8655_v23, %v7786_v32  ;;  %v8647_v32 = vld [vmem:[#allocation7 + $0x34] sm:$0xf0]  ;;  %v7842_v23 = vld [vmem:[#allocation7 + $0xe0] sm:$0xf] }
 0x2d4   :  { %4528 = vmatpush.bf16.msrb.mxu1 %v7131_v46 }
 0x2d5   :  { %4606 = vmatpush.bf16.msra.mxu3 %v6879_v48  ;;  %4567 = vmatpush.bf16.msra.mxu0 %v7515_v3  ;;  %v8469_v48 = vld [vmem:[#allocation6 + $0x2ac] sm:$0xf] }
 0x2d6   :  { %v8525_v3 = vld [vmem:[#allocation6 + $0x46c] sm:$0xf]  ;;  %v7055_v46 = vor.u32 %v8469_v48, %v7052_v24  ;;  %v7778_v24 = vld [vmem:[#allocation7 + $0x60] sm:$0xf] }
 0x2d7   :  { %4592 = vmatpush.bf16.msra.mxu2 %v6767_v9  ;;  %v7115_v9 = vor.u32 %v8487_v60, %v7114_v59  ;;  %v7674_v59 = vld [vmem:[#allocation6 + $0x788] sm:$0xf]  ;;  %v8465_v60 = vld [vmem:[#allocation6 + $0x28c] sm:$0xf] }
 0x2d8   :  { %v7675_v5 = vor.u32 %v8627_v21, %v7674_v59  ;;  %v8611_v59 = vld [vmem:[#allocation6 + $0x714] sm:$0xf0]  ;;  %v7779_v21 = vor.u32 %v8653_v49, %v7778_v24  ;;  %v7834_v24 = vld [vmem:[#allocation7 + $0xd0] sm:$0xf] }
 0x2d9   :  { %4607 = vmatpush.bf16.msra.mxu3 %v6863_v56  ;;  %4568 = vmatpush.bf16.msra.mxu0 %v7499_v22  ;;  %v7036_v56 = vld [vmem:[#allocation6 + $0x298] sm:$0xf0]  ;;  %v8667_v49 = vld [vmem:[#allocation7 + $0xd4] sm:$0xf0] }
 0x2da   :  { %4529 = vmatpush.bf16.msrb.mxu1 %v7115_v9  ;;  %v7039_v22 = vor.u32 %v8465_v60, %v7036_v56  ;;  %v7658_v9 = vld [vmem:[#allocation6 + $0x768] sm:$0xf]  ;;  %v8605_v60 = vld [vmem:[#allocation6 + $0x6ec] sm:$0xf]  ;;  %v7596_v56 = vld [vmem:[#allocation6 + $0x6f8] sm:$0xf0] }
 0x2db   :  { %4593 = vmatpush.bf16.msra.mxu2 %v6751_v8  ;;  %v7483_v8 = vor.u32 %v8579_v29, %v7482_v2  ;;  %v8461_v29 = vld [vmem:[#allocation6 + $0x26c] sm:$0xf]  ;;  %v7659_v37 = vor.u32 %v8623_v11, %v7658_v9 }
 0x2dc   :  { %v7023_v14 = vor.u32 %v8461_v29, %v7020_v10  ;;  %v8601_v29 = vld [vmem:[#allocation6 + $0x6cc] sm:$0xf]  ;;  %v7580_v10 = vld [vmem:[#allocation6 + $0x6d8] sm:$0xf0] }
 0x2dd   :  { %4608 = vmatpush.bf16.msra.mxu3 %v6847_v15  ;;  %4569 = vmatpush.bf16.msra.mxu0 %v7483_v8  ;;  %v8553_v15 = vld [vmem:[#allocation6 + $0x54c] sm:$0xf] }
 0x2de   :  { %4530 = vmatpush.bf16.msrb.mxu1 %v7099_v19  ;;  %v8457_v19 = vld [vmem:[#allocation6 + $0x24c] sm:$0xf] }
 0x2df   :  { %4594 = vmatpush.bf16.msra.mxu2 %v6735_v40  ;;  %v7292_v40 = vld [vmem:[#allocation6 + $0x498] sm:$0xf0]  ;;  %v8505_v11 = vld [vmem:[#allocation6 + $0x3cc] sm:$0xf] }
 0x2e0   :  { %v7295_v38 = vor.u32 %v8529_v39, %v7292_v40  ;;  %4570 = vmatmul.bf16.vlgmr.msra.gmra.mxu0 %v9161_v63  ;;  %4609 = vmatmul.bf16.vlgmr.msra.gmra.mxu3 %v9120_v34  ;;  %v8521_v34 = vld [vmem:[#allocation6 + $0x44c] sm:$0xf]  ;;  %v7372_v39 = vld [vmem:[#allocation6 + $0x538] sm:$0xf0] }
 0x2e1   :  { %4653 = vmatpush.bf16.msrb.mxu3 %v7471_v18  ;;  %4614 = vmatpush.bf16.msrb.mxu0 %v7087_v20  ;;  %v7263_v6 = vor.u32 %v8521_v34, %v7260_v25  ;;  %v9192_v16 = vpop.f32.mrf.mxu3  ;;  %v7642_v18 = vld [vmem:[#allocation6 + $0x748] sm:$0xf]  ;;  %v7004_v20 = vld [vmem:[#allocation6 + $0x258] sm:$0xf0]  ;;  %v7375_v48 = vor.u32 %v8549_v35, %v7372_v39  ;;  %v8509_v25 = vld [vmem:[#allocation6 + $0x3ec] sm:$0xf] }
 0x2e2   :  { %4575 = vmatpush.bf16.msra.mxu1 %v7723_v4  ;;  %v7228_v4 = vld [vmem:[#allocation6 + $0x418] sm:$0xf0]  ;;  %v7007_v33 = vor.u32 %v8457_v19, %v7004_v20 }
 0x2e3   :  { %4595 = vmatpush.bf16.msra.mxu2 %v6719_v55  ;;  %4531 = vmatmul.bf16.vlgmr.msrb.gmra.mxu1 %v9134_v7  ;;  %v8561_v55 = vld [vmem:[#allocation6 + $0x58c] sm:$0xf]  ;;  %v7564_v19 = vld [vmem:[#allocation6 + $0x6b8] sm:$0xf0] }
 0x2e4   :  { %v7423_v61 = vor.u32 %v8561_v55, %v7420_v57  ;;  %v7610_v57 = vld [vmem:[#allocation6 + $0x708] sm:$0xf] }
 0x2e5   :  { %4615 = vmatpush.bf16.msrb.mxu0 %v7071_v41 }
 0x2e6   :  { %4596 = vmatmul.bf16.vlgmr.msra.gmra.mxu2 %v9125_v52  ;;  %v7455_v52 = vor.u32 %v8569_v17, %v7452_v30  ;;  %4576 = vmatpush.bf16.msra.mxu1 %v7707_v45  ;;  %v8619_v17 = vld [vmem:[#allocation6 + $0x754] sm:$0xf0]  ;;  %v8513_v30 = vld [vmem:[#allocation6 + $0x40c] sm:$0xf]  ;;  %v7626_v45 = vld [vmem:[#allocation6 + $0x728] sm:$0xf] }
 0x2e7   :  { %4640 = vmatpush.bf16.msrb.mxu2 %v7343_v28  ;;  %v7279_v28 = vor.u32 %v8525_v3, %v7276_v54  ;;  %v7231_v41 = vor.u32 %v8513_v30, %v7228_v4  ;;  %v6991_v3 = vor.u32 %v8453_v43, %v6988_v44  ;;  %v8545_v54 = vld [vmem:[#allocation6 + $0x50c] sm:$0xf]  ;;  %v7180_v30 = vld [vmem:[#allocation6 + $0x3b8] sm:$0xf0]  ;;  %v7746_v44 = vld [vmem:[#allocation7 + $0x20] sm:$0xf] }
 0x2e8   :  { %4654 = vmatpush.bf16.msrb.mxu3 %v7455_v52  ;;  %v7643_v52 = vor.u32 %v8619_v17, %v7642_v18  ;;  %v8597_v18 = vld [vmem:[#allocation6 + $0x6ac] sm:$0xf] }
 0x2e9   :  { %4616 = vmatpush.bf16.msrb.mxu0 %v7055_v46  ;;  %v9190_v2 = vpop.f32.mrf.mxu2  ;;  %v4352_v46 = vpop.f32.mrf.mxu3  ;;  %v8501_v17 = vld [vmem:[#allocation6 + $0x3ac] sm:$0xf]  ;;  %v7567_v35 = vor.u32 %v8597_v18, %v7564_v19  ;;  %v7500_v18 = vld [vmem:[#allocation6 + $0x638] sm:$0xf0] }
 0x2ea   :  { %4577 = vmatpush.bf16.msra.mxu1 %v7691_v58  ;;  %v8449_v58 = vld [vmem:[#allocation6 + $0x20c] sm:$0xf]  ;;  %v7183_v39 = vor.u32 %v8501_v17, %v7180_v30  ;;  %v7532_v46 = vld [vmem:[#allocation6 + $0x678] sm:$0xf0] }
 0x2eb   :  { %4641 = vmatpush.bf16.msrb.mxu2 %v7327_v62  ;;  %v8517_v62 = vld [vmem:[#allocation6 + $0x42c] sm:$0xf]  ;;  %v7116_v17 = vld [vmem:[#allocation6 + $0x338] sm:$0xf0] }
 0x2ec   :  { %4655 = vmatpush.bf16.msrb.mxu3 %v7439_v53  ;;  %v7247_v8 = vor.u32 %v8517_v62, %v7244_v12  ;;  %v7356_v53 = vld [vmem:[#allocation6 + $0x518] sm:$0xf0]  ;;  %v7771_v12 = vor.u32 %v8651_v1, %v7770_v0  ;;  %v8489_v1 = vld [vmem:[#allocation6 + $0x34c] sm:$0xf] }
 0x2ed   :  { %4617 = vmatpush.bf16.msrb.mxu0 %v7039_v22  ;;  %v7359_v34 = vor.u32 %v8545_v54, %v7356_v53  ;;  %v7196_v62 = vld [vmem:[#allocation6 + $0x3d8] sm:$0xf0]  ;;  %v8589_v53 = vld [vmem:[#allocation6 + $0x66c] sm:$0xf] }
 0x2ee   :  { %4578 = vmatpush.bf16.msra.mxu1 %v7675_v5  ;;  %v7611_v5 = vor.u32 %v8611_v59, %v7610_v57  ;;  %v8493_v57 = vld [vmem:[#allocation6 + $0x36c] sm:$0xf]  ;;  %v7738_v59 = vld [vmem:[#allocation7 + $0x10] sm:$0xf] }
 0x2ef   :  { %4642 = vmatpush.bf16.msrb.mxu2 %v7311_v31  ;;  %v7391_v31 = vor.u32 %v8553_v15, %v7388_v26  ;;  %v7850_v15 = vld [vmem:[#allocation7 + $0xf0] sm:$0xf]  ;;  %v7583_v26 = vor.u32 %v8601_v29, %v7580_v10  ;;  %v8641_v29 = vld [vmem:[#allocation7 + $0x4] sm:$0xf0] }
 0x2f0   :  { %4656 = vmatpush.bf16.msrb.mxu3 %v7423_v61  ;;  %v7212_v61 = vld [vmem:[#allocation6 + $0x3f8] sm:$0xf0]  ;;  %v7818_v10 = vld [vmem:[#allocation7 + $0xb0] sm:$0xf] }
 0x2f1   :  { %4618 = vmatpush.bf16.msrb.mxu0 %v7023_v14  ;;  %v4391_v40 = vpop.f32.mrf.mxu2  ;;  %v7215_v9 = vor.u32 %v8509_v25, %v7212_v61  ;;  %v8649_v14 = vld [vmem:[#allocation7 + $0x44] sm:$0xf0]  ;;  %v8585_v61 = vld [vmem:[#allocation6 + $0x64c] sm:$0xf] }
 0x2f2   :  { %4579 = vmatpush.bf16.msra.mxu1 %v7659_v37  ;;  %v8671_v37 = vld [vmem:[#allocation7 + $0xf4] sm:$0xf0]  ;;  %v8593_v40 = vld [vmem:[#allocation6 + $0x68c] sm:$0xf] }
 0x2f3   :  { %4643 = vmatpush.bf16.msrb.mxu2 %v7295_v38  ;;  %v8615_v38 = vld [vmem:[#allocation6 + $0x734] sm:$0xf0]  ;;  %v7851_v20 = vor.u32 %v8671_v37, %v7850_v15 }
 0x2f4   :  { %4657 = vmatpush.bf16.msrb.mxu3 %v7407_v13  ;;  %v7627_v55 = vor.u32 %v8615_v38, %v7626_v45  ;;  %v7762_v13 = vld [vmem:[#allocation7 + $0x40] sm:$0xf]  ;;  %v8645_v45 = vld [vmem:[#allocation7 + $0x24] sm:$0xf0]  ;;  %v8663_v15 = vld [vmem:[#allocation7 + $0xb4] sm:$0xf0] }
 0x2f5   :  { %4619 = vmatpush.bf16.msrb.mxu0 %v7007_v33  ;;  %v7763_v4 = vor.u32 %v8649_v14, %v7762_v13  ;;  %v8669_v33 = vld [vmem:[#allocation7 + $0xe4] sm:$0xf0]  ;;  %v8654_v13 = vld [vmem:[#allocation7 + $0x74] sm:$0xf]  ;;  %v7788_v14 = vld [vmem:[#allocation7 + $0x78] sm:$0xf0]  ;;  %v7819_v19 = vor.u32 %v8663_v15, %v7818_v10 }
 0x2f6   :  { %4580 = vmatpush.bf16.msra.mxu1 %v7643_v52  ;;  %v7548_v52 = vld [vmem:[#allocation6 + $0x698] sm:$0xf0] }
 0x2f7   :  { %4644 = vmatpush.bf16.msrb.mxu2 %v7279_v28  ;;  %v6972_v28 = vld [vmem:[#allocation6 + $0x218] sm:$0xf0] }
 0x2f8   :  { %4658 = vmatpush.bf16.msrb.mxu3 %v7391_v31  ;;  %v6975_v22 = vor.u32 %v8449_v58, %v6972_v28  ;;  %v7754_v31 = vld [vmem:[#allocation7 + $0x30] sm:$0xf]  ;;  %v7148_v58 = vld [vmem:[#allocation6 + $0x378] sm:$0xf0]  ;;  %v7747_v28 = vor.u32 %v8645_v45, %v7746_v44 }
 0x2f9   :  { %4620 = vmatpush.bf16.msrb.mxu0 %v6991_v3  ;;  %v7755_v43 = vor.u32 %v8647_v32, %v7754_v31  ;;  %v9200_v38 = vpop.f32.mrf.mxu0  ;;  %v7151_v25 = vor.u32 %v8493_v57, %v7148_v58  ;;  %v7810_v31 = vld [vmem:[#allocation7 + $0xa0] sm:$0xf]  ;;  %v8661_v32 = vld [vmem:[#allocation7 + $0xa4] sm:$0xf0]  ;;  %v7724_v44 = vld [vmem:[#allocation6 + $0x7f8] sm:$0xf0] }
 0x2fa   :  { %4581 = vmatpush.bf16.msra.mxu1 %v7627_v55  ;;  %v7835_v55 = vor.u32 %v8667_v49, %v7834_v24  ;;  %v7692_v10 = vld [vmem:[#allocation6 + $0x7b8] sm:$0xf0] }
 0x2fb   :  { %4645 = vmatpush.bf16.msrb.mxu2 %v7263_v6  ;;  %v7599_v6 = vor.u32 %v8605_v60, %v7596_v56  ;;  %v8643_v60 = vld [vmem:[#allocation7 + $0x14] sm:$0xf0]  ;;  %v7826_v56 = vld [vmem:[#allocation7 + $0xc0] sm:$0xf] }
 0x2fc   :  { %4659 = vmatpush.bf16.msrb.mxu3 %v7375_v48  ;;  %v7551_v48 = vor.u32 %v8593_v40, %v7548_v52  ;;  %v8577_v40 = vld [vmem:[#allocation6 + $0x60c] sm:$0xf]  ;;  %v7484_v52 = vld [vmem:[#allocation6 + $0x618] sm:$0xf0] }
 0x2fd   :  { %4621 = vmatpush.bf16.msrb.mxu0 %v6975_v22  ;;  %v7516_v22 = vld [vmem:[#allocation6 + $0x658] sm:$0xf0]  ;;  %v7487_v49 = vor.u32 %v8577_v40, %v7484_v52  ;;  %v8664_v52 = vld [vmem:[#allocation7 + $0xc4] sm:$0xf] }
 0x2fe   :  { %4582 = vmatpush.bf16.msra.mxu1 %v7611_v5  ;;  %v7132_v5 = vld [vmem:[#allocation6 + $0x358] sm:$0xf0] }
 0x2ff   :  { %4646 = vmatpush.bf16.msrb.mxu2 %v7247_v8  ;;  %v7199_v8 = vor.u32 %v8505_v11, %v7196_v62  ;;  %v7135_v37 = vor.u32 %v8489_v1, %v7132_v5  ;;  %v7740_v40 = vld [vmem:[#allocation7 + $0x18] sm:$0xf0] }
 0x300   :  { %4660 = vmatpush.bf16.msrb.mxu3 %v7359_v34  ;;  %4622 = vmatmul.bf16.vlgmr.msrb.gmra.mxu0 %v9138_v51  ;;  %v7164_v51 = vld [vmem:[#allocation6 + $0x398] sm:$0xf0]  ;;  %v8665_v34 = vld [vmem:[#allocation7 + $0xc4] sm:$0xf0] }
 0x301   :  { %4666 = vmatpush.bf16.msra.mxu0 %v7599_v6  ;;  %4583 = vmatmul.bf16.vlgmr.msra.gmra.mxu1 %v9168_v50  ;;  %v7827_v0 = vor.u32 %v8665_v34, %v7826_v56  ;;  %v7739_v6 = vor.u32 %v8643_v60, %v7738_v59  ;;  %v4365_v11 = vpop.f32.mrf.mxu0  ;;  %v7708_v59 = vld [vmem:[#allocation6 + $0x7d8] sm:$0xf0]  ;;  %v8648_v56 = vld [vmem:[#allocation7 + $0x44] sm:$0xf]  ;;  %v8657_v34 = vld [vmem:[#allocation7 + $0x84] sm:$0xf0] }
 0x302   :  { %4627 = vmatpush.bf16.msrb.mxu1 %v7215_v9  ;;  %v7730_v9 = vld [vmem:[#allocation7] sm:$0xf] }
 0x303   :  { %4647 = vmatpush.bf16.msrb.mxu2 %v7231_v41  ;;  %4661 = vmatmul.bf16.vlgmr.msrb.gmra.mxu3 %v9155_v27  ;;  %v7843_v27 = vor.u32 %v8669_v33, %v7842_v23  ;;  %v8497_v41 = vld [vmem:[#allocation6 + $0x38c] sm:$0xf]  ;;  %v7731_v30 = vor.u32 %v8641_v29, %v7730_v9  ;;  %v8652_v33 = vld [vmem:[#allocation7 + $0x64] sm:$0xf] }
 0x304   :  { %5103 = vmatpush.bf16.msra.mxu3 %v7851_v20  ;;  %v7167_v54 = vor.u32 %v8497_v41, %v7164_v51  ;;  %v8485_v20 = vld [vmem:[#allocation6 + $0x32c] sm:$0xf]  ;;  %v7100_v51 = vld [vmem:[#allocation6 + $0x318] sm:$0xf0] }
 0x305   :  { %4667 = vmatpush.bf16.msra.mxu0 %v7583_v26  ;;  %v8481_v41 = vld [vmem:[#allocation6 + $0x30c] sm:$0xf] }
 0x306   :  { %4648 = vmatmul.bf16.vlgmr.msrb.gmra.mxu2 %v9142_v42  ;;  %v9195_v42 = vpop.f32.mrf.mxu3  ;;  %4628 = vmatpush.bf16.msrb.mxu1 %v7199_v8  ;;  %v8581_v8 = vld [vmem:[#allocation6 + $0x62c] sm:$0xf] }
 0x307   :  { %5090 = vmatpush.bf16.msra.mxu2 %v7787_v47  ;;  %v7503_v23 = vor.u32 %v8581_v8, %v7500_v18  ;;  %v7844_v9 = vld [vmem:[#allocation7 + $0xe8] sm:$0xf0]  ;;  %v7676_v18 = vld [vmem:[#allocation6 + $0x798] sm:$0xf0] }
 0x308   :  { %5104 = vmatpush.bf16.msra.mxu3 %v7843_v27  ;;  %v7811_v27 = vor.u32 %v8661_v32, %v7810_v31  ;;  %v8629_v29 = vld [vmem:[#allocation6 + $0x7ac] sm:$0xf] }
 0x309   :  { %4668 = vmatpush.bf16.msra.mxu0 %v7567_v35  ;;  %v9202_v3 = vpop.f32.mrf.mxu2  ;;  %v7780_v35 = vld [vmem:[#allocation7 + $0x68] sm:$0xf0] }
 0x30a   :  { %4629 = vmatpush.bf16.msrb.mxu1 %v7183_v39  ;;  %v7119_v39 = vor.u32 %v8485_v20, %v7116_v17  ;;  %v7783_v45 = vor.u32 %v8652_v33, %v7780_v35  ;;  %v8625_v8 = vld [vmem:[#allocation6 + $0x78c] sm:$0xf]  ;;  %v8666_v17 = vld [vmem:[#allocation7 + $0xd4] sm:$0xf] }
 0x30b   :  { %5091 = vmatpush.bf16.msra.mxu2 %v7779_v21  ;;  %v7535_v21 = vor.u32 %v8589_v53, %v7532_v46  ;;  %v7772_v53 = vld [vmem:[#allocation7 + $0x58] sm:$0xf0]  ;;  %v8659_v46 = vld [vmem:[#allocation7 + $0x94] sm:$0xf0]  ;;  %v7748_v20 = vld [vmem:[#allocation7 + $0x28] sm:$0xf0] }
 0x30c   :  { %5105 = vmatpush.bf16.msra.mxu3 %v7835_v55  ;;  %v7103_v55 = vor.u32 %v8481_v41, %v7100_v51  ;;  %v8621_v35 = vld [vmem:[#allocation6 + $0x76c] sm:$0xf] }
 0x30d   :  { %4669 = vmatpush.bf16.msra.mxu0 %v7551_v48  ;;  %v9206_v48 = vpop.f32.mrf.mxu0  ;;  %v7828_v41 = vld [vmem:[#allocation7 + $0xc8] sm:$0xf0] }
 0x30e   :  { %v4404_v47 = vpop.f32.mrf.mxu3  ;;  %4630 = vmatpush.bf16.msrb.mxu1 %v7167_v54  ;;  %v8650_v54 = vld [vmem:[#allocation7 + $0x54] sm:$0xf] }
 0x30f   :  { %5092 = vmatpush.bf16.msra.mxu2 %v7771_v12  ;;  %v7519_v12 = vor.u32 %v8585_v61, %v7516_v22  ;;  %v7802_v47 = vld [vmem:[#allocation7 + $0x90] sm:$0xf]  ;;  %v7775_v60 = vor.u32 %v8650_v54, %v7772_v53  ;;  %v8670_v22 = vld [vmem:[#allocation7 + $0xf4] sm:$0xf]  ;;  %v8640_v53 = vld [vmem:[#allocation7 + $0x4] sm:$0xf] }
 0x310   :  { %5106 = vmatpush.bf16.msra.mxu3 %v7827_v0  ;;  %v7803_v57 = vor.u32 %v8659_v46, %v7802_v47  ;;  %v7852_v0 = vld [vmem:[#allocation7 + $0xf8] sm:$0xf0]  ;;  %v7732_v46 = vld [vmem:[#allocation7 + $0x8] sm:$0xf0] }
 0x311   :  { %4670 = vmatpush.bf16.msra.mxu0 %v7535_v21  ;;  %v4443_v26 = vpop.f32.mrf.mxu2  ;;  %v7794_v21 = vld [vmem:[#allocation7 + $0x80] sm:$0xf]  ;;  %v7855_v1 = vor.u32 %v8670_v22, %v7852_v0  ;;  %v8613_v0 = vld [vmem:[#allocation6 + $0x72c] sm:$0xf] }
 0x312   :  { %4631 = vmatpush.bf16.msrb.mxu1 %v7151_v25  ;;  %v7764_v25 = vld [vmem:[#allocation7 + $0x48] sm:$0xf0]  ;;  %v7795_v61 = vor.u32 %v8657_v34, %v7794_v21  ;;  %v7695_v26 = vor.u32 %v8629_v29, %v7692_v10  ;;  %v8660_v21 = vld [vmem:[#allocation7 + $0xa4] sm:$0xf] }
 0x313   :  { %5093 = vmatpush.bf16.msra.mxu2 %v7763_v4  ;;  %v7791_v4 = vor.u32 %v8654_v13, %v7788_v14  ;;  %v7767_v11 = vor.u32 %v8648_v56, %v7764_v25  ;;  %v8646_v13 = vld [vmem:[#allocation7 + $0x34] sm:$0xf]  ;;  %v7756_v14 = vld [vmem:[#allocation7 + $0x38] sm:$0xf0]  ;;  %v7812_v34 = vld [vmem:[#allocation7 + $0xa8] sm:$0xf0] }
 0x314   :  { %5107 = vmatpush.bf16.msra.mxu3 %v7819_v19  ;;  %v8644_v19 = vld [vmem:[#allocation7 + $0x24] sm:$0xf]  ;;  %v8609_v10 = vld [vmem:[#allocation6 + $0x70c] sm:$0xf] }
 0x315   :  { %4671 = vmatpush.bf16.msra.mxu0 %v7519_v12  ;;  %v4417_v12 = vpop.f32.mrf.mxu0 }
 0x316   :  { %v9204_v62 = vpop.f32.mrf.mxu3  ;;  %4632 = vmatpush.bf16.msrb.mxu1 %v7135_v37  ;;  %v4351_v37 = vadd.f32 %v9192_v16, %v9184_v36  ;;  %v7751_v36 = vor.u32 %v8644_v19, %v7748_v20  ;;  %v8642_v16 = vld [vmem:[#allocation7 + $0x14] sm:$0xf] }
 0x317   :  { %5094 = vmatpush.bf16.msra.mxu2 %v7755_v43  ;;  %v8637_v43 = vld [vmem:[#allocation6 + $0x7ec] sm:$0xf]  ;;  %v7743_v54 = vor.u32 %v8642_v16, %v7740_v40  ;;  %v7890_v40 = vld [vmem:[#allocation7 + $0x140] sm:$0xf] }
 0x318   :  { %5108 = vmatpush.bf16.msra.mxu3 %v7811_v27  ;;  %v7727_v58 = vor.u32 %v8637_v43, %v7724_v44  ;;  %v7660_v27 = vld [vmem:[#allocation6 + $0x778] sm:$0xf0]  ;;  %v7831_v44 = vor.u32 %v8664_v52, %v7828_v41  ;;  %v8681_v52 = vld [vmem:[#allocation7 + $0x144] sm:$0xf0] }
 0x319   :  { %4672 = vmatpush.bf16.msra.mxu0 %v7503_v23  ;;  %v7679_v23 = vor.u32 %v8625_v8, %v7676_v18 }
 0x31a   :  { %4633 = vmatpush.bf16.msrb.mxu1 %v7119_v39 }
 0x31b   :  { %5095 = vmatpush.bf16.msra.mxu2 %v7747_v28  ;;  %v8633_v28 = vld [vmem:[#allocation6 + $0x7cc] sm:$0xf] }
 0x31c   :  { %5109 = vmatpush.bf16.msra.mxu3 %v7803_v57  ;;  %v7711_v5 = vor.u32 %v8633_v28, %v7708_v59  ;;  %v4376_v31 = vpop.f32.mrf.mxu1  ;;  %v7820_v57 = vld [vmem:[#allocation7 + $0xb8] sm:$0xf0] }
 0x31d   :  { %4673 = vmatpush.bf16.msra.mxu0 %v7487_v49  ;;  %v9213_v39 = vpop.f32.mrf.mxu0  ;;  %v7644_v49 = vld [vmem:[#allocation6 + $0x758] sm:$0xf0] }
 0x31e   :  { %v4456_v24 = vpop.f32.mrf.mxu3  ;;  %4634 = vmatpush.bf16.msrb.mxu1 %v7103_v55  ;;  %v8662_v55 = vld [vmem:[#allocation7 + $0xb4] sm:$0xf] }
 0x31f   :  { %5096 = vmatpush.bf16.msra.mxu2 %v7739_v6  ;;  %v8668_v6 = vld [vmem:[#allocation7 + $0xe4] sm:$0xf]  ;;  %v8617_v24 = vld [vmem:[#allocation6 + $0x74c] sm:$0xf]  ;;  %v7823_v28 = vor.u32 %v8662_v55, %v7820_v57 }
 0x320   :  { %4674 = vmatmul.bf16.vlgmr.msra.gmra.mxu0 %v9161_v63  ;;  %5110 = vmatpush.bf16.msra.mxu3 %v7795_v61  ;;  %v7847_v15 = vor.u32 %v8668_v6, %v7844_v9  ;;  %v7759_v63 = vor.u32 %v8646_v13, %v7756_v14  ;;  %v7647_v56 = vor.u32 %v8617_v24, %v7644_v49  ;;  %v8658_v13 = vld [vmem:[#allocation7 + $0x94] sm:$0xf]  ;;  %v7804_v14 = vld [vmem:[#allocation7 + $0x98] sm:$0xf0] }
 0x321   :  { %4635 = vmatmul.bf16.vlgmr.msrb.gmra.mxu1 %v9134_v7  ;;  %v4364_v7 = vadd.f32 %v9200_v38, %v4351_v37  ;;  %v9218_v38 = vld [vmem:[%s9313_s8] sm:$0xf]  ;;  %v7815_v9 = vor.u32 %v8660_v21, %v7812_v34  ;;  %v7807_v8 = vor.u32 %v8658_v13, %v7804_v14  ;;  %v8686_v21 = vld [vmem:[#allocation7 + $0x174] sm:$0xf]  ;;  %v7916_v34 = vld [vmem:[#allocation7 + $0x178] sm:$0xf0] }
 0x322   :  { %4679 = vmatpush.bf16.msra.mxu1 %v7727_v58  ;;  %v2990_v43 = vperm.slane %v9218_v38, 2  ;;  %v2989_v25 = vperm.slane %v9218_v38, 1  ;;  %v7892_v13 = vld [vmem:[#allocation7 + $0x148] sm:$0xf0] }
 0x323   :  { %5097 = vmatpush.bf16.msra.mxu2 %v7731_v30  ;;  %v7836_v30 = vld [vmem:[#allocation7 + $0xd8] sm:$0xf0]  ;;  %v4377_v33 = vadd.f32 %v4376_v31, %v4364_v7  ;;  %v7796_v7 = vld [vmem:[#allocation7 + $0x88] sm:$0xf0]  ;;  %v7906_v31 = vld [vmem:[#allocation7 + $0x160] sm:$0xf] }
 0x324   :  { %5155 = vmatpush.bf16.msrb.mxu3 %v7855_v1  ;;  %v4378_v59 = vpop.f32.mrf.mxu1  ;;  %v7628_v1 = vld [vmem:[#allocation6 + $0x738] sm:$0xf0]  ;;  %v4390_v12 = vadd.f32 %v9190_v2, %v2989_v25 }
 0x325   :  { %v4692_v51 = vmax.f32 %v4377_v33, 0.0  ;;  %v4469_v6 = vpop.f32.mrf.mxu0  ;;  %v7631_v29 = vor.u32 %v8613_v0, %v7628_v1  ;;  %v7858_v59 = vld [vmem:[#allocation7 + $0x100] sm:$0xf]  ;;  %v7919_v0 = vor.u32 %v8686_v21, %v7916_v34  ;;  %v8684_v1 = vld [vmem:[#allocation7 + $0x164] sm:$0xf] }
 0x326   :  { %4680 = vmatpush.bf16.msra.mxu1 %v7711_v5  ;;  %v7735_v5 = vor.u32 %v8640_v53, %v7732_v46  ;;  %v4403_v37 = vadd.f32 %v9195_v42, %v4390_v12  ;;  %v8677_v53 = vld [vmem:[#allocation7 + $0x124] sm:$0xf0]  ;;  %v8680_v12 = vld [vmem:[#allocation7 + $0x144] sm:$0xf] }
 0x327   :  { %5142 = vmatpush.bf16.msrb.mxu2 %v7791_v4  ;;  %v7839_v4 = vor.u32 %v8666_v17, %v7836_v30  ;;  %v4696_v47 = vpack.c.bf16 %v4692_v51, %v4692_v51  ;;  %v8656_v30 = vld [vmem:[#allocation7 + $0x84] sm:$0xf]  ;;  %v8693_v34 = vld [vmem:[#allocation7 + $0x1a4] sm:$0xf0] }
 0x328   :  { %5156 = vmatpush.bf16.msrb.mxu3 %v7847_v15  ;;  %v7914_v15 = vld [vmem:[#allocation7 + $0x170] sm:$0xf]  ;;  %v4416_v17 = vadd.f32 %v9206_v48, %v4403_v37  ;;  %v8683_v48 = vld [vmem:[#allocation7 + $0x154] sm:$0xf0] }
 0x329   :  { %v4493_v32 = vpop.f32.mrf.mxu2  ;;  %5098 = vmatmul.bf16.vlgmr.msra.gmra.mxu2 %v4696_v47 }
 0x32a   :  { %4681 = vmatpush.bf16.msra.mxu1 %v7695_v26  ;;  %v4494_v58 = vadd.f32 %v4493_v32, %v2990_v43  ;;  %v8687_v26 = vld [vmem:[#allocation7 + $0x174] sm:$0xf0]  ;;  %v8685_v32 = vld [vmem:[#allocation7 + $0x164] sm:$0xf0] }
 0x32b   :  { %5143 = vmatpush.bf16.msrb.mxu2 %v7783_v45  ;;  %v7663_v45 = vor.u32 %v8621_v35, %v7660_v27  ;;  %v7915_v18 = vor.u32 %v8687_v26, %v7914_v15  ;;  %v7898_v35 = vld [vmem:[#allocation7 + $0x150] sm:$0xf]  ;;  %v7895_v15 = vor.u32 %v8680_v12, %v7892_v13  ;;  %v2991_v26 = vperm.slane %v9218_v38, 3  ;;  %v8672_v38 = vld [vmem:[#allocation7 + $0x104] sm:$0xf] }
 0x32c   :  { %5157 = vmatpush.bf16.msrb.mxu3 %v7839_v4  ;;  %v7799_v4 = vor.u32 %v8656_v30, %v7796_v7  ;;  %v7876_v30 = vld [vmem:[#allocation7 + $0x128] sm:$0xf0]  ;;  %v8702_v13 = vld [vmem:[#allocation7 + $0x1f4] sm:$0xf] }
 0x32d   :  { %5116 = vmatpush.bf16.msrb.mxu0 %v7915_v18  ;;  %v7884_v18 = vld [vmem:[#allocation7 + $0x138] sm:$0xf0] }
 0x32e   :  { %4682 = vmatpush.bf16.msra.mxu1 %v7679_v23  ;;  %v7907_v23 = vor.u32 %v8685_v32, %v7906_v31 }
 0x32f   :  { %5144 = vmatpush.bf16.msrb.mxu2 %v7775_v60  ;;  %v4506_v60 = vpop.f32.mrf.mxu3 }
 0x330   :  { %5158 = vmatpush.bf16.msrb.mxu3 %v7831_v44  ;;  %v9222_v61 = vadd.f32 %v4506_v60, %v4494_v58  ;;  %v7882_v44 = vld [vmem:[#allocation7 + $0x130] sm:$0xf] }
 0x331   :  { %v4495_v22 = vpop.f32.mrf.mxu2  ;;  %5117 = vmatpush.bf16.msrb.mxu0 %v7907_v23  ;;  %v7868_v23 = vld [vmem:[#allocation7 + $0x118] sm:$0xf0] }
 0x332   :  { %4683 = vmatpush.bf16.msra.mxu1 %v7663_v45  ;;  %v8679_v45 = vld [vmem:[#allocation7 + $0x134] sm:$0xf0] }
 0x333   :  { %5145 = vmatpush.bf16.msrb.mxu2 %v7767_v11  ;;  %v7612_v11 = vld [vmem:[#allocation6 + $0x718] sm:$0xf0]  ;;  %v7883_v24 = vor.u32 %v8679_v45, %v7882_v44 }
 0x334   :  { %5159 = vmatpush.bf16.msrb.mxu3 %v7823_v28  ;;  %v7615_v20 = vor.u32 %v8609_v10, %v7612_v11  ;;  %v8675_v28 = vld [vmem:[#allocation7 + $0x114] sm:$0xf0] }
 0x336   :  { %4684 = vmatpush.bf16.msra.mxu1 %v7647_v56  ;;  %v8673_v56 = vld [vmem:[#allocation7 + $0x104] sm:$0xf0] }
 0x337   :  { %5146 = vmatpush.bf16.msrb.mxu2 %v7759_v63  ;;  %v4428_v63 = vpop.f32.mrf.mxu1  ;;  %v4508_v19 = vpop.f32.mrf.mxu3  ;;  %v7859_v22 = vor.u32 %v8673_v56, %v7858_v59 }
 0x338   :  { %5160 = vmatpush.bf16.msrb.mxu3 %v7815_v9  ;;  %v4429_v2 = vadd.f32 %v4428_v63, %v4416_v17  ;;  %v8682_v9 = vld [vmem:[#allocation7 + $0x154] sm:$0xf]  ;;  %v8676_v17 = vld [vmem:[#allocation7 + $0x124] sm:$0xf] }
 0x33a   :  { %4685 = vmatpush.bf16.msra.mxu1 %v7631_v29  ;;  %v4442_v42 = vadd.f32 %v9202_v3, %v4429_v2  ;;  %v7900_v29 = vld [vmem:[#allocation7 + $0x158] sm:$0xf0] }
 0x33b   :  { %5147 = vmatpush.bf16.msrb.mxu2 %v7751_v36  ;;  %v7899_v36 = vor.u32 %v8683_v48, %v7898_v35  ;;  %v7903_v10 = vor.u32 %v8682_v9, %v7900_v29  ;;  %v7860_v35 = vld [vmem:[#allocation7 + $0x108] sm:$0xf0]  ;;  %v7978_v48 = vld [vmem:[#allocation7 + $0x1f0] sm:$0xf] }
 0x33c   :  { %5161 = vmatpush.bf16.msrb.mxu3 %v7807_v8  ;;  %v4455_v27 = vadd.f32 %v9204_v62, %v4442_v42  ;;  %v8678_v8 = vld [vmem:[#allocation7 + $0x134] sm:$0xf] }
 0x33d   :  { %5118 = vmatpush.bf16.msrb.mxu0 %v7899_v36  ;;  %v9232_v41 = vpop.f32.mrf.mxu0  ;;  %v7887_v63 = vor.u32 %v8678_v8, %v7884_v18  ;;  %v8674_v42 = vld [vmem:[#allocation7 + $0x114] sm:$0xf] }
 0x33e   :  { %4686 = vmatpush.bf16.msra.mxu1 %v7615_v20  ;;  %v4468_v3 = vadd.f32 %v9213_v39, %v4455_v27  ;;  %v7866_v39 = vld [vmem:[#allocation7 + $0x110] sm:$0xf]  ;;  %v8703_v27 = vld [vmem:[#allocation7 + $0x1f4] sm:$0xf0]  ;;  %v8698_v18 = vld [vmem:[#allocation7 + $0x1d4] sm:$0xf] }
 0x33f   :  { %5148 = vmatpush.bf16.msrb.mxu2 %v7743_v54  ;;  %v4430_v33 = vpop.f32.mrf.mxu1  ;;  %v7874_v54 = vld [vmem:[#allocation7 + $0x120] sm:$0xf]  ;;  %v7867_v60 = vor.u32 %v8675_v28, %v7866_v39  ;;  %v7979_v36 = vor.u32 %v8703_v27, %v7978_v48  ;;  %v8695_v28 = vld [vmem:[#allocation7 + $0x1b4] sm:$0xf0]  ;;  %v8690_v27 = vld [vmem:[#allocation7 + $0x194] sm:$0xf] }
 0x340   :  { %5162 = vmatpush.bf16.msrb.mxu3 %v7799_v4  ;;  %v7875_v55 = vor.u32 %v8677_v53, %v7874_v54  ;;  %v7879_v4 = vor.u32 %v8676_v17, %v7876_v30  ;;  %v7871_v33 = vor.u32 %v8674_v42, %v7868_v23  ;;  %v7956_v17 = vld [vmem:[#allocation7 + $0x1c8] sm:$0xf0]  ;;  %v8692_v23 = vld [vmem:[#allocation7 + $0x1a4] sm:$0xf] }
 0x341   :  { %4687 = vmatmul.bf16.vlgmr.msra.gmra.mxu1 %v9168_v50  ;;  %v7891_v50 = vor.u32 %v8681_v52, %v7890_v40  ;;  %v7863_v52 = vor.u32 %v8672_v38, %v7860_v35  ;;  %v7940_v38 = vld [vmem:[#allocation7 + $0x1a8] sm:$0xf0] }
 0x342   :  { %5129 = vmatpush.bf16.msrb.mxu1 %v7979_v36  ;;  %v7932_v36 = vld [vmem:[#allocation7 + $0x198] sm:$0xf0] }
 0x343   :  { %5149 = vmatpush.bf16.msrb.mxu2 %v7735_v5  ;;  %5119 = vmatpush.bf16.msrb.mxu0 %v7891_v50  ;;  %v7908_v5 = vld [vmem:[#allocation7 + $0x168] sm:$0xf0] }
 0x344   :  { %v7911_v6 = vor.u32 %v8684_v1, %v7908_v5  ;;  %v8691_v1 = vld [vmem:[#allocation7 + $0x194] sm:$0xf0] }
 0x345   :  { %v9235_v62 = vpop.f32.mrf.mxu3  ;;  %v4521_v57 = vpop.f32.mrf.mxu0 }
 0x346   :  { %5150 = vmatmul.bf16.vlgmr.msrb.gmra.mxu2 %v4696_v47 }
 0x347   :  { %v4480_v51 = vpop.f32.mrf.mxu1  ;;  %5120 = vmatpush.bf16.msrb.mxu0 %v7883_v24  ;;  %v8699_v24 = vld [vmem:[#allocation7 + $0x1d4] sm:$0xf0] }
 0x348   :  { %v4481_v43 = vadd.f32 %v4480_v51, %v4468_v3  ;;  %v4520_v3 = vadd.f32 %v9232_v41, %v9222_v61  ;;  %v7970_v51 = vld [vmem:[#allocation7 + $0x1e0] sm:$0xf] }
 0x349   :  { %v9230_v16 = vpop.f32.mrf.mxu2 }
 0x34a   :  { %v4693_v47 = vmax.f32 %v4481_v43, 0.0  ;;  %v8701_v43 = vld [vmem:[#allocation7 + $0x1e4] sm:$0xf0] }
 0x34b   :  { %5121 = vmatpush.bf16.msrb.mxu0 %v7875_v55  ;;  %v7971_v45 = vor.u32 %v8701_v43, %v7970_v51  ;;  %v8697_v55 = vld [vmem:[#allocation7 + $0x1c4] sm:$0xf0] }
 0x34c   :  { %v4697_v49 = vpack.c.bf16 %v4693_v47, %v4693_v47  ;;  %v7962_v47 = vld [vmem:[#allocation7 + $0x1d0] sm:$0xf] }
 0x34d   :  { %v4560_v25 = vpop.f32.mrf.mxu3  ;;  %5130 = vmatpush.bf16.msrb.mxu1 %v7971_v45  ;;  %v7963_v54 = vor.u32 %v8699_v24, %v7962_v47 }
 0x34e   :  { %5111 = vmatmul.bf16.vlgmr.msra.gmra.mxu3 %v4697_v49 }
 0x34f   :  { %v4482_v58 = vpop.f32.mrf.mxu1  ;;  %5122 = vmatpush.bf16.msrb.mxu0 %v7867_v60 }
 0x351   :  { %v4547_v46 = vpop.f32.mrf.mxu2  ;;  %5131 = vmatpush.bf16.msrb.mxu1 %v7963_v54 }
 0x352   :  { %v7954_v46 = vld [vmem:[#allocation7 + $0x1c0] sm:$0xf] }
 0x353   :  { %5123 = vmatpush.bf16.msrb.mxu0 %v7859_v22  ;;  %v7955_v41 = vor.u32 %v8697_v55, %v7954_v46 }
 0x355   :  { %5132 = vmatpush.bf16.msrb.mxu1 %v7955_v41 }
 0x357   :  { %5168 = vmatpush.bf16.msra.mxu0 %v7919_v0  ;;  %v7930_v0 = vld [vmem:[#allocation7 + $0x190] sm:$0xf] }
 0x358   :  { %v7931_v9 = vor.u32 %v8691_v1, %v7930_v0  ;;  %v8710_v0 = vld [vmem:[%s9316_s11 + $0x30] sm:$0xff] }
 0x359   :  { %v8718_v1 = vld [vmem:[%s9316_s11 + $0x70] sm:$0xff] }
 0x35b   :  { %5169 = vmatpush.bf16.msra.mxu0 %v7911_v6 }
 0x35d   :  { %v4571_v14 = vpop.f32.mrf.mxu0 }
 0x35e   :  { %5163 = vmatmul.bf16.vlgmr.msrb.gmra.mxu3 %v4697_v49 }
 0x35f   :  { %5170 = vmatpush.bf16.msra.mxu0 %v7903_v10  ;;  %v7922_v10 = vld [vmem:[#allocation7 + $0x180] sm:$0xf] }
 0x360   :  { %v4532_v37 = vpop.f32.mrf.mxu1 }
 0x361   :  { %v4533_v50 = vadd.f32 %v4532_v37, %v4520_v3  ;;  %v7972_v37 = vld [vmem:[#allocation7 + $0x1e8] sm:$0xf0] }
 0x362   :  { %v7924_v3 = vld [vmem:[#allocation7 + $0x188] sm:$0xf0] }
 0x363   :  { %5171 = vmatpush.bf16.msra.mxu0 %v7895_v15  ;;  %v4610_v20 = vpop.f32.mrf.mxu3  ;;  %v4546_v44 = vadd.f32 %v9230_v16, %v4533_v50  ;;  %v7946_v16 = vld [vmem:[#allocation7 + $0x1b0] sm:$0xf] }
 0x364   :  { %v7947_v60 = vor.u32 %v8695_v28, %v7946_v16 }
 0x365   :  { %v4573_v31 = vpop.f32.mrf.mxu0  ;;  %v4559_v49 = vadd.f32 %v9235_v62, %v4546_v44  ;;  %v7938_v62 = vld [vmem:[#allocation7 + $0x1a0] sm:$0xf] }
 0x366   :  { %5133 = vmatpush.bf16.msrb.mxu1 %v7947_v60  ;;  %v7939_v22 = vor.u32 %v8693_v34, %v7938_v62  ;;  %v8694_v31 = vld [vmem:[#allocation7 + $0x1b4] sm:$0xf] }
 0x367   :  { %5172 = vmatpush.bf16.msra.mxu0 %v7887_v63  ;;  %v4572_v57 = vadd.f32 %v4571_v14, %v4559_v49  ;;  %v7980_v14 = vld [vmem:[#allocation7 + $0x1f8] sm:$0xf0] }
 0x368   :  { %v4534_v32 = vpop.f32.mrf.mxu1  ;;  %v7983_v15 = vor.u32 %v8702_v13, %v7980_v14  ;;  %v7964_v63 = vld [vmem:[#allocation7 + $0x1d8] sm:$0xf0]  ;;  %v8705_v14 = vld [vmem:[%s9316_s11 + $0x8] sm:$0xff] }
 0x369   :  { %v4597_v11 = vpop.f32.mrf.mxu2  ;;  %v7948_v32 = vld [vmem:[#allocation7 + $0x1b8] sm:$0xf0] }
 0x36a   :  { %v4598_v19 = vadd.f32 %v4597_v11, %v2991_v26  ;;  %5134 = vmatpush.bf16.msrb.mxu1 %v7939_v22  ;;  %v8689_v11 = vld [vmem:[#allocation7 + $0x184] sm:$0xf0]  ;;  %v8700_v26 = vld [vmem:[#allocation7 + $0x1e4] sm:$0xf]  ;;  %v7951_v42 = vor.u32 %v8694_v31, %v7948_v32  ;;  %v8719_v22 = vld [vmem:[%s9316_s11 + $0x78] sm:$0xff] }
 0x36b   :  { %5173 = vmatpush.bf16.msra.mxu0 %v7879_v4  ;;  %v4612_v40 = vpop.f32.mrf.mxu3  ;;  %v7923_v12 = vor.u32 %v8689_v11, %v7922_v10  ;;  %v7975_v8 = vor.u32 %v8700_v26, %v7972_v37  ;;  %5339 = vmatpush.bf16.msra.mxu3 %v8719_v22  ;;  %v8706_v11 = vld [vmem:[%s9316_s11 + $0x10] sm:$0xff]  ;;  %v8704_v26 = vld [vmem:[%s9316_s11] sm:$0xff] }
 0x36c   :  { %v9238_v7 = vadd.f32 %v4610_v20, %v4598_v19  ;;  %v7967_v19 = vor.u32 %v8698_v18, %v7964_v63  ;;  %v8696_v20 = vld [vmem:[#allocation7 + $0x1c4] sm:$0xf]  ;;  %v7935_v40 = vor.u32 %v8690_v27, %v7932_v36  ;;  %v8714_v18 = vld [vmem:[%s9316_s11 + $0x50] sm:$0xff]  ;;  %v8713_v63 = vld [vmem:[%s9316_s11 + $0x48] sm:$0xff] }
 0x36d   :  { %v8716_v37 = vld [vmem:[%s9316_s11 + $0x60] sm:$0xff] }
 0x36e   :  { %5135 = vmatpush.bf16.msrb.mxu1 %v7931_v9  ;;  %v8708_v9 = vld [vmem:[%s9316_s11 + $0x20] sm:$0xff] }
 0x36f   :  { %5174 = vmatpush.bf16.msra.mxu0 %v7871_v33  ;;  %v7943_v33 = vor.u32 %v8692_v23, %v7940_v38  ;;  %5340 = vmatpush.bf16.msra.mxu3 %v8718_v1 }
 0x371   :  { %v4599_v2 = vpop.f32.mrf.mxu2 }
 0x372   :  { %5136 = vmatpush.bf16.msrb.mxu1 %v7923_v12  ;;  %v7959_v2 = vor.u32 %v8696_v20, %v7956_v17 }
 0x373   :  { %5175 = vmatpush.bf16.msra.mxu0 %v7863_v52  ;;  %v8688_v52 = vld [vmem:[#allocation7 + $0x184] sm:$0xf] }
 0x374   :  { %v7927_v50 = vor.u32 %v8688_v52, %v7924_v3 }
 0x376   :  { %5181 = vmatpush.bf16.msra.mxu1 %v7983_v15  ;;  %v8717_v15 = vld [vmem:[%s9316_s11 + $0x68] sm:$0xff] }
 0x377   :  { %5341 = vmatpush.bf16.msra.mxu3 %v8717_v15 }
 0x37a   :  { %5182 = vmatpush.bf16.msra.mxu1 %v7975_v8  ;;  %v8715_v8 = vld [vmem:[%s9316_s11 + $0x58] sm:$0xff] }
 0x37b   :  { %5342 = vmatpush.bf16.msra.mxu3 %v8716_v37 }
 0x37d   :  { %v9246_v61 = vpop.f32.mrf.mxu0 }
 0x37e   :  { %v4584_v58 = vpop.f32.mrf.mxu1  ;;  %5183 = vmatpush.bf16.msra.mxu1 %v7967_v19  ;;  %v4624_v51 = vadd.f32 %v9246_v61, %v9238_v7  ;;  %v8712_v19 = vld [vmem:[%s9316_s11 + $0x40] sm:$0xff] }
 0x37f   :  { %v4585_v39 = vadd.f32 %v4584_v58, %v4572_v57  ;;  %5343 = vmatpush.bf16.msra.mxu3 %v8715_v8 }
 0x381   :  { %v4694_v59 = vmax.f32 %v4585_v39, 0.0  ;;  %v4764_v39 = vld [vmem:[%s9315_s10] sm:$0x3] }
 0x382   :  { %5184 = vmatpush.bf16.msra.mxu1 %v7959_v2  ;;  %v4766_v61 = vperm.slane %v4764_v39, 0  ;;  %v4767_v60 = vperm.slane %v4764_v39, 1 }
 0x383   :  { %v4698_v21 = vpack.c.bf16 %v4694_v59, %v4694_v59  ;;  %5344 = vmatpush.bf16.msra.mxu3 %v8714_v18 }
 0x385   :  { %5124 = vmatmul.bf16.vlgmr.msrb.gmra.mxu0 %v4698_v21  ;;  %v4625_v5 = vpop.f32.mrf.mxu0 }
 0x386   :  { %v4662_v56 = vpop.f32.mrf.mxu3  ;;  %v4586_v6 = vpop.f32.mrf.mxu1  ;;  %5185 = vmatpush.bf16.msra.mxu1 %v7951_v42  ;;  %v8709_v5 = vld [vmem:[%s9316_s11 + $0x28] sm:$0xff] }
 0x387   :  { %5345 = vmatpush.bf16.msra.mxu3 %v8713_v63 }
 0x389   :  { %v9244_v53 = vpop.f32.mrf.mxu2 }
 0x38a   :  { %5186 = vmatpush.bf16.msra.mxu1 %v7943_v33 }
 0x38b   :  { %5346 = vmatpush.bf16.msra.mxu3 %v8712_v19 }
 0x38e   :  { %v4664_v29 = vpop.f32.mrf.mxu3  ;;  %5187 = vmatpush.bf16.msra.mxu1 %v7935_v40 }
 0x38f   :  { %v8707_v29 = vld [vmem:[%s9316_s11 + $0x18] sm:$0xff] }
 0x391   :  { %v4651_v25 = vpop.f32.mrf.mxu2 }
 0x392   :  { %5188 = vmatpush.bf16.msra.mxu1 %v7927_v50  ;;  %v8711_v25 = vld [vmem:[%s9316_s11 + $0x38] sm:$0xff] }
 0x393   :  { %5326 = vmatpush.bf16.msra.mxu2 %v8711_v25 }
 0x395   :  { %5176 = vmatmul.bf16.vlgmr.msra.gmra.mxu0 %v4698_v21 }
 0x397   :  { %5327 = vmatpush.bf16.msra.mxu2 %v8710_v0 }
 0x39b   :  { %5328 = vmatpush.bf16.msra.mxu2 %v8709_v5 }
 0x39d   :  { %v4675_v30 = vpop.f32.mrf.mxu0 }
 0x39e   :  { %v4636_v4 = vpop.f32.mrf.mxu1 }
 0x39f   :  { %v4637_v43 = vadd.f32 %v4636_v4, %v4624_v51  ;;  %5329 = vmatpush.bf16.msra.mxu2 %v8708_v9 }
 0x3a1   :  { %v4650_v45 = vadd.f32 %v9244_v53, %v4637_v43 }
 0x3a3   :  { %v4663_v47 = vadd.f32 %v4662_v56, %v4650_v45  ;;  %5330 = vmatpush.bf16.msra.mxu2 %v8707_v29 }
 0x3a5   :  { %v4677_v35 = vpop.f32.mrf.mxu0  ;;  %v4676_v49 = vadd.f32 %v4675_v30, %v4663_v47 }
 0x3a6   :  { %v4638_v48 = vpop.f32.mrf.mxu1 }
 0x3a7   :  { %5331 = vmatpush.bf16.msra.mxu2 %v8706_v11 }
 0x3ab   :  { %5332 = vmatpush.bf16.msra.mxu2 %v8705_v14 }
 0x3ac   :  { %v5099_v44 = vpop.f32.mrf.mxu2 }
 0x3ad   :  { %v5100_v16 = vadd.f32 %v5099_v44, %v4766_v61 }
 0x3af   :  { %5333 = vmatpush.bf16.msra.mxu2 %v8704_v26 }
 0x3b4   :  { %v5101_v24 = vpop.f32.mrf.mxu2 }
 0x3be   :  { %v4688_v54 = vpop.f32.mrf.mxu1 }
 0x3bf   :  { %v4689_v46 = vadd.f32 %v4688_v54, %v4676_v49 }
 0x3c1   :  { %v4695_v55 = vmax.f32 %v4689_v46, 0.0 }
 0x3c3   :  { %v4699_v57 = vpack.c.bf16 %v4695_v55, %v4695_v55 }
 0x3c5   :  { %5137 = vmatmul.bf16.vlgmr.msrb.gmra.mxu1 %v4699_v57 }
 0x3c6   :  { %v4690_v58 = vpop.f32.mrf.mxu1 }
 0x3c9   :  { %v5151_v41 = vpop.f32.mrf.mxu2 }
 0x3ca   :  { %v5152_v56 = vadd.f32 %v5151_v41, %v4767_v60 }
 0x3d1   :  { %v5153_v7 = vpop.f32.mrf.mxu2  ;;  %v5112_v28 = vpop.f32.mrf.mxu3 }
 0x3d2   :  { %v5113_v59 = vadd.f32 %v5112_v28, %v5100_v16 }
 0x3d5   :  { %5189 = vmatmul.bf16.vlgmr.msra.gmra.mxu1 %v4699_v57 }
 0x3d9   :  { %v5114_v53 = vpop.f32.mrf.mxu3 }
 0x3e1   :  { %v5164_v21 = vpop.f32.mrf.mxu3 }
 0x3e2   :  { %v5165_v62 = vadd.f32 %v5164_v21, %v5152_v56 }
 0x3e9   :  { %v5166_v34 = vpop.f32.mrf.mxu3 }
 0x402   :  { %v5125_v6 = vpop.f32.mrf.mxu0 }
 0x403   :  { %v5126_v20 = vadd.f32 %v5125_v6, %v5113_v59 }
 0x40a   :  { %v5127_v10 = vpop.f32.mrf.mxu0 }
 0x412   :  { %v5177_v12 = vpop.f32.mrf.mxu0 }
 0x413   :  { %v5178_v32 = vadd.f32 %v5177_v12, %v5165_v62 }
 0x41a   :  { %v5179_v13 = vpop.f32.mrf.mxu0 }
 0x442   :  { %v5138_v17 = vpop.f32.mrf.mxu1 }
 0x443   :  { %v5139_v30 = vadd.f32 %v5138_v17, %v5126_v20 }
 0x445   :  { %v5194_v2 = vmax.f32 %v5139_v30, 0.0 }
 0x447   :  { %v5196_v4 = vpack.c.bf16 %v5194_v2, %v5194_v2 }
 0x449   :  { %5334 = vmatmul.bf16.vlgmr.msra.gmra.mxu2 %v5196_v4 }
 0x44a   :  { %v5140_v31 = vpop.f32.mrf.mxu1 }
 0x452   :  { %v5190_v42 = vpop.f32.mrf.mxu1 }
 0x453   :  { %v5191_v23 = vadd.f32 %v5190_v42, %v5178_v32 }
 0x455   :  { %v5195_v38 = vmax.f32 %v5191_v23, 0.0 }
 0x457   :  { %v5197_v33 = vpack.c.bf16 %v5195_v38, %v5195_v38 }
 0x459   :  { %5347 = vmatmul.bf16.vlgmr.msra.gmra.mxu3 %v5197_v33 }
 0x45a   :  { %v5192_v35 = vpop.f32.mrf.mxu1 }
 0x4cc   :  { %v5335_v48 = vpop.f32.mrf.mxu2 }
 0x4d4   :  { %v5337_v27 = vpop.f32.mrf.mxu2 }
 0x4dc   :  { %v5348_v36 = vpop.f32.mrf.mxu3 }
 0x4dd   :  { %v5349_v40 = vadd.f32 %v5348_v36, %v5335_v48 }
 0x4df   :  { %5352 = vst [vmem:[%s9317_s12] sm:$0x3] %v5349_v40 }
 0x4e4   :  { %v5350_v52 = vpop.f32.mrf.mxu3 }
 0x4e5   :  { %5357 = vsyncpa [#allocation3], 1 }
 0x4e6   :  { %5358 = vsyncpa [#allocation5], 1 }
 0x4e7   :  { %5359 = vsyncpa [#allocation8], 1 }

</bundles_post_ra>
